<compile_context>
chip_gen: v7x
topology: tpu7x:2x2x1
jax: 0.10.0
libtpu: 0.0.40
codegen_flags: <defaults>
</compile_context>

<pallas_src>
import jax
import jax.numpy as jnp
from jax import lax
from jax.experimental import pallas as pl
from jax.experimental.pallas import tpu as pltpu

# ----------------------------- small demo hyper-params -----------------------
BATCH = 8            # bz
EDIM = 64            # embedding dim
HDIM = 32            # LSTM hidden dim  (4H = 128 -> lane-dense gate matmuls)
NLAYER = 2
T_SRC = 12           # source sequence length
T_TGT = 10           # target sequence length
SRC_VOCAB = 96
TGT_VOCAB = 128      # multiple of 128 -> lane-dense (B, V) logits tile
SRC_PADDING_IDX = 0
TGT_PADDING_IDX = 0
TGT_SOS_IDX = 1
FORCE_TEACHER_PROB = 0.3


# ============================ LSTM cell from gates ============================
def _cell_from_gates(gates, c, hdim):
    """LSTM update from pre-activation gates, PyTorch (i,f,g,o) order.

    Applies sigmoid/tanh to the full (B, 4H) vreg (two EUP passes) and then
    lane-slices, instead of four quarter-vreg nonlinearities.
    """
    sig = jax.nn.sigmoid(gates)
    th = jnp.tanh(gates)
    i = sig[:, 0 * hdim:1 * hdim]
    f = sig[:, 1 * hdim:2 * hdim]
    g = th[:, 2 * hdim:3 * hdim]
    o = sig[:, 3 * hdim:4 * hdim]
    c_new = f * c + i * g
    h_new = o * jnp.tanh(c_new)
    return h_new, c_new


# ===================== fused seq2seq forward + CE kernel ======================
def _seq2seq_kernel(tf_ref, x2d_ref, yoh_ref,
                    enc_wx0_ref, enc_wh0_ref, enc_b0_ref, enc_w1s_ref, enc_b1_ref,
                    dec_ewx0_ref, dec_wh0_ref, dec_b0_ref, dec_w1s_ref, dec_b1_ref,
                    ffw_ref, ffb_ref,
                    loss_ref, xg0_scr):
    t_tgt, batch, vocab = yoh_ref.shape
    hdim = enc_wh0_ref.shape[0]
    t_src = x2d_ref.shape[0] // batch

    # -------------------------------- encoder --------------------------------
    # Hoisted layer-0 input projection for ALL source timesteps: one
    # (T*B, E) x (E, 4H) matmul (+ bias) written to VMEM scratch.
    xg0_scr[...] = (jnp.dot(x2d_ref[...], enc_wx0_ref[...],
                            preferred_element_type=jnp.float32)
                    + enc_b0_ref[...])

    zero = jnp.zeros((batch, hdim), jnp.float32)

    def enc_step(t, carry):
        h0, c0, h1, c1 = carry
        off = pl.multiple_of(t * batch, batch)
        g0 = (xg0_scr[pl.ds(off, batch), :]
              + jnp.dot(h0, enc_wh0_ref[...], preferred_element_type=jnp.float32))
        h0, c0 = _cell_from_gates(g0, c0, hdim)
        # layer 1: fused [x;h] @ [Wx;Wh] gate matmul
        g1 = (jnp.dot(jnp.concatenate([h0, h1], axis=-1), enc_w1s_ref[...],
                      preferred_element_type=jnp.float32)
              + enc_b1_ref[...])
        h1, c1 = _cell_from_gates(g1, c1, hdim)
        return (h0, c0, h1, c1)

    h0, c0, h1, c1 = lax.fori_loop(0, t_src, enc_step,
                                   (zero, zero, zero, zero), unroll=True)

    # --------------------- decoder + projection + CE loss --------------------
    vio = lax.broadcasted_iota(jnp.int32, (batch, vocab), 1)
    vio_f = vio.astype(jnp.float32)          # exact as long as vocab < 2**24
    sos_oh = (vio == TGT_SOS_IDX).astype(jnp.float32)

    def dec_step(t, carry):
        h0, c0, h1, c1, loss_sum, cnt, ipt_oh = carry

        # layer 0: embedding lookup folded into the (V, 4H) input weights
        g0 = (jnp.dot(ipt_oh, dec_ewx0_ref[...], preferred_element_type=jnp.float32)
              + jnp.dot(h0, dec_wh0_ref[...], preferred_element_type=jnp.float32)
              + dec_b0_ref[...])
        h0, c0 = _cell_from_gates(g0, c0, hdim)
        # layer 1: fused [x;h] @ [Wx;Wh]
        g1 = (jnp.dot(jnp.concatenate([h0, h1], axis=-1), dec_w1s_ref[...],
                      preferred_element_type=jnp.float32)
              + dec_b1_ref[...])
        h1, c1 = _cell_from_gates(g1, c1, hdim)

        # output projection: (B, V) logits never leave VMEM/vregs.
        logits = (jnp.dot(h1, ffw_ref[...], preferred_element_type=jnp.float32)
                  + ffb_ref[...])

        # cross entropy: max-subtracted LSE; ignore_index handled by the
        # validity-masked one-hot (all-zero row when target == padding).
        m = jnp.max(logits, axis=-1, keepdims=True)                       # (B, 1)
        lse = m + jnp.log(jnp.sum(jnp.exp(logits - m), axis=-1, keepdims=True))
        yoh = yoh_ref[t]                                                  # (B, V)
        valid = jnp.sum(yoh, axis=-1, keepdims=True)                      # (B, 1)
        tgt_logit = jnp.sum(logits * yoh, axis=-1, keepdims=True)         # valid*logit[y]
        loss_sum = loss_sum + jnp.sum(valid * lse - tgt_logit)
        cnt = cnt + jnp.sum(valid)

        # greedy argmax with first-max tie-breaking.  Float equality against m
        # is exact because m is the max of these very logits.
        neg_idx = jnp.where(logits == m, -vio_f, jnp.float32(-vocab))
        greedy = -jnp.max(neg_idx, axis=-1, keepdims=True)                # (B, 1)
        greedy_oh = (vio_f == greedy).astype(jnp.float32)

        # Teacher forcing (precomputed per-step flag in SMEM).  An all-zero
        # one-hot (masked padding target) reproduces emb(padding)=0 exactly.
        ipt_oh = jnp.where(tf_ref[t] > 0, yoh, greedy_oh)
        return (h0, c0, h1, c1, loss_sum, cnt, ipt_oh)

    init = (h0, c0, h1, c1, jnp.float32(0.0), jnp.float32(0.0), sos_oh)
    carry = lax.fori_loop(0, t_tgt, dec_step, init, unroll=True)
    loss_sum, cnt = carry[4], carry[5]
    loss_ref[0, 0] = loss_sum / jnp.maximum(cnt, 1.0)


# ============================== full forward ==================================
def seq2seq_loss(params, x_tok, y_tok, tf_flags):
    t_src, batch = x_tok.shape
    hdim = params["enc_wh0"].shape[0]
    vocab = params["tgt_emb"].shape[0]

    # Source embedding gather in plain XLA (tiny; avoids 96 sub-efficient DMAs).
    x_emb2d = params["src_emb"][x_tok.reshape(-1).astype(jnp.int32)]      # (T*B, E)

    # Target one-hot, pre-masked by the ignore_index validity (lane-dense slab).
    # The padding row of tgt_emb is zero, so the all-zero one-hot also gives
    # emb(pad)=0 when the padding target is fed back via teacher forcing.
    valid = (y_tok != TGT_PADDING_IDX).astype(jnp.float32)
    yoh_m = jax.nn.one_hot(y_tok, vocab, dtype=jnp.float32) * valid[..., None]

    # Weight prep (pure functions of the parameters).
    dec_ewx0 = jnp.dot(params["tgt_emb"], params["dec_wx0"])              # (V, 4H)
    enc_w1s = jnp.concatenate([params["enc_wx1"], params["enc_wh1"]], axis=0)
    dec_w1s = jnp.concatenate([params["dec_wx1"], params["dec_wh1"]], axis=0)

    vmem = pltpu.MemorySpace.VMEM
    smem = pltpu.MemorySpace.SMEM
    loss = pl.pallas_call(
        _seq2seq_kernel,
        out_shape=jax.ShapeDtypeStruct((1, 1), jnp.float32),
        in_specs=[pl.BlockSpec(memory_space=smem)]       # teacher-force flags
                 + [pl.BlockSpec(memory_space=vmem)] * 14,
        out_specs=pl.BlockSpec(memory_space=smem),
        scratch_shapes=[pltpu.VMEM((t_src * batch, 4 * hdim), jnp.float32)],
    )(tf_flags.astype(jnp.int32), x_emb2d, yoh_m,
      params["enc_wx0"], params["enc_wh0"], params["enc_b0"],
      enc_w1s, params["enc_b1"],
      dec_ewx0, params["dec_wh0"], params["dec_b0"],
      dec_w1s, params["dec_b1"],
      params["ff_w"], params["ff_b"])
    return loss[0, 0]


# ============================ pure-JAX reference ==============================
def _ref_cell(x, h, c, wx, wh, b):
    hh = h.shape[-1]
    g = x @ wx + h @ wh + b
    i = jax.nn.sigmoid(g[:, :hh])
    f = jax.nn.sigmoid(g[:, hh:2 * hh])
    gg = jnp.tanh(g[:, 2 * hh:3 * hh])
    o = jax.nn.sigmoid(g[:, 3 * hh:])
    c = f * c + i * gg
    h = o * jnp.tanh(c)
    return h, c


def reference_loss(p, x_tok, y_tok, tf_flags):
    t_src, batch = x_tok.shape
    t_tgt = y_tok.shape[0]
    hdim = p["enc_wh0"].shape[0]
    xe = p["src_emb"][x_tok]
    h0 = jnp.zeros((batch, hdim), jnp.float32); c0 = jnp.zeros_like(h0)
    h1 = jnp.zeros_like(h0); c1 = jnp.zeros_like(h0)
    for t in range(t_src):
        h0, c0 = _ref_cell(xe[t], h0, c0, p["enc_wx0"], p["enc_wh0"], p["enc_b0"])
        h1, c1 = _ref_cell(h0, h1, c1, p["enc_wx1"], p["enc_wh1"], p["enc_b1"])
    ipt = jnp.full((batch,), TGT_SOS_IDX, jnp.int32)
    loss_sum = jnp.float32(0.0); cnt = jnp.float32(0.0)
    for t in range(t_tgt):
        x = p["tgt_emb"][ipt]
        h0, c0 = _ref_cell(x, h0, c0, p["dec_wx0"], p["dec_wh0"], p["dec_b0"])
        h1, c1 = _ref_cell(h0, h1, c1, p["dec_wx1"], p["dec_wh1"], p["dec_b1"])
        logits = h1 @ p["ff_w"] + p["ff_b"]
        m = jnp.max(logits, axis=-1, keepdims=True)
        lse = (m + jnp.log(jnp.sum(jnp.exp(logits - m), axis=-1, keepdims=True)))[:, 0]
        tgt = jnp.take_along_axis(logits, y_tok[t][:, None], axis=-1)[:, 0]
        valid = (y_tok[t] != TGT_PADDING_IDX).astype(jnp.float32)
        loss_sum = loss_sum + jnp.sum((lse - tgt) * valid)
        cnt = cnt + jnp.sum(valid)
        greedy = jnp.argmax(logits, axis=-1).astype(jnp.int32)
        ipt = jnp.where(tf_flags[t] > 0, y_tok[t], greedy)
    return loss_sum / jnp.maximum(cnt, 1.0)


# ================================== main ======================================
def init_params(key):
    ks = jax.random.split(key, 16)
    nrm = lambda k, s, sc: jax.random.normal(k, s, jnp.float32) * sc
    # padding rows are zero (nn.Embedding padding_idx behavior)
    src_emb = nrm(ks[0], (SRC_VOCAB, EDIM), 0.5).at[SRC_PADDING_IDX].set(0.0)
    tgt_emb = nrm(ks[1], (TGT_VOCAB, EDIM), 0.5).at[TGT_PADDING_IDX].set(0.0)
    return dict(
        src_emb=src_emb, tgt_emb=tgt_emb,
        enc_wx0=nrm(ks[2], (EDIM, 4 * HDIM), 0.3),
        enc_wh0=nrm(ks[3], (HDIM, 4 * HDIM), 0.3),
        enc_b0=nrm(ks[4], (1, 4 * HDIM), 0.1),
        enc_wx1=nrm(ks[5], (HDIM, 4 * HDIM), 0.3),
        enc_wh1=nrm(ks[6], (HDIM, 4 * HDIM), 0.3),
        enc_b1=nrm(ks[7], (1, 4 * HDIM), 0.1),
        dec_wx0=nrm(ks[8], (EDIM, 4 * HDIM), 0.3),
        dec_wh0=nrm(ks[9], (HDIM, 4 * HDIM), 0.3),
        dec_b0=nrm(ks[10], (1, 4 * HDIM), 0.1),
        dec_wx1=nrm(ks[11], (HDIM, 4 * HDIM), 0.3),
        dec_wh1=nrm(ks[12], (HDIM, 4 * HDIM), 0.3),
        dec_b1=nrm(ks[13], (1, 4 * HDIM), 0.1),
        ff_w=nrm(ks[14], (HDIM, TGT_VOCAB), 0.3),
        ff_b=nrm(ks[15], (1, TGT_VOCAB), 0.1),
    )


if __name__ == "__main__":
    root = jax.random.PRNGKey(0)
    k_params, k_x, k_y, k_tf = jax.random.split(root, 4)
    params = init_params(k_params)

    x_tok = jax.random.randint(k_x, (T_SRC, BATCH), 2, SRC_VOCAB, dtype=jnp.int32)
    x_tok = x_tok.at[-2:, : BATCH // 2].set(SRC_PADDING_IDX)     # some source padding
    y_tok = jax.random.randint(k_y, (T_TGT, BATCH), 2, TGT_VOCAB, dtype=jnp.int32)
    y_tok = y_tok.at[-1, : BATCH // 2].set(TGT_PADDING_IDX)      # exercise ignore_index
    # TODO(synk): the PyTorch module flips `random.random() < p` on the host each
    # step; there is no in-kernel equivalent of Python's RNG, so per-step
    # teacher-forcing decisions are precomputed deterministically and passed in.
    tf_flags = jax.random.bernoulli(
        k_tf, FORCE_TEACHER_PROB, (T_TGT,)).astype(jnp.int32)

    loss_fn = jax.jit(seq2seq_loss)
    loss = jax.block_until_ready(loss_fn(params, x_tok, y_tok, tf_flags))

    ref = reference_loss(params, x_tok, y_tok, tf_flags)
    if not (bool(jnp.isfinite(loss)) and abs(float(loss) - float(ref)) < 5e-2):
        raise AssertionError(
            f"mismatch: pallas={float(loss):.6f} ref={float(ref):.6f}")
    print("KERNEL_OK")
</pallas_src>

<mosaic_0001>
module attributes {stable_mosaic.version = 11 : i64} {
  func.func @_seq2seq_kernel(%arg0: memref<10xi32, #tpu.memory_space<smem>>, %arg1: memref<96x64xf32, #tpu.memory_space<vmem>>, %arg2: memref<10x8x128xf32, #tpu.memory_space<vmem>>, %arg3: memref<64x128xf32, #tpu.memory_space<vmem>>, %arg4: memref<32x128xf32, #tpu.memory_space<vmem>>, %arg5: memref<1x128xf32, #tpu.memory_space<vmem>>, %arg6: memref<64x128xf32, #tpu.memory_space<vmem>>, %arg7: memref<1x128xf32, #tpu.memory_space<vmem>>, %arg8: memref<128x128xf32, #tpu.memory_space<vmem>>, %arg9: memref<32x128xf32, #tpu.memory_space<vmem>>, %arg10: memref<1x128xf32, #tpu.memory_space<vmem>>, %arg11: memref<64x128xf32, #tpu.memory_space<vmem>>, %arg12: memref<1x128xf32, #tpu.memory_space<vmem>>, %arg13: memref<32x128xf32, #tpu.memory_space<vmem>>, %arg14: memref<1x128xf32, #tpu.memory_space<vmem>>, %arg15: memref<1x1xf32, #tpu.memory_space<smem>>, %arg16: memref<96x128xf32, #tpu.memory_space<vmem>>) attributes {dimension_semantics = [], scalar_prefetch = 0 : i64, scratch_operands = 1 : i64, tpu.core_type = #tpu.core_type<tc>} {
    %c0 = arith.constant 0 : index
    %c0_0 = arith.constant 0 : index
    %0 = vector.load %arg1[%c0, %c0_0] : memref<96x64xf32, #tpu.memory_space<vmem>>, vector<96x64xf32>
    %c0_1 = arith.constant 0 : index
    %c0_2 = arith.constant 0 : index
    %1 = vector.load %arg3[%c0_1, %c0_2] : memref<64x128xf32, #tpu.memory_space<vmem>>, vector<64x128xf32>
    %cst = arith.constant dense<0.000000e+00> : vector<96x128xf32>
    %2 = tpu.matmul %0, %1, %cst {dimension_numbers = #tpu.dot_dimension_numbers<[1], [0], [0], [1], [0, 0, 1, 1], [], []>} : vector<96x64xf32>, vector<64x128xf32>, vector<96x128xf32> -> vector<96x128xf32>
    %c0_3 = arith.constant 0 : index
    %c0_4 = arith.constant 0 : index
    %3 = vector.load %arg5[%c0_3, %c0_4] : memref<1x128xf32, #tpu.memory_space<vmem>>, vector<1x128xf32>
    %4 = vector.broadcast %3 : vector<1x128xf32> to vector<96x128xf32>
    %5 = arith.addf %2, %4 : vector<96x128xf32>
    %c0_5 = arith.constant 0 : index
    %c0_6 = arith.constant 0 : index
    %6 = vector.load %arg16[%c0_5, %c0_6] : memref<96x128xf32, #tpu.memory_space<vmem>>, vector<96x128xf32>
    tpu.vector_store %arg16[%c0_5, %c0_6], %5 {strides = array<i32>} : memref<96x128xf32, #tpu.memory_space<vmem>>, vector<96x128xf32>,
    %cst_7 = arith.constant 0.000000e+00 : f32
    %7 = vector.broadcast %cst_7 : f32 to vector<8x32xf32>
    %c0_i32 = arith.constant 0 : i32
    %c8_i32 = arith.constant 8 : i32
    %8 = arith.muli %c0_i32, %c8_i32 : i32
    %9 = tpu.assume_multiple %8, 8 : i32
    %10 = arith.index_cast %9 : i32 to index
    %c0_8 = arith.constant 0 : index
    %11 = vector.load %arg16[%10, %c0_8] : memref<96x128xf32, #tpu.memory_space<vmem>>, vector<8x128xf32>
    %c0_9 = arith.constant 0 : index
    %c0_10 = arith.constant 0 : index
    %12 = vector.load %arg4[%c0_9, %c0_10] : memref<32x128xf32, #tpu.memory_space<vmem>>, vector<32x128xf32>
    %cst_11 = arith.constant dense<0.000000e+00> : vector<8x128xf32>
    %13 = tpu.matmul %7, %12, %cst_11 {dimension_numbers = #tpu.dot_dimension_numbers<[1], [0], [0], [1], [0, 0, 1, 1], [], []>} : vector<8x32xf32>, vector<32x128xf32>, vector<8x128xf32> -> vector<8x128xf32>
    %14 = arith.addf %11, %13 : vector<8x128xf32>
    %15 = arith.negf %14 : vector<8x128xf32>
    %16 = math.exp %15 : vector<8x128xf32>
    %cst_12 = arith.constant 1.000000e+00 : f32
    %17 = vector.broadcast %cst_12 : f32 to vector<8x128xf32>
    %18 = arith.addf %17, %16 : vector<8x128xf32>
    %19 = arith.divf %17, %18 : vector<8x128xf32>
    %20 = math.tanh %14 : vector<8x128xf32>
    %21 = vector.extract_strided_slice %19 {offsets = [0, 0], sizes = [8, 32], strides = [1, 1]} : vector<8x128xf32> to vector<8x32xf32>
    %22 = vector.extract_strided_slice %19 {offsets = [0, 32], sizes = [8, 32], strides = [1, 1]} : vector<8x128xf32> to vector<8x32xf32>
    %23 = vector.extract_strided_slice %20 {offsets = [0, 64], sizes = [8, 32], strides = [1, 1]} : vector<8x128xf32> to vector<8x32xf32>
    %24 = vector.extract_strided_slice %19 {offsets = [0, 96], sizes = [8, 32], strides = [1, 1]} : vector<8x128xf32> to vector<8x32xf32>
    %25 = arith.mulf %22, %7 : vector<8x32xf32>
    %26 = arith.mulf %21, %23 : vector<8x32xf32>
    %27 = arith.addf %25, %26 : vector<8x32xf32>
    %28 = math.tanh %27 : vector<8x32xf32>
    %29 = arith.mulf %24, %28 : vector<8x32xf32>
    %30 = tpu.concatenate %29, %7 in 1 : vector<8x32xf32>, vector<8x32xf32> -> vector<8x64xf32>
    %c0_13 = arith.constant 0 : index
    %c0_14 = arith.constant 0 : index
    %31 = vector.load %arg6[%c0_13, %c0_14] : memref<64x128xf32, #tpu.memory_space<vmem>>, vector<64x128xf32>
    %cst_15 = arith.constant dense<0.000000e+00> : vector<8x128xf32>
    %32 = tpu.matmul %30, %31, %cst_15 {dimension_numbers = #tpu.dot_dimension_numbers<[1], [0], [0], [1], [0, 0, 1, 1], [], []>} : vector<8x64xf32>, vector<64x128xf32>, vector<8x128xf32> -> vector<8x128xf32>
    %c0_16 = arith.constant 0 : index
    %c0_17 = arith.constant 0 : index
    %33 = vector.load %arg7[%c0_16, %c0_17] : memref<1x128xf32, #tpu.memory_space<vmem>>, vector<1x128xf32>
    %34 = vector.broadcast %33 : vector<1x128xf32> to vector<8x128xf32>
    %35 = arith.addf %32, %34 : vector<8x128xf32>
    %36 = arith.negf %35 : vector<8x128xf32>
    %37 = math.exp %36 : vector<8x128xf32>
    %cst_18 = arith.constant 1.000000e+00 : f32
    %38 = vector.broadcast %cst_18 : f32 to vector<8x128xf32>
    %39 = arith.addf %38, %37 : vector<8x128xf32>
    %40 = arith.divf %38, %39 : vector<8x128xf32>
    %41 = math.tanh %35 : vector<8x128xf32>
    %42 = vector.extract_strided_slice %40 {offsets = [0, 0], sizes = [8, 32], strides = [1, 1]} : vector<8x128xf32> to vector<8x32xf32>
    %43 = vector.extract_strided_slice %40 {offsets = [0, 32], sizes = [8, 32], strides = [1, 1]} : vector<8x128xf32> to vector<8x32xf32>
    %44 = vector.extract_strided_slice %41 {offsets = [0, 64], sizes = [8, 32], strides = [1, 1]} : vector<8x128xf32> to vector<8x32xf32>
    %45 = vector.extract_strided_slice %40 {offsets = [0, 96], sizes = [8, 32], strides = [1, 1]} : vector<8x128xf32> to vector<8x32xf32>
    %46 = arith.mulf %43, %7 : vector<8x32xf32>
    %47 = arith.mulf %42, %44 : vector<8x32xf32>
    %48 = arith.addf %46, %47 : vector<8x32xf32>
    %49 = math.tanh %48 : vector<8x32xf32>
    %50 = arith.mulf %45, %49 : vector<8x32xf32>
    %c1_i32 = arith.constant 1 : i32
    %c8_i32_19 = arith.constant 8 : i32
    %51 = arith.muli %c1_i32, %c8_i32_19 : i32
    %52 = tpu.assume_multiple %51, 8 : i32
    %53 = arith.index_cast %52 : i32 to index
    %c0_20 = arith.constant 0 : index
    %54 = vector.load %arg16[%53, %c0_20] : memref<96x128xf32, #tpu.memory_space<vmem>>, vector<8x128xf32>
    %c0_21 = arith.constant 0 : index
    %c0_22 = arith.constant 0 : index
    %55 = vector.load %arg4[%c0_21, %c0_22] : memref<32x128xf32, #tpu.memory_space<vmem>>, vector<32x128xf32>
    %cst_23 = arith.constant dense<0.000000e+00> : vector<8x128xf32>
    %56 = tpu.matmul %29, %55, %cst_23 {dimension_numbers = #tpu.dot_dimension_numbers<[1], [0], [0], [1], [0, 0, 1, 1], [], []>} : vector<8x32xf32>, vector<32x128xf32>, vector<8x128xf32> -> vector<8x128xf32>
    %57 = arith.addf %54, %56 : vector<8x128xf32>
    %58 = arith.negf %57 : vector<8x128xf32>
    %59 = math.exp %58 : vector<8x128xf32>
    %cst_24 = arith.constant 1.000000e+00 : f32
    %60 = vector.broadcast %cst_24 : f32 to vector<8x128xf32>
    %61 = arith.addf %60, %59 : vector<8x128xf32>
    %62 = arith.divf %60, %61 : vector<8x128xf32>
    %63 = math.tanh %57 : vector<8x128xf32>
    %64 = vector.extract_strided_slice %62 {offsets = [0, 0], sizes = [8, 32], strides = [1, 1]} : vector<8x128xf32> to vector<8x32xf32>
    %65 = vector.extract_strided_slice %62 {offsets = [0, 32], sizes = [8, 32], strides = [1, 1]} : vector<8x128xf32> to vector<8x32xf32>
    %66 = vector.extract_strided_slice %63 {offsets = [0, 64], sizes = [8, 32], strides = [1, 1]} : vector<8x128xf32> to vector<8x32xf32>
    %67 = vector.extract_strided_slice %62 {offsets = [0, 96], sizes = [8, 32], strides = [1, 1]} : vector<8x128xf32> to vector<8x32xf32>
    %68 = arith.mulf %65, %27 : vector<8x32xf32>
    %69 = arith.mulf %64, %66 : vector<8x32xf32>
    %70 = arith.addf %68, %69 : vector<8x32xf32>
    %71 = math.tanh %70 : vector<8x32xf32>
    %72 = arith.mulf %67, %71 : vector<8x32xf32>
    %73 = tpu.concatenate %72, %50 in 1 : vector<8x32xf32>, vector<8x32xf32> -> vector<8x64xf32>
    %c0_25 = arith.constant 0 : index
    %c0_26 = arith.constant 0 : index
    %74 = vector.load %arg6[%c0_25, %c0_26] : memref<64x128xf32, #tpu.memory_space<vmem>>, vector<64x128xf32>
    %cst_27 = arith.constant dense<0.000000e+00> : vector<8x128xf32>
    %75 = tpu.matmul %73, %74, %cst_27 {dimension_numbers = #tpu.dot_dimension_numbers<[1], [0], [0], [1], [0, 0, 1, 1], [], []>} : vector<8x64xf32>, vector<64x128xf32>, vector<8x128xf32> -> vector<8x128xf32>
    %c0_28 = arith.constant 0 : index
    %c0_29 = arith.constant 0 : index
    %76 = vector.load %arg7[%c0_28, %c0_29] : memref<1x128xf32, #tpu.memory_space<vmem>>, vector<1x128xf32>
    %77 = vector.broadcast %76 : vector<1x128xf32> to vector<8x128xf32>
    %78 = arith.addf %75, %77 : vector<8x128xf32>
    %79 = arith.negf %78 : vector<8x128xf32>
    %80 = math.exp %79 : vector<8x128xf32>
    %cst_30 = arith.constant 1.000000e+00 : f32
    %81 = vector.broadcast %cst_30 : f32 to vector<8x128xf32>
    %82 = arith.addf %81, %80 : vector<8x128xf32>
    %83 = arith.divf %81, %82 : vector<8x128xf32>
    %84 = math.tanh %78 : vector<8x128xf32>
    %85 = vector.extract_strided_slice %83 {offsets = [0, 0], sizes = [8, 32], strides = [1, 1]} : vector<8x128xf32> to vector<8x32xf32>
    %86 = vector.extract_strided_slice %83 {offsets = [0, 32], sizes = [8, 32], strides = [1, 1]} : vector<8x128xf32> to vector<8x32xf32>
    %87 = vector.extract_strided_slice %84 {offsets = [0, 64], sizes = [8, 32], strides = [1, 1]} : vector<8x128xf32> to vector<8x32xf32>
    %88 = vector.extract_strided_slice %83 {offsets = [0, 96], sizes = [8, 32], strides = [1, 1]} : vector<8x128xf32> to vector<8x32xf32>
    %89 = arith.mulf %86, %48 : vector<8x32xf32>
    %90 = arith.mulf %85, %87 : vector<8x32xf32>
    %91 = arith.addf %89, %90 : vector<8x32xf32>
    %92 = math.tanh %91 : vector<8x32xf32>
    %93 = arith.mulf %88, %92 : vector<8x32xf32>
    %c2_i32 = arith.constant 2 : i32
    %c8_i32_31 = arith.constant 8 : i32
    %94 = arith.muli %c2_i32, %c8_i32_31 : i32
    %95 = tpu.assume_multiple %94, 8 : i32
    %96 = arith.index_cast %95 : i32 to index
    %c0_32 = arith.constant 0 : index
    %97 = vector.load %arg16[%96, %c0_32] : memref<96x128xf32, #tpu.memory_space<vmem>>, vector<8x128xf32>
    %c0_33 = arith.constant 0 : index
    %c0_34 = arith.constant 0 : index
    %98 = vector.load %arg4[%c0_33, %c0_34] : memref<32x128xf32, #tpu.memory_space<vmem>>, vector<32x128xf32>
    %cst_35 = arith.constant dense<0.000000e+00> : vector<8x128xf32>
    %99 = tpu.matmul %72, %98, %cst_35 {dimension_numbers = #tpu.dot_dimension_numbers<[1], [0], [0], [1], [0, 0, 1, 1], [], []>} : vector<8x32xf32>, vector<32x128xf32>, vector<8x128xf32> -> vector<8x128xf32>
    %100 = arith.addf %97, %99 : vector<8x128xf32>
    %101 = arith.negf %100 : vector<8x128xf32>
    %102 = math.exp %101 : vector<8x128xf32>
    %cst_36 = arith.constant 1.000000e+00 : f32
    %103 = vector.broadcast %cst_36 : f32 to vector<8x128xf32>
    %104 = arith.addf %103, %102 : vector<8x128xf32>
    %105 = arith.divf %103, %104 : vector<8x128xf32>
    %106 = math.tanh %100 : vector<8x128xf32>
    %107 = vector.extract_strided_slice %105 {offsets = [0, 0], sizes = [8, 32], strides = [1, 1]} : vector<8x128xf32> to vector<8x32xf32>
    %108 = vector.extract_strided_slice %105 {offsets = [0, 32], sizes = [8, 32], strides = [1, 1]} : vector<8x128xf32> to vector<8x32xf32>
    %109 = vector.extract_strided_slice %106 {offsets = [0, 64], sizes = [8, 32], strides = [1, 1]} : vector<8x128xf32> to vector<8x32xf32>
    %110 = vector.extract_strided_slice %105 {offsets = [0, 96], sizes = [8, 32], strides = [1, 1]} : vector<8x128xf32> to vector<8x32xf32>
    %111 = arith.mulf %108, %70 : vector<8x32xf32>
    %112 = arith.mulf %107, %109 : vector<8x32xf32>
    %113 = arith.addf %111, %112 : vector<8x32xf32>
    %114 = math.tanh %113 : vector<8x32xf32>
    %115 = arith.mulf %110, %114 : vector<8x32xf32>
    %116 = tpu.concatenate %115, %93 in 1 : vector<8x32xf32>, vector<8x32xf32> -> vector<8x64xf32>
    %c0_37 = arith.constant 0 : index
    %c0_38 = arith.constant 0 : index
    %117 = vector.load %arg6[%c0_37, %c0_38] : memref<64x128xf32, #tpu.memory_space<vmem>>, vector<64x128xf32>
    %cst_39 = arith.constant dense<0.000000e+00> : vector<8x128xf32>
    %118 = tpu.matmul %116, %117, %cst_39 {dimension_numbers = #tpu.dot_dimension_numbers<[1], [0], [0], [1], [0, 0, 1, 1], [], []>} : vector<8x64xf32>, vector<64x128xf32>, vector<8x128xf32> -> vector<8x128xf32>
    %c0_40 = arith.constant 0 : index
    %c0_41 = arith.constant 0 : index
    %119 = vector.load %arg7[%c0_40, %c0_41] : memref<1x128xf32, #tpu.memory_space<vmem>>, vector<1x128xf32>
    %120 = vector.broadcast %119 : vector<1x128xf32> to vector<8x128xf32>
    %121 = arith.addf %118, %120 : vector<8x128xf32>
    %122 = arith.negf %121 : vector<8x128xf32>
    %123 = math.exp %122 : vector<8x128xf32>
    %cst_42 = arith.constant 1.000000e+00 : f32
    %124 = vector.broadcast %cst_42 : f32 to vector<8x128xf32>
    %125 = arith.addf %124, %123 : vector<8x128xf32>
    %126 = arith.divf %124, %125 : vector<8x128xf32>
    %127 = math.tanh %121 : vector<8x128xf32>
    %128 = vector.extract_strided_slice %126 {offsets = [0, 0], sizes = [8, 32], strides = [1, 1]} : vector<8x128xf32> to vector<8x32xf32>
    %129 = vector.extract_strided_slice %126 {offsets = [0, 32], sizes = [8, 32], strides = [1, 1]} : vector<8x128xf32> to vector<8x32xf32>
    %130 = vector.extract_strided_slice %127 {offsets = [0, 64], sizes = [8, 32], strides = [1, 1]} : vector<8x128xf32> to vector<8x32xf32>
    %131 = vector.extract_strided_slice %126 {offsets = [0, 96], sizes = [8, 32], strides = [1, 1]} : vector<8x128xf32> to vector<8x32xf32>
    %132 = arith.mulf %129, %91 : vector<8x32xf32>
    %133 = arith.mulf %128, %130 : vector<8x32xf32>
    %134 = arith.addf %132, %133 : vector<8x32xf32>
    %135 = math.tanh %134 : vector<8x32xf32>
    %136 = arith.mulf %131, %135 : vector<8x32xf32>
    %c3_i32 = arith.constant 3 : i32
    %c8_i32_43 = arith.constant 8 : i32
    %137 = arith.muli %c3_i32, %c8_i32_43 : i32
    %138 = tpu.assume_multiple %137, 8 : i32
    %139 = arith.index_cast %138 : i32 to index
    %c0_44 = arith.constant 0 : index
    %140 = vector.load %arg16[%139, %c0_44] : memref<96x128xf32, #tpu.memory_space<vmem>>, vector<8x128xf32>
    %c0_45 = arith.constant 0 : index
    %c0_46 = arith.constant 0 : index
    %141 = vector.load %arg4[%c0_45, %c0_46] : memref<32x128xf32, #tpu.memory_space<vmem>>, vector<32x128xf32>
    %cst_47 = arith.constant dense<0.000000e+00> : vector<8x128xf32>
    %142 = tpu.matmul %115, %141, %cst_47 {dimension_numbers = #tpu.dot_dimension_numbers<[1], [0], [0], [1], [0, 0, 1, 1], [], []>} : vector<8x32xf32>, vector<32x128xf32>, vector<8x128xf32> -> vector<8x128xf32>
    %143 = arith.addf %140, %142 : vector<8x128xf32>
    %144 = arith.negf %143 : vector<8x128xf32>
    %145 = math.exp %144 : vector<8x128xf32>
    %cst_48 = arith.constant 1.000000e+00 : f32
    %146 = vector.broadcast %cst_48 : f32 to vector<8x128xf32>
    %147 = arith.addf %146, %145 : vector<8x128xf32>
    %148 = arith.divf %146, %147 : vector<8x128xf32>
    %149 = math.tanh %143 : vector<8x128xf32>
    %150 = vector.extract_strided_slice %148 {offsets = [0, 0], sizes = [8, 32], strides = [1, 1]} : vector<8x128xf32> to vector<8x32xf32>
    %151 = vector.extract_strided_slice %148 {offsets = [0, 32], sizes = [8, 32], strides = [1, 1]} : vector<8x128xf32> to vector<8x32xf32>
    %152 = vector.extract_strided_slice %149 {offsets = [0, 64], sizes = [8, 32], strides = [1, 1]} : vector<8x128xf32> to vector<8x32xf32>
    %153 = vector.extract_strided_slice %148 {offsets = [0, 96], sizes = [8, 32], strides = [1, 1]} : vector<8x128xf32> to vector<8x32xf32>
    %154 = arith.mulf %151, %113 : vector<8x32xf32>
    %155 = arith.mulf %150, %152 : vector<8x32xf32>
    %156 = arith.addf %154, %155 : vector<8x32xf32>
    %157 = math.tanh %156 : vector<8x32xf32>
    %158 = arith.mulf %153, %157 : vector<8x32xf32>
    %159 = tpu.concatenate %158, %136 in 1 : vector<8x32xf32>, vector<8x32xf32> -> vector<8x64xf32>
    %c0_49 = arith.constant 0 : index
    %c0_50 = arith.constant 0 : index
    %160 = vector.load %arg6[%c0_49, %c0_50] : memref<64x128xf32, #tpu.memory_space<vmem>>, vector<64x128xf32>
    %cst_51 = arith.constant dense<0.000000e+00> : vector<8x128xf32>
    %161 = tpu.matmul %159, %160, %cst_51 {dimension_numbers = #tpu.dot_dimension_numbers<[1], [0], [0], [1], [0, 0, 1, 1], [], []>} : vector<8x64xf32>, vector<64x128xf32>, vector<8x128xf32> -> vector<8x128xf32>
    %c0_52 = arith.constant 0 : index
    %c0_53 = arith.constant 0 : index
    %162 = vector.load %arg7[%c0_52, %c0_53] : memref<1x128xf32, #tpu.memory_space<vmem>>, vector<1x128xf32>
    %163 = vector.broadcast %162 : vector<1x128xf32> to vector<8x128xf32>
    %164 = arith.addf %161, %163 : vector<8x128xf32>
    %165 = arith.negf %164 : vector<8x128xf32>
    %166 = math.exp %165 : vector<8x128xf32>
    %cst_54 = arith.constant 1.000000e+00 : f32
    %167 = vector.broadcast %cst_54 : f32 to vector<8x128xf32>
    %168 = arith.addf %167, %166 : vector<8x128xf32>
    %169 = arith.divf %167, %168 : vector<8x128xf32>
    %170 = math.tanh %164 : vector<8x128xf32>
    %171 = vector.extract_strided_slice %169 {offsets = [0, 0], sizes = [8, 32], strides = [1, 1]} : vector<8x128xf32> to vector<8x32xf32>
    %172 = vector.extract_strided_slice %169 {offsets = [0, 32], sizes = [8, 32], strides = [1, 1]} : vector<8x128xf32> to vector<8x32xf32>
    %173 = vector.extract_strided_slice %170 {offsets = [0, 64], sizes = [8, 32], strides = [1, 1]} : vector<8x128xf32> to vector<8x32xf32>
    %174 = vector.extract_strided_slice %169 {offsets = [0, 96], sizes = [8, 32], strides = [1, 1]} : vector<8x128xf32> to vector<8x32xf32>
    %175 = arith.mulf %172, %134 : vector<8x32xf32>
    %176 = arith.mulf %171, %173 : vector<8x32xf32>
    %177 = arith.addf %175, %176 : vector<8x32xf32>
    %178 = math.tanh %177 : vector<8x32xf32>
    %179 = arith.mulf %174, %178 : vector<8x32xf32>
    %c4_i32 = arith.constant 4 : i32
    %c8_i32_55 = arith.constant 8 : i32
    %180 = arith.muli %c4_i32, %c8_i32_55 : i32
    %181 = tpu.assume_multiple %180, 8 : i32
    %182 = arith.index_cast %181 : i32 to index
    %c0_56 = arith.constant 0 : index
    %183 = vector.load %arg16[%182, %c0_56] : memref<96x128xf32, #tpu.memory_space<vmem>>, vector<8x128xf32>
    %c0_57 = arith.constant 0 : index
    %c0_58 = arith.constant 0 : index
    %184 = vector.load %arg4[%c0_57, %c0_58] : memref<32x128xf32, #tpu.memory_space<vmem>>, vector<32x128xf32>
    %cst_59 = arith.constant dense<0.000000e+00> : vector<8x128xf32>
    %185 = tpu.matmul %158, %184, %cst_59 {dimension_numbers = #tpu.dot_dimension_numbers<[1], [0], [0], [1], [0, 0, 1, 1], [], []>} : vector<8x32xf32>, vector<32x128xf32>, vector<8x128xf32> -> vector<8x128xf32>
    %186 = arith.addf %183, %185 : vector<8x128xf32>
    %187 = arith.negf %186 : vector<8x128xf32>
    %188 = math.exp %187 : vector<8x128xf32>
    %cst_60 = arith.constant 1.000000e+00 : f32
    %189 = vector.broadcast %cst_60 : f32 to vector<8x128xf32>
    %190 = arith.addf %189, %188 : vector<8x128xf32>
    %191 = arith.divf %189, %190 : vector<8x128xf32>
    %192 = math.tanh %186 : vector<8x128xf32>
    %193 = vector.extract_strided_slice %191 {offsets = [0, 0], sizes = [8, 32], strides = [1, 1]} : vector<8x128xf32> to vector<8x32xf32>
    %194 = vector.extract_strided_slice %191 {offsets = [0, 32], sizes = [8, 32], strides = [1, 1]} : vector<8x128xf32> to vector<8x32xf32>
    %195 = vector.extract_strided_slice %192 {offsets = [0, 64], sizes = [8, 32], strides = [1, 1]} : vector<8x128xf32> to vector<8x32xf32>
    %196 = vector.extract_strided_slice %191 {offsets = [0, 96], sizes = [8, 32], strides = [1, 1]} : vector<8x128xf32> to vector<8x32xf32>
    %197 = arith.mulf %194, %156 : vector<8x32xf32>
    %198 = arith.mulf %193, %195 : vector<8x32xf32>
    %199 = arith.addf %197, %198 : vector<8x32xf32>
    %200 = math.tanh %199 : vector<8x32xf32>
    %201 = arith.mulf %196, %200 : vector<8x32xf32>
    %202 = tpu.concatenate %201, %179 in 1 : vector<8x32xf32>, vector<8x32xf32> -> vector<8x64xf32>
    %c0_61 = arith.constant 0 : index
    %c0_62 = arith.constant 0 : index
    %203 = vector.load %arg6[%c0_61, %c0_62] : memref<64x128xf32, #tpu.memory_space<vmem>>, vector<64x128xf32>
    %cst_63 = arith.constant dense<0.000000e+00> : vector<8x128xf32>
    %204 = tpu.matmul %202, %203, %cst_63 {dimension_numbers = #tpu.dot_dimension_numbers<[1], [0], [0], [1], [0, 0, 1, 1], [], []>} : vector<8x64xf32>, vector<64x128xf32>, vector<8x128xf32> -> vector<8x128xf32>
    %c0_64 = arith.constant 0 : index
    %c0_65 = arith.constant 0 : index
    %205 = vector.load %arg7[%c0_64, %c0_65] : memref<1x128xf32, #tpu.memory_space<vmem>>, vector<1x128xf32>
    %206 = vector.broadcast %205 : vector<1x128xf32> to vector<8x128xf32>
    %207 = arith.addf %204, %206 : vector<8x128xf32>
    %208 = arith.negf %207 : vector<8x128xf32>
    %209 = math.exp %208 : vector<8x128xf32>
    %cst_66 = arith.constant 1.000000e+00 : f32
    %210 = vector.broadcast %cst_66 : f32 to vector<8x128xf32>
    %211 = arith.addf %210, %209 : vector<8x128xf32>
    %212 = arith.divf %210, %211 : vector<8x128xf32>
    %213 = math.tanh %207 : vector<8x128xf32>
    %214 = vector.extract_strided_slice %212 {offsets = [0, 0], sizes = [8, 32], strides = [1, 1]} : vector<8x128xf32> to vector<8x32xf32>
    %215 = vector.extract_strided_slice %212 {offsets = [0, 32], sizes = [8, 32], strides = [1, 1]} : vector<8x128xf32> to vector<8x32xf32>
    %216 = vector.extract_strided_slice %213 {offsets = [0, 64], sizes = [8, 32], strides = [1, 1]} : vector<8x128xf32> to vector<8x32xf32>
    %217 = vector.extract_strided_slice %212 {offsets = [0, 96], sizes = [8, 32], strides = [1, 1]} : vector<8x128xf32> to vector<8x32xf32>
    %218 = arith.mulf %215, %177 : vector<8x32xf32>
    %219 = arith.mulf %214, %216 : vector<8x32xf32>
    %220 = arith.addf %218, %219 : vector<8x32xf32>
    %221 = math.tanh %220 : vector<8x32xf32>
    %222 = arith.mulf %217, %221 : vector<8x32xf32>
    %c5_i32 = arith.constant 5 : i32
    %c8_i32_67 = arith.constant 8 : i32
    %223 = arith.muli %c5_i32, %c8_i32_67 : i32
    %224 = tpu.assume_multiple %223, 8 : i32
    %225 = arith.index_cast %224 : i32 to index
    %c0_68 = arith.constant 0 : index
    %226 = vector.load %arg16[%225, %c0_68] : memref<96x128xf32, #tpu.memory_space<vmem>>, vector<8x128xf32>
    %c0_69 = arith.constant 0 : index
    %c0_70 = arith.constant 0 : index
    %227 = vector.load %arg4[%c0_69, %c0_70] : memref<32x128xf32, #tpu.memory_space<vmem>>, vector<32x128xf32>
    %cst_71 = arith.constant dense<0.000000e+00> : vector<8x128xf32>
    %228 = tpu.matmul %201, %227, %cst_71 {dimension_numbers = #tpu.dot_dimension_numbers<[1], [0], [0], [1], [0, 0, 1, 1], [], []>} : vector<8x32xf32>, vector<32x128xf32>, vector<8x128xf32> -> vector<8x128xf32>
    %229 = arith.addf %226, %228 : vector<8x128xf32>
    %230 = arith.negf %229 : vector<8x128xf32>
    %231 = math.exp %230 : vector<8x128xf32>
    %cst_72 = arith.constant 1.000000e+00 : f32
    %232 = vector.broadcast %cst_72 : f32 to vector<8x128xf32>
    %233 = arith.addf %232, %231 : vector<8x128xf32>
    %234 = arith.divf %232, %233 : vector<8x128xf32>
    %235 = math.tanh %229 : vector<8x128xf32>
    %236 = vector.extract_strided_slice %234 {offsets = [0, 0], sizes = [8, 32], strides = [1, 1]} : vector<8x128xf32> to vector<8x32xf32>
    %237 = vector.extract_strided_slice %234 {offsets = [0, 32], sizes = [8, 32], strides = [1, 1]} : vector<8x128xf32> to vector<8x32xf32>
    %238 = vector.extract_strided_slice %235 {offsets = [0, 64], sizes = [8, 32], strides = [1, 1]} : vector<8x128xf32> to vector<8x32xf32>
    %239 = vector.extract_strided_slice %234 {offsets = [0, 96], sizes = [8, 32], strides = [1, 1]} : vector<8x128xf32> to vector<8x32xf32>
    %240 = arith.mulf %237, %199 : vector<8x32xf32>
    %241 = arith.mulf %236, %238 : vector<8x32xf32>
    %242 = arith.addf %240, %241 : vector<8x32xf32>
    %243 = math.tanh %242 : vector<8x32xf32>
    %244 = arith.mulf %239, %243 : vector<8x32xf32>
    %245 = tpu.concatenate %244, %222 in 1 : vector<8x32xf32>, vector<8x32xf32> -> vector<8x64xf32>
    %c0_73 = arith.constant 0 : index
    %c0_74 = arith.constant 0 : index
    %246 = vector.load %arg6[%c0_73, %c0_74] : memref<64x128xf32, #tpu.memory_space<vmem>>, vector<64x128xf32>
    %cst_75 = arith.constant dense<0.000000e+00> : vector<8x128xf32>
    %247 = tpu.matmul %245, %246, %cst_75 {dimension_numbers = #tpu.dot_dimension_numbers<[1], [0], [0], [1], [0, 0, 1, 1], [], []>} : vector<8x64xf32>, vector<64x128xf32>, vector<8x128xf32> -> vector<8x128xf32>
    %c0_76 = arith.constant 0 : index
    %c0_77 = arith.constant 0 : index
    %248 = vector.load %arg7[%c0_76, %c0_77] : memref<1x128xf32, #tpu.memory_space<vmem>>, vector<1x128xf32>
    %249 = vector.broadcast %248 : vector<1x128xf32> to vector<8x128xf32>
    %250 = arith.addf %247, %249 : vector<8x128xf32>
    %251 = arith.negf %250 : vector<8x128xf32>
    %252 = math.exp %251 : vector<8x128xf32>
    %cst_78 = arith.constant 1.000000e+00 : f32
    %253 = vector.broadcast %cst_78 : f32 to vector<8x128xf32>
    %254 = arith.addf %253, %252 : vector<8x128xf32>
    %255 = arith.divf %253, %254 : vector<8x128xf32>
    %256 = math.tanh %250 : vector<8x128xf32>
    %257 = vector.extract_strided_slice %255 {offsets = [0, 0], sizes = [8, 32], strides = [1, 1]} : vector<8x128xf32> to vector<8x32xf32>
    %258 = vector.extract_strided_slice %255 {offsets = [0, 32], sizes = [8, 32], strides = [1, 1]} : vector<8x128xf32> to vector<8x32xf32>
    %259 = vector.extract_strided_slice %256 {offsets = [0, 64], sizes = [8, 32], strides = [1, 1]} : vector<8x128xf32> to vector<8x32xf32>
    %260 = vector.extract_strided_slice %255 {offsets = [0, 96], sizes = [8, 32], strides = [1, 1]} : vector<8x128xf32> to vector<8x32xf32>
    %261 = arith.mulf %258, %220 : vector<8x32xf32>
    %262 = arith.mulf %257, %259 : vector<8x32xf32>
    %263 = arith.addf %261, %262 : vector<8x32xf32>
    %264 = math.tanh %263 : vector<8x32xf32>
    %265 = arith.mulf %260, %264 : vector<8x32xf32>
    %c6_i32 = arith.constant 6 : i32
    %c8_i32_79 = arith.constant 8 : i32
    %266 = arith.muli %c6_i32, %c8_i32_79 : i32
    %267 = tpu.assume_multiple %266, 8 : i32
    %268 = arith.index_cast %267 : i32 to index
    %c0_80 = arith.constant 0 : index
    %269 = vector.load %arg16[%268, %c0_80] : memref<96x128xf32, #tpu.memory_space<vmem>>, vector<8x128xf32>
    %c0_81 = arith.constant 0 : index
    %c0_82 = arith.constant 0 : index
    %270 = vector.load %arg4[%c0_81, %c0_82] : memref<32x128xf32, #tpu.memory_space<vmem>>, vector<32x128xf32>
    %cst_83 = arith.constant dense<0.000000e+00> : vector<8x128xf32>
    %271 = tpu.matmul %244, %270, %cst_83 {dimension_numbers = #tpu.dot_dimension_numbers<[1], [0], [0], [1], [0, 0, 1, 1], [], []>} : vector<8x32xf32>, vector<32x128xf32>, vector<8x128xf32> -> vector<8x128xf32>
    %272 = arith.addf %269, %271 : vector<8x128xf32>
    %273 = arith.negf %272 : vector<8x128xf32>
    %274 = math.exp %273 : vector<8x128xf32>
    %cst_84 = arith.constant 1.000000e+00 : f32
    %275 = vector.broadcast %cst_84 : f32 to vector<8x128xf32>
    %276 = arith.addf %275, %274 : vector<8x128xf32>
    %277 = arith.divf %275, %276 : vector<8x128xf32>
    %278 = math.tanh %272 : vector<8x128xf32>
    %279 = vector.extract_strided_slice %277 {offsets = [0, 0], sizes = [8, 32], strides = [1, 1]} : vector<8x128xf32> to vector<8x32xf32>
    %280 = vector.extract_strided_slice %277 {offsets = [0, 32], sizes = [8, 32], strides = [1, 1]} : vector<8x128xf32> to vector<8x32xf32>
    %281 = vector.extract_strided_slice %278 {offsets = [0, 64], sizes = [8, 32], strides = [1, 1]} : vector<8x128xf32> to vector<8x32xf32>
    %282 = vector.extract_strided_slice %277 {offsets = [0, 96], sizes = [8, 32], strides = [1, 1]} : vector<8x128xf32> to vector<8x32xf32>
    %283 = arith.mulf %280, %242 : vector<8x32xf32>
    %284 = arith.mulf %279, %281 : vector<8x32xf32>
    %285 = arith.addf %283, %284 : vector<8x32xf32>
    %286 = math.tanh %285 : vector<8x32xf32>
    %287 = arith.mulf %282, %286 : vector<8x32xf32>
    %288 = tpu.concatenate %287, %265 in 1 : vector<8x32xf32>, vector<8x32xf32> -> vector<8x64xf32>
    %c0_85 = arith.constant 0 : index
    %c0_86 = arith.constant 0 : index
    %289 = vector.load %arg6[%c0_85, %c0_86] : memref<64x128xf32, #tpu.memory_space<vmem>>, vector<64x128xf32>
    %cst_87 = arith.constant dense<0.000000e+00> : vector<8x128xf32>
    %290 = tpu.matmul %288, %289, %cst_87 {dimension_numbers = #tpu.dot_dimension_numbers<[1], [0], [0], [1], [0, 0, 1, 1], [], []>} : vector<8x64xf32>, vector<64x128xf32>, vector<8x128xf32> -> vector<8x128xf32>
    %c0_88 = arith.constant 0 : index
    %c0_89 = arith.constant 0 : index
    %291 = vector.load %arg7[%c0_88, %c0_89] : memref<1x128xf32, #tpu.memory_space<vmem>>, vector<1x128xf32>
    %292 = vector.broadcast %291 : vector<1x128xf32> to vector<8x128xf32>
    %293 = arith.addf %290, %292 : vector<8x128xf32>
    %294 = arith.negf %293 : vector<8x128xf32>
    %295 = math.exp %294 : vector<8x128xf32>
    %cst_90 = arith.constant 1.000000e+00 : f32
    %296 = vector.broadcast %cst_90 : f32 to vector<8x128xf32>
    %297 = arith.addf %296, %295 : vector<8x128xf32>
    %298 = arith.divf %296, %297 : vector<8x128xf32>
    %299 = math.tanh %293 : vector<8x128xf32>
    %300 = vector.extract_strided_slice %298 {offsets = [0, 0], sizes = [8, 32], strides = [1, 1]} : vector<8x128xf32> to vector<8x32xf32>
    %301 = vector.extract_strided_slice %298 {offsets = [0, 32], sizes = [8, 32], strides = [1, 1]} : vector<8x128xf32> to vector<8x32xf32>
    %302 = vector.extract_strided_slice %299 {offsets = [0, 64], sizes = [8, 32], strides = [1, 1]} : vector<8x128xf32> to vector<8x32xf32>
    %303 = vector.extract_strided_slice %298 {offsets = [0, 96], sizes = [8, 32], strides = [1, 1]} : vector<8x128xf32> to vector<8x32xf32>
    %304 = arith.mulf %301, %263 : vector<8x32xf32>
    %305 = arith.mulf %300, %302 : vector<8x32xf32>
    %306 = arith.addf %304, %305 : vector<8x32xf32>
    %307 = math.tanh %306 : vector<8x32xf32>
    %308 = arith.mulf %303, %307 : vector<8x32xf32>
    %c7_i32 = arith.constant 7 : i32
    %c8_i32_91 = arith.constant 8 : i32
    %309 = arith.muli %c7_i32, %c8_i32_91 : i32
    %310 = tpu.assume_multiple %309, 8 : i32
    %311 = arith.index_cast %310 : i32 to index
    %c0_92 = arith.constant 0 : index
    %312 = vector.load %arg16[%311, %c0_92] : memref<96x128xf32, #tpu.memory_space<vmem>>, vector<8x128xf32>
    %c0_93 = arith.constant 0 : index
    %c0_94 = arith.constant 0 : index
    %313 = vector.load %arg4[%c0_93, %c0_94] : memref<32x128xf32, #tpu.memory_space<vmem>>, vector<32x128xf32>
    %cst_95 = arith.constant dense<0.000000e+00> : vector<8x128xf32>
    %314 = tpu.matmul %287, %313, %cst_95 {dimension_numbers = #tpu.dot_dimension_numbers<[1], [0], [0], [1], [0, 0, 1, 1], [], []>} : vector<8x32xf32>, vector<32x128xf32>, vector<8x128xf32> -> vector<8x128xf32>
    %315 = arith.addf %312, %314 : vector<8x128xf32>
    %316 = arith.negf %315 : vector<8x128xf32>
    %317 = math.exp %316 : vector<8x128xf32>
    %cst_96 = arith.constant 1.000000e+00 : f32
    %318 = vector.broadcast %cst_96 : f32 to vector<8x128xf32>
    %319 = arith.addf %318, %317 : vector<8x128xf32>
    %320 = arith.divf %318, %319 : vector<8x128xf32>
    %321 = math.tanh %315 : vector<8x128xf32>
    %322 = vector.extract_strided_slice %320 {offsets = [0, 0], sizes = [8, 32], strides = [1, 1]} : vector<8x128xf32> to vector<8x32xf32>
    %323 = vector.extract_strided_slice %320 {offsets = [0, 32], sizes = [8, 32], strides = [1, 1]} : vector<8x128xf32> to vector<8x32xf32>
    %324 = vector.extract_strided_slice %321 {offsets = [0, 64], sizes = [8, 32], strides = [1, 1]} : vector<8x128xf32> to vector<8x32xf32>
    %325 = vector.extract_strided_slice %320 {offsets = [0, 96], sizes = [8, 32], strides = [1, 1]} : vector<8x128xf32> to vector<8x32xf32>
    %326 = arith.mulf %323, %285 : vector<8x32xf32>
    %327 = arith.mulf %322, %324 : vector<8x32xf32>
    %328 = arith.addf %326, %327 : vector<8x32xf32>
    %329 = math.tanh %328 : vector<8x32xf32>
    %330 = arith.mulf %325, %329 : vector<8x32xf32>
    %331 = tpu.concatenate %330, %308 in 1 : vector<8x32xf32>, vector<8x32xf32> -> vector<8x64xf32>
    %c0_97 = arith.constant 0 : index
    %c0_98 = arith.constant 0 : index
    %332 = vector.load %arg6[%c0_97, %c0_98] : memref<64x128xf32, #tpu.memory_space<vmem>>, vector<64x128xf32>
    %cst_99 = arith.constant dense<0.000000e+00> : vector<8x128xf32>
    %333 = tpu.matmul %331, %332, %cst_99 {dimension_numbers = #tpu.dot_dimension_numbers<[1], [0], [0], [1], [0, 0, 1, 1], [], []>} : vector<8x64xf32>, vector<64x128xf32>, vector<8x128xf32> -> vector<8x128xf32>
    %c0_100 = arith.constant 0 : index
    %c0_101 = arith.constant 0 : index
    %334 = vector.load %arg7[%c0_100, %c0_101] : memref<1x128xf32, #tpu.memory_space<vmem>>, vector<1x128xf32>
    %335 = vector.broadcast %334 : vector<1x128xf32> to vector<8x128xf32>
    %336 = arith.addf %333, %335 : vector<8x128xf32>
    %337 = arith.negf %336 : vector<8x128xf32>
    %338 = math.exp %337 : vector<8x128xf32>
    %cst_102 = arith.constant 1.000000e+00 : f32
    %339 = vector.broadcast %cst_102 : f32 to vector<8x128xf32>
    %340 = arith.addf %339, %338 : vector<8x128xf32>
    %341 = arith.divf %339, %340 : vector<8x128xf32>
    %342 = math.tanh %336 : vector<8x128xf32>
    %343 = vector.extract_strided_slice %341 {offsets = [0, 0], sizes = [8, 32], strides = [1, 1]} : vector<8x128xf32> to vector<8x32xf32>
    %344 = vector.extract_strided_slice %341 {offsets = [0, 32], sizes = [8, 32], strides = [1, 1]} : vector<8x128xf32> to vector<8x32xf32>
    %345 = vector.extract_strided_slice %342 {offsets = [0, 64], sizes = [8, 32], strides = [1, 1]} : vector<8x128xf32> to vector<8x32xf32>
    %346 = vector.extract_strided_slice %341 {offsets = [0, 96], sizes = [8, 32], strides = [1, 1]} : vector<8x128xf32> to vector<8x32xf32>
    %347 = arith.mulf %344, %306 : vector<8x32xf32>
    %348 = arith.mulf %343, %345 : vector<8x32xf32>
    %349 = arith.addf %347, %348 : vector<8x32xf32>
    %350 = math.tanh %349 : vector<8x32xf32>
    %351 = arith.mulf %346, %350 : vector<8x32xf32>
    %c8_i32_103 = arith.constant 8 : i32
    %c8_i32_104 = arith.constant 8 : i32
    %352 = arith.muli %c8_i32_103, %c8_i32_104 : i32
    %353 = tpu.assume_multiple %352, 8 : i32
    %354 = arith.index_cast %353 : i32 to index
    %c0_105 = arith.constant 0 : index
    %355 = vector.load %arg16[%354, %c0_105] : memref<96x128xf32, #tpu.memory_space<vmem>>, vector<8x128xf32>
    %c0_106 = arith.constant 0 : index
    %c0_107 = arith.constant 0 : index
    %356 = vector.load %arg4[%c0_106, %c0_107] : memref<32x128xf32, #tpu.memory_space<vmem>>, vector<32x128xf32>
    %cst_108 = arith.constant dense<0.000000e+00> : vector<8x128xf32>
    %357 = tpu.matmul %330, %356, %cst_108 {dimension_numbers = #tpu.dot_dimension_numbers<[1], [0], [0], [1], [0, 0, 1, 1], [], []>} : vector<8x32xf32>, vector<32x128xf32>, vector<8x128xf32> -> vector<8x128xf32>
    %358 = arith.addf %355, %357 : vector<8x128xf32>
    %359 = arith.negf %358 : vector<8x128xf32>
    %360 = math.exp %359 : vector<8x128xf32>
    %cst_109 = arith.constant 1.000000e+00 : f32
    %361 = vector.broadcast %cst_109 : f32 to vector<8x128xf32>
    %362 = arith.addf %361, %360 : vector<8x128xf32>
    %363 = arith.divf %361, %362 : vector<8x128xf32>
    %364 = math.tanh %358 : vector<8x128xf32>
    %365 = vector.extract_strided_slice %363 {offsets = [0, 0], sizes = [8, 32], strides = [1, 1]} : vector<8x128xf32> to vector<8x32xf32>
    %366 = vector.extract_strided_slice %363 {offsets = [0, 32], sizes = [8, 32], strides = [1, 1]} : vector<8x128xf32> to vector<8x32xf32>
    %367 = vector.extract_strided_slice %364 {offsets = [0, 64], sizes = [8, 32], strides = [1, 1]} : vector<8x128xf32> to vector<8x32xf32>
    %368 = vector.extract_strided_slice %363 {offsets = [0, 96], sizes = [8, 32], strides = [1, 1]} : vector<8x128xf32> to vector<8x32xf32>
    %369 = arith.mulf %366, %328 : vector<8x32xf32>
    %370 = arith.mulf %365, %367 : vector<8x32xf32>
    %371 = arith.addf %369, %370 : vector<8x32xf32>
    %372 = math.tanh %371 : vector<8x32xf32>
    %373 = arith.mulf %368, %372 : vector<8x32xf32>
    %374 = tpu.concatenate %373, %351 in 1 : vector<8x32xf32>, vector<8x32xf32> -> vector<8x64xf32>
    %c0_110 = arith.constant 0 : index
    %c0_111 = arith.constant 0 : index
    %375 = vector.load %arg6[%c0_110, %c0_111] : memref<64x128xf32, #tpu.memory_space<vmem>>, vector<64x128xf32>
    %cst_112 = arith.constant dense<0.000000e+00> : vector<8x128xf32>
    %376 = tpu.matmul %374, %375, %cst_112 {dimension_numbers = #tpu.dot_dimension_numbers<[1], [0], [0], [1], [0, 0, 1, 1], [], []>} : vector<8x64xf32>, vector<64x128xf32>, vector<8x128xf32> -> vector<8x128xf32>
    %c0_113 = arith.constant 0 : index
    %c0_114 = arith.constant 0 : index
    %377 = vector.load %arg7[%c0_113, %c0_114] : memref<1x128xf32, #tpu.memory_space<vmem>>, vector<1x128xf32>
    %378 = vector.broadcast %377 : vector<1x128xf32> to vector<8x128xf32>
    %379 = arith.addf %376, %378 : vector<8x128xf32>
    %380 = arith.negf %379 : vector<8x128xf32>
    %381 = math.exp %380 : vector<8x128xf32>
    %cst_115 = arith.constant 1.000000e+00 : f32
    %382 = vector.broadcast %cst_115 : f32 to vector<8x128xf32>
    %383 = arith.addf %382, %381 : vector<8x128xf32>
    %384 = arith.divf %382, %383 : vector<8x128xf32>
    %385 = math.tanh %379 : vector<8x128xf32>
    %386 = vector.extract_strided_slice %384 {offsets = [0, 0], sizes = [8, 32], strides = [1, 1]} : vector<8x128xf32> to vector<8x32xf32>
    %387 = vector.extract_strided_slice %384 {offsets = [0, 32], sizes = [8, 32], strides = [1, 1]} : vector<8x128xf32> to vector<8x32xf32>
    %388 = vector.extract_strided_slice %385 {offsets = [0, 64], sizes = [8, 32], strides = [1, 1]} : vector<8x128xf32> to vector<8x32xf32>
    %389 = vector.extract_strided_slice %384 {offsets = [0, 96], sizes = [8, 32], strides = [1, 1]} : vector<8x128xf32> to vector<8x32xf32>
    %390 = arith.mulf %387, %349 : vector<8x32xf32>
    %391 = arith.mulf %386, %388 : vector<8x32xf32>
    %392 = arith.addf %390, %391 : vector<8x32xf32>
    %393 = math.tanh %392 : vector<8x32xf32>
    %394 = arith.mulf %389, %393 : vector<8x32xf32>
    %c9_i32 = arith.constant 9 : i32
    %c8_i32_116 = arith.constant 8 : i32
    %395 = arith.muli %c9_i32, %c8_i32_116 : i32
    %396 = tpu.assume_multiple %395, 8 : i32
    %397 = arith.index_cast %396 : i32 to index
    %c0_117 = arith.constant 0 : index
    %398 = vector.load %arg16[%397, %c0_117] : memref<96x128xf32, #tpu.memory_space<vmem>>, vector<8x128xf32>
    %c0_118 = arith.constant 0 : index
    %c0_119 = arith.constant 0 : index
    %399 = vector.load %arg4[%c0_118, %c0_119] : memref<32x128xf32, #tpu.memory_space<vmem>>, vector<32x128xf32>
    %cst_120 = arith.constant dense<0.000000e+00> : vector<8x128xf32>
    %400 = tpu.matmul %373, %399, %cst_120 {dimension_numbers = #tpu.dot_dimension_numbers<[1], [0], [0], [1], [0, 0, 1, 1], [], []>} : vector<8x32xf32>, vector<32x128xf32>, vector<8x128xf32> -> vector<8x128xf32>
    %401 = arith.addf %398, %400 : vector<8x128xf32>
    %402 = arith.negf %401 : vector<8x128xf32>
    %403 = math.exp %402 : vector<8x128xf32>
    %cst_121 = arith.constant 1.000000e+00 : f32
    %404 = vector.broadcast %cst_121 : f32 to vector<8x128xf32>
    %405 = arith.addf %404, %403 : vector<8x128xf32>
    %406 = arith.divf %404, %405 : vector<8x128xf32>
    %407 = math.tanh %401 : vector<8x128xf32>
    %408 = vector.extract_strided_slice %406 {offsets = [0, 0], sizes = [8, 32], strides = [1, 1]} : vector<8x128xf32> to vector<8x32xf32>
    %409 = vector.extract_strided_slice %406 {offsets = [0, 32], sizes = [8, 32], strides = [1, 1]} : vector<8x128xf32> to vector<8x32xf32>
    %410 = vector.extract_strided_slice %407 {offsets = [0, 64], sizes = [8, 32], strides = [1, 1]} : vector<8x128xf32> to vector<8x32xf32>
    %411 = vector.extract_strided_slice %406 {offsets = [0, 96], sizes = [8, 32], strides = [1, 1]} : vector<8x128xf32> to vector<8x32xf32>
    %412 = arith.mulf %409, %371 : vector<8x32xf32>
    %413 = arith.mulf %408, %410 : vector<8x32xf32>
    %414 = arith.addf %412, %413 : vector<8x32xf32>
    %415 = math.tanh %414 : vector<8x32xf32>
    %416 = arith.mulf %411, %415 : vector<8x32xf32>
    %417 = tpu.concatenate %416, %394 in 1 : vector<8x32xf32>, vector<8x32xf32> -> vector<8x64xf32>
    %c0_122 = arith.constant 0 : index
    %c0_123 = arith.constant 0 : index
    %418 = vector.load %arg6[%c0_122, %c0_123] : memref<64x128xf32, #tpu.memory_space<vmem>>, vector<64x128xf32>
    %cst_124 = arith.constant dense<0.000000e+00> : vector<8x128xf32>
    %419 = tpu.matmul %417, %418, %cst_124 {dimension_numbers = #tpu.dot_dimension_numbers<[1], [0], [0], [1], [0, 0, 1, 1], [], []>} : vector<8x64xf32>, vector<64x128xf32>, vector<8x128xf32> -> vector<8x128xf32>
    %c0_125 = arith.constant 0 : index
    %c0_126 = arith.constant 0 : index
    %420 = vector.load %arg7[%c0_125, %c0_126] : memref<1x128xf32, #tpu.memory_space<vmem>>, vector<1x128xf32>
    %421 = vector.broadcast %420 : vector<1x128xf32> to vector<8x128xf32>
    %422 = arith.addf %419, %421 : vector<8x128xf32>
    %423 = arith.negf %422 : vector<8x128xf32>
    %424 = math.exp %423 : vector<8x128xf32>
    %cst_127 = arith.constant 1.000000e+00 : f32
    %425 = vector.broadcast %cst_127 : f32 to vector<8x128xf32>
    %426 = arith.addf %425, %424 : vector<8x128xf32>
    %427 = arith.divf %425, %426 : vector<8x128xf32>
    %428 = math.tanh %422 : vector<8x128xf32>
    %429 = vector.extract_strided_slice %427 {offsets = [0, 0], sizes = [8, 32], strides = [1, 1]} : vector<8x128xf32> to vector<8x32xf32>
    %430 = vector.extract_strided_slice %427 {offsets = [0, 32], sizes = [8, 32], strides = [1, 1]} : vector<8x128xf32> to vector<8x32xf32>
    %431 = vector.extract_strided_slice %428 {offsets = [0, 64], sizes = [8, 32], strides = [1, 1]} : vector<8x128xf32> to vector<8x32xf32>
    %432 = vector.extract_strided_slice %427 {offsets = [0, 96], sizes = [8, 32], strides = [1, 1]} : vector<8x128xf32> to vector<8x32xf32>
    %433 = arith.mulf %430, %392 : vector<8x32xf32>
    %434 = arith.mulf %429, %431 : vector<8x32xf32>
    %435 = arith.addf %433, %434 : vector<8x32xf32>
    %436 = math.tanh %435 : vector<8x32xf32>
    %437 = arith.mulf %432, %436 : vector<8x32xf32>
    %c10_i32 = arith.constant 10 : i32
    %c8_i32_128 = arith.constant 8 : i32
    %438 = arith.muli %c10_i32, %c8_i32_128 : i32
    %439 = tpu.assume_multiple %438, 8 : i32
    %440 = arith.index_cast %439 : i32 to index
    %c0_129 = arith.constant 0 : index
    %441 = vector.load %arg16[%440, %c0_129] : memref<96x128xf32, #tpu.memory_space<vmem>>, vector<8x128xf32>
    %c0_130 = arith.constant 0 : index
    %c0_131 = arith.constant 0 : index
    %442 = vector.load %arg4[%c0_130, %c0_131] : memref<32x128xf32, #tpu.memory_space<vmem>>, vector<32x128xf32>
    %cst_132 = arith.constant dense<0.000000e+00> : vector<8x128xf32>
    %443 = tpu.matmul %416, %442, %cst_132 {dimension_numbers = #tpu.dot_dimension_numbers<[1], [0], [0], [1], [0, 0, 1, 1], [], []>} : vector<8x32xf32>, vector<32x128xf32>, vector<8x128xf32> -> vector<8x128xf32>
    %444 = arith.addf %441, %443 : vector<8x128xf32>
    %445 = arith.negf %444 : vector<8x128xf32>
    %446 = math.exp %445 : vector<8x128xf32>
    %cst_133 = arith.constant 1.000000e+00 : f32
    %447 = vector.broadcast %cst_133 : f32 to vector<8x128xf32>
    %448 = arith.addf %447, %446 : vector<8x128xf32>
    %449 = arith.divf %447, %448 : vector<8x128xf32>
    %450 = math.tanh %444 : vector<8x128xf32>
    %451 = vector.extract_strided_slice %449 {offsets = [0, 0], sizes = [8, 32], strides = [1, 1]} : vector<8x128xf32> to vector<8x32xf32>
    %452 = vector.extract_strided_slice %449 {offsets = [0, 32], sizes = [8, 32], strides = [1, 1]} : vector<8x128xf32> to vector<8x32xf32>
    %453 = vector.extract_strided_slice %450 {offsets = [0, 64], sizes = [8, 32], strides = [1, 1]} : vector<8x128xf32> to vector<8x32xf32>
    %454 = vector.extract_strided_slice %449 {offsets = [0, 96], sizes = [8, 32], strides = [1, 1]} : vector<8x128xf32> to vector<8x32xf32>
    %455 = arith.mulf %452, %414 : vector<8x32xf32>
    %456 = arith.mulf %451, %453 : vector<8x32xf32>
    %457 = arith.addf %455, %456 : vector<8x32xf32>
    %458 = math.tanh %457 : vector<8x32xf32>
    %459 = arith.mulf %454, %458 : vector<8x32xf32>
    %460 = tpu.concatenate %459, %437 in 1 : vector<8x32xf32>, vector<8x32xf32> -> vector<8x64xf32>
    %c0_134 = arith.constant 0 : index
    %c0_135 = arith.constant 0 : index
    %461 = vector.load %arg6[%c0_134, %c0_135] : memref<64x128xf32, #tpu.memory_space<vmem>>, vector<64x128xf32>
    %cst_136 = arith.constant dense<0.000000e+00> : vector<8x128xf32>
    %462 = tpu.matmul %460, %461, %cst_136 {dimension_numbers = #tpu.dot_dimension_numbers<[1], [0], [0], [1], [0, 0, 1, 1], [], []>} : vector<8x64xf32>, vector<64x128xf32>, vector<8x128xf32> -> vector<8x128xf32>
    %c0_137 = arith.constant 0 : index
    %c0_138 = arith.constant 0 : index
    %463 = vector.load %arg7[%c0_137, %c0_138] : memref<1x128xf32, #tpu.memory_space<vmem>>, vector<1x128xf32>
    %464 = vector.broadcast %463 : vector<1x128xf32> to vector<8x128xf32>
    %465 = arith.addf %462, %464 : vector<8x128xf32>
    %466 = arith.negf %465 : vector<8x128xf32>
    %467 = math.exp %466 : vector<8x128xf32>
    %cst_139 = arith.constant 1.000000e+00 : f32
    %468 = vector.broadcast %cst_139 : f32 to vector<8x128xf32>
    %469 = arith.addf %468, %467 : vector<8x128xf32>
    %470 = arith.divf %468, %469 : vector<8x128xf32>
    %471 = math.tanh %465 : vector<8x128xf32>
    %472 = vector.extract_strided_slice %470 {offsets = [0, 0], sizes = [8, 32], strides = [1, 1]} : vector<8x128xf32> to vector<8x32xf32>
    %473 = vector.extract_strided_slice %470 {offsets = [0, 32], sizes = [8, 32], strides = [1, 1]} : vector<8x128xf32> to vector<8x32xf32>
    %474 = vector.extract_strided_slice %471 {offsets = [0, 64], sizes = [8, 32], strides = [1, 1]} : vector<8x128xf32> to vector<8x32xf32>
    %475 = vector.extract_strided_slice %470 {offsets = [0, 96], sizes = [8, 32], strides = [1, 1]} : vector<8x128xf32> to vector<8x32xf32>
    %476 = arith.mulf %473, %435 : vector<8x32xf32>
    %477 = arith.mulf %472, %474 : vector<8x32xf32>
    %478 = arith.addf %476, %477 : vector<8x32xf32>
    %479 = math.tanh %478 : vector<8x32xf32>
    %480 = arith.mulf %475, %479 : vector<8x32xf32>
    %c11_i32 = arith.constant 11 : i32
    %c8_i32_140 = arith.constant 8 : i32
    %481 = arith.muli %c11_i32, %c8_i32_140 : i32
    %482 = tpu.assume_multiple %481, 8 : i32
    %483 = arith.index_cast %482 : i32 to index
    %c0_141 = arith.constant 0 : index
    %484 = vector.load %arg16[%483, %c0_141] : memref<96x128xf32, #tpu.memory_space<vmem>>, vector<8x128xf32>
    %c0_142 = arith.constant 0 : index
    %c0_143 = arith.constant 0 : index
    %485 = vector.load %arg4[%c0_142, %c0_143] : memref<32x128xf32, #tpu.memory_space<vmem>>, vector<32x128xf32>
    %cst_144 = arith.constant dense<0.000000e+00> : vector<8x128xf32>
    %486 = tpu.matmul %459, %485, %cst_144 {dimension_numbers = #tpu.dot_dimension_numbers<[1], [0], [0], [1], [0, 0, 1, 1], [], []>} : vector<8x32xf32>, vector<32x128xf32>, vector<8x128xf32> -> vector<8x128xf32>
    %487 = arith.addf %484, %486 : vector<8x128xf32>
    %488 = arith.negf %487 : vector<8x128xf32>
    %489 = math.exp %488 : vector<8x128xf32>
    %cst_145 = arith.constant 1.000000e+00 : f32
    %490 = vector.broadcast %cst_145 : f32 to vector<8x128xf32>
    %491 = arith.addf %490, %489 : vector<8x128xf32>
    %492 = arith.divf %490, %491 : vector<8x128xf32>
    %493 = math.tanh %487 : vector<8x128xf32>
    %494 = vector.extract_strided_slice %492 {offsets = [0, 0], sizes = [8, 32], strides = [1, 1]} : vector<8x128xf32> to vector<8x32xf32>
    %495 = vector.extract_strided_slice %492 {offsets = [0, 32], sizes = [8, 32], strides = [1, 1]} : vector<8x128xf32> to vector<8x32xf32>
    %496 = vector.extract_strided_slice %493 {offsets = [0, 64], sizes = [8, 32], strides = [1, 1]} : vector<8x128xf32> to vector<8x32xf32>
    %497 = vector.extract_strided_slice %492 {offsets = [0, 96], sizes = [8, 32], strides = [1, 1]} : vector<8x128xf32> to vector<8x32xf32>
    %498 = arith.mulf %495, %457 : vector<8x32xf32>
    %499 = arith.mulf %494, %496 : vector<8x32xf32>
    %500 = arith.addf %498, %499 : vector<8x32xf32>
    %501 = math.tanh %500 : vector<8x32xf32>
    %502 = arith.mulf %497, %501 : vector<8x32xf32>
    %503 = tpu.concatenate %502, %480 in 1 : vector<8x32xf32>, vector<8x32xf32> -> vector<8x64xf32>
    %c0_146 = arith.constant 0 : index
    %c0_147 = arith.constant 0 : index
    %504 = vector.load %arg6[%c0_146, %c0_147] : memref<64x128xf32, #tpu.memory_space<vmem>>, vector<64x128xf32>
    %cst_148 = arith.constant dense<0.000000e+00> : vector<8x128xf32>
    %505 = tpu.matmul %503, %504, %cst_148 {dimension_numbers = #tpu.dot_dimension_numbers<[1], [0], [0], [1], [0, 0, 1, 1], [], []>} : vector<8x64xf32>, vector<64x128xf32>, vector<8x128xf32> -> vector<8x128xf32>
    %c0_149 = arith.constant 0 : index
    %c0_150 = arith.constant 0 : index
    %506 = vector.load %arg7[%c0_149, %c0_150] : memref<1x128xf32, #tpu.memory_space<vmem>>, vector<1x128xf32>
    %507 = vector.broadcast %506 : vector<1x128xf32> to vector<8x128xf32>
    %508 = arith.addf %505, %507 : vector<8x128xf32>
    %509 = arith.negf %508 : vector<8x128xf32>
    %510 = math.exp %509 : vector<8x128xf32>
    %cst_151 = arith.constant 1.000000e+00 : f32
    %511 = vector.broadcast %cst_151 : f32 to vector<8x128xf32>
    %512 = arith.addf %511, %510 : vector<8x128xf32>
    %513 = arith.divf %511, %512 : vector<8x128xf32>
    %514 = math.tanh %508 : vector<8x128xf32>
    %515 = vector.extract_strided_slice %513 {offsets = [0, 0], sizes = [8, 32], strides = [1, 1]} : vector<8x128xf32> to vector<8x32xf32>
    %516 = vector.extract_strided_slice %513 {offsets = [0, 32], sizes = [8, 32], strides = [1, 1]} : vector<8x128xf32> to vector<8x32xf32>
    %517 = vector.extract_strided_slice %514 {offsets = [0, 64], sizes = [8, 32], strides = [1, 1]} : vector<8x128xf32> to vector<8x32xf32>
    %518 = vector.extract_strided_slice %513 {offsets = [0, 96], sizes = [8, 32], strides = [1, 1]} : vector<8x128xf32> to vector<8x32xf32>
    %519 = arith.mulf %516, %478 : vector<8x32xf32>
    %520 = arith.mulf %515, %517 : vector<8x32xf32>
    %521 = arith.addf %519, %520 : vector<8x32xf32>
    %522 = math.tanh %521 : vector<8x32xf32>
    %523 = arith.mulf %518, %522 : vector<8x32xf32>
    %c12_i32 = arith.constant 12 : i32
    %524 = tpu.iota {dimensions = array<i32: 1>} : vector<8x128xi32>
    %525 = arith.sitofp %524 : vector<8x128xi32> to vector<8x128xf32>
    %c1_i32_152 = arith.constant 1 : i32
    %526 = vector.broadcast %c1_i32_152 : i32 to vector<8x128xi32>
    %527 = arith.cmpi eq, %524, %526 : vector<8x128xi32>
    %528 = arith.extui %527 : vector<8x128xi1> to vector<8x128xi32>
    %529 = arith.sitofp %528 : vector<8x128xi32> to vector<8x128xf32>
    %cst_153 = arith.constant 0.000000e+00 : f32
    %cst_154 = arith.constant 0.000000e+00 : f32
    %c0_i32_155 = arith.constant 0 : i32
    %c0_156 = arith.constant 0 : index
    %c0_157 = arith.constant 0 : index
    %530 = vector.load %arg8[%c0_156, %c0_157] : memref<128x128xf32, #tpu.memory_space<vmem>>, vector<128x128xf32>
    %cst_158 = arith.constant dense<0.000000e+00> : vector<8x128xf32>
    %531 = tpu.matmul %529, %530, %cst_158 {dimension_numbers = #tpu.dot_dimension_numbers<[1], [0], [0], [1], [0, 0, 1, 1], [], []>} : vector<8x128xf32>, vector<128x128xf32>, vector<8x128xf32> -> vector<8x128xf32>
    %c0_159 = arith.constant 0 : index
    %c0_160 = arith.constant 0 : index
    %532 = vector.load %arg9[%c0_159, %c0_160] : memref<32x128xf32, #tpu.memory_space<vmem>>, vector<32x128xf32>
    %cst_161 = arith.constant dense<0.000000e+00> : vector<8x128xf32>
    %533 = tpu.matmul %502, %532, %cst_161 {dimension_numbers = #tpu.dot_dimension_numbers<[1], [0], [0], [1], [0, 0, 1, 1], [], []>} : vector<8x32xf32>, vector<32x128xf32>, vector<8x128xf32> -> vector<8x128xf32>
    %534 = arith.addf %531, %533 : vector<8x128xf32>
    %c0_162 = arith.constant 0 : index
    %c0_163 = arith.constant 0 : index
    %535 = vector.load %arg10[%c0_162, %c0_163] : memref<1x128xf32, #tpu.memory_space<vmem>>, vector<1x128xf32>
    %536 = vector.broadcast %535 : vector<1x128xf32> to vector<8x128xf32>
    %537 = arith.addf %534, %536 : vector<8x128xf32>
    %538 = arith.negf %537 : vector<8x128xf32>
    %539 = math.exp %538 : vector<8x128xf32>
    %cst_164 = arith.constant 1.000000e+00 : f32
    %540 = vector.broadcast %cst_164 : f32 to vector<8x128xf32>
    %541 = arith.addf %540, %539 : vector<8x128xf32>
    %542 = arith.divf %540, %541 : vector<8x128xf32>
    %543 = math.tanh %537 : vector<8x128xf32>
    %544 = vector.extract_strided_slice %542 {offsets = [0, 0], sizes = [8, 32], strides = [1, 1]} : vector<8x128xf32> to vector<8x32xf32>
    %545 = vector.extract_strided_slice %542 {offsets = [0, 32], sizes = [8, 32], strides = [1, 1]} : vector<8x128xf32> to vector<8x32xf32>
    %546 = vector.extract_strided_slice %543 {offsets = [0, 64], sizes = [8, 32], strides = [1, 1]} : vector<8x128xf32> to vector<8x32xf32>
    %547 = vector.extract_strided_slice %542 {offsets = [0, 96], sizes = [8, 32], strides = [1, 1]} : vector<8x128xf32> to vector<8x32xf32>
    %548 = arith.mulf %545, %500 : vector<8x32xf32>
    %549 = arith.mulf %544, %546 : vector<8x32xf32>
    %550 = arith.addf %548, %549 : vector<8x32xf32>
    %551 = math.tanh %550 : vector<8x32xf32>
    %552 = arith.mulf %547, %551 : vector<8x32xf32>
    %553 = tpu.concatenate %552, %523 in 1 : vector<8x32xf32>, vector<8x32xf32> -> vector<8x64xf32>
    %c0_165 = arith.constant 0 : index
    %c0_166 = arith.constant 0 : index
    %554 = vector.load %arg11[%c0_165, %c0_166] : memref<64x128xf32, #tpu.memory_space<vmem>>, vector<64x128xf32>
    %cst_167 = arith.constant dense<0.000000e+00> : vector<8x128xf32>
    %555 = tpu.matmul %553, %554, %cst_167 {dimension_numbers = #tpu.dot_dimension_numbers<[1], [0], [0], [1], [0, 0, 1, 1], [], []>} : vector<8x64xf32>, vector<64x128xf32>, vector<8x128xf32> -> vector<8x128xf32>
    %c0_168 = arith.constant 0 : index
    %c0_169 = arith.constant 0 : index
    %556 = vector.load %arg12[%c0_168, %c0_169] : memref<1x128xf32, #tpu.memory_space<vmem>>, vector<1x128xf32>
    %557 = vector.broadcast %556 : vector<1x128xf32> to vector<8x128xf32>
    %558 = arith.addf %555, %557 : vector<8x128xf32>
    %559 = arith.negf %558 : vector<8x128xf32>
    %560 = math.exp %559 : vector<8x128xf32>
    %cst_170 = arith.constant 1.000000e+00 : f32
    %561 = vector.broadcast %cst_170 : f32 to vector<8x128xf32>
    %562 = arith.addf %561, %560 : vector<8x128xf32>
    %563 = arith.divf %561, %562 : vector<8x128xf32>
    %564 = math.tanh %558 : vector<8x128xf32>
    %565 = vector.extract_strided_slice %563 {offsets = [0, 0], sizes = [8, 32], strides = [1, 1]} : vector<8x128xf32> to vector<8x32xf32>
    %566 = vector.extract_strided_slice %563 {offsets = [0, 32], sizes = [8, 32], strides = [1, 1]} : vector<8x128xf32> to vector<8x32xf32>
    %567 = vector.extract_strided_slice %564 {offsets = [0, 64], sizes = [8, 32], strides = [1, 1]} : vector<8x128xf32> to vector<8x32xf32>
    %568 = vector.extract_strided_slice %563 {offsets = [0, 96], sizes = [8, 32], strides = [1, 1]} : vector<8x128xf32> to vector<8x32xf32>
    %569 = arith.mulf %566, %521 : vector<8x32xf32>
    %570 = arith.mulf %565, %567 : vector<8x32xf32>
    %571 = arith.addf %569, %570 : vector<8x32xf32>
    %572 = math.tanh %571 : vector<8x32xf32>
    %573 = arith.mulf %568, %572 : vector<8x32xf32>
    %c0_171 = arith.constant 0 : index
    %c0_172 = arith.constant 0 : index
    %574 = vector.load %arg13[%c0_171, %c0_172] : memref<32x128xf32, #tpu.memory_space<vmem>>, vector<32x128xf32>
    %cst_173 = arith.constant dense<0.000000e+00> : vector<8x128xf32>
    %575 = tpu.matmul %573, %574, %cst_173 {dimension_numbers = #tpu.dot_dimension_numbers<[1], [0], [0], [1], [0, 0, 1, 1], [], []>} : vector<8x32xf32>, vector<32x128xf32>, vector<8x128xf32> -> vector<8x128xf32>
    %c0_174 = arith.constant 0 : index
    %c0_175 = arith.constant 0 : index
    %576 = vector.load %arg14[%c0_174, %c0_175] : memref<1x128xf32, #tpu.memory_space<vmem>>, vector<1x128xf32>
    %577 = vector.broadcast %576 : vector<1x128xf32> to vector<8x128xf32>
    %578 = arith.addf %575, %577 : vector<8x128xf32>
    %cst_176 = arith.constant dense<0xFF800000> : vector<8xf32>
    %579 = vector.multi_reduction <maximumf>, %578, %cst_176 [1] : vector<8x128xf32> to vector<8xf32>
    %580 = vector.shape_cast %579 : vector<8xf32> to vector<8x1xf32>
    %581 = vector.broadcast %580 : vector<8x1xf32> to vector<8x128xf32>
    %582 = arith.subf %578, %581 : vector<8x128xf32>
    %583 = math.exp %582 : vector<8x128xf32>
    %cst_177 = arith.constant dense<0.000000e+00> : vector<8xf32>
    %584 = vector.multi_reduction <add>, %583, %cst_177 [1] : vector<8x128xf32> to vector<8xf32>
    %585 = vector.shape_cast %584 : vector<8xf32> to vector<8x1xf32>
    %586 = math.log %585 : vector<8x1xf32>
    %587 = arith.addf %580, %586 : vector<8x1xf32>
    %588 = arith.index_cast %c0_i32_155 : i32 to index
    %c0_178 = arith.constant 0 : index
    %c0_179 = arith.constant 0 : index
    %589 = vector.load %arg2[%588, %c0_178, %c0_179] : memref<10x8x128xf32, #tpu.memory_space<vmem>>, vector<1x8x128xf32>
    %590 = vector.shape_cast %589 : vector<1x8x128xf32> to vector<8x128xf32>
    %cst_180 = arith.constant dense<0.000000e+00> : vector<8xf32>
    %591 = vector.multi_reduction <add>, %590, %cst_180 [1] : vector<8x128xf32> to vector<8xf32>
    %592 = vector.shape_cast %591 : vector<8xf32> to vector<8x1xf32>
    %593 = arith.mulf %578, %590 : vector<8x128xf32>
    %cst_181 = arith.constant dense<0.000000e+00> : vector<8xf32>
    %594 = vector.multi_reduction <add>, %593, %cst_181 [1] : vector<8x128xf32> to vector<8xf32>
    %595 = vector.shape_cast %594 : vector<8xf32> to vector<8x1xf32>
    %596 = arith.mulf %592, %587 : vector<8x1xf32>
    %597 = arith.subf %596, %595 : vector<8x1xf32>
    %598 = vector.shape_cast %597 : vector<8x1xf32> to vector<1x8x1xf32>
    %cst_182 = arith.constant dense<0.000000e+00> : vector<1xf32>
    %599 = vector.multi_reduction <add>, %598, %cst_182 [1, 2] : vector<1x8x1xf32> to vector<1xf32>
    %600 = vector.shape_cast %599 : vector<1xf32> to vector<1x1x1xf32>
    %601 = vector.extract %600[0, 0, 0] : f32 from vector<1x1x1xf32>
    %602 = arith.addf %cst_153, %601 : f32
    %603 = vector.shape_cast %592 : vector<8x1xf32> to vector<1x8x1xf32>
    %cst_183 = arith.constant dense<0.000000e+00> : vector<1xf32>
    %604 = vector.multi_reduction <add>, %603, %cst_183 [1, 2] : vector<1x8x1xf32> to vector<1xf32>
    %605 = vector.shape_cast %604 : vector<1xf32> to vector<1x1x1xf32>
    %606 = vector.extract %605[0, 0, 0] : f32 from vector<1x1x1xf32>
    %607 = arith.addf %cst_154, %606 : f32
    %608 = vector.broadcast %580 : vector<8x1xf32> to vector<8x128xf32>
    %609 = arith.cmpf oeq, %578, %608 : vector<8x128xf32>
    %cst_184 = arith.constant 0.000000e+00 : f32
    %610 = vector.broadcast %cst_184 : f32 to vector<8x128xf32>
    %611 = arith.subf %610, %525 : vector<8x128xf32>
    %cst_185 = arith.constant -1.280000e+02 : f32
    %612 = vector.broadcast %cst_185 : f32 to vector<8x128xf32>
    %613 = arith.select %609, %611, %612 : vector<8x128xi1>, vector<8x128xf32>
    %cst_186 = arith.constant dense<0xFF800000> : vector<8xf32>
    %614 = vector.multi_reduction <maximumf>, %613, %cst_186 [1] : vector<8x128xf32> to vector<8xf32>
    %615 = vector.shape_cast %614 : vector<8xf32> to vector<8x1xf32>
    %cst_187 = arith.constant 0.000000e+00 : f32
    %616 = vector.broadcast %cst_187 : f32 to vector<8x1xf32>
    %617 = arith.subf %616, %615 : vector<8x1xf32>
    %618 = vector.broadcast %617 : vector<8x1xf32> to vector<8x128xf32>
    %619 = arith.cmpf oeq, %525, %618 : vector<8x128xf32>
    %620 = arith.extui %619 : vector<8x128xi1> to vector<8x128xi32>
    %621 = arith.sitofp %620 : vector<8x128xi32> to vector<8x128xf32>
    %622 = arith.index_cast %c0_i32_155 : i32 to index
    %623 = memref.load %arg0[%622] : memref<10xi32, #tpu.memory_space<smem>>
    %c0_i32_188 = arith.constant 0 : i32
    %624 = arith.cmpi sgt, %623, %c0_i32_188 : i32
    %625 = arith.select %624, %590, %621 : vector<8x128xf32>
    %c1_i32_189 = arith.constant 1 : i32
    %c0_190 = arith.constant 0 : index
    %c0_191 = arith.constant 0 : index
    %626 = vector.load %arg8[%c0_190, %c0_191] : memref<128x128xf32, #tpu.memory_space<vmem>>, vector<128x128xf32>
    %cst_192 = arith.constant dense<0.000000e+00> : vector<8x128xf32>
    %627 = tpu.matmul %625, %626, %cst_192 {dimension_numbers = #tpu.dot_dimension_numbers<[1], [0], [0], [1], [0, 0, 1, 1], [], []>} : vector<8x128xf32>, vector<128x128xf32>, vector<8x128xf32> -> vector<8x128xf32>
    %c0_193 = arith.constant 0 : index
    %c0_194 = arith.constant 0 : index
    %628 = vector.load %arg9[%c0_193, %c0_194] : memref<32x128xf32, #tpu.memory_space<vmem>>, vector<32x128xf32>
    %cst_195 = arith.constant dense<0.000000e+00> : vector<8x128xf32>
    %629 = tpu.matmul %552, %628, %cst_195 {dimension_numbers = #tpu.dot_dimension_numbers<[1], [0], [0], [1], [0, 0, 1, 1], [], []>} : vector<8x32xf32>, vector<32x128xf32>, vector<8x128xf32> -> vector<8x128xf32>
    %630 = arith.addf %627, %629 : vector<8x128xf32>
    %c0_196 = arith.constant 0 : index
    %c0_197 = arith.constant 0 : index
    %631 = vector.load %arg10[%c0_196, %c0_197] : memref<1x128xf32, #tpu.memory_space<vmem>>, vector<1x128xf32>
    %632 = vector.broadcast %631 : vector<1x128xf32> to vector<8x128xf32>
    %633 = arith.addf %630, %632 : vector<8x128xf32>
    %634 = arith.negf %633 : vector<8x128xf32>
    %635 = math.exp %634 : vector<8x128xf32>
    %cst_198 = arith.constant 1.000000e+00 : f32
    %636 = vector.broadcast %cst_198 : f32 to vector<8x128xf32>
    %637 = arith.addf %636, %635 : vector<8x128xf32>
    %638 = arith.divf %636, %637 : vector<8x128xf32>
    %639 = math.tanh %633 : vector<8x128xf32>
    %640 = vector.extract_strided_slice %638 {offsets = [0, 0], sizes = [8, 32], strides = [1, 1]} : vector<8x128xf32> to vector<8x32xf32>
    %641 = vector.extract_strided_slice %638 {offsets = [0, 32], sizes = [8, 32], strides = [1, 1]} : vector<8x128xf32> to vector<8x32xf32>
    %642 = vector.extract_strided_slice %639 {offsets = [0, 64], sizes = [8, 32], strides = [1, 1]} : vector<8x128xf32> to vector<8x32xf32>
    %643 = vector.extract_strided_slice %638 {offsets = [0, 96], sizes = [8, 32], strides = [1, 1]} : vector<8x128xf32> to vector<8x32xf32>
    %644 = arith.mulf %641, %550 : vector<8x32xf32>
    %645 = arith.mulf %640, %642 : vector<8x32xf32>
    %646 = arith.addf %644, %645 : vector<8x32xf32>
    %647 = math.tanh %646 : vector<8x32xf32>
    %648 = arith.mulf %643, %647 : vector<8x32xf32>
    %649 = tpu.concatenate %648, %573 in 1 : vector<8x32xf32>, vector<8x32xf32> -> vector<8x64xf32>
    %c0_199 = arith.constant 0 : index
    %c0_200 = arith.constant 0 : index
    %650 = vector.load %arg11[%c0_199, %c0_200] : memref<64x128xf32, #tpu.memory_space<vmem>>, vector<64x128xf32>
    %cst_201 = arith.constant dense<0.000000e+00> : vector<8x128xf32>
    %651 = tpu.matmul %649, %650, %cst_201 {dimension_numbers = #tpu.dot_dimension_numbers<[1], [0], [0], [1], [0, 0, 1, 1], [], []>} : vector<8x64xf32>, vector<64x128xf32>, vector<8x128xf32> -> vector<8x128xf32>
    %c0_202 = arith.constant 0 : index
    %c0_203 = arith.constant 0 : index
    %652 = vector.load %arg12[%c0_202, %c0_203] : memref<1x128xf32, #tpu.memory_space<vmem>>, vector<1x128xf32>
    %653 = vector.broadcast %652 : vector<1x128xf32> to vector<8x128xf32>
    %654 = arith.addf %651, %653 : vector<8x128xf32>
    %655 = arith.negf %654 : vector<8x128xf32>
    %656 = math.exp %655 : vector<8x128xf32>
    %cst_204 = arith.constant 1.000000e+00 : f32
    %657 = vector.broadcast %cst_204 : f32 to vector<8x128xf32>
    %658 = arith.addf %657, %656 : vector<8x128xf32>
    %659 = arith.divf %657, %658 : vector<8x128xf32>
    %660 = math.tanh %654 : vector<8x128xf32>
    %661 = vector.extract_strided_slice %659 {offsets = [0, 0], sizes = [8, 32], strides = [1, 1]} : vector<8x128xf32> to vector<8x32xf32>
    %662 = vector.extract_strided_slice %659 {offsets = [0, 32], sizes = [8, 32], strides = [1, 1]} : vector<8x128xf32> to vector<8x32xf32>
    %663 = vector.extract_strided_slice %660 {offsets = [0, 64], sizes = [8, 32], strides = [1, 1]} : vector<8x128xf32> to vector<8x32xf32>
    %664 = vector.extract_strided_slice %659 {offsets = [0, 96], sizes = [8, 32], strides = [1, 1]} : vector<8x128xf32> to vector<8x32xf32>
    %665 = arith.mulf %662, %571 : vector<8x32xf32>
    %666 = arith.mulf %661, %663 : vector<8x32xf32>
    %667 = arith.addf %665, %666 : vector<8x32xf32>
    %668 = math.tanh %667 : vector<8x32xf32>
    %669 = arith.mulf %664, %668 : vector<8x32xf32>
    %c0_205 = arith.constant 0 : index
    %c0_206 = arith.constant 0 : index
    %670 = vector.load %arg13[%c0_205, %c0_206] : memref<32x128xf32, #tpu.memory_space<vmem>>, vector<32x128xf32>
    %cst_207 = arith.constant dense<0.000000e+00> : vector<8x128xf32>
    %671 = tpu.matmul %669, %670, %cst_207 {dimension_numbers = #tpu.dot_dimension_numbers<[1], [0], [0], [1], [0, 0, 1, 1], [], []>} : vector<8x32xf32>, vector<32x128xf32>, vector<8x128xf32> -> vector<8x128xf32>
    %c0_208 = arith.constant 0 : index
    %c0_209 = arith.constant 0 : index
    %672 = vector.load %arg14[%c0_208, %c0_209] : memref<1x128xf32, #tpu.memory_space<vmem>>, vector<1x128xf32>
    %673 = vector.broadcast %672 : vector<1x128xf32> to vector<8x128xf32>
    %674 = arith.addf %671, %673 : vector<8x128xf32>
    %cst_210 = arith.constant dense<0xFF800000> : vector<8xf32>
    %675 = vector.multi_reduction <maximumf>, %674, %cst_210 [1] : vector<8x128xf32> to vector<8xf32>
    %676 = vector.shape_cast %675 : vector<8xf32> to vector<8x1xf32>
    %677 = vector.broadcast %676 : vector<8x1xf32> to vector<8x128xf32>
    %678 = arith.subf %674, %677 : vector<8x128xf32>
    %679 = math.exp %678 : vector<8x128xf32>
    %cst_211 = arith.constant dense<0.000000e+00> : vector<8xf32>
    %680 = vector.multi_reduction <add>, %679, %cst_211 [1] : vector<8x128xf32> to vector<8xf32>
    %681 = vector.shape_cast %680 : vector<8xf32> to vector<8x1xf32>
    %682 = math.log %681 : vector<8x1xf32>
    %683 = arith.addf %676, %682 : vector<8x1xf32>
    %684 = arith.index_cast %c1_i32_189 : i32 to index
    %c0_212 = arith.constant 0 : index
    %c0_213 = arith.constant 0 : index
    %685 = vector.load %arg2[%684, %c0_212, %c0_213] : memref<10x8x128xf32, #tpu.memory_space<vmem>>, vector<1x8x128xf32>
    %686 = vector.shape_cast %685 : vector<1x8x128xf32> to vector<8x128xf32>
    %cst_214 = arith.constant dense<0.000000e+00> : vector<8xf32>
    %687 = vector.multi_reduction <add>, %686, %cst_214 [1] : vector<8x128xf32> to vector<8xf32>
    %688 = vector.shape_cast %687 : vector<8xf32> to vector<8x1xf32>
    %689 = arith.mulf %674, %686 : vector<8x128xf32>
    %cst_215 = arith.constant dense<0.000000e+00> : vector<8xf32>
    %690 = vector.multi_reduction <add>, %689, %cst_215 [1] : vector<8x128xf32> to vector<8xf32>
    %691 = vector.shape_cast %690 : vector<8xf32> to vector<8x1xf32>
    %692 = arith.mulf %688, %683 : vector<8x1xf32>
    %693 = arith.subf %692, %691 : vector<8x1xf32>
    %694 = vector.shape_cast %693 : vector<8x1xf32> to vector<1x8x1xf32>
    %cst_216 = arith.constant dense<0.000000e+00> : vector<1xf32>
    %695 = vector.multi_reduction <add>, %694, %cst_216 [1, 2] : vector<1x8x1xf32> to vector<1xf32>
    %696 = vector.shape_cast %695 : vector<1xf32> to vector<1x1x1xf32>
    %697 = vector.extract %696[0, 0, 0] : f32 from vector<1x1x1xf32>
    %698 = arith.addf %602, %697 : f32
    %699 = vector.shape_cast %688 : vector<8x1xf32> to vector<1x8x1xf32>
    %cst_217 = arith.constant dense<0.000000e+00> : vector<1xf32>
    %700 = vector.multi_reduction <add>, %699, %cst_217 [1, 2] : vector<1x8x1xf32> to vector<1xf32>
    %701 = vector.shape_cast %700 : vector<1xf32> to vector<1x1x1xf32>
    %702 = vector.extract %701[0, 0, 0] : f32 from vector<1x1x1xf32>
    %703 = arith.addf %607, %702 : f32
    %704 = vector.broadcast %676 : vector<8x1xf32> to vector<8x128xf32>
    %705 = arith.cmpf oeq, %674, %704 : vector<8x128xf32>
    %cst_218 = arith.constant 0.000000e+00 : f32
    %706 = vector.broadcast %cst_218 : f32 to vector<8x128xf32>
    %707 = arith.subf %706, %525 : vector<8x128xf32>
    %cst_219 = arith.constant -1.280000e+02 : f32
    %708 = vector.broadcast %cst_219 : f32 to vector<8x128xf32>
    %709 = arith.select %705, %707, %708 : vector<8x128xi1>, vector<8x128xf32>
    %cst_220 = arith.constant dense<0xFF800000> : vector<8xf32>
    %710 = vector.multi_reduction <maximumf>, %709, %cst_220 [1] : vector<8x128xf32> to vector<8xf32>
    %711 = vector.shape_cast %710 : vector<8xf32> to vector<8x1xf32>
    %cst_221 = arith.constant 0.000000e+00 : f32
    %712 = vector.broadcast %cst_221 : f32 to vector<8x1xf32>
    %713 = arith.subf %712, %711 : vector<8x1xf32>
    %714 = vector.broadcast %713 : vector<8x1xf32> to vector<8x128xf32>
    %715 = arith.cmpf oeq, %525, %714 : vector<8x128xf32>
    %716 = arith.extui %715 : vector<8x128xi1> to vector<8x128xi32>
    %717 = arith.sitofp %716 : vector<8x128xi32> to vector<8x128xf32>
    %718 = arith.index_cast %c1_i32_189 : i32 to index
    %719 = memref.load %arg0[%718] : memref<10xi32, #tpu.memory_space<smem>>
    %c0_i32_222 = arith.constant 0 : i32
    %720 = arith.cmpi sgt, %719, %c0_i32_222 : i32
    %721 = arith.select %720, %686, %717 : vector<8x128xf32>
    %c2_i32_223 = arith.constant 2 : i32
    %c0_224 = arith.constant 0 : index
    %c0_225 = arith.constant 0 : index
    %722 = vector.load %arg8[%c0_224, %c0_225] : memref<128x128xf32, #tpu.memory_space<vmem>>, vector<128x128xf32>
    %cst_226 = arith.constant dense<0.000000e+00> : vector<8x128xf32>
    %723 = tpu.matmul %721, %722, %cst_226 {dimension_numbers = #tpu.dot_dimension_numbers<[1], [0], [0], [1], [0, 0, 1, 1], [], []>} : vector<8x128xf32>, vector<128x128xf32>, vector<8x128xf32> -> vector<8x128xf32>
    %c0_227 = arith.constant 0 : index
    %c0_228 = arith.constant 0 : index
    %724 = vector.load %arg9[%c0_227, %c0_228] : memref<32x128xf32, #tpu.memory_space<vmem>>, vector<32x128xf32>
    %cst_229 = arith.constant dense<0.000000e+00> : vector<8x128xf32>
    %725 = tpu.matmul %648, %724, %cst_229 {dimension_numbers = #tpu.dot_dimension_numbers<[1], [0], [0], [1], [0, 0, 1, 1], [], []>} : vector<8x32xf32>, vector<32x128xf32>, vector<8x128xf32> -> vector<8x128xf32>
    %726 = arith.addf %723, %725 : vector<8x128xf32>
    %c0_230 = arith.constant 0 : index
    %c0_231 = arith.constant 0 : index
    %727 = vector.load %arg10[%c0_230, %c0_231] : memref<1x128xf32, #tpu.memory_space<vmem>>, vector<1x128xf32>
    %728 = vector.broadcast %727 : vector<1x128xf32> to vector<8x128xf32>
    %729 = arith.addf %726, %728 : vector<8x128xf32>
    %730 = arith.negf %729 : vector<8x128xf32>
    %731 = math.exp %730 : vector<8x128xf32>
    %cst_232 = arith.constant 1.000000e+00 : f32
    %732 = vector.broadcast %cst_232 : f32 to vector<8x128xf32>
    %733 = arith.addf %732, %731 : vector<8x128xf32>
    %734 = arith.divf %732, %733 : vector<8x128xf32>
    %735 = math.tanh %729 : vector<8x128xf32>
    %736 = vector.extract_strided_slice %734 {offsets = [0, 0], sizes = [8, 32], strides = [1, 1]} : vector<8x128xf32> to vector<8x32xf32>
    %737 = vector.extract_strided_slice %734 {offsets = [0, 32], sizes = [8, 32], strides = [1, 1]} : vector<8x128xf32> to vector<8x32xf32>
    %738 = vector.extract_strided_slice %735 {offsets = [0, 64], sizes = [8, 32], strides = [1, 1]} : vector<8x128xf32> to vector<8x32xf32>
    %739 = vector.extract_strided_slice %734 {offsets = [0, 96], sizes = [8, 32], strides = [1, 1]} : vector<8x128xf32> to vector<8x32xf32>
    %740 = arith.mulf %737, %646 : vector<8x32xf32>
    %741 = arith.mulf %736, %738 : vector<8x32xf32>
    %742 = arith.addf %740, %741 : vector<8x32xf32>
    %743 = math.tanh %742 : vector<8x32xf32>
    %744 = arith.mulf %739, %743 : vector<8x32xf32>
    %745 = tpu.concatenate %744, %669 in 1 : vector<8x32xf32>, vector<8x32xf32> -> vector<8x64xf32>
    %c0_233 = arith.constant 0 : index
    %c0_234 = arith.constant 0 : index
    %746 = vector.load %arg11[%c0_233, %c0_234] : memref<64x128xf32, #tpu.memory_space<vmem>>, vector<64x128xf32>
    %cst_235 = arith.constant dense<0.000000e+00> : vector<8x128xf32>
    %747 = tpu.matmul %745, %746, %cst_235 {dimension_numbers = #tpu.dot_dimension_numbers<[1], [0], [0], [1], [0, 0, 1, 1], [], []>} : vector<8x64xf32>, vector<64x128xf32>, vector<8x128xf32> -> vector<8x128xf32>
    %c0_236 = arith.constant 0 : index
    %c0_237 = arith.constant 0 : index
    %748 = vector.load %arg12[%c0_236, %c0_237] : memref<1x128xf32, #tpu.memory_space<vmem>>, vector<1x128xf32>
    %749 = vector.broadcast %748 : vector<1x128xf32> to vector<8x128xf32>
    %750 = arith.addf %747, %749 : vector<8x128xf32>
    %751 = arith.negf %750 : vector<8x128xf32>
    %752 = math.exp %751 : vector<8x128xf32>
    %cst_238 = arith.constant 1.000000e+00 : f32
    %753 = vector.broadcast %cst_238 : f32 to vector<8x128xf32>
    %754 = arith.addf %753, %752 : vector<8x128xf32>
    %755 = arith.divf %753, %754 : vector<8x128xf32>
    %756 = math.tanh %750 : vector<8x128xf32>
    %757 = vector.extract_strided_slice %755 {offsets = [0, 0], sizes = [8, 32], strides = [1, 1]} : vector<8x128xf32> to vector<8x32xf32>
    %758 = vector.extract_strided_slice %755 {offsets = [0, 32], sizes = [8, 32], strides = [1, 1]} : vector<8x128xf32> to vector<8x32xf32>
    %759 = vector.extract_strided_slice %756 {offsets = [0, 64], sizes = [8, 32], strides = [1, 1]} : vector<8x128xf32> to vector<8x32xf32>
    %760 = vector.extract_strided_slice %755 {offsets = [0, 96], sizes = [8, 32], strides = [1, 1]} : vector<8x128xf32> to vector<8x32xf32>
    %761 = arith.mulf %758, %667 : vector<8x32xf32>
    %762 = arith.mulf %757, %759 : vector<8x32xf32>
    %763 = arith.addf %761, %762 : vector<8x32xf32>
    %764 = math.tanh %763 : vector<8x32xf32>
    %765 = arith.mulf %760, %764 : vector<8x32xf32>
    %c0_239 = arith.constant 0 : index
    %c0_240 = arith.constant 0 : index
    %766 = vector.load %arg13[%c0_239, %c0_240] : memref<32x128xf32, #tpu.memory_space<vmem>>, vector<32x128xf32>
    %cst_241 = arith.constant dense<0.000000e+00> : vector<8x128xf32>
    %767 = tpu.matmul %765, %766, %cst_241 {dimension_numbers = #tpu.dot_dimension_numbers<[1], [0], [0], [1], [0, 0, 1, 1], [], []>} : vector<8x32xf32>, vector<32x128xf32>, vector<8x128xf32> -> vector<8x128xf32>
    %c0_242 = arith.constant 0 : index
    %c0_243 = arith.constant 0 : index
    %768 = vector.load %arg14[%c0_242, %c0_243] : memref<1x128xf32, #tpu.memory_space<vmem>>, vector<1x128xf32>
    %769 = vector.broadcast %768 : vector<1x128xf32> to vector<8x128xf32>
    %770 = arith.addf %767, %769 : vector<8x128xf32>
    %cst_244 = arith.constant dense<0xFF800000> : vector<8xf32>
    %771 = vector.multi_reduction <maximumf>, %770, %cst_244 [1] : vector<8x128xf32> to vector<8xf32>
    %772 = vector.shape_cast %771 : vector<8xf32> to vector<8x1xf32>
    %773 = vector.broadcast %772 : vector<8x1xf32> to vector<8x128xf32>
    %774 = arith.subf %770, %773 : vector<8x128xf32>
    %775 = math.exp %774 : vector<8x128xf32>
    %cst_245 = arith.constant dense<0.000000e+00> : vector<8xf32>
    %776 = vector.multi_reduction <add>, %775, %cst_245 [1] : vector<8x128xf32> to vector<8xf32>
    %777 = vector.shape_cast %776 : vector<8xf32> to vector<8x1xf32>
    %778 = math.log %777 : vector<8x1xf32>
    %779 = arith.addf %772, %778 : vector<8x1xf32>
    %780 = arith.index_cast %c2_i32_223 : i32 to index
    %c0_246 = arith.constant 0 : index
    %c0_247 = arith.constant 0 : index
    %781 = vector.load %arg2[%780, %c0_246, %c0_247] : memref<10x8x128xf32, #tpu.memory_space<vmem>>, vector<1x8x128xf32>
    %782 = vector.shape_cast %781 : vector<1x8x128xf32> to vector<8x128xf32>
    %cst_248 = arith.constant dense<0.000000e+00> : vector<8xf32>
    %783 = vector.multi_reduction <add>, %782, %cst_248 [1] : vector<8x128xf32> to vector<8xf32>
    %784 = vector.shape_cast %783 : vector<8xf32> to vector<8x1xf32>
    %785 = arith.mulf %770, %782 : vector<8x128xf32>
    %cst_249 = arith.constant dense<0.000000e+00> : vector<8xf32>
    %786 = vector.multi_reduction <add>, %785, %cst_249 [1] : vector<8x128xf32> to vector<8xf32>
    %787 = vector.shape_cast %786 : vector<8xf32> to vector<8x1xf32>
    %788 = arith.mulf %784, %779 : vector<8x1xf32>
    %789 = arith.subf %788, %787 : vector<8x1xf32>
    %790 = vector.shape_cast %789 : vector<8x1xf32> to vector<1x8x1xf32>
    %cst_250 = arith.constant dense<0.000000e+00> : vector<1xf32>
    %791 = vector.multi_reduction <add>, %790, %cst_250 [1, 2] : vector<1x8x1xf32> to vector<1xf32>
    %792 = vector.shape_cast %791 : vector<1xf32> to vector<1x1x1xf32>
    %793 = vector.extract %792[0, 0, 0] : f32 from vector<1x1x1xf32>
    %794 = arith.addf %698, %793 : f32
    %795 = vector.shape_cast %784 : vector<8x1xf32> to vector<1x8x1xf32>
    %cst_251 = arith.constant dense<0.000000e+00> : vector<1xf32>
    %796 = vector.multi_reduction <add>, %795, %cst_251 [1, 2] : vector<1x8x1xf32> to vector<1xf32>
    %797 = vector.shape_cast %796 : vector<1xf32> to vector<1x1x1xf32>
    %798 = vector.extract %797[0, 0, 0] : f32 from vector<1x1x1xf32>
    %799 = arith.addf %703, %798 : f32
    %800 = vector.broadcast %772 : vector<8x1xf32> to vector<8x128xf32>
    %801 = arith.cmpf oeq, %770, %800 : vector<8x128xf32>
    %cst_252 = arith.constant 0.000000e+00 : f32
    %802 = vector.broadcast %cst_252 : f32 to vector<8x128xf32>
    %803 = arith.subf %802, %525 : vector<8x128xf32>
    %cst_253 = arith.constant -1.280000e+02 : f32
    %804 = vector.broadcast %cst_253 : f32 to vector<8x128xf32>
    %805 = arith.select %801, %803, %804 : vector<8x128xi1>, vector<8x128xf32>
    %cst_254 = arith.constant dense<0xFF800000> : vector<8xf32>
    %806 = vector.multi_reduction <maximumf>, %805, %cst_254 [1] : vector<8x128xf32> to vector<8xf32>
    %807 = vector.shape_cast %806 : vector<8xf32> to vector<8x1xf32>
    %cst_255 = arith.constant 0.000000e+00 : f32
    %808 = vector.broadcast %cst_255 : f32 to vector<8x1xf32>
    %809 = arith.subf %808, %807 : vector<8x1xf32>
    %810 = vector.broadcast %809 : vector<8x1xf32> to vector<8x128xf32>
    %811 = arith.cmpf oeq, %525, %810 : vector<8x128xf32>
    %812 = arith.extui %811 : vector<8x128xi1> to vector<8x128xi32>
    %813 = arith.sitofp %812 : vector<8x128xi32> to vector<8x128xf32>
    %814 = arith.index_cast %c2_i32_223 : i32 to index
    %815 = memref.load %arg0[%814] : memref<10xi32, #tpu.memory_space<smem>>
    %c0_i32_256 = arith.constant 0 : i32
    %816 = arith.cmpi sgt, %815, %c0_i32_256 : i32
    %817 = arith.select %816, %782, %813 : vector<8x128xf32>
    %c3_i32_257 = arith.constant 3 : i32
    %c0_258 = arith.constant 0 : index
    %c0_259 = arith.constant 0 : index
    %818 = vector.load %arg8[%c0_258, %c0_259] : memref<128x128xf32, #tpu.memory_space<vmem>>, vector<128x128xf32>
    %cst_260 = arith.constant dense<0.000000e+00> : vector<8x128xf32>
    %819 = tpu.matmul %817, %818, %cst_260 {dimension_numbers = #tpu.dot_dimension_numbers<[1], [0], [0], [1], [0, 0, 1, 1], [], []>} : vector<8x128xf32>, vector<128x128xf32>, vector<8x128xf32> -> vector<8x128xf32>
    %c0_261 = arith.constant 0 : index
    %c0_262 = arith.constant 0 : index
    %820 = vector.load %arg9[%c0_261, %c0_262] : memref<32x128xf32, #tpu.memory_space<vmem>>, vector<32x128xf32>
    %cst_263 = arith.constant dense<0.000000e+00> : vector<8x128xf32>
    %821 = tpu.matmul %744, %820, %cst_263 {dimension_numbers = #tpu.dot_dimension_numbers<[1], [0], [0], [1], [0, 0, 1, 1], [], []>} : vector<8x32xf32>, vector<32x128xf32>, vector<8x128xf32> -> vector<8x128xf32>
    %822 = arith.addf %819, %821 : vector<8x128xf32>
    %c0_264 = arith.constant 0 : index
    %c0_265 = arith.constant 0 : index
    %823 = vector.load %arg10[%c0_264, %c0_265] : memref<1x128xf32, #tpu.memory_space<vmem>>, vector<1x128xf32>
    %824 = vector.broadcast %823 : vector<1x128xf32> to vector<8x128xf32>
    %825 = arith.addf %822, %824 : vector<8x128xf32>
    %826 = arith.negf %825 : vector<8x128xf32>
    %827 = math.exp %826 : vector<8x128xf32>
    %cst_266 = arith.constant 1.000000e+00 : f32
    %828 = vector.broadcast %cst_266 : f32 to vector<8x128xf32>
    %829 = arith.addf %828, %827 : vector<8x128xf32>
    %830 = arith.divf %828, %829 : vector<8x128xf32>
    %831 = math.tanh %825 : vector<8x128xf32>
    %832 = vector.extract_strided_slice %830 {offsets = [0, 0], sizes = [8, 32], strides = [1, 1]} : vector<8x128xf32> to vector<8x32xf32>
    %833 = vector.extract_strided_slice %830 {offsets = [0, 32], sizes = [8, 32], strides = [1, 1]} : vector<8x128xf32> to vector<8x32xf32>
    %834 = vector.extract_strided_slice %831 {offsets = [0, 64], sizes = [8, 32], strides = [1, 1]} : vector<8x128xf32> to vector<8x32xf32>
    %835 = vector.extract_strided_slice %830 {offsets = [0, 96], sizes = [8, 32], strides = [1, 1]} : vector<8x128xf32> to vector<8x32xf32>
    %836 = arith.mulf %833, %742 : vector<8x32xf32>
    %837 = arith.mulf %832, %834 : vector<8x32xf32>
    %838 = arith.addf %836, %837 : vector<8x32xf32>
    %839 = math.tanh %838 : vector<8x32xf32>
    %840 = arith.mulf %835, %839 : vector<8x32xf32>
    %841 = tpu.concatenate %840, %765 in 1 : vector<8x32xf32>, vector<8x32xf32> -> vector<8x64xf32>
    %c0_267 = arith.constant 0 : index
    %c0_268 = arith.constant 0 : index
    %842 = vector.load %arg11[%c0_267, %c0_268] : memref<64x128xf32, #tpu.memory_space<vmem>>, vector<64x128xf32>
    %cst_269 = arith.constant dense<0.000000e+00> : vector<8x128xf32>
    %843 = tpu.matmul %841, %842, %cst_269 {dimension_numbers = #tpu.dot_dimension_numbers<[1], [0], [0], [1], [0, 0, 1, 1], [], []>} : vector<8x64xf32>, vector<64x128xf32>, vector<8x128xf32> -> vector<8x128xf32>
    %c0_270 = arith.constant 0 : index
    %c0_271 = arith.constant 0 : index
    %844 = vector.load %arg12[%c0_270, %c0_271] : memref<1x128xf32, #tpu.memory_space<vmem>>, vector<1x128xf32>
    %845 = vector.broadcast %844 : vector<1x128xf32> to vector<8x128xf32>
    %846 = arith.addf %843, %845 : vector<8x128xf32>
    %847 = arith.negf %846 : vector<8x128xf32>
    %848 = math.exp %847 : vector<8x128xf32>
    %cst_272 = arith.constant 1.000000e+00 : f32
    %849 = vector.broadcast %cst_272 : f32 to vector<8x128xf32>
    %850 = arith.addf %849, %848 : vector<8x128xf32>
    %851 = arith.divf %849, %850 : vector<8x128xf32>
    %852 = math.tanh %846 : vector<8x128xf32>
    %853 = vector.extract_strided_slice %851 {offsets = [0, 0], sizes = [8, 32], strides = [1, 1]} : vector<8x128xf32> to vector<8x32xf32>
    %854 = vector.extract_strided_slice %851 {offsets = [0, 32], sizes = [8, 32], strides = [1, 1]} : vector<8x128xf32> to vector<8x32xf32>
    %855 = vector.extract_strided_slice %852 {offsets = [0, 64], sizes = [8, 32], strides = [1, 1]} : vector<8x128xf32> to vector<8x32xf32>
    %856 = vector.extract_strided_slice %851 {offsets = [0, 96], sizes = [8, 32], strides = [1, 1]} : vector<8x128xf32> to vector<8x32xf32>
    %857 = arith.mulf %854, %763 : vector<8x32xf32>
    %858 = arith.mulf %853, %855 : vector<8x32xf32>
    %859 = arith.addf %857, %858 : vector<8x32xf32>
    %860 = math.tanh %859 : vector<8x32xf32>
    %861 = arith.mulf %856, %860 : vector<8x32xf32>
    %c0_273 = arith.constant 0 : index
    %c0_274 = arith.constant 0 : index
    %862 = vector.load %arg13[%c0_273, %c0_274] : memref<32x128xf32, #tpu.memory_space<vmem>>, vector<32x128xf32>
    %cst_275 = arith.constant dense<0.000000e+00> : vector<8x128xf32>
    %863 = tpu.matmul %861, %862, %cst_275 {dimension_numbers = #tpu.dot_dimension_numbers<[1], [0], [0], [1], [0, 0, 1, 1], [], []>} : vector<8x32xf32>, vector<32x128xf32>, vector<8x128xf32> -> vector<8x128xf32>
    %c0_276 = arith.constant 0 : index
    %c0_277 = arith.constant 0 : index
    %864 = vector.load %arg14[%c0_276, %c0_277] : memref<1x128xf32, #tpu.memory_space<vmem>>, vector<1x128xf32>
    %865 = vector.broadcast %864 : vector<1x128xf32> to vector<8x128xf32>
    %866 = arith.addf %863, %865 : vector<8x128xf32>
    %cst_278 = arith.constant dense<0xFF800000> : vector<8xf32>
    %867 = vector.multi_reduction <maximumf>, %866, %cst_278 [1] : vector<8x128xf32> to vector<8xf32>
    %868 = vector.shape_cast %867 : vector<8xf32> to vector<8x1xf32>
    %869 = vector.broadcast %868 : vector<8x1xf32> to vector<8x128xf32>
    %870 = arith.subf %866, %869 : vector<8x128xf32>
    %871 = math.exp %870 : vector<8x128xf32>
    %cst_279 = arith.constant dense<0.000000e+00> : vector<8xf32>
    %872 = vector.multi_reduction <add>, %871, %cst_279 [1] : vector<8x128xf32> to vector<8xf32>
    %873 = vector.shape_cast %872 : vector<8xf32> to vector<8x1xf32>
    %874 = math.log %873 : vector<8x1xf32>
    %875 = arith.addf %868, %874 : vector<8x1xf32>
    %876 = arith.index_cast %c3_i32_257 : i32 to index
    %c0_280 = arith.constant 0 : index
    %c0_281 = arith.constant 0 : index
    %877 = vector.load %arg2[%876, %c0_280, %c0_281] : memref<10x8x128xf32, #tpu.memory_space<vmem>>, vector<1x8x128xf32>
    %878 = vector.shape_cast %877 : vector<1x8x128xf32> to vector<8x128xf32>
    %cst_282 = arith.constant dense<0.000000e+00> : vector<8xf32>
    %879 = vector.multi_reduction <add>, %878, %cst_282 [1] : vector<8x128xf32> to vector<8xf32>
    %880 = vector.shape_cast %879 : vector<8xf32> to vector<8x1xf32>
    %881 = arith.mulf %866, %878 : vector<8x128xf32>
    %cst_283 = arith.constant dense<0.000000e+00> : vector<8xf32>
    %882 = vector.multi_reduction <add>, %881, %cst_283 [1] : vector<8x128xf32> to vector<8xf32>
    %883 = vector.shape_cast %882 : vector<8xf32> to vector<8x1xf32>
    %884 = arith.mulf %880, %875 : vector<8x1xf32>
    %885 = arith.subf %884, %883 : vector<8x1xf32>
    %886 = vector.shape_cast %885 : vector<8x1xf32> to vector<1x8x1xf32>
    %cst_284 = arith.constant dense<0.000000e+00> : vector<1xf32>
    %887 = vector.multi_reduction <add>, %886, %cst_284 [1, 2] : vector<1x8x1xf32> to vector<1xf32>
    %888 = vector.shape_cast %887 : vector<1xf32> to vector<1x1x1xf32>
    %889 = vector.extract %888[0, 0, 0] : f32 from vector<1x1x1xf32>
    %890 = arith.addf %794, %889 : f32
    %891 = vector.shape_cast %880 : vector<8x1xf32> to vector<1x8x1xf32>
    %cst_285 = arith.constant dense<0.000000e+00> : vector<1xf32>
    %892 = vector.multi_reduction <add>, %891, %cst_285 [1, 2] : vector<1x8x1xf32> to vector<1xf32>
    %893 = vector.shape_cast %892 : vector<1xf32> to vector<1x1x1xf32>
    %894 = vector.extract %893[0, 0, 0] : f32 from vector<1x1x1xf32>
    %895 = arith.addf %799, %894 : f32
    %896 = vector.broadcast %868 : vector<8x1xf32> to vector<8x128xf32>
    %897 = arith.cmpf oeq, %866, %896 : vector<8x128xf32>
    %cst_286 = arith.constant 0.000000e+00 : f32
    %898 = vector.broadcast %cst_286 : f32 to vector<8x128xf32>
    %899 = arith.subf %898, %525 : vector<8x128xf32>
    %cst_287 = arith.constant -1.280000e+02 : f32
    %900 = vector.broadcast %cst_287 : f32 to vector<8x128xf32>
    %901 = arith.select %897, %899, %900 : vector<8x128xi1>, vector<8x128xf32>
    %cst_288 = arith.constant dense<0xFF800000> : vector<8xf32>
    %902 = vector.multi_reduction <maximumf>, %901, %cst_288 [1] : vector<8x128xf32> to vector<8xf32>
    %903 = vector.shape_cast %902 : vector<8xf32> to vector<8x1xf32>
    %cst_289 = arith.constant 0.000000e+00 : f32
    %904 = vector.broadcast %cst_289 : f32 to vector<8x1xf32>
    %905 = arith.subf %904, %903 : vector<8x1xf32>
    %906 = vector.broadcast %905 : vector<8x1xf32> to vector<8x128xf32>
    %907 = arith.cmpf oeq, %525, %906 : vector<8x128xf32>
    %908 = arith.extui %907 : vector<8x128xi1> to vector<8x128xi32>
    %909 = arith.sitofp %908 : vector<8x128xi32> to vector<8x128xf32>
    %910 = arith.index_cast %c3_i32_257 : i32 to index
    %911 = memref.load %arg0[%910] : memref<10xi32, #tpu.memory_space<smem>>
    %c0_i32_290 = arith.constant 0 : i32
    %912 = arith.cmpi sgt, %911, %c0_i32_290 : i32
    %913 = arith.select %912, %878, %909 : vector<8x128xf32>
    %c4_i32_291 = arith.constant 4 : i32
    %c0_292 = arith.constant 0 : index
    %c0_293 = arith.constant 0 : index
    %914 = vector.load %arg8[%c0_292, %c0_293] : memref<128x128xf32, #tpu.memory_space<vmem>>, vector<128x128xf32>
    %cst_294 = arith.constant dense<0.000000e+00> : vector<8x128xf32>
    %915 = tpu.matmul %913, %914, %cst_294 {dimension_numbers = #tpu.dot_dimension_numbers<[1], [0], [0], [1], [0, 0, 1, 1], [], []>} : vector<8x128xf32>, vector<128x128xf32>, vector<8x128xf32> -> vector<8x128xf32>
    %c0_295 = arith.constant 0 : index
    %c0_296 = arith.constant 0 : index
    %916 = vector.load %arg9[%c0_295, %c0_296] : memref<32x128xf32, #tpu.memory_space<vmem>>, vector<32x128xf32>
    %cst_297 = arith.constant dense<0.000000e+00> : vector<8x128xf32>
    %917 = tpu.matmul %840, %916, %cst_297 {dimension_numbers = #tpu.dot_dimension_numbers<[1], [0], [0], [1], [0, 0, 1, 1], [], []>} : vector<8x32xf32>, vector<32x128xf32>, vector<8x128xf32> -> vector<8x128xf32>
    %918 = arith.addf %915, %917 : vector<8x128xf32>
    %c0_298 = arith.constant 0 : index
    %c0_299 = arith.constant 0 : index
    %919 = vector.load %arg10[%c0_298, %c0_299] : memref<1x128xf32, #tpu.memory_space<vmem>>, vector<1x128xf32>
    %920 = vector.broadcast %919 : vector<1x128xf32> to vector<8x128xf32>
    %921 = arith.addf %918, %920 : vector<8x128xf32>
    %922 = arith.negf %921 : vector<8x128xf32>
    %923 = math.exp %922 : vector<8x128xf32>
    %cst_300 = arith.constant 1.000000e+00 : f32
    %924 = vector.broadcast %cst_300 : f32 to vector<8x128xf32>
    %925 = arith.addf %924, %923 : vector<8x128xf32>
    %926 = arith.divf %924, %925 : vector<8x128xf32>
    %927 = math.tanh %921 : vector<8x128xf32>
    %928 = vector.extract_strided_slice %926 {offsets = [0, 0], sizes = [8, 32], strides = [1, 1]} : vector<8x128xf32> to vector<8x32xf32>
    %929 = vector.extract_strided_slice %926 {offsets = [0, 32], sizes = [8, 32], strides = [1, 1]} : vector<8x128xf32> to vector<8x32xf32>
    %930 = vector.extract_strided_slice %927 {offsets = [0, 64], sizes = [8, 32], strides = [1, 1]} : vector<8x128xf32> to vector<8x32xf32>
    %931 = vector.extract_strided_slice %926 {offsets = [0, 96], sizes = [8, 32], strides = [1, 1]} : vector<8x128xf32> to vector<8x32xf32>
    %932 = arith.mulf %929, %838 : vector<8x32xf32>
    %933 = arith.mulf %928, %930 : vector<8x32xf32>
    %934 = arith.addf %932, %933 : vector<8x32xf32>
    %935 = math.tanh %934 : vector<8x32xf32>
    %936 = arith.mulf %931, %935 : vector<8x32xf32>
    %937 = tpu.concatenate %936, %861 in 1 : vector<8x32xf32>, vector<8x32xf32> -> vector<8x64xf32>
    %c0_301 = arith.constant 0 : index
    %c0_302 = arith.constant 0 : index
    %938 = vector.load %arg11[%c0_301, %c0_302] : memref<64x128xf32, #tpu.memory_space<vmem>>, vector<64x128xf32>
    %cst_303 = arith.constant dense<0.000000e+00> : vector<8x128xf32>
    %939 = tpu.matmul %937, %938, %cst_303 {dimension_numbers = #tpu.dot_dimension_numbers<[1], [0], [0], [1], [0, 0, 1, 1], [], []>} : vector<8x64xf32>, vector<64x128xf32>, vector<8x128xf32> -> vector<8x128xf32>
    %c0_304 = arith.constant 0 : index
    %c0_305 = arith.constant 0 : index
    %940 = vector.load %arg12[%c0_304, %c0_305] : memref<1x128xf32, #tpu.memory_space<vmem>>, vector<1x128xf32>
    %941 = vector.broadcast %940 : vector<1x128xf32> to vector<8x128xf32>
    %942 = arith.addf %939, %941 : vector<8x128xf32>
    %943 = arith.negf %942 : vector<8x128xf32>
    %944 = math.exp %943 : vector<8x128xf32>
    %cst_306 = arith.constant 1.000000e+00 : f32
    %945 = vector.broadcast %cst_306 : f32 to vector<8x128xf32>
    %946 = arith.addf %945, %944 : vector<8x128xf32>
    %947 = arith.divf %945, %946 : vector<8x128xf32>
    %948 = math.tanh %942 : vector<8x128xf32>
    %949 = vector.extract_strided_slice %947 {offsets = [0, 0], sizes = [8, 32], strides = [1, 1]} : vector<8x128xf32> to vector<8x32xf32>
    %950 = vector.extract_strided_slice %947 {offsets = [0, 32], sizes = [8, 32], strides = [1, 1]} : vector<8x128xf32> to vector<8x32xf32>
    %951 = vector.extract_strided_slice %948 {offsets = [0, 64], sizes = [8, 32], strides = [1, 1]} : vector<8x128xf32> to vector<8x32xf32>
    %952 = vector.extract_strided_slice %947 {offsets = [0, 96], sizes = [8, 32], strides = [1, 1]} : vector<8x128xf32> to vector<8x32xf32>
    %953 = arith.mulf %950, %859 : vector<8x32xf32>
    %954 = arith.mulf %949, %951 : vector<8x32xf32>
    %955 = arith.addf %953, %954 : vector<8x32xf32>
    %956 = math.tanh %955 : vector<8x32xf32>
    %957 = arith.mulf %952, %956 : vector<8x32xf32>
    %c0_307 = arith.constant 0 : index
    %c0_308 = arith.constant 0 : index
    %958 = vector.load %arg13[%c0_307, %c0_308] : memref<32x128xf32, #tpu.memory_space<vmem>>, vector<32x128xf32>
    %cst_309 = arith.constant dense<0.000000e+00> : vector<8x128xf32>
    %959 = tpu.matmul %957, %958, %cst_309 {dimension_numbers = #tpu.dot_dimension_numbers<[1], [0], [0], [1], [0, 0, 1, 1], [], []>} : vector<8x32xf32>, vector<32x128xf32>, vector<8x128xf32> -> vector<8x128xf32>
    %c0_310 = arith.constant 0 : index
    %c0_311 = arith.constant 0 : index
    %960 = vector.load %arg14[%c0_310, %c0_311] : memref<1x128xf32, #tpu.memory_space<vmem>>, vector<1x128xf32>
    %961 = vector.broadcast %960 : vector<1x128xf32> to vector<8x128xf32>
    %962 = arith.addf %959, %961 : vector<8x128xf32>
    %cst_312 = arith.constant dense<0xFF800000> : vector<8xf32>
    %963 = vector.multi_reduction <maximumf>, %962, %cst_312 [1] : vector<8x128xf32> to vector<8xf32>
    %964 = vector.shape_cast %963 : vector<8xf32> to vector<8x1xf32>
    %965 = vector.broadcast %964 : vector<8x1xf32> to vector<8x128xf32>
    %966 = arith.subf %962, %965 : vector<8x128xf32>
    %967 = math.exp %966 : vector<8x128xf32>
    %cst_313 = arith.constant dense<0.000000e+00> : vector<8xf32>
    %968 = vector.multi_reduction <add>, %967, %cst_313 [1] : vector<8x128xf32> to vector<8xf32>
    %969 = vector.shape_cast %968 : vector<8xf32> to vector<8x1xf32>
    %970 = math.log %969 : vector<8x1xf32>
    %971 = arith.addf %964, %970 : vector<8x1xf32>
    %972 = arith.index_cast %c4_i32_291 : i32 to index
    %c0_314 = arith.constant 0 : index
    %c0_315 = arith.constant 0 : index
    %973 = vector.load %arg2[%972, %c0_314, %c0_315] : memref<10x8x128xf32, #tpu.memory_space<vmem>>, vector<1x8x128xf32>
    %974 = vector.shape_cast %973 : vector<1x8x128xf32> to vector<8x128xf32>
    %cst_316 = arith.constant dense<0.000000e+00> : vector<8xf32>
    %975 = vector.multi_reduction <add>, %974, %cst_316 [1] : vector<8x128xf32> to vector<8xf32>
    %976 = vector.shape_cast %975 : vector<8xf32> to vector<8x1xf32>
    %977 = arith.mulf %962, %974 : vector<8x128xf32>
    %cst_317 = arith.constant dense<0.000000e+00> : vector<8xf32>
    %978 = vector.multi_reduction <add>, %977, %cst_317 [1] : vector<8x128xf32> to vector<8xf32>
    %979 = vector.shape_cast %978 : vector<8xf32> to vector<8x1xf32>
    %980 = arith.mulf %976, %971 : vector<8x1xf32>
    %981 = arith.subf %980, %979 : vector<8x1xf32>
    %982 = vector.shape_cast %981 : vector<8x1xf32> to vector<1x8x1xf32>
    %cst_318 = arith.constant dense<0.000000e+00> : vector<1xf32>
    %983 = vector.multi_reduction <add>, %982, %cst_318 [1, 2] : vector<1x8x1xf32> to vector<1xf32>
    %984 = vector.shape_cast %983 : vector<1xf32> to vector<1x1x1xf32>
    %985 = vector.extract %984[0, 0, 0] : f32 from vector<1x1x1xf32>
    %986 = arith.addf %890, %985 : f32
    %987 = vector.shape_cast %976 : vector<8x1xf32> to vector<1x8x1xf32>
    %cst_319 = arith.constant dense<0.000000e+00> : vector<1xf32>
    %988 = vector.multi_reduction <add>, %987, %cst_319 [1, 2] : vector<1x8x1xf32> to vector<1xf32>
    %989 = vector.shape_cast %988 : vector<1xf32> to vector<1x1x1xf32>
    %990 = vector.extract %989[0, 0, 0] : f32 from vector<1x1x1xf32>
    %991 = arith.addf %895, %990 : f32
    %992 = vector.broadcast %964 : vector<8x1xf32> to vector<8x128xf32>
    %993 = arith.cmpf oeq, %962, %992 : vector<8x128xf32>
    %cst_320 = arith.constant 0.000000e+00 : f32
    %994 = vector.broadcast %cst_320 : f32 to vector<8x128xf32>
    %995 = arith.subf %994, %525 : vector<8x128xf32>
    %cst_321 = arith.constant -1.280000e+02 : f32
    %996 = vector.broadcast %cst_321 : f32 to vector<8x128xf32>
    %997 = arith.select %993, %995, %996 : vector<8x128xi1>, vector<8x128xf32>
    %cst_322 = arith.constant dense<0xFF800000> : vector<8xf32>
    %998 = vector.multi_reduction <maximumf>, %997, %cst_322 [1] : vector<8x128xf32> to vector<8xf32>
    %999 = vector.shape_cast %998 : vector<8xf32> to vector<8x1xf32>
    %cst_323 = arith.constant 0.000000e+00 : f32
    %1000 = vector.broadcast %cst_323 : f32 to vector<8x1xf32>
    %1001 = arith.subf %1000, %999 : vector<8x1xf32>
    %1002 = vector.broadcast %1001 : vector<8x1xf32> to vector<8x128xf32>
    %1003 = arith.cmpf oeq, %525, %1002 : vector<8x128xf32>
    %1004 = arith.extui %1003 : vector<8x128xi1> to vector<8x128xi32>
    %1005 = arith.sitofp %1004 : vector<8x128xi32> to vector<8x128xf32>
    %1006 = arith.index_cast %c4_i32_291 : i32 to index
    %1007 = memref.load %arg0[%1006] : memref<10xi32, #tpu.memory_space<smem>>
    %c0_i32_324 = arith.constant 0 : i32
    %1008 = arith.cmpi sgt, %1007, %c0_i32_324 : i32
    %1009 = arith.select %1008, %974, %1005 : vector<8x128xf32>
    %c5_i32_325 = arith.constant 5 : i32
    %c0_326 = arith.constant 0 : index
    %c0_327 = arith.constant 0 : index
    %1010 = vector.load %arg8[%c0_326, %c0_327] : memref<128x128xf32, #tpu.memory_space<vmem>>, vector<128x128xf32>
    %cst_328 = arith.constant dense<0.000000e+00> : vector<8x128xf32>
    %1011 = tpu.matmul %1009, %1010, %cst_328 {dimension_numbers = #tpu.dot_dimension_numbers<[1], [0], [0], [1], [0, 0, 1, 1], [], []>} : vector<8x128xf32>, vector<128x128xf32>, vector<8x128xf32> -> vector<8x128xf32>
    %c0_329 = arith.constant 0 : index
    %c0_330 = arith.constant 0 : index
    %1012 = vector.load %arg9[%c0_329, %c0_330] : memref<32x128xf32, #tpu.memory_space<vmem>>, vector<32x128xf32>
    %cst_331 = arith.constant dense<0.000000e+00> : vector<8x128xf32>
    %1013 = tpu.matmul %936, %1012, %cst_331 {dimension_numbers = #tpu.dot_dimension_numbers<[1], [0], [0], [1], [0, 0, 1, 1], [], []>} : vector<8x32xf32>, vector<32x128xf32>, vector<8x128xf32> -> vector<8x128xf32>
    %1014 = arith.addf %1011, %1013 : vector<8x128xf32>
    %c0_332 = arith.constant 0 : index
    %c0_333 = arith.constant 0 : index
    %1015 = vector.load %arg10[%c0_332, %c0_333] : memref<1x128xf32, #tpu.memory_space<vmem>>, vector<1x128xf32>
    %1016 = vector.broadcast %1015 : vector<1x128xf32> to vector<8x128xf32>
    %1017 = arith.addf %1014, %1016 : vector<8x128xf32>
    %1018 = arith.negf %1017 : vector<8x128xf32>
    %1019 = math.exp %1018 : vector<8x128xf32>
    %cst_334 = arith.constant 1.000000e+00 : f32
    %1020 = vector.broadcast %cst_334 : f32 to vector<8x128xf32>
    %1021 = arith.addf %1020, %1019 : vector<8x128xf32>
    %1022 = arith.divf %1020, %1021 : vector<8x128xf32>
    %1023 = math.tanh %1017 : vector<8x128xf32>
    %1024 = vector.extract_strided_slice %1022 {offsets = [0, 0], sizes = [8, 32], strides = [1, 1]} : vector<8x128xf32> to vector<8x32xf32>
    %1025 = vector.extract_strided_slice %1022 {offsets = [0, 32], sizes = [8, 32], strides = [1, 1]} : vector<8x128xf32> to vector<8x32xf32>
    %1026 = vector.extract_strided_slice %1023 {offsets = [0, 64], sizes = [8, 32], strides = [1, 1]} : vector<8x128xf32> to vector<8x32xf32>
    %1027 = vector.extract_strided_slice %1022 {offsets = [0, 96], sizes = [8, 32], strides = [1, 1]} : vector<8x128xf32> to vector<8x32xf32>
    %1028 = arith.mulf %1025, %934 : vector<8x32xf32>
    %1029 = arith.mulf %1024, %1026 : vector<8x32xf32>
    %1030 = arith.addf %1028, %1029 : vector<8x32xf32>
    %1031 = math.tanh %1030 : vector<8x32xf32>
    %1032 = arith.mulf %1027, %1031 : vector<8x32xf32>
    %1033 = tpu.concatenate %1032, %957 in 1 : vector<8x32xf32>, vector<8x32xf32> -> vector<8x64xf32>
    %c0_335 = arith.constant 0 : index
    %c0_336 = arith.constant 0 : index
    %1034 = vector.load %arg11[%c0_335, %c0_336] : memref<64x128xf32, #tpu.memory_space<vmem>>, vector<64x128xf32>
    %cst_337 = arith.constant dense<0.000000e+00> : vector<8x128xf32>
    %1035 = tpu.matmul %1033, %1034, %cst_337 {dimension_numbers = #tpu.dot_dimension_numbers<[1], [0], [0], [1], [0, 0, 1, 1], [], []>} : vector<8x64xf32>, vector<64x128xf32>, vector<8x128xf32> -> vector<8x128xf32>
    %c0_338 = arith.constant 0 : index
    %c0_339 = arith.constant 0 : index
    %1036 = vector.load %arg12[%c0_338, %c0_339] : memref<1x128xf32, #tpu.memory_space<vmem>>, vector<1x128xf32>
    %1037 = vector.broadcast %1036 : vector<1x128xf32> to vector<8x128xf32>
    %1038 = arith.addf %1035, %1037 : vector<8x128xf32>
    %1039 = arith.negf %1038 : vector<8x128xf32>
    %1040 = math.exp %1039 : vector<8x128xf32>
    %cst_340 = arith.constant 1.000000e+00 : f32
    %1041 = vector.broadcast %cst_340 : f32 to vector<8x128xf32>
    %1042 = arith.addf %1041, %1040 : vector<8x128xf32>
    %1043 = arith.divf %1041, %1042 : vector<8x128xf32>
    %1044 = math.tanh %1038 : vector<8x128xf32>
    %1045 = vector.extract_strided_slice %1043 {offsets = [0, 0], sizes = [8, 32], strides = [1, 1]} : vector<8x128xf32> to vector<8x32xf32>
    %1046 = vector.extract_strided_slice %1043 {offsets = [0, 32], sizes = [8, 32], strides = [1, 1]} : vector<8x128xf32> to vector<8x32xf32>
    %1047 = vector.extract_strided_slice %1044 {offsets = [0, 64], sizes = [8, 32], strides = [1, 1]} : vector<8x128xf32> to vector<8x32xf32>
    %1048 = vector.extract_strided_slice %1043 {offsets = [0, 96], sizes = [8, 32], strides = [1, 1]} : vector<8x128xf32> to vector<8x32xf32>
    %1049 = arith.mulf %1046, %955 : vector<8x32xf32>
    %1050 = arith.mulf %1045, %1047 : vector<8x32xf32>
    %1051 = arith.addf %1049, %1050 : vector<8x32xf32>
    %1052 = math.tanh %1051 : vector<8x32xf32>
    %1053 = arith.mulf %1048, %1052 : vector<8x32xf32>
    %c0_341 = arith.constant 0 : index
    %c0_342 = arith.constant 0 : index
    %1054 = vector.load %arg13[%c0_341, %c0_342] : memref<32x128xf32, #tpu.memory_space<vmem>>, vector<32x128xf32>
    %cst_343 = arith.constant dense<0.000000e+00> : vector<8x128xf32>
    %1055 = tpu.matmul %1053, %1054, %cst_343 {dimension_numbers = #tpu.dot_dimension_numbers<[1], [0], [0], [1], [0, 0, 1, 1], [], []>} : vector<8x32xf32>, vector<32x128xf32>, vector<8x128xf32> -> vector<8x128xf32>
    %c0_344 = arith.constant 0 : index
    %c0_345 = arith.constant 0 : index
    %1056 = vector.load %arg14[%c0_344, %c0_345] : memref<1x128xf32, #tpu.memory_space<vmem>>, vector<1x128xf32>
    %1057 = vector.broadcast %1056 : vector<1x128xf32> to vector<8x128xf32>
    %1058 = arith.addf %1055, %1057 : vector<8x128xf32>
    %cst_346 = arith.constant dense<0xFF800000> : vector<8xf32>
    %1059 = vector.multi_reduction <maximumf>, %1058, %cst_346 [1] : vector<8x128xf32> to vector<8xf32>
    %1060 = vector.shape_cast %1059 : vector<8xf32> to vector<8x1xf32>
    %1061 = vector.broadcast %1060 : vector<8x1xf32> to vector<8x128xf32>
    %1062 = arith.subf %1058, %1061 : vector<8x128xf32>
    %1063 = math.exp %1062 : vector<8x128xf32>
    %cst_347 = arith.constant dense<0.000000e+00> : vector<8xf32>
    %1064 = vector.multi_reduction <add>, %1063, %cst_347 [1] : vector<8x128xf32> to vector<8xf32>
    %1065 = vector.shape_cast %1064 : vector<8xf32> to vector<8x1xf32>
    %1066 = math.log %1065 : vector<8x1xf32>
    %1067 = arith.addf %1060, %1066 : vector<8x1xf32>
    %1068 = arith.index_cast %c5_i32_325 : i32 to index
    %c0_348 = arith.constant 0 : index
    %c0_349 = arith.constant 0 : index
    %1069 = vector.load %arg2[%1068, %c0_348, %c0_349] : memref<10x8x128xf32, #tpu.memory_space<vmem>>, vector<1x8x128xf32>
    %1070 = vector.shape_cast %1069 : vector<1x8x128xf32> to vector<8x128xf32>
    %cst_350 = arith.constant dense<0.000000e+00> : vector<8xf32>
    %1071 = vector.multi_reduction <add>, %1070, %cst_350 [1] : vector<8x128xf32> to vector<8xf32>
    %1072 = vector.shape_cast %1071 : vector<8xf32> to vector<8x1xf32>
    %1073 = arith.mulf %1058, %1070 : vector<8x128xf32>
    %cst_351 = arith.constant dense<0.000000e+00> : vector<8xf32>
    %1074 = vector.multi_reduction <add>, %1073, %cst_351 [1] : vector<8x128xf32> to vector<8xf32>
    %1075 = vector.shape_cast %1074 : vector<8xf32> to vector<8x1xf32>
    %1076 = arith.mulf %1072, %1067 : vector<8x1xf32>
    %1077 = arith.subf %1076, %1075 : vector<8x1xf32>
    %1078 = vector.shape_cast %1077 : vector<8x1xf32> to vector<1x8x1xf32>
    %cst_352 = arith.constant dense<0.000000e+00> : vector<1xf32>
    %1079 = vector.multi_reduction <add>, %1078, %cst_352 [1, 2] : vector<1x8x1xf32> to vector<1xf32>
    %1080 = vector.shape_cast %1079 : vector<1xf32> to vector<1x1x1xf32>
    %1081 = vector.extract %1080[0, 0, 0] : f32 from vector<1x1x1xf32>
    %1082 = arith.addf %986, %1081 : f32
    %1083 = vector.shape_cast %1072 : vector<8x1xf32> to vector<1x8x1xf32>
    %cst_353 = arith.constant dense<0.000000e+00> : vector<1xf32>
    %1084 = vector.multi_reduction <add>, %1083, %cst_353 [1, 2] : vector<1x8x1xf32> to vector<1xf32>
    %1085 = vector.shape_cast %1084 : vector<1xf32> to vector<1x1x1xf32>
    %1086 = vector.extract %1085[0, 0, 0] : f32 from vector<1x1x1xf32>
    %1087 = arith.addf %991, %1086 : f32
    %1088 = vector.broadcast %1060 : vector<8x1xf32> to vector<8x128xf32>
    %1089 = arith.cmpf oeq, %1058, %1088 : vector<8x128xf32>
    %cst_354 = arith.constant 0.000000e+00 : f32
    %1090 = vector.broadcast %cst_354 : f32 to vector<8x128xf32>
    %1091 = arith.subf %1090, %525 : vector<8x128xf32>
    %cst_355 = arith.constant -1.280000e+02 : f32
    %1092 = vector.broadcast %cst_355 : f32 to vector<8x128xf32>
    %1093 = arith.select %1089, %1091, %1092 : vector<8x128xi1>, vector<8x128xf32>
    %cst_356 = arith.constant dense<0xFF800000> : vector<8xf32>
    %1094 = vector.multi_reduction <maximumf>, %1093, %cst_356 [1] : vector<8x128xf32> to vector<8xf32>
    %1095 = vector.shape_cast %1094 : vector<8xf32> to vector<8x1xf32>
    %cst_357 = arith.constant 0.000000e+00 : f32
    %1096 = vector.broadcast %cst_357 : f32 to vector<8x1xf32>
    %1097 = arith.subf %1096, %1095 : vector<8x1xf32>
    %1098 = vector.broadcast %1097 : vector<8x1xf32> to vector<8x128xf32>
    %1099 = arith.cmpf oeq, %525, %1098 : vector<8x128xf32>
    %1100 = arith.extui %1099 : vector<8x128xi1> to vector<8x128xi32>
    %1101 = arith.sitofp %1100 : vector<8x128xi32> to vector<8x128xf32>
    %1102 = arith.index_cast %c5_i32_325 : i32 to index
    %1103 = memref.load %arg0[%1102] : memref<10xi32, #tpu.memory_space<smem>>
    %c0_i32_358 = arith.constant 0 : i32
    %1104 = arith.cmpi sgt, %1103, %c0_i32_358 : i32
    %1105 = arith.select %1104, %1070, %1101 : vector<8x128xf32>
    %c6_i32_359 = arith.constant 6 : i32
    %c0_360 = arith.constant 0 : index
    %c0_361 = arith.constant 0 : index
    %1106 = vector.load %arg8[%c0_360, %c0_361] : memref<128x128xf32, #tpu.memory_space<vmem>>, vector<128x128xf32>
    %cst_362 = arith.constant dense<0.000000e+00> : vector<8x128xf32>
    %1107 = tpu.matmul %1105, %1106, %cst_362 {dimension_numbers = #tpu.dot_dimension_numbers<[1], [0], [0], [1], [0, 0, 1, 1], [], []>} : vector<8x128xf32>, vector<128x128xf32>, vector<8x128xf32> -> vector<8x128xf32>
    %c0_363 = arith.constant 0 : index
    %c0_364 = arith.constant 0 : index
    %1108 = vector.load %arg9[%c0_363, %c0_364] : memref<32x128xf32, #tpu.memory_space<vmem>>, vector<32x128xf32>
    %cst_365 = arith.constant dense<0.000000e+00> : vector<8x128xf32>
    %1109 = tpu.matmul %1032, %1108, %cst_365 {dimension_numbers = #tpu.dot_dimension_numbers<[1], [0], [0], [1], [0, 0, 1, 1], [], []>} : vector<8x32xf32>, vector<32x128xf32>, vector<8x128xf32> -> vector<8x128xf32>
    %1110 = arith.addf %1107, %1109 : vector<8x128xf32>
    %c0_366 = arith.constant 0 : index
    %c0_367 = arith.constant 0 : index
    %1111 = vector.load %arg10[%c0_366, %c0_367] : memref<1x128xf32, #tpu.memory_space<vmem>>, vector<1x128xf32>
    %1112 = vector.broadcast %1111 : vector<1x128xf32> to vector<8x128xf32>
    %1113 = arith.addf %1110, %1112 : vector<8x128xf32>
    %1114 = arith.negf %1113 : vector<8x128xf32>
    %1115 = math.exp %1114 : vector<8x128xf32>
    %cst_368 = arith.constant 1.000000e+00 : f32
    %1116 = vector.broadcast %cst_368 : f32 to vector<8x128xf32>
    %1117 = arith.addf %1116, %1115 : vector<8x128xf32>
    %1118 = arith.divf %1116, %1117 : vector<8x128xf32>
    %1119 = math.tanh %1113 : vector<8x128xf32>
    %1120 = vector.extract_strided_slice %1118 {offsets = [0, 0], sizes = [8, 32], strides = [1, 1]} : vector<8x128xf32> to vector<8x32xf32>
    %1121 = vector.extract_strided_slice %1118 {offsets = [0, 32], sizes = [8, 32], strides = [1, 1]} : vector<8x128xf32> to vector<8x32xf32>
    %1122 = vector.extract_strided_slice %1119 {offsets = [0, 64], sizes = [8, 32], strides = [1, 1]} : vector<8x128xf32> to vector<8x32xf32>
    %1123 = vector.extract_strided_slice %1118 {offsets = [0, 96], sizes = [8, 32], strides = [1, 1]} : vector<8x128xf32> to vector<8x32xf32>
    %1124 = arith.mulf %1121, %1030 : vector<8x32xf32>
    %1125 = arith.mulf %1120, %1122 : vector<8x32xf32>
    %1126 = arith.addf %1124, %1125 : vector<8x32xf32>
    %1127 = math.tanh %1126 : vector<8x32xf32>
    %1128 = arith.mulf %1123, %1127 : vector<8x32xf32>
    %1129 = tpu.concatenate %1128, %1053 in 1 : vector<8x32xf32>, vector<8x32xf32> -> vector<8x64xf32>
    %c0_369 = arith.constant 0 : index
    %c0_370 = arith.constant 0 : index
    %1130 = vector.load %arg11[%c0_369, %c0_370] : memref<64x128xf32, #tpu.memory_space<vmem>>, vector<64x128xf32>
    %cst_371 = arith.constant dense<0.000000e+00> : vector<8x128xf32>
    %1131 = tpu.matmul %1129, %1130, %cst_371 {dimension_numbers = #tpu.dot_dimension_numbers<[1], [0], [0], [1], [0, 0, 1, 1], [], []>} : vector<8x64xf32>, vector<64x128xf32>, vector<8x128xf32> -> vector<8x128xf32>
    %c0_372 = arith.constant 0 : index
    %c0_373 = arith.constant 0 : index
    %1132 = vector.load %arg12[%c0_372, %c0_373] : memref<1x128xf32, #tpu.memory_space<vmem>>, vector<1x128xf32>
    %1133 = vector.broadcast %1132 : vector<1x128xf32> to vector<8x128xf32>
    %1134 = arith.addf %1131, %1133 : vector<8x128xf32>
    %1135 = arith.negf %1134 : vector<8x128xf32>
    %1136 = math.exp %1135 : vector<8x128xf32>
    %cst_374 = arith.constant 1.000000e+00 : f32
    %1137 = vector.broadcast %cst_374 : f32 to vector<8x128xf32>
    %1138 = arith.addf %1137, %1136 : vector<8x128xf32>
    %1139 = arith.divf %1137, %1138 : vector<8x128xf32>
    %1140 = math.tanh %1134 : vector<8x128xf32>
    %1141 = vector.extract_strided_slice %1139 {offsets = [0, 0], sizes = [8, 32], strides = [1, 1]} : vector<8x128xf32> to vector<8x32xf32>
    %1142 = vector.extract_strided_slice %1139 {offsets = [0, 32], sizes = [8, 32], strides = [1, 1]} : vector<8x128xf32> to vector<8x32xf32>
    %1143 = vector.extract_strided_slice %1140 {offsets = [0, 64], sizes = [8, 32], strides = [1, 1]} : vector<8x128xf32> to vector<8x32xf32>
    %1144 = vector.extract_strided_slice %1139 {offsets = [0, 96], sizes = [8, 32], strides = [1, 1]} : vector<8x128xf32> to vector<8x32xf32>
    %1145 = arith.mulf %1142, %1051 : vector<8x32xf32>
    %1146 = arith.mulf %1141, %1143 : vector<8x32xf32>
    %1147 = arith.addf %1145, %1146 : vector<8x32xf32>
    %1148 = math.tanh %1147 : vector<8x32xf32>
    %1149 = arith.mulf %1144, %1148 : vector<8x32xf32>
    %c0_375 = arith.constant 0 : index
    %c0_376 = arith.constant 0 : index
    %1150 = vector.load %arg13[%c0_375, %c0_376] : memref<32x128xf32, #tpu.memory_space<vmem>>, vector<32x128xf32>
    %cst_377 = arith.constant dense<0.000000e+00> : vector<8x128xf32>
    %1151 = tpu.matmul %1149, %1150, %cst_377 {dimension_numbers = #tpu.dot_dimension_numbers<[1], [0], [0], [1], [0, 0, 1, 1], [], []>} : vector<8x32xf32>, vector<32x128xf32>, vector<8x128xf32> -> vector<8x128xf32>
    %c0_378 = arith.constant 0 : index
    %c0_379 = arith.constant 0 : index
    %1152 = vector.load %arg14[%c0_378, %c0_379] : memref<1x128xf32, #tpu.memory_space<vmem>>, vector<1x128xf32>
    %1153 = vector.broadcast %1152 : vector<1x128xf32> to vector<8x128xf32>
    %1154 = arith.addf %1151, %1153 : vector<8x128xf32>
    %cst_380 = arith.constant dense<0xFF800000> : vector<8xf32>
    %1155 = vector.multi_reduction <maximumf>, %1154, %cst_380 [1] : vector<8x128xf32> to vector<8xf32>
    %1156 = vector.shape_cast %1155 : vector<8xf32> to vector<8x1xf32>
    %1157 = vector.broadcast %1156 : vector<8x1xf32> to vector<8x128xf32>
    %1158 = arith.subf %1154, %1157 : vector<8x128xf32>
    %1159 = math.exp %1158 : vector<8x128xf32>
    %cst_381 = arith.constant dense<0.000000e+00> : vector<8xf32>
    %1160 = vector.multi_reduction <add>, %1159, %cst_381 [1] : vector<8x128xf32> to vector<8xf32>
    %1161 = vector.shape_cast %1160 : vector<8xf32> to vector<8x1xf32>
    %1162 = math.log %1161 : vector<8x1xf32>
    %1163 = arith.addf %1156, %1162 : vector<8x1xf32>
    %1164 = arith.index_cast %c6_i32_359 : i32 to index
    %c0_382 = arith.constant 0 : index
    %c0_383 = arith.constant 0 : index
    %1165 = vector.load %arg2[%1164, %c0_382, %c0_383] : memref<10x8x128xf32, #tpu.memory_space<vmem>>, vector<1x8x128xf32>
    %1166 = vector.shape_cast %1165 : vector<1x8x128xf32> to vector<8x128xf32>
    %cst_384 = arith.constant dense<0.000000e+00> : vector<8xf32>
    %1167 = vector.multi_reduction <add>, %1166, %cst_384 [1] : vector<8x128xf32> to vector<8xf32>
    %1168 = vector.shape_cast %1167 : vector<8xf32> to vector<8x1xf32>
    %1169 = arith.mulf %1154, %1166 : vector<8x128xf32>
    %cst_385 = arith.constant dense<0.000000e+00> : vector<8xf32>
    %1170 = vector.multi_reduction <add>, %1169, %cst_385 [1] : vector<8x128xf32> to vector<8xf32>
    %1171 = vector.shape_cast %1170 : vector<8xf32> to vector<8x1xf32>
    %1172 = arith.mulf %1168, %1163 : vector<8x1xf32>
    %1173 = arith.subf %1172, %1171 : vector<8x1xf32>
    %1174 = vector.shape_cast %1173 : vector<8x1xf32> to vector<1x8x1xf32>
    %cst_386 = arith.constant dense<0.000000e+00> : vector<1xf32>
    %1175 = vector.multi_reduction <add>, %1174, %cst_386 [1, 2] : vector<1x8x1xf32> to vector<1xf32>
    %1176 = vector.shape_cast %1175 : vector<1xf32> to vector<1x1x1xf32>
    %1177 = vector.extract %1176[0, 0, 0] : f32 from vector<1x1x1xf32>
    %1178 = arith.addf %1082, %1177 : f32
    %1179 = vector.shape_cast %1168 : vector<8x1xf32> to vector<1x8x1xf32>
    %cst_387 = arith.constant dense<0.000000e+00> : vector<1xf32>
    %1180 = vector.multi_reduction <add>, %1179, %cst_387 [1, 2] : vector<1x8x1xf32> to vector<1xf32>
    %1181 = vector.shape_cast %1180 : vector<1xf32> to vector<1x1x1xf32>
    %1182 = vector.extract %1181[0, 0, 0] : f32 from vector<1x1x1xf32>
    %1183 = arith.addf %1087, %1182 : f32
    %1184 = vector.broadcast %1156 : vector<8x1xf32> to vector<8x128xf32>
    %1185 = arith.cmpf oeq, %1154, %1184 : vector<8x128xf32>
    %cst_388 = arith.constant 0.000000e+00 : f32
    %1186 = vector.broadcast %cst_388 : f32 to vector<8x128xf32>
    %1187 = arith.subf %1186, %525 : vector<8x128xf32>
    %cst_389 = arith.constant -1.280000e+02 : f32
    %1188 = vector.broadcast %cst_389 : f32 to vector<8x128xf32>
    %1189 = arith.select %1185, %1187, %1188 : vector<8x128xi1>, vector<8x128xf32>
    %cst_390 = arith.constant dense<0xFF800000> : vector<8xf32>
    %1190 = vector.multi_reduction <maximumf>, %1189, %cst_390 [1] : vector<8x128xf32> to vector<8xf32>
    %1191 = vector.shape_cast %1190 : vector<8xf32> to vector<8x1xf32>
    %cst_391 = arith.constant 0.000000e+00 : f32
    %1192 = vector.broadcast %cst_391 : f32 to vector<8x1xf32>
    %1193 = arith.subf %1192, %1191 : vector<8x1xf32>
    %1194 = vector.broadcast %1193 : vector<8x1xf32> to vector<8x128xf32>
    %1195 = arith.cmpf oeq, %525, %1194 : vector<8x128xf32>
    %1196 = arith.extui %1195 : vector<8x128xi1> to vector<8x128xi32>
    %1197 = arith.sitofp %1196 : vector<8x128xi32> to vector<8x128xf32>
    %1198 = arith.index_cast %c6_i32_359 : i32 to index
    %1199 = memref.load %arg0[%1198] : memref<10xi32, #tpu.memory_space<smem>>
    %c0_i32_392 = arith.constant 0 : i32
    %1200 = arith.cmpi sgt, %1199, %c0_i32_392 : i32
    %1201 = arith.select %1200, %1166, %1197 : vector<8x128xf32>
    %c7_i32_393 = arith.constant 7 : i32
    %c0_394 = arith.constant 0 : index
    %c0_395 = arith.constant 0 : index
    %1202 = vector.load %arg8[%c0_394, %c0_395] : memref<128x128xf32, #tpu.memory_space<vmem>>, vector<128x128xf32>
    %cst_396 = arith.constant dense<0.000000e+00> : vector<8x128xf32>
    %1203 = tpu.matmul %1201, %1202, %cst_396 {dimension_numbers = #tpu.dot_dimension_numbers<[1], [0], [0], [1], [0, 0, 1, 1], [], []>} : vector<8x128xf32>, vector<128x128xf32>, vector<8x128xf32> -> vector<8x128xf32>
    %c0_397 = arith.constant 0 : index
    %c0_398 = arith.constant 0 : index
    %1204 = vector.load %arg9[%c0_397, %c0_398] : memref<32x128xf32, #tpu.memory_space<vmem>>, vector<32x128xf32>
    %cst_399 = arith.constant dense<0.000000e+00> : vector<8x128xf32>
    %1205 = tpu.matmul %1128, %1204, %cst_399 {dimension_numbers = #tpu.dot_dimension_numbers<[1], [0], [0], [1], [0, 0, 1, 1], [], []>} : vector<8x32xf32>, vector<32x128xf32>, vector<8x128xf32> -> vector<8x128xf32>
    %1206 = arith.addf %1203, %1205 : vector<8x128xf32>
    %c0_400 = arith.constant 0 : index
    %c0_401 = arith.constant 0 : index
    %1207 = vector.load %arg10[%c0_400, %c0_401] : memref<1x128xf32, #tpu.memory_space<vmem>>, vector<1x128xf32>
    %1208 = vector.broadcast %1207 : vector<1x128xf32> to vector<8x128xf32>
    %1209 = arith.addf %1206, %1208 : vector<8x128xf32>
    %1210 = arith.negf %1209 : vector<8x128xf32>
    %1211 = math.exp %1210 : vector<8x128xf32>
    %cst_402 = arith.constant 1.000000e+00 : f32
    %1212 = vector.broadcast %cst_402 : f32 to vector<8x128xf32>
    %1213 = arith.addf %1212, %1211 : vector<8x128xf32>
    %1214 = arith.divf %1212, %1213 : vector<8x128xf32>
    %1215 = math.tanh %1209 : vector<8x128xf32>
    %1216 = vector.extract_strided_slice %1214 {offsets = [0, 0], sizes = [8, 32], strides = [1, 1]} : vector<8x128xf32> to vector<8x32xf32>
    %1217 = vector.extract_strided_slice %1214 {offsets = [0, 32], sizes = [8, 32], strides = [1, 1]} : vector<8x128xf32> to vector<8x32xf32>
    %1218 = vector.extract_strided_slice %1215 {offsets = [0, 64], sizes = [8, 32], strides = [1, 1]} : vector<8x128xf32> to vector<8x32xf32>
    %1219 = vector.extract_strided_slice %1214 {offsets = [0, 96], sizes = [8, 32], strides = [1, 1]} : vector<8x128xf32> to vector<8x32xf32>
    %1220 = arith.mulf %1217, %1126 : vector<8x32xf32>
    %1221 = arith.mulf %1216, %1218 : vector<8x32xf32>
    %1222 = arith.addf %1220, %1221 : vector<8x32xf32>
    %1223 = math.tanh %1222 : vector<8x32xf32>
    %1224 = arith.mulf %1219, %1223 : vector<8x32xf32>
    %1225 = tpu.concatenate %1224, %1149 in 1 : vector<8x32xf32>, vector<8x32xf32> -> vector<8x64xf32>
    %c0_403 = arith.constant 0 : index
    %c0_404 = arith.constant 0 : index
    %1226 = vector.load %arg11[%c0_403, %c0_404] : memref<64x128xf32, #tpu.memory_space<vmem>>, vector<64x128xf32>
    %cst_405 = arith.constant dense<0.000000e+00> : vector<8x128xf32>
    %1227 = tpu.matmul %1225, %1226, %cst_405 {dimension_numbers = #tpu.dot_dimension_numbers<[1], [0], [0], [1], [0, 0, 1, 1], [], []>} : vector<8x64xf32>, vector<64x128xf32>, vector<8x128xf32> -> vector<8x128xf32>
    %c0_406 = arith.constant 0 : index
    %c0_407 = arith.constant 0 : index
    %1228 = vector.load %arg12[%c0_406, %c0_407] : memref<1x128xf32, #tpu.memory_space<vmem>>, vector<1x128xf32>
    %1229 = vector.broadcast %1228 : vector<1x128xf32> to vector<8x128xf32>
    %1230 = arith.addf %1227, %1229 : vector<8x128xf32>
    %1231 = arith.negf %1230 : vector<8x128xf32>
    %1232 = math.exp %1231 : vector<8x128xf32>
    %cst_408 = arith.constant 1.000000e+00 : f32
    %1233 = vector.broadcast %cst_408 : f32 to vector<8x128xf32>
    %1234 = arith.addf %1233, %1232 : vector<8x128xf32>
    %1235 = arith.divf %1233, %1234 : vector<8x128xf32>
    %1236 = math.tanh %1230 : vector<8x128xf32>
    %1237 = vector.extract_strided_slice %1235 {offsets = [0, 0], sizes = [8, 32], strides = [1, 1]} : vector<8x128xf32> to vector<8x32xf32>
    %1238 = vector.extract_strided_slice %1235 {offsets = [0, 32], sizes = [8, 32], strides = [1, 1]} : vector<8x128xf32> to vector<8x32xf32>
    %1239 = vector.extract_strided_slice %1236 {offsets = [0, 64], sizes = [8, 32], strides = [1, 1]} : vector<8x128xf32> to vector<8x32xf32>
    %1240 = vector.extract_strided_slice %1235 {offsets = [0, 96], sizes = [8, 32], strides = [1, 1]} : vector<8x128xf32> to vector<8x32xf32>
    %1241 = arith.mulf %1238, %1147 : vector<8x32xf32>
    %1242 = arith.mulf %1237, %1239 : vector<8x32xf32>
    %1243 = arith.addf %1241, %1242 : vector<8x32xf32>
    %1244 = math.tanh %1243 : vector<8x32xf32>
    %1245 = arith.mulf %1240, %1244 : vector<8x32xf32>
    %c0_409 = arith.constant 0 : index
    %c0_410 = arith.constant 0 : index
    %1246 = vector.load %arg13[%c0_409, %c0_410] : memref<32x128xf32, #tpu.memory_space<vmem>>, vector<32x128xf32>
    %cst_411 = arith.constant dense<0.000000e+00> : vector<8x128xf32>
    %1247 = tpu.matmul %1245, %1246, %cst_411 {dimension_numbers = #tpu.dot_dimension_numbers<[1], [0], [0], [1], [0, 0, 1, 1], [], []>} : vector<8x32xf32>, vector<32x128xf32>, vector<8x128xf32> -> vector<8x128xf32>
    %c0_412 = arith.constant 0 : index
    %c0_413 = arith.constant 0 : index
    %1248 = vector.load %arg14[%c0_412, %c0_413] : memref<1x128xf32, #tpu.memory_space<vmem>>, vector<1x128xf32>
    %1249 = vector.broadcast %1248 : vector<1x128xf32> to vector<8x128xf32>
    %1250 = arith.addf %1247, %1249 : vector<8x128xf32>
    %cst_414 = arith.constant dense<0xFF800000> : vector<8xf32>
    %1251 = vector.multi_reduction <maximumf>, %1250, %cst_414 [1] : vector<8x128xf32> to vector<8xf32>
    %1252 = vector.shape_cast %1251 : vector<8xf32> to vector<8x1xf32>
    %1253 = vector.broadcast %1252 : vector<8x1xf32> to vector<8x128xf32>
    %1254 = arith.subf %1250, %1253 : vector<8x128xf32>
    %1255 = math.exp %1254 : vector<8x128xf32>
    %cst_415 = arith.constant dense<0.000000e+00> : vector<8xf32>
    %1256 = vector.multi_reduction <add>, %1255, %cst_415 [1] : vector<8x128xf32> to vector<8xf32>
    %1257 = vector.shape_cast %1256 : vector<8xf32> to vector<8x1xf32>
    %1258 = math.log %1257 : vector<8x1xf32>
    %1259 = arith.addf %1252, %1258 : vector<8x1xf32>
    %1260 = arith.index_cast %c7_i32_393 : i32 to index
    %c0_416 = arith.constant 0 : index
    %c0_417 = arith.constant 0 : index
    %1261 = vector.load %arg2[%1260, %c0_416, %c0_417] : memref<10x8x128xf32, #tpu.memory_space<vmem>>, vector<1x8x128xf32>
    %1262 = vector.shape_cast %1261 : vector<1x8x128xf32> to vector<8x128xf32>
    %cst_418 = arith.constant dense<0.000000e+00> : vector<8xf32>
    %1263 = vector.multi_reduction <add>, %1262, %cst_418 [1] : vector<8x128xf32> to vector<8xf32>
    %1264 = vector.shape_cast %1263 : vector<8xf32> to vector<8x1xf32>
    %1265 = arith.mulf %1250, %1262 : vector<8x128xf32>
    %cst_419 = arith.constant dense<0.000000e+00> : vector<8xf32>
    %1266 = vector.multi_reduction <add>, %1265, %cst_419 [1] : vector<8x128xf32> to vector<8xf32>
    %1267 = vector.shape_cast %1266 : vector<8xf32> to vector<8x1xf32>
    %1268 = arith.mulf %1264, %1259 : vector<8x1xf32>
    %1269 = arith.subf %1268, %1267 : vector<8x1xf32>
    %1270 = vector.shape_cast %1269 : vector<8x1xf32> to vector<1x8x1xf32>
    %cst_420 = arith.constant dense<0.000000e+00> : vector<1xf32>
    %1271 = vector.multi_reduction <add>, %1270, %cst_420 [1, 2] : vector<1x8x1xf32> to vector<1xf32>
    %1272 = vector.shape_cast %1271 : vector<1xf32> to vector<1x1x1xf32>
    %1273 = vector.extract %1272[0, 0, 0] : f32 from vector<1x1x1xf32>
    %1274 = arith.addf %1178, %1273 : f32
    %1275 = vector.shape_cast %1264 : vector<8x1xf32> to vector<1x8x1xf32>
    %cst_421 = arith.constant dense<0.000000e+00> : vector<1xf32>
    %1276 = vector.multi_reduction <add>, %1275, %cst_421 [1, 2] : vector<1x8x1xf32> to vector<1xf32>
    %1277 = vector.shape_cast %1276 : vector<1xf32> to vector<1x1x1xf32>
    %1278 = vector.extract %1277[0, 0, 0] : f32 from vector<1x1x1xf32>
    %1279 = arith.addf %1183, %1278 : f32
    %1280 = vector.broadcast %1252 : vector<8x1xf32> to vector<8x128xf32>
    %1281 = arith.cmpf oeq, %1250, %1280 : vector<8x128xf32>
    %cst_422 = arith.constant 0.000000e+00 : f32
    %1282 = vector.broadcast %cst_422 : f32 to vector<8x128xf32>
    %1283 = arith.subf %1282, %525 : vector<8x128xf32>
    %cst_423 = arith.constant -1.280000e+02 : f32
    %1284 = vector.broadcast %cst_423 : f32 to vector<8x128xf32>
    %1285 = arith.select %1281, %1283, %1284 : vector<8x128xi1>, vector<8x128xf32>
    %cst_424 = arith.constant dense<0xFF800000> : vector<8xf32>
    %1286 = vector.multi_reduction <maximumf>, %1285, %cst_424 [1] : vector<8x128xf32> to vector<8xf32>
    %1287 = vector.shape_cast %1286 : vector<8xf32> to vector<8x1xf32>
    %cst_425 = arith.constant 0.000000e+00 : f32
    %1288 = vector.broadcast %cst_425 : f32 to vector<8x1xf32>
    %1289 = arith.subf %1288, %1287 : vector<8x1xf32>
    %1290 = vector.broadcast %1289 : vector<8x1xf32> to vector<8x128xf32>
    %1291 = arith.cmpf oeq, %525, %1290 : vector<8x128xf32>
    %1292 = arith.extui %1291 : vector<8x128xi1> to vector<8x128xi32>
    %1293 = arith.sitofp %1292 : vector<8x128xi32> to vector<8x128xf32>
    %1294 = arith.index_cast %c7_i32_393 : i32 to index
    %1295 = memref.load %arg0[%1294] : memref<10xi32, #tpu.memory_space<smem>>
    %c0_i32_426 = arith.constant 0 : i32
    %1296 = arith.cmpi sgt, %1295, %c0_i32_426 : i32
    %1297 = arith.select %1296, %1262, %1293 : vector<8x128xf32>
    %c8_i32_427 = arith.constant 8 : i32
    %c0_428 = arith.constant 0 : index
    %c0_429 = arith.constant 0 : index
    %1298 = vector.load %arg8[%c0_428, %c0_429] : memref<128x128xf32, #tpu.memory_space<vmem>>, vector<128x128xf32>
    %cst_430 = arith.constant dense<0.000000e+00> : vector<8x128xf32>
    %1299 = tpu.matmul %1297, %1298, %cst_430 {dimension_numbers = #tpu.dot_dimension_numbers<[1], [0], [0], [1], [0, 0, 1, 1], [], []>} : vector<8x128xf32>, vector<128x128xf32>, vector<8x128xf32> -> vector<8x128xf32>
    %c0_431 = arith.constant 0 : index
    %c0_432 = arith.constant 0 : index
    %1300 = vector.load %arg9[%c0_431, %c0_432] : memref<32x128xf32, #tpu.memory_space<vmem>>, vector<32x128xf32>
    %cst_433 = arith.constant dense<0.000000e+00> : vector<8x128xf32>
    %1301 = tpu.matmul %1224, %1300, %cst_433 {dimension_numbers = #tpu.dot_dimension_numbers<[1], [0], [0], [1], [0, 0, 1, 1], [], []>} : vector<8x32xf32>, vector<32x128xf32>, vector<8x128xf32> -> vector<8x128xf32>
    %1302 = arith.addf %1299, %1301 : vector<8x128xf32>
    %c0_434 = arith.constant 0 : index
    %c0_435 = arith.constant 0 : index
    %1303 = vector.load %arg10[%c0_434, %c0_435] : memref<1x128xf32, #tpu.memory_space<vmem>>, vector<1x128xf32>
    %1304 = vector.broadcast %1303 : vector<1x128xf32> to vector<8x128xf32>
    %1305 = arith.addf %1302, %1304 : vector<8x128xf32>
    %1306 = arith.negf %1305 : vector<8x128xf32>
    %1307 = math.exp %1306 : vector<8x128xf32>
    %cst_436 = arith.constant 1.000000e+00 : f32
    %1308 = vector.broadcast %cst_436 : f32 to vector<8x128xf32>
    %1309 = arith.addf %1308, %1307 : vector<8x128xf32>
    %1310 = arith.divf %1308, %1309 : vector<8x128xf32>
    %1311 = math.tanh %1305 : vector<8x128xf32>
    %1312 = vector.extract_strided_slice %1310 {offsets = [0, 0], sizes = [8, 32], strides = [1, 1]} : vector<8x128xf32> to vector<8x32xf32>
    %1313 = vector.extract_strided_slice %1310 {offsets = [0, 32], sizes = [8, 32], strides = [1, 1]} : vector<8x128xf32> to vector<8x32xf32>
    %1314 = vector.extract_strided_slice %1311 {offsets = [0, 64], sizes = [8, 32], strides = [1, 1]} : vector<8x128xf32> to vector<8x32xf32>
    %1315 = vector.extract_strided_slice %1310 {offsets = [0, 96], sizes = [8, 32], strides = [1, 1]} : vector<8x128xf32> to vector<8x32xf32>
    %1316 = arith.mulf %1313, %1222 : vector<8x32xf32>
    %1317 = arith.mulf %1312, %1314 : vector<8x32xf32>
    %1318 = arith.addf %1316, %1317 : vector<8x32xf32>
    %1319 = math.tanh %1318 : vector<8x32xf32>
    %1320 = arith.mulf %1315, %1319 : vector<8x32xf32>
    %1321 = tpu.concatenate %1320, %1245 in 1 : vector<8x32xf32>, vector<8x32xf32> -> vector<8x64xf32>
    %c0_437 = arith.constant 0 : index
    %c0_438 = arith.constant 0 : index
    %1322 = vector.load %arg11[%c0_437, %c0_438] : memref<64x128xf32, #tpu.memory_space<vmem>>, vector<64x128xf32>
    %cst_439 = arith.constant dense<0.000000e+00> : vector<8x128xf32>
    %1323 = tpu.matmul %1321, %1322, %cst_439 {dimension_numbers = #tpu.dot_dimension_numbers<[1], [0], [0], [1], [0, 0, 1, 1], [], []>} : vector<8x64xf32>, vector<64x128xf32>, vector<8x128xf32> -> vector<8x128xf32>
    %c0_440 = arith.constant 0 : index
    %c0_441 = arith.constant 0 : index
    %1324 = vector.load %arg12[%c0_440, %c0_441] : memref<1x128xf32, #tpu.memory_space<vmem>>, vector<1x128xf32>
    %1325 = vector.broadcast %1324 : vector<1x128xf32> to vector<8x128xf32>
    %1326 = arith.addf %1323, %1325 : vector<8x128xf32>
    %1327 = arith.negf %1326 : vector<8x128xf32>
    %1328 = math.exp %1327 : vector<8x128xf32>
    %cst_442 = arith.constant 1.000000e+00 : f32
    %1329 = vector.broadcast %cst_442 : f32 to vector<8x128xf32>
    %1330 = arith.addf %1329, %1328 : vector<8x128xf32>
    %1331 = arith.divf %1329, %1330 : vector<8x128xf32>
    %1332 = math.tanh %1326 : vector<8x128xf32>
    %1333 = vector.extract_strided_slice %1331 {offsets = [0, 0], sizes = [8, 32], strides = [1, 1]} : vector<8x128xf32> to vector<8x32xf32>
    %1334 = vector.extract_strided_slice %1331 {offsets = [0, 32], sizes = [8, 32], strides = [1, 1]} : vector<8x128xf32> to vector<8x32xf32>
    %1335 = vector.extract_strided_slice %1332 {offsets = [0, 64], sizes = [8, 32], strides = [1, 1]} : vector<8x128xf32> to vector<8x32xf32>
    %1336 = vector.extract_strided_slice %1331 {offsets = [0, 96], sizes = [8, 32], strides = [1, 1]} : vector<8x128xf32> to vector<8x32xf32>
    %1337 = arith.mulf %1334, %1243 : vector<8x32xf32>
    %1338 = arith.mulf %1333, %1335 : vector<8x32xf32>
    %1339 = arith.addf %1337, %1338 : vector<8x32xf32>
    %1340 = math.tanh %1339 : vector<8x32xf32>
    %1341 = arith.mulf %1336, %1340 : vector<8x32xf32>
    %c0_443 = arith.constant 0 : index
    %c0_444 = arith.constant 0 : index
    %1342 = vector.load %arg13[%c0_443, %c0_444] : memref<32x128xf32, #tpu.memory_space<vmem>>, vector<32x128xf32>
    %cst_445 = arith.constant dense<0.000000e+00> : vector<8x128xf32>
    %1343 = tpu.matmul %1341, %1342, %cst_445 {dimension_numbers = #tpu.dot_dimension_numbers<[1], [0], [0], [1], [0, 0, 1, 1], [], []>} : vector<8x32xf32>, vector<32x128xf32>, vector<8x128xf32> -> vector<8x128xf32>
    %c0_446 = arith.constant 0 : index
    %c0_447 = arith.constant 0 : index
    %1344 = vector.load %arg14[%c0_446, %c0_447] : memref<1x128xf32, #tpu.memory_space<vmem>>, vector<1x128xf32>
    %1345 = vector.broadcast %1344 : vector<1x128xf32> to vector<8x128xf32>
    %1346 = arith.addf %1343, %1345 : vector<8x128xf32>
    %cst_448 = arith.constant dense<0xFF800000> : vector<8xf32>
    %1347 = vector.multi_reduction <maximumf>, %1346, %cst_448 [1] : vector<8x128xf32> to vector<8xf32>
    %1348 = vector.shape_cast %1347 : vector<8xf32> to vector<8x1xf32>
    %1349 = vector.broadcast %1348 : vector<8x1xf32> to vector<8x128xf32>
    %1350 = arith.subf %1346, %1349 : vector<8x128xf32>
    %1351 = math.exp %1350 : vector<8x128xf32>
    %cst_449 = arith.constant dense<0.000000e+00> : vector<8xf32>
    %1352 = vector.multi_reduction <add>, %1351, %cst_449 [1] : vector<8x128xf32> to vector<8xf32>
    %1353 = vector.shape_cast %1352 : vector<8xf32> to vector<8x1xf32>
    %1354 = math.log %1353 : vector<8x1xf32>
    %1355 = arith.addf %1348, %1354 : vector<8x1xf32>
    %1356 = arith.index_cast %c8_i32_427 : i32 to index
    %c0_450 = arith.constant 0 : index
    %c0_451 = arith.constant 0 : index
    %1357 = vector.load %arg2[%1356, %c0_450, %c0_451] : memref<10x8x128xf32, #tpu.memory_space<vmem>>, vector<1x8x128xf32>
    %1358 = vector.shape_cast %1357 : vector<1x8x128xf32> to vector<8x128xf32>
    %cst_452 = arith.constant dense<0.000000e+00> : vector<8xf32>
    %1359 = vector.multi_reduction <add>, %1358, %cst_452 [1] : vector<8x128xf32> to vector<8xf32>
    %1360 = vector.shape_cast %1359 : vector<8xf32> to vector<8x1xf32>
    %1361 = arith.mulf %1346, %1358 : vector<8x128xf32>
    %cst_453 = arith.constant dense<0.000000e+00> : vector<8xf32>
    %1362 = vector.multi_reduction <add>, %1361, %cst_453 [1] : vector<8x128xf32> to vector<8xf32>
    %1363 = vector.shape_cast %1362 : vector<8xf32> to vector<8x1xf32>
    %1364 = arith.mulf %1360, %1355 : vector<8x1xf32>
    %1365 = arith.subf %1364, %1363 : vector<8x1xf32>
    %1366 = vector.shape_cast %1365 : vector<8x1xf32> to vector<1x8x1xf32>
    %cst_454 = arith.constant dense<0.000000e+00> : vector<1xf32>
    %1367 = vector.multi_reduction <add>, %1366, %cst_454 [1, 2] : vector<1x8x1xf32> to vector<1xf32>
    %1368 = vector.shape_cast %1367 : vector<1xf32> to vector<1x1x1xf32>
    %1369 = vector.extract %1368[0, 0, 0] : f32 from vector<1x1x1xf32>
    %1370 = arith.addf %1274, %1369 : f32
    %1371 = vector.shape_cast %1360 : vector<8x1xf32> to vector<1x8x1xf32>
    %cst_455 = arith.constant dense<0.000000e+00> : vector<1xf32>
    %1372 = vector.multi_reduction <add>, %1371, %cst_455 [1, 2] : vector<1x8x1xf32> to vector<1xf32>
    %1373 = vector.shape_cast %1372 : vector<1xf32> to vector<1x1x1xf32>
    %1374 = vector.extract %1373[0, 0, 0] : f32 from vector<1x1x1xf32>
    %1375 = arith.addf %1279, %1374 : f32
    %1376 = vector.broadcast %1348 : vector<8x1xf32> to vector<8x128xf32>
    %1377 = arith.cmpf oeq, %1346, %1376 : vector<8x128xf32>
    %cst_456 = arith.constant 0.000000e+00 : f32
    %1378 = vector.broadcast %cst_456 : f32 to vector<8x128xf32>
    %1379 = arith.subf %1378, %525 : vector<8x128xf32>
    %cst_457 = arith.constant -1.280000e+02 : f32
    %1380 = vector.broadcast %cst_457 : f32 to vector<8x128xf32>
    %1381 = arith.select %1377, %1379, %1380 : vector<8x128xi1>, vector<8x128xf32>
    %cst_458 = arith.constant dense<0xFF800000> : vector<8xf32>
    %1382 = vector.multi_reduction <maximumf>, %1381, %cst_458 [1] : vector<8x128xf32> to vector<8xf32>
    %1383 = vector.shape_cast %1382 : vector<8xf32> to vector<8x1xf32>
    %cst_459 = arith.constant 0.000000e+00 : f32
    %1384 = vector.broadcast %cst_459 : f32 to vector<8x1xf32>
    %1385 = arith.subf %1384, %1383 : vector<8x1xf32>
    %1386 = vector.broadcast %1385 : vector<8x1xf32> to vector<8x128xf32>
    %1387 = arith.cmpf oeq, %525, %1386 : vector<8x128xf32>
    %1388 = arith.extui %1387 : vector<8x128xi1> to vector<8x128xi32>
    %1389 = arith.sitofp %1388 : vector<8x128xi32> to vector<8x128xf32>
    %1390 = arith.index_cast %c8_i32_427 : i32 to index
    %1391 = memref.load %arg0[%1390] : memref<10xi32, #tpu.memory_space<smem>>
    %c0_i32_460 = arith.constant 0 : i32
    %1392 = arith.cmpi sgt, %1391, %c0_i32_460 : i32
    %1393 = arith.select %1392, %1358, %1389 : vector<8x128xf32>
    %c9_i32_461 = arith.constant 9 : i32
    %c0_462 = arith.constant 0 : index
    %c0_463 = arith.constant 0 : index
    %1394 = vector.load %arg8[%c0_462, %c0_463] : memref<128x128xf32, #tpu.memory_space<vmem>>, vector<128x128xf32>
    %cst_464 = arith.constant dense<0.000000e+00> : vector<8x128xf32>
    %1395 = tpu.matmul %1393, %1394, %cst_464 {dimension_numbers = #tpu.dot_dimension_numbers<[1], [0], [0], [1], [0, 0, 1, 1], [], []>} : vector<8x128xf32>, vector<128x128xf32>, vector<8x128xf32> -> vector<8x128xf32>
    %c0_465 = arith.constant 0 : index
    %c0_466 = arith.constant 0 : index
    %1396 = vector.load %arg9[%c0_465, %c0_466] : memref<32x128xf32, #tpu.memory_space<vmem>>, vector<32x128xf32>
    %cst_467 = arith.constant dense<0.000000e+00> : vector<8x128xf32>
    %1397 = tpu.matmul %1320, %1396, %cst_467 {dimension_numbers = #tpu.dot_dimension_numbers<[1], [0], [0], [1], [0, 0, 1, 1], [], []>} : vector<8x32xf32>, vector<32x128xf32>, vector<8x128xf32> -> vector<8x128xf32>
    %1398 = arith.addf %1395, %1397 : vector<8x128xf32>
    %c0_468 = arith.constant 0 : index
    %c0_469 = arith.constant 0 : index
    %1399 = vector.load %arg10[%c0_468, %c0_469] : memref<1x128xf32, #tpu.memory_space<vmem>>, vector<1x128xf32>
    %1400 = vector.broadcast %1399 : vector<1x128xf32> to vector<8x128xf32>
    %1401 = arith.addf %1398, %1400 : vector<8x128xf32>
    %1402 = arith.negf %1401 : vector<8x128xf32>
    %1403 = math.exp %1402 : vector<8x128xf32>
    %cst_470 = arith.constant 1.000000e+00 : f32
    %1404 = vector.broadcast %cst_470 : f32 to vector<8x128xf32>
    %1405 = arith.addf %1404, %1403 : vector<8x128xf32>
    %1406 = arith.divf %1404, %1405 : vector<8x128xf32>
    %1407 = math.tanh %1401 : vector<8x128xf32>
    %1408 = vector.extract_strided_slice %1406 {offsets = [0, 0], sizes = [8, 32], strides = [1, 1]} : vector<8x128xf32> to vector<8x32xf32>
    %1409 = vector.extract_strided_slice %1406 {offsets = [0, 32], sizes = [8, 32], strides = [1, 1]} : vector<8x128xf32> to vector<8x32xf32>
    %1410 = vector.extract_strided_slice %1407 {offsets = [0, 64], sizes = [8, 32], strides = [1, 1]} : vector<8x128xf32> to vector<8x32xf32>
    %1411 = vector.extract_strided_slice %1406 {offsets = [0, 96], sizes = [8, 32], strides = [1, 1]} : vector<8x128xf32> to vector<8x32xf32>
    %1412 = arith.mulf %1409, %1318 : vector<8x32xf32>
    %1413 = arith.mulf %1408, %1410 : vector<8x32xf32>
    %1414 = arith.addf %1412, %1413 : vector<8x32xf32>
    %1415 = math.tanh %1414 : vector<8x32xf32>
    %1416 = arith.mulf %1411, %1415 : vector<8x32xf32>
    %1417 = tpu.concatenate %1416, %1341 in 1 : vector<8x32xf32>, vector<8x32xf32> -> vector<8x64xf32>
    %c0_471 = arith.constant 0 : index
    %c0_472 = arith.constant 0 : index
    %1418 = vector.load %arg11[%c0_471, %c0_472] : memref<64x128xf32, #tpu.memory_space<vmem>>, vector<64x128xf32>
    %cst_473 = arith.constant dense<0.000000e+00> : vector<8x128xf32>
    %1419 = tpu.matmul %1417, %1418, %cst_473 {dimension_numbers = #tpu.dot_dimension_numbers<[1], [0], [0], [1], [0, 0, 1, 1], [], []>} : vector<8x64xf32>, vector<64x128xf32>, vector<8x128xf32> -> vector<8x128xf32>
    %c0_474 = arith.constant 0 : index
    %c0_475 = arith.constant 0 : index
    %1420 = vector.load %arg12[%c0_474, %c0_475] : memref<1x128xf32, #tpu.memory_space<vmem>>, vector<1x128xf32>
    %1421 = vector.broadcast %1420 : vector<1x128xf32> to vector<8x128xf32>
    %1422 = arith.addf %1419, %1421 : vector<8x128xf32>
    %1423 = arith.negf %1422 : vector<8x128xf32>
    %1424 = math.exp %1423 : vector<8x128xf32>
    %cst_476 = arith.constant 1.000000e+00 : f32
    %1425 = vector.broadcast %cst_476 : f32 to vector<8x128xf32>
    %1426 = arith.addf %1425, %1424 : vector<8x128xf32>
    %1427 = arith.divf %1425, %1426 : vector<8x128xf32>
    %1428 = math.tanh %1422 : vector<8x128xf32>
    %1429 = vector.extract_strided_slice %1427 {offsets = [0, 0], sizes = [8, 32], strides = [1, 1]} : vector<8x128xf32> to vector<8x32xf32>
    %1430 = vector.extract_strided_slice %1427 {offsets = [0, 32], sizes = [8, 32], strides = [1, 1]} : vector<8x128xf32> to vector<8x32xf32>
    %1431 = vector.extract_strided_slice %1428 {offsets = [0, 64], sizes = [8, 32], strides = [1, 1]} : vector<8x128xf32> to vector<8x32xf32>
    %1432 = vector.extract_strided_slice %1427 {offsets = [0, 96], sizes = [8, 32], strides = [1, 1]} : vector<8x128xf32> to vector<8x32xf32>
    %1433 = arith.mulf %1430, %1339 : vector<8x32xf32>
    %1434 = arith.mulf %1429, %1431 : vector<8x32xf32>
    %1435 = arith.addf %1433, %1434 : vector<8x32xf32>
    %1436 = math.tanh %1435 : vector<8x32xf32>
    %1437 = arith.mulf %1432, %1436 : vector<8x32xf32>
    %c0_477 = arith.constant 0 : index
    %c0_478 = arith.constant 0 : index
    %1438 = vector.load %arg13[%c0_477, %c0_478] : memref<32x128xf32, #tpu.memory_space<vmem>>, vector<32x128xf32>
    %cst_479 = arith.constant dense<0.000000e+00> : vector<8x128xf32>
    %1439 = tpu.matmul %1437, %1438, %cst_479 {dimension_numbers = #tpu.dot_dimension_numbers<[1], [0], [0], [1], [0, 0, 1, 1], [], []>} : vector<8x32xf32>, vector<32x128xf32>, vector<8x128xf32> -> vector<8x128xf32>
    %c0_480 = arith.constant 0 : index
    %c0_481 = arith.constant 0 : index
    %1440 = vector.load %arg14[%c0_480, %c0_481] : memref<1x128xf32, #tpu.memory_space<vmem>>, vector<1x128xf32>
    %1441 = vector.broadcast %1440 : vector<1x128xf32> to vector<8x128xf32>
    %1442 = arith.addf %1439, %1441 : vector<8x128xf32>
    %cst_482 = arith.constant dense<0xFF800000> : vector<8xf32>
    %1443 = vector.multi_reduction <maximumf>, %1442, %cst_482 [1] : vector<8x128xf32> to vector<8xf32>
    %1444 = vector.shape_cast %1443 : vector<8xf32> to vector<8x1xf32>
    %1445 = vector.broadcast %1444 : vector<8x1xf32> to vector<8x128xf32>
    %1446 = arith.subf %1442, %1445 : vector<8x128xf32>
    %1447 = math.exp %1446 : vector<8x128xf32>
    %cst_483 = arith.constant dense<0.000000e+00> : vector<8xf32>
    %1448 = vector.multi_reduction <add>, %1447, %cst_483 [1] : vector<8x128xf32> to vector<8xf32>
    %1449 = vector.shape_cast %1448 : vector<8xf32> to vector<8x1xf32>
    %1450 = math.log %1449 : vector<8x1xf32>
    %1451 = arith.addf %1444, %1450 : vector<8x1xf32>
    %1452 = arith.index_cast %c9_i32_461 : i32 to index
    %c0_484 = arith.constant 0 : index
    %c0_485 = arith.constant 0 : index
    %1453 = vector.load %arg2[%1452, %c0_484, %c0_485] : memref<10x8x128xf32, #tpu.memory_space<vmem>>, vector<1x8x128xf32>
    %1454 = vector.shape_cast %1453 : vector<1x8x128xf32> to vector<8x128xf32>
    %cst_486 = arith.constant dense<0.000000e+00> : vector<8xf32>
    %1455 = vector.multi_reduction <add>, %1454, %cst_486 [1] : vector<8x128xf32> to vector<8xf32>
    %1456 = vector.shape_cast %1455 : vector<8xf32> to vector<8x1xf32>
    %1457 = arith.mulf %1442, %1454 : vector<8x128xf32>
    %cst_487 = arith.constant dense<0.000000e+00> : vector<8xf32>
    %1458 = vector.multi_reduction <add>, %1457, %cst_487 [1] : vector<8x128xf32> to vector<8xf32>
    %1459 = vector.shape_cast %1458 : vector<8xf32> to vector<8x1xf32>
    %1460 = arith.mulf %1456, %1451 : vector<8x1xf32>
    %1461 = arith.subf %1460, %1459 : vector<8x1xf32>
    %1462 = vector.shape_cast %1461 : vector<8x1xf32> to vector<1x8x1xf32>
    %cst_488 = arith.constant dense<0.000000e+00> : vector<1xf32>
    %1463 = vector.multi_reduction <add>, %1462, %cst_488 [1, 2] : vector<1x8x1xf32> to vector<1xf32>
    %1464 = vector.shape_cast %1463 : vector<1xf32> to vector<1x1x1xf32>
    %1465 = vector.extract %1464[0, 0, 0] : f32 from vector<1x1x1xf32>
    %1466 = arith.addf %1370, %1465 : f32
    %1467 = vector.shape_cast %1456 : vector<8x1xf32> to vector<1x8x1xf32>
    %cst_489 = arith.constant dense<0.000000e+00> : vector<1xf32>
    %1468 = vector.multi_reduction <add>, %1467, %cst_489 [1, 2] : vector<1x8x1xf32> to vector<1xf32>
    %1469 = vector.shape_cast %1468 : vector<1xf32> to vector<1x1x1xf32>
    %1470 = vector.extract %1469[0, 0, 0] : f32 from vector<1x1x1xf32>
    %1471 = arith.addf %1375, %1470 : f32
    %1472 = vector.broadcast %1444 : vector<8x1xf32> to vector<8x128xf32>
    %1473 = arith.cmpf oeq, %1442, %1472 : vector<8x128xf32>
    %cst_490 = arith.constant 0.000000e+00 : f32
    %1474 = vector.broadcast %cst_490 : f32 to vector<8x128xf32>
    %1475 = arith.subf %1474, %525 : vector<8x128xf32>
    %cst_491 = arith.constant -1.280000e+02 : f32
    %1476 = vector.broadcast %cst_491 : f32 to vector<8x128xf32>
    %1477 = arith.select %1473, %1475, %1476 : vector<8x128xi1>, vector<8x128xf32>
    %cst_492 = arith.constant dense<0xFF800000> : vector<8xf32>
    %1478 = vector.multi_reduction <maximumf>, %1477, %cst_492 [1] : vector<8x128xf32> to vector<8xf32>
    %1479 = vector.shape_cast %1478 : vector<8xf32> to vector<8x1xf32>
    %cst_493 = arith.constant 0.000000e+00 : f32
    %1480 = vector.broadcast %cst_493 : f32 to vector<8x1xf32>
    %1481 = arith.subf %1480, %1479 : vector<8x1xf32>
    %1482 = vector.broadcast %1481 : vector<8x1xf32> to vector<8x128xf32>
    %1483 = arith.cmpf oeq, %525, %1482 : vector<8x128xf32>
    %1484 = arith.extui %1483 : vector<8x128xi1> to vector<8x128xi32>
    %1485 = arith.sitofp %1484 : vector<8x128xi32> to vector<8x128xf32>
    %1486 = arith.index_cast %c9_i32_461 : i32 to index
    %1487 = memref.load %arg0[%1486] : memref<10xi32, #tpu.memory_space<smem>>
    %c0_i32_494 = arith.constant 0 : i32
    %1488 = arith.cmpi sgt, %1487, %c0_i32_494 : i32
    %1489 = arith.select %1488, %1454, %1485 : vector<8x128xf32>
    %c10_i32_495 = arith.constant 10 : i32
    %cst_496 = arith.constant 1.000000e+00 : f32
    %1490 = arith.maximumf %1471, %cst_496 : f32
    %1491 = arith.divf %1466, %1490 : f32
    %c0_497 = arith.constant 0 : index
    %c0_498 = arith.constant 0 : index
    %1492 = memref.load %arg15[%c0_497, %c0_498] : memref<1x1xf32, #tpu.memory_space<smem>>
    memref.store %1491, %arg15[%c0_497, %c0_498] : memref<1x1xf32, #tpu.memory_space<smem>>
    return
  }
}

</mosaic_0001>

<bundles_post_ra>
// kernel: seq2seq_loss.1
= control target key start
LH: loop header
LB: loop body
LE: loop exit
PB: predicated region body
PF: predicated region fallthrough
CT: control target
= control target key end

     0   :  { %20 = vsyncpa [#allocation5], 0  ;;  %s11641_s0 = inlined_call_operand.vmem [shape: s32[10], index: 0, kind: input, shape index: {}]   ;;  %s11642_s1 = inlined_call_operand.vmem [shape: f32[96,64], index: 1, kind: input, shape index: {}]   ;;  %s11643_s2 = inlined_call_operand.vmem [shape: f32[10,8,128], index: 2, kind: input, shape index: {}]   ;;  %s11644_s3 = inlined_call_operand.vmem [shape: f32[64,128], index: 3, kind: input, shape index: {}]   ;;  %s11645_s4 = inlined_call_operand.vmem [shape: f32[32,128], index: 4, kind: input, shape index: {}]   ;;  %s11646_s5 = inlined_call_operand.vmem [shape: f32[1,128], index: 5, kind: input, shape index: {}]   ;;  %s11647_s6 = inlined_call_operand.vmem [shape: f32[64,128], index: 6, kind: input, shape index: {}]   ;;  %s11648_s7 = inlined_call_operand.vmem [shape: f32[1,128], index: 7, kind: input, shape index: {}]   ;;  %s11649_s8 = inlined_call_operand.vmem [shape: f32[128,128], index: 8, kind: input, shape index: {}]   ;;  %s11650_s9 = inlined_call_operand.vmem [shape: f32[32,128], index: 9, kind: input, shape index: {}]   ;;  %s11651_s10 = inlined_call_operand.vmem [shape: f32[1,128], index: 10, kind: input, shape index: {}]   ;;  %s11652_s11 = inlined_call_operand.vmem [shape: f32[64,128], index: 11, kind: input, shape index: {}]   ;;  %s11653_s12 = inlined_call_operand.vmem [shape: f32[1,128], index: 12, kind: input, shape index: {}]   ;;  %s11654_s13 = inlined_call_operand.vmem [shape: f32[32,128], index: 13, kind: input, shape index: {}]   ;;  %s11655_s14 = inlined_call_operand.vmem [shape: f32[1,128], index: 14, kind: input, shape index: {}]   ;;  %s11656_s15 = inlined_call_operand.hbm [shape: f32[1,1], index: 15, kind: output, shape index: {}]  }
   0x1   :  { %21 = vsyncpa [#allocation4], 0  ;;  %s28_s20 = sshll.u32 %s11641_s0, 4  ;;  %s29_s20 = int_to_ptr.vmem [resolvable:$true] %s28_s20 }
   0x2   :  { %s9840_s21 = scalar_lea.vmem %s29_s20, 16  ;;  %p9845_p1 = scmp.lt.s32.totalorder %s29_s20, %s29_s20 }
   0x3   :  { %p9841_p0 = scmp.ne.s32.totalorder %s29_s20, %s9840_s21  ;;  %p9846_p2 = scmp.lt.s32.totalorder %s9840_s21, %s9840_s21 }
   0x5   :  { %p9847_p3 = por %p9846_p2, %p9845_p1 }
   0x7   :  { %p9848_p4 = pnand %p9847_p3, %p9841_p0 }
   0x9   :  { %9851 = shalt.err (!%p9848_p4)
}
   0xa   :  { %s9866_s22 = smov [#allocation3]  }
   0xb   :  { %31 = dma.vmem_to_smem %s29_s20, 16, %s9866_s22, [#allocation5]  }
   0xc   :  { %9862 = dma.done.wait [#allocation5], 16  }
   0xd   :  { %9863 = vsyncadd [#allocation5], 4294967280 }
   0xe   :  { %63 = sfence }
   0xf   :  { %v76_v0 = vld [vmem:[%s11644_s3] sm:$0xff]  ;;  %v77_v1 = vld [vmem:[%s11644_s3 + $0x8] sm:$0xff]  ;;  %v78_v2 = vld [vmem:[%s11644_s3 + $0x10] sm:$0xff]  ;;  %v9867_v6 = vmov 0.0|0.0   ;;  %vm91_vm0 = vcmask 523264   ;;  %vm9868_vm1 = vmmov 0  }
  0x10   :  { %v8673_v3 = vpack.c.bf16 %v77_v1, %v76_v0  ;;  %v79_v4 = vld [vmem:[%s11644_s3 + $0x18] sm:$0xff]  ;;  %v80_v5 = vld [vmem:[%s11644_s3 + $0x20] sm:$0xff]  ;;  %8689 = vmatprep.subr.bf16.mxu1 %v9867_v6  ;;  %v81_v8 = vld [vmem:[%s11644_s3 + $0x28] sm:$0xff]  ;;  %v9869_v11 = vmov 0.0   ;;  %s9870_s19 = smov 64   ;;  %s9871_s20 = smov 32  }
  0x11   :  { %v8677_v7 = vpack.c.bf16 %v79_v4, %v78_v2  ;;  %v266_v9 = vld [vmem:[%s11645_s4] sm:$0xff]  ;;  %v267_v10 = vld [vmem:[%s11645_s4 + $0x8] sm:$0xff]  ;;  %7561 = vmatprep.mubr.msk.f32.mxu1 %vm9868_vm1, %v9869_v11  ;;  %v268_v14 = vld [vmem:[%s11645_s4 + $0x10] sm:$0xff]  ;;  %v8681_v16 = vpack.c.bf16 %v81_v8, %v80_v5  ;;  %vm270_vm2 = vcmask 261120   ;;  %s3198_s28 = sld [smem:[#allocation3]]  ;;  %s6916_s18 = sld [smem:[#allocation3 + $0x2]] }
  0x12   :  { %8674 = vmatprep.subr.bf16.mxu0 %v8673_v3  ;;  %v9985_v12 = vpack.c.bf16 %v267_v10, %v266_v9  ;;  %v64_v13 = vld [vmem:[%s11642_s1] sm:$0xff]  ;;  %v269_v15 = vld [vmem:[%s11645_s4 + $0x18] sm:$0xff]  ;;  %v82_v18 = vld [vmem:[%s11644_s3 + $0x30] sm:$0xff]  ;;  %s6908_s4 = sld [smem:[#allocation3 + $0x1]]  ;;  %s6932_s25 = sld [smem:[#allocation3 + $0x4]] }
  0x13   :  { %8676 = vmatpush3.bf16.msra.mxu0 %v8673_v3  ;;  %7535 = vmatprep.mubr.msk.f32.mxu0 %vm91_vm0, %v64_v13  ;;  %v9998_v17 = vpack.c.bf16 %v269_v15, %v268_v14  ;;  %v83_v19 = vld [vmem:[%s11644_s3 + $0x38] sm:$0xff]  ;;  %v65_v21 = vld [vmem:[%s11642_s1 + $0x8] sm:$0xff]  ;;  %v10020_v24 = vld [vmem:[%s11646_s5] ss:$0 sm:$0xff]  ;;  %s6948_s16 = sld [smem:[#allocation3 + $0x6]]  ;;  %s6956_s3 = sld [smem:[#allocation3 + $0x7]] }
  0x14   :  { %8678 = vmatprep.subr.bf16.mxu0 %v8677_v7  ;;  %8691 = vmatpush3.bf16.msra.mxu1 %v9985_v12  ;;  %v8685_v20 = vpack.c.bf16 %v83_v19, %v82_v18  ;;  %v374_v39 = vld [vmem:[%s11647_s6] sm:$0xff]  ;;  %v375_v40 = vld [vmem:[%s11647_s6 + $0x8] sm:$0xff]  ;;  %v376_v41 = vld [vmem:[%s11647_s6 + $0x10] sm:$0xff]  ;;  %s6964_s22 = sld [smem:[#allocation3 + $0x8]] }
  0x15   :  { %8692 = vmatprep.subr.bf16.mxu1 %v9867_v6  ;;  %v10039_v42 = vpack.c.bf16 %v375_v40, %v374_v39  ;;  %v377_v43 = vld [vmem:[%s11647_s6 + $0x18] sm:$0xff]  ;;  %v378_v45 = vld [vmem:[%s11647_s6 + $0x20] sm:$0xff]  ;;  %v379_v46 = vld [vmem:[%s11647_s6 + $0x28] sm:$0xff] }
  0x16   :  { %v10045_v44 = vpack.c.bf16 %v377_v43, %v376_v41  ;;  %v10057_v47 = vpack.c.bf16 %v379_v46, %v378_v45  ;;  %v380_v48 = vld [vmem:[%s11647_s6 + $0x30] sm:$0xff]  ;;  %v381_v49 = vld [vmem:[%s11647_s6 + $0x38] sm:$0xff]  ;;  %v10098_v56 = vld [vmem:[%s11648_s7] ss:$0 sm:$0xff] }
  0x17   :  { %8680 = vmatpush3.bf16.msra.mxu0 %v8677_v7  ;;  %v10070_v51 = vpack.c.bf16 %v381_v49, %v380_v48  ;;  %p3199_p5 = scmp.gt.s32.totalorder %s3198_s28, 0  ;;  %p4003_p7 = scmp.gt.s32.totalorder %s6916_s18, 0 }
  0x18   :  { %8682 = vmatprep.subr.bf16.mxu0 %v8681_v16  ;;  %8694 = vmatpush3.bf16.msra.mxu1 %v9998_v17  ;;  %p3601_p6 = scmp.gt.s32.totalorder %s6908_s4, 0  ;;  %p4807_p9 = scmp.gt.s32.totalorder %s6932_s25, 0 }
  0x19   :  { %8695 = vmatprep.subr.bf16.mxu1 %v9867_v6  ;;  %s3200_s29 = scalar_select %p3199_p5, 1, 0 }
  0x1a   :  { %s4004_s6 = scalar_select %p4003_p7, 1, 0 }
  0x1b   :  { %8684 = vmatpush3.bf16.msra.mxu0 %v8681_v16  ;;  %7562 = vmatmul.mubr.f32.vlgmr.msra.gmra.mrb[0].mxu1 %v9869_v11  ;;  %s6940_s28 = sld [smem:[#allocation3 + $0x5]]  ;;  %p5611_p11 = scmp.gt.s32.totalorder %s6948_s16, 0 }
  0x1c   :  { %8686 = vmatprep.subr.bf16.mxu0 %v8685_v20  ;;  %7580 = vmatprep.mubr.msk.f32.mxu1 %vm9868_vm1, %v9869_v11  ;;  %p6013_p12 = scmp.gt.s32.totalorder %s6956_s3, 0  ;;  %p6415_p13 = scmp.gt.s32.totalorder %s6964_s22, 0 }
  0x1d   :  { %8697 = vmatpush3.bf16.msra.mxu1 %v10039_v42  ;;  %s5612_s4 = scalar_select %p5611_p11, 1, 0 }
  0x1e   :  { %8698 = vmatprep.subr.bf16.mxu1 %v9867_v6  ;;  %s6014_s18 = scalar_select %p6013_p12, 1, 0 }
  0x1f   :  { %8688 = vmatpush3.bf16.msra.mxu0 %v8685_v20 }
  0x20   :  { %8713 = vmatprep.subr.bf16.mxu0 %v9867_v6 }
  0x21   :  { %8700 = vmatpush3.bf16.msra.mxu1 %v10045_v44  ;;  %p5209_p10 = scmp.gt.s32.totalorder %s6940_s28, 0 }
  0x22   :  { %7536 = vmatmul.mubr.msk.f32.vlgmr.msra.gmra.mrb[0].mxu0 %vm91_vm0, %v65_v21  ;;  %8701 = vmatprep.subr.bf16.mxu1 %v9867_v6 }
  0x23   :  { %8715 = vmatpush3.bf16.msra.mxu0 %v10039_v42 }
  0x24   :  { %8716 = vmatprep.subr.bf16.mxu0 %v9867_v6 }
  0x25   :  { %8703 = vmatpush3.bf16.msra.mxu1 %v10057_v47 }
  0x26   :  { %8704 = vmatprep.subr.bf16.mxu1 %v9867_v6 }
  0x27   :  { %8718 = vmatpush3.bf16.msra.mxu0 %v10045_v44 }
  0x28   :  { %8719 = vmatprep.subr.bf16.mxu0 %v9867_v6 }
  0x29   :  { %8706 = vmatpush3.bf16.msra.mxu1 %v10070_v51 }
  0x2a   :  { %8707 = vmatprep.subr.bf16.mxu1 %v9867_v6 }
  0x2b   :  { %8721 = vmatpush3.bf16.msra.mxu0 %v10057_v47 }
  0x2c   :  { %8722 = vmatprep.subr.bf16.mxu0 %v9867_v6 }
  0x2f   :  { %8724 = vmatpush3.bf16.msra.mxu0 %v10070_v51 }
  0x30   :  { %8731 = vmatprep.subr.bf16.mxu0 %v9867_v6 }
  0xee   :  { %v340_v22 = vpop.f32.mrb[0].mxu1 }
  0xef   :  { %v7563_v23 = vpop.f32.mrb[1].mxu1 }
  0xf5   :  { %v10022_v25 = vpop.f32.mrb[0].mxu0 }
  0xf6   :  { %v194_v26 = vpop.f32.mrb[1].mxu0  ;;  %v200_v60 = vadd.f32 %v10022_v25, %v10020_v24  ;;  %v66_v25 = vld [vmem:[%s11642_s1 + $0x10] sm:$0xff] }
  0xf7   :  { %v195_v27 = vadd.f32 %v10020_v24, %v194_v26  ;;  %v67_v26 = vld [vmem:[%s11642_s1 + $0x18] sm:$0xff]  ;;  %7538 = vmatprep.mubr.msk.f32.mxu0 %vm91_vm0, %v66_v25 }
  0xf8   :  { %7539 = vmatmul.mubr.msk.f32.gmra.mrb[2].mxu0 %vm91_vm0, %v67_v26 }
  0xf9   :  { %v344_v28 = vadd.f32 %v340_v22, %v195_v27  ;;  %v68_v27 = vld [vmem:[%s11642_s1 + $0x20] sm:$0xff] }
  0xfa   :  { %7541 = vmatprep.mubr.msk.f32.mxu0 %vm91_vm0, %v68_v27 }
  0xfb   :  { %9436 = vtanh.f32 %v344_v28  ;;  %v6842_v30 = vmul.f32 -1.442695, %v344_v28 }
  0xfd   :  { %9438 = vpow2.f32 %v6842_v30  ;;  %v70_v30 = vld [vmem:[%s11642_s1 + $0x30] sm:$0xff] }
 0x105   :  { %v9437_v29 = vpop.eup %9436 }
 0x106   :  { %354 = vrot.lane.b32.xlu0 %v9437_v29, %s9870_s19  ;;  %v69_v29 = vld [vmem:[%s11642_s1 + $0x28] sm:$0xff] }
 0x107   :  { %v9439_v31 = vpop.eup %9438  ;;  %7542 = vmatmul.mubr.msk.f32.gmra.mrb[4].mxu0 %vm91_vm0, %v69_v29 }
 0x108   :  { %v348_v32 = vadd.f32 1.0, %v9439_v31  ;;  %7544 = vmatprep.mubr.msk.f32.mxu0 %vm91_vm0, %v70_v30  ;;  %v71_v31 = vld [vmem:[%s11642_s1 + $0x38] sm:$0xff] }
 0x10a   :  { %9440 = vrcp.f32 %v348_v32  ;;  %v72_v32 = vld [vmem:[%s11642_s1 + $0x40] sm:$0xff] }
 0x10b   :  { %7545 = vmatmul.mubr.msk.f32.gmra.mrb[6].mxu0 %vm91_vm0, %v71_v31 }
 0x10c   :  { %7547 = vmatprep.mubr.msk.f32.mxu0 %vm91_vm0, %v72_v32 }
 0x114   :  { %v9441_v33 = vpop.eup %9440 }
 0x115   :  { %v352_v36 = vmul.f32 0.0, %v9441_v33 }
 0x178   :  { %v355_v34 = vpop.permute.xlu0 %354 }
 0x179   :  { %v357_v35 = vmul.f32 %v9441_v33, %v355_v34  ;;  %v73_v34 = vld [vmem:[%s11642_s1 + $0x48] sm:$0xff] }
 0x17a   :  { %7548 = vmatmul.mubr.msk.f32.gmra.mrb[8].mxu0 %vm91_vm0, %v73_v34 }
 0x17b   :  { %359 = vrot.lane.b32.xlu0 %v357_v35, %s9871_s20  ;;  %v74_v35 = vld [vmem:[%s11642_s1 + $0x50] sm:$0xff] }
 0x17c   :  { %7550 = vmatprep.mubr.msk.f32.mxu0 %vm91_vm0, %v74_v35 }
 0x1cb   :  { %v10160_v41 = vpop.f32.mrb[2].mxu0 }
 0x1cc   :  { %v204_v43 = vpop.f32.mrb[3].mxu0 }
 0x1da   :  { %v10162_v45 = vpop.f32.mrb[4].mxu0 }
 0x1db   :  { %v10164_v46 = vpop.f32.mrb[5].mxu0 }
 0x1de   :  { %v10166_v48 = vpop.f32.mrb[6].mxu0 }
 0x1df   :  { %v10168_v49 = vpop.f32.mrb[7].mxu0 }
 0x1ed   :  { %v360_v37 = vpop.permute.xlu0 %359 }
 0x1ee   :  { %v10027_v38 = vadd.f32 %v360_v37, %v352_v36  ;;  %v75_v36 = vld [vmem:[%s11642_s1 + $0x58] sm:$0xff] }
 0x1ef   :  { %7551 = vmatmul.mubr.msk.f32.gmra.mrb[10].mxu0 %vm91_vm0, %v75_v36  ;;  %v210_v36 = vadd.f32 %v10160_v41, %v10020_v24 }
 0x1f0   :  { %9442 = vtanh.f32 %v10027_v38  ;;  %7610 = vmatprep.mubr.msk.f32.mxu0 %vm9868_vm1, %v9869_v11 }
 0x1fa   :  { %v9443_v50 = vpop.eup %9442 }
 0x1fb   :  { %365 = vrot.lane.b32.xlu1 %v9443_v50, %s9870_s19 }
 0x26d   :  { %v366_v52 = vpop.permute.xlu1 %365 }
 0x26e   :  { %v368_v53 = vmul.f32 %v9441_v33, %v366_v52 }
 0x270   :  { %370 = vrot.lane.b32.xlu1 %v368_v53, %s9871_s20 }
 0x2e2   :  { %v371_v54 = vpop.permute.xlu1 %370 }
 0x2e3   :  { %v373_v55 = vsel %vm270_vm2, %v371_v54, 0.0 }
 0x2e4   :  { %7581 = vmatmul.mubr.msk.f32.vlgmr.msra.gmra.mrb[2].mxu1 %vm91_vm0, %v373_v55 }
 0x2e5   :  { %8709 = vmatpush3.bf16.msra.mxu1 %v9985_v12  ;;  %7591 = vmatprep.mubr.msk.f32.mxu1 %vm9868_vm1, %v9869_v11 }
 0x2e6   :  { %8710 = vmatprep.subr.bf16.mxu1 %v9867_v6 }
 0x2e9   :  { %8712 = vmatpush3.bf16.msra.mxu1 %v9998_v17 }
 0x2ea   :  { %8725 = vmatprep.subr.bf16.mxu1 %v9867_v6 }
 0x2ec   :  { %7592 = vmatmul.mubr.msk.f32.vlgmr.msra.gmra.mrb[4].mxu1 %vm270_vm2, %v371_v54  ;;  %v10189_v54 = vpop.f32.mrb[8].mxu0 }
 0x2ed   :  { %8727 = vmatpush3.bf16.msra.mxu1 %v9985_v12  ;;  %7621 = vmatprep.mubr.msk.f32.mxu1 %vm9868_vm1, %v9869_v11  ;;  %v10191_v55 = vpop.f32.mrb[9].mxu0 }
 0x2ee   :  { %8728 = vmatprep.subr.bf16.mxu1 %v9867_v6 }
 0x2f1   :  { %8730 = vmatpush3.bf16.msra.mxu1 %v9998_v17 }
 0x2f2   :  { %8743 = vmatprep.subr.bf16.mxu1 %v9867_v6 }
 0x3b7   :  { %v458_v57 = vpop.f32.mrb[2].mxu1 }
 0x3b8   :  { %v459_v58 = vadd.f32 %v10098_v56, %v458_v57  ;;  %v7582_v59 = vpop.f32.mrb[3].mxu1  ;;  %v10193_v57 = vpop.f32.mrb[10].mxu0 }
 0x3b9   :  { %v205_v59 = vadd.f32 %v10020_v24, %v204_v43 }
 0x3ba   :  { %9444 = vtanh.f32 %v459_v58  ;;  %v6845_v2 = vmul.f32 -1.442695, %v459_v58  ;;  %v10195_v58 = vpop.f32.mrb[11].mxu0 }
 0x3bf   :  { %v556_v61 = vpop.f32.mrb[4].mxu1 }
 0x3c0   :  { %v560_v62 = vadd.f32 %v556_v61, %v200_v60  ;;  %v7593_v63 = vpop.f32.mrb[5].mxu1 }
 0x3c2   :  { %9446 = vtanh.f32 %v560_v62  ;;  %v6847_v3 = vmul.f32 -1.442695, %v560_v62 }
 0x3c3   :  { %9448 = vpow2.f32 %v6845_v2 }
 0x3c4   :  { %v9445_v0 = vpop.eup %9444  ;;  %9450 = vpow2.f32 %v6847_v3 }
 0x3c5   :  { %471 = vrot.lane.b32.xlu1 %v9445_v0, %s9870_s19 }
 0x3cc   :  { %v9447_v1 = vpop.eup %9446 }
 0x3cd   :  { %570 = vrot.lane.b32.xlu0 %v9447_v1, %s9870_s19  ;;  %v9449_v4 = vpop.eup %9448 }
 0x3ce   :  { %v465_v5 = vadd.f32 1.0, %v9449_v4  ;;  %v9451_v7 = vpop.eup %9450 }
 0x3cf   :  { %v564_v8 = vadd.f32 1.0, %v9451_v7 }
 0x3d0   :  { %9452 = vrcp.f32 %v465_v5 }
 0x3d1   :  { %9454 = vrcp.f32 %v564_v8 }
 0x3da   :  { %v9453_v9 = vpop.eup %9452 }
 0x3db   :  { %v9455_v14 = vpop.eup %9454  ;;  %v469_v18 = vmul.f32 0.0, %v9453_v9 }
 0x3dc   :  { %v568_v21 = vmul.f32 %v9455_v14, %v10027_v38 }
 0x437   :  { %v472_v10 = vpop.permute.xlu1 %471 }
 0x438   :  { %v474_v13 = vmul.f32 %v9453_v9, %v472_v10 }
 0x43a   :  { %476 = vrot.lane.b32.xlu1 %v474_v13, %s9871_s20 }
 0x43f   :  { %v571_v15 = vpop.permute.xlu0 %570 }
 0x440   :  { %v573_v16 = vmul.f32 %v9455_v14, %v571_v15 }
 0x442   :  { %575 = vrot.lane.b32.xlu0 %v573_v16, %s9871_s20 }
 0x4ac   :  { %v477_v19 = vpop.permute.xlu1 %476 }
 0x4ad   :  { %v10107_v20 = vadd.f32 %v477_v19, %v469_v18 }
 0x4af   :  { %9456 = vtanh.f32 %v10107_v20 }
 0x4b4   :  { %v576_v22 = vpop.permute.xlu0 %575 }
 0x4b5   :  { %v10111_v23 = vadd.f32 %v576_v22, %v568_v21 }
 0x4b7   :  { %9458 = vtanh.f32 %v10111_v23 }
 0x4b9   :  { %v9457_v28 = vpop.eup %9456 }
 0x4ba   :  { %482 = vrot.lane.b32.xlu1 %v9457_v28, %s9870_s19 }
 0x4c1   :  { %v9459_v33 = vpop.eup %9458 }
 0x4c2   :  { %581 = vrot.lane.b32.xlu0 %v9459_v33, %s9870_s19 }
 0x52c   :  { %v483_v37 = vpop.permute.xlu1 %482 }
 0x52d   :  { %v485_v38 = vmul.f32 %v9453_v9, %v483_v37 }
 0x52f   :  { %590 = vrot.lane.b32.xlu1 %v485_v38, %s9870_s19 }
 0x534   :  { %v582_v39 = vpop.permute.xlu0 %581 }
 0x535   :  { %v584_v40 = vmul.f32 %v9455_v14, %v582_v39 }
 0x537   :  { %586 = vrot.lane.b32.xlu0 %v584_v40, %s9871_s20 }
 0x5a1   :  { %v591_v50 = vpop.permute.xlu1 %590 }
 0x5a9   :  { %v587_v52 = vpop.permute.xlu0 %586 }
 0x5aa   :  { %v593_v53 = vsel %vm270_vm2, %v587_v52, %v591_v50  ;;  %7622 = vmatmul.mubr.msk.f32.vlgmr.msra.gmra.mrb[6].mxu1 %vm270_vm2, %v587_v52 }
 0x5ab   :  { %7611 = vmatmul.mubr.msk.f32.vlgmr.msra.gmra.mrb[12].mxu0 %vm91_vm0, %v593_v53  ;;  %8745 = vmatpush3.bf16.msra.mxu1 %v9985_v12 }
 0x5ac   :  { %8733 = vmatpush3.bf16.msra.mxu0 %v10039_v42  ;;  %8746 = vmatprep.subr.bf16.mxu1 %v9867_v6 }
 0x5ad   :  { %8734 = vmatprep.subr.bf16.mxu0 %v9867_v6  ;;  %7651 = vmatprep.mubr.msk.f32.mxu1 %vm9868_vm1, %v9869_v11 }
 0x5ae   :  { %7640 = vmatprep.mubr.msk.f32.mxu0 %vm9868_vm1, %v9869_v11 }
 0x5af   :  { %8748 = vmatpush3.bf16.msra.mxu1 %v9998_v17 }
 0x5b0   :  { %8736 = vmatpush3.bf16.msra.mxu0 %v10045_v44  ;;  %8749 = vmatprep.subr.bf16.mxu1 %v9867_v6 }
 0x5b1   :  { %8737 = vmatprep.subr.bf16.mxu0 %v9867_v6 }
 0x5b4   :  { %8739 = vmatpush3.bf16.msra.mxu0 %v10057_v47 }
 0x5b5   :  { %8740 = vmatprep.subr.bf16.mxu0 %v9867_v6 }
 0x5b8   :  { %8742 = vmatpush3.bf16.msra.mxu0 %v10070_v51 }
 0x5b9   :  { %8761 = vmatprep.subr.bf16.mxu0 %v9867_v6 }
 0x67d   :  { %v761_v60 = vpop.f32.mrb[6].mxu1 }
 0x67e   :  { %v765_v61 = vadd.f32 %v761_v60, %v205_v59  ;;  %v663_v62 = vpop.f32.mrb[12].mxu0  ;;  %v7623_v63 = vpop.f32.mrb[7].mxu1 }
 0x67f   :  { %v664_v0 = vadd.f32 %v10098_v56, %v663_v62  ;;  %v7612_v1 = vpop.f32.mrb[13].mxu0 }
 0x680   :  { %9460 = vtanh.f32 %v765_v61  ;;  %v6851_v4 = vmul.f32 -1.442695, %v765_v61 }
 0x681   :  { %9462 = vtanh.f32 %v664_v0  ;;  %v6849_v5 = vmul.f32 -1.442695, %v664_v0 }
 0x682   :  { %9464 = vpow2.f32 %v6851_v4 }
 0x683   :  { %9466 = vpow2.f32 %v6849_v5 }
 0x68a   :  { %v9461_v2 = vpop.eup %9460 }
 0x68b   :  { %v9463_v3 = vpop.eup %9462  ;;  %775 = vrot.lane.b32.xlu0 %v9461_v2, %s9870_s19 }
 0x68c   :  { %676 = vrot.lane.b32.xlu1 %v9463_v3, %s9870_s19  ;;  %v9465_v7 = vpop.eup %9464 }
 0x68d   :  { %v9467_v8 = vpop.eup %9466  ;;  %v769_v9 = vadd.f32 1.0, %v9465_v7 }
 0x68e   :  { %v670_v10 = vadd.f32 1.0, %v9467_v8 }
 0x68f   :  { %9468 = vrcp.f32 %v769_v9 }
 0x690   :  { %9470 = vrcp.f32 %v670_v10 }
 0x699   :  { %v9469_v13 = vpop.eup %9468 }
 0x69a   :  { %v9471_v15 = vpop.eup %9470  ;;  %v773_v21 = vmul.f32 %v9469_v13, %v10111_v23 }
 0x69b   :  { %v674_v25 = vmul.f32 %v9471_v15, %v10107_v20 }
 0x6fd   :  { %v776_v14 = vpop.permute.xlu0 %775 }
 0x6fe   :  { %v778_v16 = vmul.f32 %v9469_v13, %v776_v14  ;;  %v677_v18 = vpop.permute.xlu1 %676 }
 0x6ff   :  { %v679_v19 = vmul.f32 %v9471_v15, %v677_v18 }
 0x700   :  { %780 = vrot.lane.b32.xlu0 %v778_v16, %s9871_s20 }
 0x701   :  { %681 = vrot.lane.b32.xlu1 %v679_v19, %s9871_s20 }
 0x772   :  { %v781_v22 = vpop.permute.xlu0 %780 }
 0x773   :  { %v10205_v26 = vadd.f32 %v781_v22, %v773_v21  ;;  %v682_v27 = vpop.permute.xlu1 %681 }
 0x774   :  { %v10207_v28 = vadd.f32 %v682_v27, %v674_v25 }
 0x775   :  { %9472 = vtanh.f32 %v10205_v26 }
 0x776   :  { %9474 = vtanh.f32 %v10207_v28 }
 0x77f   :  { %v9473_v29 = vpop.eup %9472 }
 0x780   :  { %v9475_v30 = vpop.eup %9474  ;;  %786 = vrot.lane.b32.xlu0 %v9473_v29, %s9870_s19 }
 0x781   :  { %687 = vrot.lane.b32.xlu1 %v9475_v30, %s9870_s19 }
 0x7f2   :  { %v787_v31 = vpop.permute.xlu0 %786 }
 0x7f3   :  { %v789_v23 = vmul.f32 %v9469_v13, %v787_v31  ;;  %v688_v32 = vpop.permute.xlu1 %687 }
 0x7f4   :  { %v690_v33 = vmul.f32 %v9471_v15, %v688_v32 }
 0x7f5   :  { %791 = vrot.lane.b32.xlu0 %v789_v23, %s9871_s20 }
 0x7f6   :  { %795 = vrot.lane.b32.xlu1 %v690_v33, %s9870_s19 }
 0x867   :  { %v792_v20 = vpop.permute.xlu0 %791 }
 0x868   :  { %v796_v34 = vpop.permute.xlu1 %795  ;;  %7652 = vmatmul.mubr.msk.f32.vlgmr.msra.gmra.mrb[8].mxu1 %vm270_vm2, %v792_v20 }
 0x869   :  { %v798_v35 = vsel %vm270_vm2, %v792_v20, %v796_v34  ;;  %8751 = vmatpush3.bf16.msra.mxu1 %v10039_v42  ;;  %7670 = vmatprep.mubr.msk.f32.mxu1 %vm9868_vm1, %v9869_v11 }
 0x86a   :  { %7641 = vmatmul.mubr.msk.f32.vlgmr.msra.gmra.mrb[14].mxu0 %vm91_vm0, %v798_v35  ;;  %8752 = vmatprep.subr.bf16.mxu1 %v9867_v6 }
 0x86b   :  { %8763 = vmatpush3.bf16.msra.mxu0 %v9985_v12  ;;  %7681 = vmatprep.mubr.msk.f32.mxu0 %vm9868_vm1, %v9869_v11 }
 0x86c   :  { %8764 = vmatprep.subr.bf16.mxu0 %v9867_v6 }
 0x86d   :  { %8754 = vmatpush3.bf16.msra.mxu1 %v10045_v44 }
 0x86e   :  { %8755 = vmatprep.subr.bf16.mxu1 %v9867_v6 }
 0x86f   :  { %8766 = vmatpush3.bf16.msra.mxu0 %v9998_v17 }
 0x870   :  { %8767 = vmatprep.subr.bf16.mxu0 %v9867_v6 }
 0x871   :  { %8757 = vmatpush3.bf16.msra.mxu1 %v10057_v47 }
 0x872   :  { %8758 = vmatprep.subr.bf16.mxu1 %v9867_v6 }
 0x875   :  { %8760 = vmatpush3.bf16.msra.mxu1 %v10070_v51 }
 0x876   :  { %8779 = vmatprep.subr.bf16.mxu1 %v9867_v6 }
 0x93b   :  { %v966_v37 = vpop.f32.mrb[8].mxu1 }
 0x93c   :  { %v970_v38 = vadd.f32 %v966_v37, %v210_v36  ;;  %v7653_v39 = vpop.f32.mrb[9].mxu1 }
 0x93d   :  { %v868_v40 = vpop.f32.mrb[14].mxu0 }
 0x93e   :  { %9476 = vtanh.f32 %v970_v38  ;;  %v869_v43 = vadd.f32 %v10098_v56, %v868_v40  ;;  %v7642_v50 = vpop.f32.mrb[15].mxu0  ;;  %v6855_v59 = vmul.f32 -1.442695, %v970_v38 }
 0x940   :  { %9478 = vtanh.f32 %v869_v43  ;;  %v6853_v60 = vmul.f32 -1.442695, %v869_v43 }
 0x941   :  { %9480 = vpow2.f32 %v6855_v59 }
 0x942   :  { %9482 = vpow2.f32 %v6853_v60 }
 0x948   :  { %v9477_v52 = vpop.eup %9476 }
 0x949   :  { %980 = vrot.lane.b32.xlu0 %v9477_v52, %s9870_s19 }
 0x94a   :  { %v9479_v53 = vpop.eup %9478 }
 0x94b   :  { %881 = vrot.lane.b32.xlu1 %v9479_v53, %s9870_s19  ;;  %v9481_v41 = vpop.eup %9480 }
 0x94c   :  { %v9483_v61 = vpop.eup %9482  ;;  %v974_v62 = vadd.f32 1.0, %v9481_v41 }
 0x94d   :  { %v875_v63 = vadd.f32 1.0, %v9483_v61 }
 0x94e   :  { %9484 = vrcp.f32 %v974_v62 }
 0x94f   :  { %9486 = vrcp.f32 %v875_v63 }
 0x958   :  { %v9485_v0 = vpop.eup %9484 }
 0x959   :  { %v9487_v3 = vpop.eup %9486  ;;  %v978_v7 = vmul.f32 %v9485_v0, %v10205_v26 }
 0x95a   :  { %v879_v10 = vmul.f32 %v9487_v3, %v10207_v28  ;;  %v215_v28 = vadd.f32 %v10020_v24, %v10164_v46 }
 0x9bb   :  { %v981_v1 = vpop.permute.xlu0 %980 }
 0x9bc   :  { %v983_v2 = vmul.f32 %v9485_v0, %v981_v1 }
 0x9bd   :  { %v882_v4 = vpop.permute.xlu1 %881 }
 0x9be   :  { %985 = vrot.lane.b32.xlu0 %v983_v2, %s9871_s20  ;;  %v884_v5 = vmul.f32 %v9487_v3, %v882_v4 }
 0x9c0   :  { %886 = vrot.lane.b32.xlu1 %v884_v5, %s9871_s20 }
 0xa30   :  { %v986_v8 = vpop.permute.xlu0 %985 }
 0xa31   :  { %v10242_v9 = vadd.f32 %v986_v8, %v978_v7 }
 0xa32   :  { %v887_v13 = vpop.permute.xlu1 %886 }
 0xa33   :  { %9488 = vtanh.f32 %v10242_v9  ;;  %v10246_v14 = vadd.f32 %v887_v13, %v879_v10  ;;  %v220_v13 = vadd.f32 %v10162_v45, %v10020_v24 }
 0xa35   :  { %9490 = vtanh.f32 %v10246_v14 }
 0xa3d   :  { %v9489_v15 = vpop.eup %9488 }
 0xa3e   :  { %991 = vrot.lane.b32.xlu0 %v9489_v15, %s9870_s19 }
 0xa3f   :  { %v9491_v16 = vpop.eup %9490 }
 0xa40   :  { %892 = vrot.lane.b32.xlu1 %v9491_v16, %s9870_s19 }
 0xab0   :  { %v992_v18 = vpop.permute.xlu0 %991 }
 0xab1   :  { %v994_v19 = vmul.f32 %v9485_v0, %v992_v18 }
 0xab2   :  { %v893_v21 = vpop.permute.xlu1 %892 }
 0xab3   :  { %996 = vrot.lane.b32.xlu0 %v994_v19, %s9871_s20  ;;  %v895_v22 = vmul.f32 %v9487_v3, %v893_v21 }
 0xab5   :  { %1000 = vrot.lane.b32.xlu1 %v895_v22, %s9870_s19 }
 0xb25   :  { %v997_v25 = vpop.permute.xlu0 %996 }
 0xb26   :  { %7682 = vmatmul.mubr.msk.f32.vlgmr.msra.gmra.mrb[16].mxu0 %vm270_vm2, %v997_v25 }
 0xb27   :  { %8769 = vmatpush3.bf16.msra.mxu0 %v10039_v42  ;;  %7700 = vmatprep.mubr.msk.f32.mxu0 %vm9868_vm1, %v9869_v11  ;;  %v1001_v26 = vpop.permute.xlu1 %1000 }
 0xb28   :  { %8770 = vmatprep.subr.bf16.mxu0 %v9867_v6  ;;  %v1003_v27 = vsel %vm270_vm2, %v997_v25, %v1001_v26 }
 0xb29   :  { %7671 = vmatmul.mubr.msk.f32.vlgmr.msra.gmra.mrb[10].mxu1 %vm91_vm0, %v1003_v27 }
 0xb2a   :  { %8781 = vmatpush3.bf16.msra.mxu1 %v9985_v12  ;;  %7711 = vmatprep.mubr.msk.f32.mxu1 %vm9868_vm1, %v9869_v11 }
 0xb2b   :  { %8772 = vmatpush3.bf16.msra.mxu0 %v10045_v44  ;;  %8782 = vmatprep.subr.bf16.mxu1 %v9867_v6 }
 0xb2c   :  { %8773 = vmatprep.subr.bf16.mxu0 %v9867_v6 }
 0xb2e   :  { %8784 = vmatpush3.bf16.msra.mxu1 %v9998_v17 }
 0xb2f   :  { %8775 = vmatpush3.bf16.msra.mxu0 %v10057_v47  ;;  %8785 = vmatprep.subr.bf16.mxu1 %v9867_v6 }
 0xb30   :  { %8776 = vmatprep.subr.bf16.mxu0 %v9867_v6 }
 0xb33   :  { %8778 = vmatpush3.bf16.msra.mxu0 %v10070_v51 }
 0xb34   :  { %8797 = vmatprep.subr.bf16.mxu0 %v9867_v6 }
 0xbf9   :  { %v1171_v29 = vpop.f32.mrb[16].mxu0 }
 0xbfa   :  { %v1175_v30 = vadd.f32 %v1171_v29, %v215_v28  ;;  %v7683_v31 = vpop.f32.mrb[17].mxu0 }
 0xbfc   :  { %9492 = vtanh.f32 %v1175_v30  ;;  %v1073_v23 = vpop.f32.mrb[10].mxu1  ;;  %v6859_v35 = vmul.f32 -1.442695, %v1175_v30 }
 0xbfd   :  { %v1074_v32 = vadd.f32 %v10098_v56, %v1073_v23  ;;  %v7672_v33 = vpop.f32.mrb[11].mxu1 }
 0xbff   :  { %9494 = vtanh.f32 %v1074_v32  ;;  %v6857_v36 = vmul.f32 -1.442695, %v1074_v32 }
 0xc00   :  { %9496 = vpow2.f32 %v6859_v35 }
 0xc01   :  { %9498 = vpow2.f32 %v6857_v36 }
 0xc06   :  { %v9493_v20 = vpop.eup %9492 }
 0xc07   :  { %1185 = vrot.lane.b32.xlu0 %v9493_v20, %s9870_s19 }
 0xc09   :  { %v9495_v34 = vpop.eup %9494 }
 0xc0a   :  { %1086 = vrot.lane.b32.xlu1 %v9495_v34, %s9870_s19  ;;  %v9497_v46 = vpop.eup %9496 }
 0xc0b   :  { %v1179_v37 = vadd.f32 1.0, %v9497_v46  ;;  %v9499_v38 = vpop.eup %9498 }
 0xc0c   :  { %v1080_v39 = vadd.f32 1.0, %v9499_v38 }
 0xc0d   :  { %9500 = vrcp.f32 %v1179_v37 }
 0xc0e   :  { %9502 = vrcp.f32 %v1080_v39 }
 0xc17   :  { %v9501_v40 = vpop.eup %9500 }
 0xc18   :  { %v9503_v52 = vpop.eup %9502  ;;  %v1183_v60 = vmul.f32 %v9501_v40, %v10242_v9 }
 0xc19   :  { %v1084_v62 = vmul.f32 %v9503_v52, %v10246_v14 }
 0xc79   :  { %v1186_v43 = vpop.permute.xlu0 %1185 }
 0xc7a   :  { %v1188_v50 = vmul.f32 %v9501_v40, %v1186_v43 }
 0xc7c   :  { %1190 = vrot.lane.b32.xlu0 %v1188_v50, %s9871_s20  ;;  %v1087_v53 = vpop.permute.xlu1 %1086 }
 0xc7d   :  { %v1089_v59 = vmul.f32 %v9503_v52, %v1087_v53 }
 0xc7f   :  { %1091 = vrot.lane.b32.xlu1 %v1089_v59, %s9871_s20 }
 0xcee   :  { %v1191_v41 = vpop.permute.xlu0 %1190 }
 0xcef   :  { %v10280_v61 = vadd.f32 %v1191_v41, %v1183_v60 }
 0xcf1   :  { %9504 = vtanh.f32 %v10280_v61  ;;  %v1092_v63 = vpop.permute.xlu1 %1091 }
 0xcf2   :  { %v10284_v0 = vadd.f32 %v1092_v63, %v1084_v62  ;;  %v225_v62 = vadd.f32 %v10020_v24, %v10168_v49 }
 0xcf4   :  { %9506 = vtanh.f32 %v10284_v0 }
 0xcfb   :  { %v9505_v1 = vpop.eup %9504 }
 0xcfc   :  { %1196 = vrot.lane.b32.xlu0 %v9505_v1, %s9870_s19 }
 0xcfe   :  { %v9507_v2 = vpop.eup %9506 }
 0xcff   :  { %1097 = vrot.lane.b32.xlu1 %v9507_v2, %s9870_s19 }
 0xd6e   :  { %v1197_v3 = vpop.permute.xlu0 %1196 }
 0xd6f   :  { %v1199_v4 = vmul.f32 %v9501_v40, %v1197_v3 }
 0xd71   :  { %1201 = vrot.lane.b32.xlu0 %v1199_v4, %s9871_s20  ;;  %v1098_v5 = vpop.permute.xlu1 %1097 }
 0xd72   :  { %v1100_v7 = vmul.f32 %v9503_v52, %v1098_v5 }
 0xd74   :  { %1205 = vrot.lane.b32.xlu1 %v1100_v7, %s9870_s19 }
 0xde3   :  { %v1202_v8 = vpop.permute.xlu0 %1201 }
 0xde4   :  { %7712 = vmatmul.mubr.msk.f32.vlgmr.msra.gmra.mrb[12].mxu1 %vm270_vm2, %v1202_v8 }
 0xde5   :  { %8787 = vmatpush3.bf16.msra.mxu1 %v10039_v42  ;;  %7730 = vmatprep.mubr.msk.f32.mxu1 %vm9868_vm1, %v9869_v11 }
 0xde6   :  { %8788 = vmatprep.subr.bf16.mxu1 %v9867_v6  ;;  %v1206_v9 = vpop.permute.xlu1 %1205 }
 0xde7   :  { %v1208_v10 = vsel %vm270_vm2, %v1202_v8, %v1206_v9 }
 0xde8   :  { %7701 = vmatmul.mubr.msk.f32.vlgmr.msra.gmra.mrb[18].mxu0 %vm91_vm0, %v1208_v10 }
 0xde9   :  { %8790 = vmatpush3.bf16.msra.mxu1 %v10045_v44  ;;  %8799 = vmatpush3.bf16.msra.mxu0 %v9985_v12 }
 0xdea   :  { %8791 = vmatprep.subr.bf16.mxu1 %v9867_v6  ;;  %8800 = vmatprep.subr.bf16.mxu0 %v9867_v6 }
 0xdeb   :  { %7741 = vmatprep.mubr.msk.f32.mxu0 %vm9868_vm1, %v9869_v11 }
 0xded   :  { %8793 = vmatpush3.bf16.msra.mxu1 %v10057_v47  ;;  %8802 = vmatpush3.bf16.msra.mxu0 %v9998_v17 }
 0xdee   :  { %8794 = vmatprep.subr.bf16.mxu1 %v9867_v6  ;;  %8803 = vmatprep.subr.bf16.mxu0 %v9867_v6 }
 0xdf1   :  { %8796 = vmatpush3.bf16.msra.mxu1 %v10070_v51 }
 0xdf2   :  { %8815 = vmatprep.subr.bf16.mxu1 %v9867_v6 }
 0xeb7   :  { %v1376_v14 = vpop.f32.mrb[12].mxu1 }
 0xeb8   :  { %v1380_v15 = vadd.f32 %v1376_v14, %v220_v13  ;;  %v7713_v16 = vpop.f32.mrb[13].mxu1 }
 0xeba   :  { %9508 = vtanh.f32 %v1380_v15  ;;  %v6863_v26 = vmul.f32 -1.442695, %v1380_v15 }
 0xebb   :  { %v1278_v18 = vpop.f32.mrb[18].mxu0 }
 0xebc   :  { %v1279_v19 = vadd.f32 %v10098_v56, %v1278_v18  ;;  %v7702_v21 = vpop.f32.mrb[19].mxu0 }
 0xebe   :  { %9510 = vtanh.f32 %v1279_v19  ;;  %v6861_v27 = vmul.f32 -1.442695, %v1279_v19 }
 0xebf   :  { %9512 = vpow2.f32 %v6863_v26 }
 0xec0   :  { %9514 = vpow2.f32 %v6861_v27 }
 0xec4   :  { %v9509_v22 = vpop.eup %9508 }
 0xec5   :  { %1390 = vrot.lane.b32.xlu0 %v9509_v22, %s9870_s19 }
 0xec8   :  { %v9511_v25 = vpop.eup %9510 }
 0xec9   :  { %1291 = vrot.lane.b32.xlu1 %v9511_v25, %s9870_s19  ;;  %v9513_v45 = vpop.eup %9512 }
 0xeca   :  { %v1384_v28 = vadd.f32 1.0, %v9513_v45  ;;  %v9515_v29 = vpop.eup %9514 }
 0xecb   :  { %v1285_v30 = vadd.f32 1.0, %v9515_v29 }
 0xecc   :  { %9516 = vrcp.f32 %v1384_v28 }
 0xecd   :  { %9518 = vrcp.f32 %v1285_v30 }
 0xed6   :  { %v9517_v31 = vpop.eup %9516 }
 0xed7   :  { %v9519_v33 = vpop.eup %9518  ;;  %v1388_v35 = vmul.f32 %v9517_v31, %v10280_v61 }
 0xed8   :  { %v1289_v37 = vmul.f32 %v9519_v33, %v10284_v0 }
 0xf37   :  { %v1391_v23 = vpop.permute.xlu0 %1390 }
 0xf38   :  { %v1393_v32 = vmul.f32 %v9517_v31, %v1391_v23 }
 0xf3a   :  { %1395 = vrot.lane.b32.xlu0 %v1393_v32, %s9871_s20 }
 0xf3b   :  { %v1292_v20 = vpop.permute.xlu1 %1291 }
 0xf3c   :  { %v1294_v34 = vmul.f32 %v9519_v33, %v1292_v20 }
 0xf3e   :  { %1296 = vrot.lane.b32.xlu1 %v1294_v34, %s9871_s20 }
 0xfac   :  { %v1396_v36 = vpop.permute.xlu0 %1395 }
 0xfad   :  { %v10318_v46 = vadd.f32 %v1396_v36, %v1388_v35 }
 0xfaf   :  { %9520 = vtanh.f32 %v10318_v46 }
 0xfb0   :  { %v1297_v38 = vpop.permute.xlu1 %1296 }
 0xfb1   :  { %v10322_v39 = vadd.f32 %v1297_v38, %v1289_v37 }
 0xfb3   :  { %9522 = vtanh.f32 %v10322_v39 }
 0xfb9   :  { %v9521_v40 = vpop.eup %9520 }
 0xfba   :  { %1401 = vrot.lane.b32.xlu0 %v9521_v40, %s9870_s19 }
 0xfbd   :  { %v9523_v43 = vpop.eup %9522 }
 0xfbe   :  { %1302 = vrot.lane.b32.xlu1 %v9523_v43, %s9870_s19 }
0x102c   :  { %v1402_v50 = vpop.permute.xlu0 %1401 }
0x102d   :  { %v1404_v52 = vmul.f32 %v9517_v31, %v1402_v50 }
0x102f   :  { %1406 = vrot.lane.b32.xlu0 %v1404_v52, %s9871_s20 }
0x1030   :  { %v1303_v53 = vpop.permute.xlu1 %1302 }
0x1031   :  { %v1305_v59 = vmul.f32 %v9519_v33, %v1303_v53 }
0x1033   :  { %1410 = vrot.lane.b32.xlu1 %v1305_v59, %s9870_s19 }
0x10a1   :  { %v1407_v60 = vpop.permute.xlu0 %1406 }
0x10a2   :  { %7742 = vmatmul.mubr.msk.f32.vlgmr.msra.gmra.mrb[20].mxu0 %vm270_vm2, %v1407_v60 }
0x10a3   :  { %8805 = vmatpush3.bf16.msra.mxu0 %v10039_v42  ;;  %7760 = vmatprep.mubr.msk.f32.mxu0 %vm9868_vm1, %v9869_v11 }
0x10a4   :  { %8806 = vmatprep.subr.bf16.mxu0 %v9867_v6 }
0x10a5   :  { %v1411_v41 = vpop.permute.xlu1 %1410 }
0x10a6   :  { %v1413_v61 = vsel %vm270_vm2, %v1407_v60, %v1411_v41 }
0x10a7   :  { %8808 = vmatpush3.bf16.msra.mxu0 %v10045_v44  ;;  %7731 = vmatmul.mubr.msk.f32.vlgmr.msra.gmra.mrb[14].mxu1 %vm91_vm0, %v1413_v61 }
0x10a8   :  { %8809 = vmatprep.subr.bf16.mxu0 %v9867_v6  ;;  %8817 = vmatpush3.bf16.msra.mxu1 %v9985_v12 }
0x10a9   :  { %7771 = vmatprep.mubr.msk.f32.mxu1 %vm9868_vm1, %v9869_v11  ;;  %8818 = vmatprep.subr.bf16.mxu1 %v9867_v6 }
0x10ab   :  { %8811 = vmatpush3.bf16.msra.mxu0 %v10057_v47 }
0x10ac   :  { %8812 = vmatprep.subr.bf16.mxu0 %v9867_v6  ;;  %8820 = vmatpush3.bf16.msra.mxu1 %v9998_v17 }
0x10ad   :  { %8821 = vmatprep.subr.bf16.mxu1 %v9867_v6 }
0x10af   :  { %8814 = vmatpush3.bf16.msra.mxu0 %v10070_v51 }
0x10b0   :  { %8833 = vmatprep.subr.bf16.mxu0 %v9867_v6 }
0x1175   :  { %v1581_v63 = vpop.f32.mrb[20].mxu0 }
0x1176   :  { %v1585_v0 = vadd.f32 %v1581_v63, %v225_v62  ;;  %v7743_v1 = vpop.f32.mrb[21].mxu0 }
0x1178   :  { %9524 = vtanh.f32 %v1585_v0  ;;  %v6867_v8 = vmul.f32 -1.442695, %v1585_v0 }
0x117a   :  { %v1483_v2 = vpop.f32.mrb[14].mxu1 }
0x117b   :  { %v1484_v3 = vadd.f32 %v10098_v56, %v1483_v2  ;;  %v7732_v4 = vpop.f32.mrb[15].mxu1 }
0x117d   :  { %9526 = vtanh.f32 %v1484_v3  ;;  %v6865_v9 = vmul.f32 -1.442695, %v1484_v3 }
0x117e   :  { %9528 = vpow2.f32 %v6867_v8 }
0x117f   :  { %9530 = vpow2.f32 %v6865_v9 }
0x1182   :  { %v9525_v5 = vpop.eup %9524 }
0x1183   :  { %1595 = vrot.lane.b32.xlu0 %v9525_v5, %s9870_s19 }
0x1187   :  { %v9527_v7 = vpop.eup %9526 }
0x1188   :  { %1496 = vrot.lane.b32.xlu1 %v9527_v7, %s9870_s19  ;;  %v9529_v49 = vpop.eup %9528 }
0x1189   :  { %v1589_v10 = vadd.f32 1.0, %v9529_v49  ;;  %v9531_v13 = vpop.eup %9530 }
0x118a   :  { %v1490_v14 = vadd.f32 1.0, %v9531_v13 }
0x118b   :  { %9532 = vrcp.f32 %v1589_v10 }
0x118c   :  { %9534 = vrcp.f32 %v1490_v14 }
0x1195   :  { %v9533_v15 = vpop.eup %9532 }
0x1196   :  { %v9535_v19 = vpop.eup %9534  ;;  %v1593_v25 = vmul.f32 %v9533_v15, %v10318_v46  ;;  %v230_v46 = vadd.f32 %v10166_v48, %v10020_v24 }
0x1197   :  { %v1494_v45 = vmul.f32 %v9535_v19, %v10322_v39 }
0x11f5   :  { %v1596_v16 = vpop.permute.xlu0 %1595 }
0x11f6   :  { %v1598_v18 = vmul.f32 %v9533_v15, %v1596_v16 }
0x11f8   :  { %1600 = vrot.lane.b32.xlu0 %v1598_v18, %s9871_s20 }
0x11fa   :  { %v1497_v21 = vpop.permute.xlu1 %1496 }
0x11fb   :  { %v1499_v22 = vmul.f32 %v9535_v19, %v1497_v21 }
0x11fd   :  { %1501 = vrot.lane.b32.xlu1 %v1499_v22, %s9871_s20  ;;  %v10427_v22 = vld [vmem:[%s11646_s5] ss:$0 sm:$0xff] }
0x126a   :  { %v1601_v26 = vpop.permute.xlu0 %1600 }
0x126b   :  { %v10356_v27 = vadd.f32 %v1601_v26, %v1593_v25  ;;  %v235_v25 = vadd.f32 %v10427_v22, %v10191_v55 }
0x126d   :  { %9536 = vtanh.f32 %v10356_v27 }
0x126f   :  { %v1502_v28 = vpop.permute.xlu1 %1501 }
0x1270   :  { %v10360_v29 = vadd.f32 %v1502_v28, %v1494_v45 }
0x1272   :  { %9538 = vtanh.f32 %v10360_v29 }
0x1277   :  { %v9537_v30 = vpop.eup %9536 }
0x1278   :  { %1606 = vrot.lane.b32.xlu0 %v9537_v30, %s9870_s19 }
0x127c   :  { %v9539_v31 = vpop.eup %9538 }
0x127d   :  { %1507 = vrot.lane.b32.xlu1 %v9539_v31, %s9870_s19 }
0x12ea   :  { %v1607_v23 = vpop.permute.xlu0 %1606 }
0x12eb   :  { %v1609_v32 = vmul.f32 %v9533_v15, %v1607_v23 }
0x12ed   :  { %1611 = vrot.lane.b32.xlu0 %v1609_v32, %s9871_s20 }
0x12ef   :  { %v1508_v33 = vpop.permute.xlu1 %1507 }
0x12f0   :  { %v1510_v20 = vmul.f32 %v9535_v19, %v1508_v33 }
0x12f2   :  { %1615 = vrot.lane.b32.xlu1 %v1510_v20, %s9870_s19 }
0x135f   :  { %v1612_v34 = vpop.permute.xlu0 %1611 }
0x1360   :  { %7772 = vmatmul.mubr.msk.f32.vlgmr.msra.gmra.mrb[16].mxu1 %vm270_vm2, %v1612_v34 }
0x1361   :  { %8823 = vmatpush3.bf16.msra.mxu1 %v10039_v42  ;;  %7790 = vmatprep.mubr.msk.f32.mxu1 %vm9868_vm1, %v9869_v11 }
0x1362   :  { %8824 = vmatprep.subr.bf16.mxu1 %v9867_v6 }
0x1364   :  { %v1616_v35 = vpop.permute.xlu1 %1615 }
0x1365   :  { %8826 = vmatpush3.bf16.msra.mxu1 %v10045_v44  ;;  %v1618_v36 = vsel %vm270_vm2, %v1612_v34, %v1616_v35 }
0x1366   :  { %8827 = vmatprep.subr.bf16.mxu1 %v9867_v6  ;;  %7761 = vmatmul.mubr.msk.f32.vlgmr.msra.gmra.mrb[22].mxu0 %vm91_vm0, %v1618_v36 }
0x1367   :  { %8835 = vmatpush3.bf16.msra.mxu0 %v9985_v12  ;;  %7801 = vmatprep.mubr.msk.f32.mxu0 %vm9868_vm1, %v9869_v11 }
0x1368   :  { %8836 = vmatprep.subr.bf16.mxu0 %v9867_v6 }
0x1369   :  { %8829 = vmatpush3.bf16.msra.mxu1 %v10057_v47 }
0x136a   :  { %8830 = vmatprep.subr.bf16.mxu1 %v9867_v6 }
0x136b   :  { %8838 = vmatpush3.bf16.msra.mxu0 %v9998_v17 }
0x136c   :  { %8839 = vmatprep.subr.bf16.mxu0 %v9867_v6 }
0x136d   :  { %8832 = vmatpush3.bf16.msra.mxu1 %v10070_v51 }
0x136e   :  { %8851 = vmatprep.subr.bf16.mxu1 %v9867_v6 }
0x1433   :  { %v1786_v37 = vpop.f32.mrb[16].mxu1 }
0x1434   :  { %v1790_v38 = vadd.f32 %v1786_v37, %v230_v46  ;;  %v7773_v39 = vpop.f32.mrb[17].mxu1 }
0x1436   :  { %9540 = vtanh.f32 %v1790_v38  ;;  %v6871_v59 = vmul.f32 -1.442695, %v1790_v38 }
0x1439   :  { %v1688_v40 = vpop.f32.mrb[22].mxu0 }
0x143a   :  { %v1689_v43 = vadd.f32 %v10098_v56, %v1688_v40  ;;  %v7762_v50 = vpop.f32.mrb[23].mxu0 }
0x143c   :  { %9542 = vtanh.f32 %v1689_v43  ;;  %v6869_v60 = vmul.f32 -1.442695, %v1689_v43 }
0x143d   :  { %9544 = vpow2.f32 %v6871_v59 }
0x143e   :  { %9546 = vpow2.f32 %v6869_v60 }
0x1440   :  { %v9541_v52 = vpop.eup %9540 }
0x1441   :  { %1800 = vrot.lane.b32.xlu0 %v9541_v52, %s9870_s19 }
0x1446   :  { %v9543_v53 = vpop.eup %9542 }
0x1447   :  { %1701 = vrot.lane.b32.xlu1 %v9543_v53, %s9870_s19  ;;  %v9545_v24 = vpop.eup %9544 }
0x1448   :  { %v1794_v48 = vadd.f32 1.0, %v9545_v24  ;;  %v9547_v41 = vpop.eup %9546 }
0x1449   :  { %v1695_v61 = vadd.f32 1.0, %v9547_v41 }
0x144a   :  { %9548 = vrcp.f32 %v1794_v48 }
0x144b   :  { %9550 = vrcp.f32 %v1695_v61 }
0x1454   :  { %v9549_v62 = vpop.eup %9548 }
0x1455   :  { %v9551_v0 = vpop.eup %9550  ;;  %v1798_v3 = vmul.f32 %v9549_v62, %v10356_v27 }
0x1456   :  { %v1699_v7 = vmul.f32 %v9551_v0, %v10360_v29  ;;  %v10434_v29 = vld [vmem:[%s11648_s7] ss:$0 sm:$0xff] }
0x14b3   :  { %v1801_v56 = vpop.permute.xlu0 %1800 }
0x14b4   :  { %v1803_v63 = vmul.f32 %v9549_v62, %v1801_v56 }
0x14b6   :  { %1805 = vrot.lane.b32.xlu0 %v1803_v63, %s9871_s20 }
0x14b9   :  { %v1702_v1 = vpop.permute.xlu1 %1701 }
0x14ba   :  { %v1704_v2 = vmul.f32 %v9551_v0, %v1702_v1 }
0x14bc   :  { %1706 = vrot.lane.b32.xlu1 %v1704_v2, %s9871_s20 }
0x1528   :  { %v1806_v4 = vpop.permute.xlu0 %1805 }
0x1529   :  { %v10394_v5 = vadd.f32 %v1806_v4, %v1798_v3  ;;  %v240_v3 = vadd.f32 %v10427_v22, %v10189_v54 }
0x152b   :  { %9552 = vtanh.f32 %v10394_v5 }
0x152e   :  { %v1707_v8 = vpop.permute.xlu1 %1706 }
0x152f   :  { %v10398_v9 = vadd.f32 %v1707_v8, %v1699_v7 }
0x1531   :  { %9554 = vtanh.f32 %v10398_v9 }
0x1535   :  { %v9553_v49 = vpop.eup %9552 }
0x1536   :  { %1811 = vrot.lane.b32.xlu0 %v9553_v49, %s9870_s19 }
0x153b   :  { %v9555_v10 = vpop.eup %9554 }
0x153c   :  { %1712 = vrot.lane.b32.xlu1 %v9555_v10, %s9870_s19 }
0x15a8   :  { %v1812_v13 = vpop.permute.xlu0 %1811 }
0x15a9   :  { %v1814_v14 = vmul.f32 %v9549_v62, %v1812_v13 }
0x15ab   :  { %1816 = vrot.lane.b32.xlu0 %v1814_v14, %s9871_s20 }
0x15ae   :  { %v1713_v15 = vpop.permute.xlu1 %1712 }
0x15af   :  { %v1715_v16 = vmul.f32 %v9551_v0, %v1713_v15 }
0x15b1   :  { %1820 = vrot.lane.b32.xlu1 %v1715_v16, %s9870_s19 }
0x161d   :  { %v1817_v18 = vpop.permute.xlu0 %1816 }
0x161e   :  { %7802 = vmatmul.mubr.msk.f32.vlgmr.msra.gmra.mrb[24].mxu0 %vm270_vm2, %v1817_v18 }
0x161f   :  { %8841 = vmatpush3.bf16.msra.mxu0 %v10039_v42  ;;  %7820 = vmatprep.mubr.msk.f32.mxu0 %vm9868_vm1, %v9869_v11 }
0x1620   :  { %8842 = vmatprep.subr.bf16.mxu0 %v9867_v6 }
0x1623   :  { %8844 = vmatpush3.bf16.msra.mxu0 %v10045_v44  ;;  %v1821_v19 = vpop.permute.xlu1 %1820 }
0x1624   :  { %8845 = vmatprep.subr.bf16.mxu0 %v9867_v6  ;;  %v1823_v21 = vsel %vm270_vm2, %v1817_v18, %v1821_v19 }
0x1625   :  { %7791 = vmatmul.mubr.msk.f32.vlgmr.msra.gmra.mrb[18].mxu1 %vm91_vm0, %v1823_v21 }
0x1626   :  { %8853 = vmatpush3.bf16.msra.mxu1 %v9985_v12  ;;  %7831 = vmatprep.mubr.msk.f32.mxu1 %vm9868_vm1, %v9869_v11 }
0x1627   :  { %8854 = vmatprep.subr.bf16.mxu1 %v9867_v6  ;;  %8847 = vmatpush3.bf16.msra.mxu0 %v10057_v47 }
0x1628   :  { %8848 = vmatprep.subr.bf16.mxu0 %v9867_v6 }
0x162a   :  { %8856 = vmatpush3.bf16.msra.mxu1 %v9998_v17 }
0x162b   :  { %8850 = vmatpush3.bf16.msra.mxu0 %v10070_v51  ;;  %8857 = vmatprep.subr.bf16.mxu1 %v9867_v6 }
0x162c   :  { %8869 = vmatprep.subr.bf16.mxu0 %v9867_v6 }
0x16f1   :  { %v1991_v26 = vpop.f32.mrb[24].mxu0 }
0x16f2   :  { %v1995_v27 = vadd.f32 %v1991_v26, %v235_v25  ;;  %v7803_v45 = vpop.f32.mrb[25].mxu0 }
0x16f4   :  { %9556 = vtanh.f32 %v1995_v27  ;;  %v6875_v55 = vmul.f32 -1.442695, %v1995_v27 }
0x16f8   :  { %v1893_v28 = vpop.f32.mrb[18].mxu1 }
0x16f9   :  { %v1894_v30 = vadd.f32 %v10434_v29, %v1893_v28  ;;  %v7792_v31 = vpop.f32.mrb[19].mxu1 }
0x16fb   :  { %9558 = vtanh.f32 %v1894_v30  ;;  %v6873_v33 = vmul.f32 -1.442695, %v1894_v30 }
0x16fc   :  { %9560 = vpow2.f32 %v6875_v55 }
0x16fd   :  { %9562 = vpow2.f32 %v6873_v33 }
0x16fe   :  { %v9557_v23 = vpop.eup %9556 }
0x16ff   :  { %2005 = vrot.lane.b32.xlu0 %v9557_v23, %s9870_s19 }
0x1705   :  { %v9559_v32 = vpop.eup %9558 }
0x1706   :  { %1906 = vrot.lane.b32.xlu1 %v9559_v32, %s9870_s19  ;;  %v9561_v20 = vpop.eup %9560 }
0x1707   :  { %v1999_v34 = vadd.f32 1.0, %v9561_v20  ;;  %v9563_v35 = vpop.eup %9562 }
0x1708   :  { %v1900_v36 = vadd.f32 1.0, %v9563_v35 }
0x1709   :  { %9564 = vrcp.f32 %v1999_v34 }
0x170a   :  { %9566 = vrcp.f32 %v1900_v36 }
0x1713   :  { %v9565_v46 = vpop.eup %9564 }
0x1714   :  { %v9567_v39 = vpop.eup %9566  ;;  %v2003_v50 = vmul.f32 %v9565_v46, %v10394_v5 }
0x1715   :  { %v1904_v59 = vmul.f32 %v9567_v39, %v10398_v9 }
0x1771   :  { %v2006_v37 = vpop.permute.xlu0 %2005 }
0x1772   :  { %v2008_v38 = vmul.f32 %v9565_v46, %v2006_v37 }
0x1774   :  { %2010 = vrot.lane.b32.xlu0 %v2008_v38, %s9871_s20 }
0x1778   :  { %v1907_v40 = vpop.permute.xlu1 %1906 }
0x1779   :  { %v1909_v43 = vmul.f32 %v9567_v39, %v1907_v40 }
0x177b   :  { %1911 = vrot.lane.b32.xlu1 %v1909_v43, %s9871_s20  ;;  %v245_v43 = vadd.f32 %v10427_v22, %v10195_v58 }
0x17e6   :  { %v2011_v52 = vpop.permute.xlu0 %2010 }
0x17e7   :  { %v10442_v53 = vadd.f32 %v2011_v52, %v2003_v50 }
0x17e9   :  { %9568 = vtanh.f32 %v10442_v53 }
0x17ed   :  { %v1912_v60 = vpop.permute.xlu1 %1911 }
0x17ee   :  { %v10446_v24 = vadd.f32 %v1912_v60, %v1904_v59 }
0x17f0   :  { %9570 = vtanh.f32 %v10446_v24 }
0x17f3   :  { %v9569_v48 = vpop.eup %9568 }
0x17f4   :  { %2016 = vrot.lane.b32.xlu0 %v9569_v48, %s9870_s19 }
0x17fa   :  { %v9571_v41 = vpop.eup %9570 }
0x17fb   :  { %1917 = vrot.lane.b32.xlu1 %v9571_v41, %s9870_s19 }
0x1866   :  { %v2017_v61 = vpop.permute.xlu0 %2016 }
0x1867   :  { %v2019_v62 = vmul.f32 %v9565_v46, %v2017_v61 }
0x1869   :  { %2021 = vrot.lane.b32.xlu0 %v2019_v62, %s9871_s20 }
0x186d   :  { %v1918_v56 = vpop.permute.xlu1 %1917 }
0x186e   :  { %v1920_v63 = vmul.f32 %v9567_v39, %v1918_v56 }
0x1870   :  { %2025 = vrot.lane.b32.xlu1 %v1920_v63, %s9870_s19 }
0x18db   :  { %v2022_v0 = vpop.permute.xlu0 %2021 }
0x18dc   :  { %7832 = vmatmul.mubr.msk.f32.vlgmr.msra.gmra.mrb[20].mxu1 %vm270_vm2, %v2022_v0 }
0x18dd   :  { %8859 = vmatpush3.bf16.msra.mxu1 %v10039_v42  ;;  %7850 = vmatprep.mubr.msk.f32.mxu1 %vm9868_vm1, %v9869_v11 }
0x18de   :  { %8860 = vmatprep.subr.bf16.mxu1 %v9867_v6 }
0x18e1   :  { %8862 = vmatpush3.bf16.msra.mxu1 %v10045_v44 }
0x18e2   :  { %8863 = vmatprep.subr.bf16.mxu1 %v9867_v6  ;;  %v2026_v1 = vpop.permute.xlu1 %2025 }
0x18e3   :  { %v2028_v2 = vsel %vm270_vm2, %v2022_v0, %v2026_v1 }
0x18e4   :  { %7821 = vmatmul.mubr.msk.f32.vlgmr.msra.gmra.mrb[26].mxu0 %vm91_vm0, %v2028_v2 }
0x18e5   :  { %8865 = vmatpush3.bf16.msra.mxu1 %v10057_v47  ;;  %8871 = vmatpush3.bf16.msra.mxu0 %v9985_v12 }
0x18e6   :  { %7861 = vmatprep.mubr.msk.f32.mxu0 %vm9868_vm1, %v9869_v11  ;;  %8872 = vmatprep.subr.bf16.mxu0 %v9867_v6 }
0x18e7   :  { %8866 = vmatprep.subr.bf16.mxu1 %v9867_v6 }
0x18e9   :  { %8868 = vmatpush3.bf16.msra.mxu1 %v10070_v51  ;;  %8874 = vmatpush3.bf16.msra.mxu0 %v9998_v17 }
0x18ea   :  { %8887 = vmatprep.subr.bf16.mxu1 %v9867_v6  ;;  %8875 = vmatprep.subr.bf16.mxu0 %v9867_v6 }
0x19af   :  { %v2196_v4 = vpop.f32.mrb[20].mxu1 }
0x19b0   :  { %v2200_v5 = vadd.f32 %v2196_v4, %v240_v3  ;;  %v7833_v7 = vpop.f32.mrb[21].mxu1 }
0x19b2   :  { %9572 = vtanh.f32 %v2200_v5  ;;  %v6879_v14 = vmul.f32 -1.442695, %v2200_v5 }
0x19b7   :  { %v2098_v8 = vpop.f32.mrb[26].mxu0 }
0x19b8   :  { %v2099_v9 = vadd.f32 %v10434_v29, %v2098_v8  ;;  %v7822_v49 = vpop.f32.mrb[27].mxu0 }
0x19ba   :  { %9574 = vtanh.f32 %v2099_v9  ;;  %v6877_v15 = vmul.f32 -1.442695, %v2099_v9 }
0x19bb   :  { %9576 = vpow2.f32 %v6879_v14 }
0x19bc   :  { %v9573_v10 = vpop.eup %9572  ;;  %9578 = vpow2.f32 %v6877_v15 }
0x19bd   :  { %2210 = vrot.lane.b32.xlu0 %v9573_v10, %s9870_s19 }
0x19c4   :  { %v9575_v13 = vpop.eup %9574 }
0x19c5   :  { %2111 = vrot.lane.b32.xlu1 %v9575_v13, %s9870_s19  ;;  %v9577_v54 = vpop.eup %9576 }
0x19c6   :  { %v2204_v16 = vadd.f32 1.0, %v9577_v54  ;;  %v9579_v18 = vpop.eup %9578 }
0x19c7   :  { %v2105_v19 = vadd.f32 1.0, %v9579_v18 }
0x19c8   :  { %9580 = vrcp.f32 %v2204_v16 }
0x19c9   :  { %9582 = vrcp.f32 %v2105_v19 }
0x19d2   :  { %v9581_v21 = vpop.eup %9580 }
0x19d3   :  { %v9583_v27 = vpop.eup %9582  ;;  %v2208_v30 = vmul.f32 %v9581_v21, %v10442_v53 }
0x19d4   :  { %v2109_v32 = vmul.f32 %v9583_v27, %v10446_v24 }
0x1a2f   :  { %v2211_v25 = vpop.permute.xlu0 %2210 }
0x1a30   :  { %v2213_v26 = vmul.f32 %v9581_v21, %v2211_v25 }
0x1a32   :  { %2215 = vrot.lane.b32.xlu0 %v2213_v26, %s9871_s20 }
0x1a37   :  { %v2112_v45 = vpop.permute.xlu1 %2111 }
0x1a38   :  { %v2114_v28 = vmul.f32 %v9583_v27, %v2112_v45 }
0x1a3a   :  { %2116 = vrot.lane.b32.xlu1 %v2114_v28, %s9871_s20 }
0x1aa4   :  { %v2216_v31 = vpop.permute.xlu0 %2215 }
0x1aa5   :  { %v10480_v23 = vadd.f32 %v2216_v31, %v2208_v30 }
0x1aa7   :  { %9584 = vtanh.f32 %v10480_v23 }
0x1aac   :  { %v2117_v55 = vpop.permute.xlu1 %2116 }
0x1aad   :  { %v10484_v33 = vadd.f32 %v2117_v55, %v2109_v32 }
0x1aaf   :  { %9586 = vtanh.f32 %v10484_v33 }
0x1ab1   :  { %v9585_v20 = vpop.eup %9584 }
0x1ab2   :  { %2221 = vrot.lane.b32.xlu0 %v9585_v20, %s9870_s19 }
0x1ab9   :  { %v9587_v34 = vpop.eup %9586 }
0x1aba   :  { %2122 = vrot.lane.b32.xlu1 %v9587_v34, %s9870_s19 }
0x1b24   :  { %v2222_v35 = vpop.permute.xlu0 %2221 }
0x1b25   :  { %v2224_v36 = vmul.f32 %v9581_v21, %v2222_v35 }
0x1b27   :  { %2226 = vrot.lane.b32.xlu0 %v2224_v36, %s9871_s20 }
0x1b2c   :  { %v2123_v46 = vpop.permute.xlu1 %2122 }
0x1b2d   :  { %v2125_v37 = vmul.f32 %v9583_v27, %v2123_v46 }
0x1b2f   :  { %2230 = vrot.lane.b32.xlu1 %v2125_v37, %s9870_s19 }
0x1b99   :  { %v2227_v38 = vpop.permute.xlu0 %2226 }
0x1b9a   :  { %7862 = vmatmul.mubr.msk.f32.vlgmr.msra.gmra.mrb[28].mxu0 %vm270_vm2, %v2227_v38 }
0x1b9b   :  { %8877 = vmatpush3.bf16.msra.mxu0 %v10039_v42  ;;  %7880 = vmatprep.mubr.msk.f32.mxu0 %vm9868_vm1, %v9869_v11 }
0x1b9c   :  { %8878 = vmatprep.subr.bf16.mxu0 %v9867_v6 }
0x1b9f   :  { %8880 = vmatpush3.bf16.msra.mxu0 %v10045_v44 }
0x1ba0   :  { %8881 = vmatprep.subr.bf16.mxu0 %v9867_v6 }
0x1ba1   :  { %v2231_v39 = vpop.permute.xlu1 %2230 }
0x1ba2   :  { %v2233_v40 = vsel %vm270_vm2, %v2227_v38, %v2231_v39 }
0x1ba3   :  { %8883 = vmatpush3.bf16.msra.mxu0 %v10057_v47  ;;  %7851 = vmatmul.mubr.msk.f32.vlgmr.msra.gmra.mrb[22].mxu1 %vm91_vm0, %v2233_v40 }
0x1ba4   :  { %8884 = vmatprep.subr.bf16.mxu0 %v9867_v6  ;;  %8889 = vmatpush3.bf16.msra.mxu1 %v9985_v12 }
0x1ba5   :  { %7891 = vmatprep.mubr.msk.f32.mxu1 %vm9868_vm1, %v9869_v11  ;;  %8890 = vmatprep.subr.bf16.mxu1 %v9867_v6 }
0x1ba7   :  { %8886 = vmatpush3.bf16.msra.mxu0 %v10070_v51 }
0x1ba8   :  { %8905 = vmatprep.subr.bf16.mxu0 %v9867_v6  ;;  %8892 = vmatpush3.bf16.msra.mxu1 %v9998_v17 }
0x1ba9   :  { %8893 = vmatprep.subr.bf16.mxu1 %v9867_v6 }
0x1c6d   :  { %v2401_v50 = vpop.f32.mrb[28].mxu0 }
0x1c6e   :  { %v2405_v52 = vadd.f32 %v2401_v50, %v245_v43  ;;  %v7863_v53 = vpop.f32.mrb[29].mxu0 }
0x1c6f   :  { %v2763_v53 = vld [vmem:[%s11650_s9] sm:$0xff] }
0x1c70   :  { %9588 = vtanh.f32 %v2405_v52  ;;  %v6883_v17 = vmul.f32 -1.442695, %v2405_v52 }
0x1c76   :  { %v2303_v12 = vpop.f32.mrb[22].mxu1 }
0x1c77   :  { %v2304_v59 = vadd.f32 %v10434_v29, %v2303_v12  ;;  %v7852_v60 = vpop.f32.mrb[23].mxu1  ;;  %v2764_v12 = vld [vmem:[%s11650_s9 + $0x8] sm:$0xff] }
0x1c78   :  { %v10561_v60 = vpack.c.bf16 %v2764_v12, %v2763_v53 }
0x1c79   :  { %9590 = vtanh.f32 %v2304_v59  ;;  %v6881_v41 = vmul.f32 -1.442695, %v2304_v59  ;;  %v2765_v59 = vld [vmem:[%s11650_s9 + $0x10] sm:$0xff] }
0x1c7a   :  { %v9589_v24 = vpop.eup %9588  ;;  %9592 = vpow2.f32 %v6883_v17 }
0x1c7b   :  { %2415 = vrot.lane.b32.xlu0 %v9589_v24, %s9870_s19  ;;  %9594 = vpow2.f32 %v6881_v41  ;;  %v2766_v24 = vld [vmem:[%s11650_s9 + $0x18] sm:$0xff]  ;;  %s3602_s9 = scalar_select %p3601_p6, 1, 0 }
0x1c83   :  { %v9591_v48 = vpop.eup %9590 }
0x1c84   :  { %2316 = vrot.lane.b32.xlu1 %v9591_v48, %s9870_s19  ;;  %v9593_v61 = vpop.eup %9592  ;;  %v10567_v48 = vpack.c.bf16 %v2766_v24, %v2765_v59 }
0x1c85   :  { %v2409_v58 = vadd.f32 1.0, %v9593_v61  ;;  %v9595_v62 = vpop.eup %9594 }
0x1c86   :  { %v2310_v56 = vadd.f32 1.0, %v9595_v62 }
0x1c87   :  { %9596 = vrcp.f32 %v2409_v58 }
0x1c88   :  { %9598 = vrcp.f32 %v2310_v56  ;;  %v2747_v56 = vld [vmem:[%s11649_s8] sm:$0xff] }
0x1c91   :  { %v9597_v63 = vpop.eup %9596 }
0x1c92   :  { %v9599_v2 = vpop.eup %9598  ;;  %v2413_v5 = vmul.f32 %v9597_v63, %v10480_v23 }
0x1c93   :  { %v2314_v9 = vmul.f32 %v9599_v2, %v10484_v33 }
0x1ced   :  { %v2416_v0 = vpop.permute.xlu0 %2415 }
0x1cee   :  { %v2418_v1 = vmul.f32 %v9597_v63, %v2416_v0 }
0x1cf0   :  { %2420 = vrot.lane.b32.xlu0 %v2418_v1, %s9871_s20  ;;  %v2749_v1 = vld [vmem:[%s11649_s8 + $0x10] sm:$0xff] }
0x1cf6   :  { %v2317_v3 = vpop.permute.xlu1 %2316 }
0x1cf7   :  { %v2319_v4 = vmul.f32 %v9599_v2, %v2317_v3 }
0x1cf9   :  { %2321 = vrot.lane.b32.xlu1 %v2319_v4, %s9871_s20 }
0x1d62   :  { %v2421_v7 = vpop.permute.xlu0 %2420 }
0x1d63   :  { %v2423_v8 = vadd.f32 %v2421_v7, %v2413_v5  ;;  %v2751_v5 = vld [vmem:[%s11649_s8 + $0x20] sm:$0xff]  ;;  %v2752_v7 = vld [vmem:[%s11649_s8 + $0x28] sm:$0xff] }
0x1d65   :  { %9600 = vtanh.f32 %v2423_v8 }
0x1d6b   :  { %v2322_v49 = vpop.permute.xlu1 %2321 }
0x1d6c   :  { %v2324_v10 = vadd.f32 %v2322_v49, %v2314_v9  ;;  %v2753_v9 = vld [vmem:[%s11649_s8 + $0x30] sm:$0xff]  ;;  %v2754_v49 = vld [vmem:[%s11649_s8 + $0x38] sm:$0xff] }
0x1d6e   :  { %9602 = vtanh.f32 %v2324_v10 }
0x1d6f   :  { %v9601_v13 = vpop.eup %9600 }
0x1d70   :  { %2426 = vrot.lane.b32.xlu0 %v9601_v13, %s9870_s19 }
0x1d78   :  { %v9603_v14 = vpop.eup %9602 }
0x1d79   :  { %2327 = vrot.lane.b32.xlu1 %v9603_v14, %s9870_s19  ;;  %v2755_v14 = vld [vmem:[%s11649_s8 + $0x40] sm:$0xff] }
0x1de2   :  { %v2427_v15 = vpop.permute.xlu0 %2426 }
0x1de3   :  { %v2429_v54 = vmul.f32 %v9597_v63, %v2427_v15  ;;  %v2748_v63 = vld [vmem:[%s11649_s8 + $0x8] sm:$0xff] }
0x1de4   :  { %v10581_v0 = vpack.c.bf16 %v2748_v63, %v2747_v56  ;;  %v2756_v15 = vld [vmem:[%s11649_s8 + $0x48] sm:$0xff] }
0x1de5   :  { %2431 = vrot.lane.b32.xlu0 %v2429_v54, %s9871_s20 }
0x1deb   :  { %v2328_v16 = vpop.permute.xlu1 %2327 }
0x1dec   :  { %v2330_v18 = vmul.f32 %v9599_v2, %v2328_v16  ;;  %v2750_v2 = vld [vmem:[%s11649_s8 + $0x18] sm:$0xff]  ;;  %v10625_v16 = vpack.c.bf16 %v2756_v15, %v2755_v14  ;;  %v2956_v15 = vld [vmem:[%s11652_s11 + $0x30] sm:$0xff] }
0x1ded   :  { %v10591_v4 = vpack.c.bf16 %v2750_v2, %v2749_v1 }
0x1dee   :  { %2435 = vrot.lane.b32.xlu1 %v2330_v18, %s9870_s19  ;;  %v2757_v18 = vld [vmem:[%s11649_s8 + $0x50] sm:$0xff] }
0x1e57   :  { %v2432_v19 = vpop.permute.xlu0 %2431 }
0x1e58   :  { %7892 = vmatmul.mubr.msk.f32.vlgmr.msra.gmra.mrb[24].mxu1 %vm270_vm2, %v2432_v19 }
0x1e59   :  { %8895 = vmatpush3.bf16.msra.mxu1 %v10039_v42  ;;  %7910 = vmatprep.mubr.msk.f32.mxu1 %vm9868_vm1, %v9869_v11  ;;  %v250_v42 = vadd.f32 %v10427_v22, %v10193_v57 }
0x1e5a   :  { %8896 = vmatprep.subr.bf16.mxu1 %v9867_v6 }
0x1e5d   :  { %8898 = vmatpush3.bf16.msra.mxu1 %v10045_v44 }
0x1e5e   :  { %8899 = vmatprep.subr.bf16.mxu1 %v9867_v6 }
0x1e60   :  { %v2436_v21 = vpop.permute.xlu1 %2435 }
0x1e61   :  { %8901 = vmatpush3.bf16.msra.mxu1 %v10057_v47  ;;  %v2438_v25 = vsel %vm270_vm2, %v2432_v19, %v2436_v21  ;;  %v2758_v19 = vld [vmem:[%s11649_s8 + $0x58] sm:$0xff] }
0x1e62   :  { %8902 = vmatprep.subr.bf16.mxu1 %v9867_v6  ;;  %7881 = vmatmul.mubr.msk.f32.vlgmr.msra.gmra.mrb[30].mxu0 %vm91_vm0, %v2438_v25  ;;  %v10637_v21 = vpack.c.bf16 %v2758_v19, %v2757_v18  ;;  %v2759_v25 = vld [vmem:[%s11649_s8 + $0x60] sm:$0xff] }
0x1e63   :  { %7921 = vmatprep.mubr.msk.f32.mxu0 %vm9868_vm1, %v9869_v11  ;;  %8907 = vmatpush3.bf16.msra.mxu0 %v10561_v60 }
0x1e64   :  { %8908 = vmatprep.subr.bf16.mxu0 %v9867_v6 }
0x1e65   :  { %8904 = vmatpush3.bf16.msra.mxu1 %v10070_v51 }
0x1e66   :  { %8935 = vmatprep.subr.bf16.mxu1 %v9867_v6 }
0x1e67   :  { %8910 = vmatpush3.bf16.msra.mxu0 %v10567_v48 }
0x1e68   :  { %8911 = vmatprep.subr.bf16.mxu0 %v9867_v6 }
0x1f2b   :  { %v2606_v44 = vpop.f32.mrb[24].mxu1 }
0x1f2c   :  { %v2610_v26 = vadd.f32 %v2606_v44, %v250_v42  ;;  %v7893_v27 = vpop.f32.mrb[25].mxu1  ;;  %v2760_v42 = vld [vmem:[%s11649_s8 + $0x68] sm:$0xff] }
0x1f2d   :  { %v10647_v44 = vpack.c.bf16 %v2760_v42, %v2759_v25  ;;  %v2761_v27 = vld [vmem:[%s11649_s8 + $0x70] sm:$0xff] }
0x1f2e   :  { %9604 = vtanh.f32 %v2610_v26  ;;  %v6887_v51 = vmul.f32 -1.442695, %v2610_v26  ;;  %v2741_v26 = vlaneseq }
0x1f35   :  { %v2508_v47 = vpop.f32.mrb[30].mxu0 }
0x1f36   :  { %v2509_v45 = vadd.f32 %v10434_v29, %v2508_v47  ;;  %v7882_v28 = vpop.f32.mrb[31].mxu0  ;;  %v2762_v47 = vld [vmem:[%s11649_s8 + $0x78] sm:$0xff]  ;;  %s4808_s8 = scalar_select %p4807_p9, 1, 0 }
0x1f37   :  { %v10659_v28 = vand.u32 127, %v2741_v26 }
0x1f38   :  { %v9605_v30 = vpop.eup %9604  ;;  %9606 = vtanh.f32 %v2509_v45  ;;  %v6885_v23 = vmul.f32 -1.442695, %v2509_v45  ;;  %v10657_v45 = vpack.c.bf16 %v2762_v47, %v2761_v27 }
0x1f39   :  { %2620 = vrot.lane.b32.xlu0 %v9605_v30, %s9870_s19  ;;  %9608 = vpow2.f32 %v6887_v51  ;;  %vm2744_vm3 = vcmp.eq.s32.totalorder %v10659_v28, 1  ;;  %v9872_v30 = vmov 1.0  }
0x1f3a   :  { %9610 = vpow2.f32 %v6885_v23 }
0x1f42   :  { %v9607_v31 = vpop.eup %9606 }
0x1f43   :  { %2521 = vrot.lane.b32.xlu1 %v9607_v31, %s9870_s19  ;;  %v9609_v32 = vpop.eup %9608 }
0x1f44   :  { %v2614_v57 = vadd.f32 1.0, %v9609_v32  ;;  %v9611_v22 = vpop.eup %9610 }
0x1f45   :  { %v2515_v55 = vadd.f32 1.0, %v9611_v22 }
0x1f46   :  { %9612 = vrcp.f32 %v2614_v57 }
0x1f47   :  { %9614 = vrcp.f32 %v2515_v55 }
0x1f50   :  { %v9613_v33 = vpop.eup %9612 }
0x1f51   :  { %v9615_v35 = vpop.eup %9614  ;;  %v2618_v37 = vmul.f32 %v9613_v33, %v2423_v8  ;;  %v10603_v8 = vpack.c.bf16 %v2752_v7, %v2751_v5  ;;  %v2953_v7 = vld [vmem:[%s11652_s11 + $0x18] sm:$0xff] }
0x1f52   :  { %v2519_v40 = vmul.f32 %v9615_v35, %v2324_v10  ;;  %v10613_v10 = vpack.c.bf16 %v2754_v49, %v2753_v9  ;;  %v2954_v49 = vld [vmem:[%s11652_s11 + $0x20] sm:$0xff] }
0x1fab   :  { %v2621_v20 = vpop.permute.xlu0 %2620 }
0x1fac   :  { %v2623_v34 = vmul.f32 %v9613_v33, %v2621_v20 }
0x1fae   :  { %2625 = vrot.lane.b32.xlu0 %v2623_v34, %s9871_s20 }
0x1fb5   :  { %v2522_v36 = vpop.permute.xlu1 %2521 }
0x1fb6   :  { %v2524_v46 = vmul.f32 %v9615_v35, %v2522_v36 }
0x1fb8   :  { %2526 = vrot.lane.b32.xlu1 %v2524_v46, %s9871_s20 }
0x2020   :  { %v2626_v38 = vpop.permute.xlu0 %2625 }
0x2021   :  { %v10545_v39 = vadd.f32 %v2626_v38, %v2618_v37 }
0x2023   :  { %9616 = vtanh.f32 %v10545_v39 }
0x202a   :  { %v2527_v43 = vpop.permute.xlu1 %2526 }
0x202b   :  { %v10548_v50 = vadd.f32 %v2527_v43, %v2519_v40 }
0x202d   :  { %v9617_v52 = vpop.eup %9616  ;;  %9618 = vtanh.f32 %v10548_v50 }
0x202e   :  { %2631 = vrot.lane.b32.xlu0 %v9617_v52, %s9870_s19 }
0x2037   :  { %v9619_v17 = vpop.eup %9618 }
0x2038   :  { %2532 = vrot.lane.b32.xlu1 %v9619_v17, %s9870_s19 }
0x20a0   :  { %v2632_v41 = vpop.permute.xlu0 %2631 }
0x20a1   :  { %v2634_v61 = vmul.f32 %v9613_v33, %v2632_v41  ;;  %v10688_v33 = vld [vmem:[%s11651_s10] ss:$0 sm:$0xff] }
0x20a3   :  { %2636 = vrot.lane.b32.xlu0 %v2634_v61, %s9871_s20 }
0x20aa   :  { %v2533_v58 = vpop.permute.xlu1 %2532 }
0x20ab   :  { %v2535_v62 = vmul.f32 %v9615_v35, %v2533_v58 }
0x20ad   :  { %2640 = vrot.lane.b32.xlu1 %v2535_v62, %s9870_s19 }
0x2115   :  { %v2637_v3 = vpop.permute.xlu0 %2636 }
0x2116   :  { %7922 = vmatmul.mubr.msk.f32.vlgmr.msra.gmra.mrb[32].mxu0 %vm270_vm2, %v2637_v3 }
0x2117   :  { %8913 = vmatpush3.bf16.msra.mxu0 %v10581_v0  ;;  %7956 = vmatprep.mubr.msk.f32.mxu0 %vm9868_vm1, %v9869_v11 }
0x2118   :  { %8914 = vmatprep.subr.bf16.mxu0 %v9867_v6 }
0x211b   :  { %8916 = vmatpush3.bf16.msra.mxu0 %v10591_v4 }
0x211c   :  { %8917 = vmatprep.subr.bf16.mxu0 %v9867_v6 }
0x211f   :  { %8919 = vmatpush3.bf16.msra.mxu0 %v10603_v8  ;;  %v2641_v13 = vpop.permute.xlu1 %2640 }
0x2120   :  { %8920 = vmatprep.subr.bf16.mxu0 %v9867_v6  ;;  %v2643_v54 = vsel %vm270_vm2, %v2637_v3, %v2641_v13  ;;  %v2951_v3 = vld [vmem:[%s11652_s11 + $0x8] sm:$0xff] }
0x2121   :  { %7911 = vmatmul.mubr.msk.f32.vlgmr.msra.gmra.mrb[26].mxu1 %vm91_vm0, %v2643_v54  ;;  %v2955_v13 = vld [vmem:[%s11652_s11 + $0x28] sm:$0xff]  ;;  %v2957_v54 = vld [vmem:[%s11652_s11 + $0x38] sm:$0xff] }
0x2122   :  { %7975 = vmatprep.mubr.msk.f32.mxu1 %vm9868_vm1, %v9869_v11  ;;  %v10726_v14 = vpack.c.bf16 %v2955_v13, %v2954_v49  ;;  %v10736_v19 = vpack.c.bf16 %v2957_v54, %v2956_v15  ;;  %v3201_v49 = vstv %s3200_s29  ;;  %v3158_v54 = vld [vmem:[%s11643_s2] sm:$0xff] }
0x2123   :  { %8922 = vmatpush3.bf16.msra.mxu0 %v10613_v10  ;;  %vm3202_vm5 = vcmp.eq.s32.totalorder %v3201_v49, 1 }
0x2124   :  { %8923 = vmatprep.subr.bf16.mxu0 %v9867_v6 }
0x2127   :  { %8925 = vmatpush3.bf16.msra.mxu0 %v10625_v16 }
0x2128   :  { %8926 = vmatprep.subr.bf16.mxu0 %v9867_v6 }
0x212b   :  { %8928 = vmatpush3.bf16.msra.mxu0 %v10637_v21 }
0x212c   :  { %8929 = vmatprep.subr.bf16.mxu0 %v9867_v6 }
0x212f   :  { %8931 = vmatpush3.bf16.msra.mxu0 %v10647_v44 }
0x2130   :  { %8932 = vmatprep.subr.bf16.mxu0 %v9867_v6 }
0x2133   :  { %8934 = vmatpush3.bf16.msra.mxu0 %v10657_v45 }
0x2134   :  { %8959 = vmatprep.subr.bf16.mxu0 %v9867_v6 }
0x2136   :  { %7957 = vmatmul.mubr.msk.f32.vlgmr.msra.gmra.mrb[34].mxu0 %vm2744_vm3, %v9872_v30 }
0x2137   :  { %8961 = vmatpush3.bf16.msra.mxu0 %v10581_v0  ;;  %8032 = vmatprep.mubr.msk.f32.mxu0 %vm9868_vm1, %v9869_v11 }
0x2138   :  { %8962 = vmatprep.subr.bf16.mxu0 %v9867_v6 }
0x213b   :  { %8964 = vmatpush3.bf16.msra.mxu0 %v10591_v4 }
0x213c   :  { %8965 = vmatprep.subr.bf16.mxu0 %v9867_v6 }
0x213f   :  { %8967 = vmatpush3.bf16.msra.mxu0 %v10603_v8 }
0x2140   :  { %8968 = vmatprep.subr.bf16.mxu0 %v9867_v6 }
0x2143   :  { %8970 = vmatpush3.bf16.msra.mxu0 %v10613_v10 }
0x2144   :  { %8971 = vmatprep.subr.bf16.mxu0 %v9867_v6 }
0x2147   :  { %8973 = vmatpush3.bf16.msra.mxu0 %v10625_v16 }
0x2148   :  { %8974 = vmatprep.subr.bf16.mxu0 %v9867_v6 }
0x214b   :  { %8976 = vmatpush3.bf16.msra.mxu0 %v10637_v21 }
0x214c   :  { %8977 = vmatprep.subr.bf16.mxu0 %v9867_v6 }
0x214f   :  { %8979 = vmatpush3.bf16.msra.mxu0 %v10647_v44 }
0x2150   :  { %8980 = vmatprep.subr.bf16.mxu0 %v9867_v6 }
0x2153   :  { %8982 = vmatpush3.bf16.msra.mxu0 %v10657_v45 }
0x2154   :  { %9007 = vmatprep.subr.bf16.mxu0 %v9867_v6 }
0x21e9   :  { %v2835_v31 = vpop.f32.mrb[32].mxu0 }
0x21ea   :  { %v7923_v51 = vpop.f32.mrb[33].mxu0 }
0x21f4   :  { %v2713_v23 = vpop.f32.mrb[26].mxu1 }
0x21f5   :  { %v2714_v32 = vadd.f32 %v10434_v29, %v2713_v23  ;;  %v7912_v57 = vpop.f32.mrb[27].mxu1 }
0x21f7   :  { %9620 = vtanh.f32 %v2714_v32  ;;  %v6889_v29 = vmul.f32 -1.442695, %v2714_v32 }
0x2201   :  { %v9621_v22 = vpop.eup %9620 }
0x2202   :  { %2726 = vrot.lane.b32.xlu0 %v9621_v22, %s9870_s19 }
0x2209   :  { %v2905_v55 = vpop.f32.mrb[34].mxu0 }
0x220a   :  { %v2906_v20 = vadd.f32 %v2905_v55, %v2835_v31  ;;  %v7958_v34 = vpop.f32.mrb[35].mxu0  ;;  %v10750_v31 = vld [vmem:[%s11653_s12] ss:$0 sm:$0xff] }
0x220c   :  { %v2916_v35 = vadd.f32 %v10688_v33, %v2906_v20 }
0x220e   :  { %9622 = vtanh.f32 %v2916_v35  ;;  %v6894_v38 = vmul.f32 -1.442695, %v2916_v35 }
0x220f   :  { %9624 = vpow2.f32 %v6889_v29 }
0x2218   :  { %v9623_v36 = vpop.eup %9622 }
0x2219   :  { %2926 = vrot.lane.b32.xlu1 %v9623_v36, %s9870_s19  ;;  %v9625_v46 = vpop.eup %9624 }
0x221a   :  { %v2720_v37 = vadd.f32 1.0, %v9625_v46 }
0x221c   :  { %9626 = vrcp.f32 %v2720_v37 }
0x221d   :  { %9628 = vpow2.f32 %v6894_v38  ;;  %v3062_v38 = vld [vmem:[%s11654_s13] sm:$0xff] }
0x2226   :  { %v9627_v40 = vpop.eup %9626 }
0x2227   :  { %v9629_v53 = vpop.eup %9628  ;;  %v2724_v41 = vmul.f32 %v9627_v40, %v10548_v50  ;;  %v2950_v50 = vld [vmem:[%s11652_s11] sm:$0xff] }
0x2228   :  { %v2920_v12 = vadd.f32 1.0, %v9629_v53  ;;  %v10710_v5 = vpack.c.bf16 %v2951_v3, %v2950_v50  ;;  %v3065_v53 = vld [vmem:[%s11654_s13 + $0x18] sm:$0xff]  ;;  %v10811_v50 = vcvt.s32.f32 %v10659_v28 }
0x222a   :  { %9630 = vrcp.f32 %v2920_v12  ;;  %8937 = vmatpush3.bf16.msra.mxu1 %v10710_v5  ;;  %v10814_v3 = vsub.f32 0.0, %v10811_v50 }
0x222b   :  { %8938 = vmatprep.subr.bf16.mxu1 %v9867_v6 }
0x2234   :  { %v9631_v59 = vpop.eup %9630 }
0x2235   :  { %v2924_v56 = vmul.f32 %v9631_v59, %v10545_v39  ;;  %v2952_v39 = vld [vmem:[%s11652_s11 + $0x10] sm:$0xff]  ;;  %s6924_s11 = sld [smem:[#allocation3 + $0x3]] }
0x2236   :  { %v10716_v9 = vpack.c.bf16 %v2953_v7, %v2952_v39 }
0x2238   :  { %8940 = vmatpush3.bf16.msra.mxu1 %v10716_v9 }
0x2239   :  { %8941 = vmatprep.subr.bf16.mxu1 %v9867_v6 }
0x223b   :  { %p4405_p8 = scmp.gt.s32.totalorder %s6924_s11, 0 }
0x223c   :  { %8943 = vmatpush3.bf16.msra.mxu1 %v10726_v14  ;;  %s6416_s11 = scalar_select %p6415_p13, 1, 0 }
0x223d   :  { %8944 = vmatprep.subr.bf16.mxu1 %v9867_v6  ;;  %s4406_s23 = scalar_select %p4405_p8, 1, 0 }
0x2240   :  { %8946 = vmatpush3.bf16.msra.mxu1 %v10736_v19 }
0x2241   :  { %8947 = vmatprep.subr.bf16.mxu1 %v9867_v6 }
0x2274   :  { %v2727_v43 = vpop.permute.xlu0 %2726 }
0x2275   :  { %v2729_v52 = vmul.f32 %v9627_v40, %v2727_v43  ;;  %v3064_v43 = vld [vmem:[%s11654_s13 + $0x10] sm:$0xff] }
0x2276   :  { %v10773_v12 = vpack.c.bf16 %v3065_v53, %v3064_v43 }
0x2277   :  { %2731 = vrot.lane.b32.xlu0 %v2729_v52, %s9871_s20 }
0x228b   :  { %v2927_v24 = vpop.permute.xlu1 %2926 }
0x228c   :  { %v2929_v17 = vmul.f32 %v9631_v59, %v2927_v24 }
0x228e   :  { %2931 = vrot.lane.b32.xlu1 %v2929_v17, %s9871_s20 }
0x22e9   :  { %v2732_v61 = vpop.permute.xlu0 %2731 }
0x22ea   :  { %v2734_v58 = vadd.f32 %v2732_v61, %v2724_v41  ;;  %v10804_v61 = vld [vmem:[%s11655_s14] ss:$0 sm:$0xff] }
0x22ec   :  { %9632 = vtanh.f32 %v2734_v58 }
0x22f6   :  { %v9633_v62 = vpop.eup %9632 }
0x22f7   :  { %2737 = vrot.lane.b32.xlu0 %v9633_v62, %s9870_s19 }
0x2300   :  { %v2932_v63 = vpop.permute.xlu1 %2931 }
0x2301   :  { %v10697_v1 = vadd.f32 %v2932_v63, %v2924_v56 }
0x2303   :  { %9634 = vtanh.f32 %v10697_v1 }
0x230d   :  { %v9635_v2 = vpop.eup %9634 }
0x230e   :  { %2937 = vrot.lane.b32.xlu1 %v9635_v2, %s9870_s19 }
0x2369   :  { %v2738_v18 = vpop.permute.xlu0 %2737 }
0x236a   :  { %v2740_v25 = vmul.f32 %v9627_v40, %v2738_v18  ;;  %v3063_v40 = vld [vmem:[%s11654_s13 + $0x8] sm:$0xff] }
0x236b   :  { %v10767_v52 = vpack.c.bf16 %v3063_v40, %v3062_v38 }
0x236c   :  { %2946 = vrot.lane.b32.xlu1 %v2740_v25, %s9870_s19 }
0x2380   :  { %v2938_v42 = vpop.permute.xlu1 %2937 }
0x2381   :  { %v2940_v26 = vmul.f32 %v9631_v59, %v2938_v42 }
0x2383   :  { %2942 = vrot.lane.b32.xlu0 %v2940_v26, %s9871_s20 }
0x23de   :  { %v2947_v27 = vpop.permute.xlu1 %2946 }
0x23f5   :  { %v2943_v47 = vpop.permute.xlu0 %2942 }
0x23f6   :  { %v2949_v30 = vsel %vm270_vm2, %v2943_v47, %v2947_v27 }
0x23f7   :  { %7976 = vmatmul.mubr.msk.f32.vlgmr.msra.gmra.mrb[28].mxu1 %vm91_vm0, %v2949_v30 }
0x23f8   :  { %7986 = vmatprep.mubr.msk.f32.mxu1 %vm9868_vm1, %v9869_v11  ;;  %8949 = vmatpush3.bf16.msra.mxu1 %v10767_v52 }
0x23f9   :  { %8950 = vmatprep.subr.bf16.mxu1 %v9867_v6 }
0x23fc   :  { %8952 = vmatpush3.bf16.msra.mxu1 %v10773_v12 }
0x23fd   :  { %8953 = vmatprep.subr.bf16.mxu1 %v9867_v6 }
0x24ca   :  { %v3034_v51 = vpop.f32.mrb[28].mxu1 }
0x24cb   :  { %v3035_v23 = vadd.f32 %v10750_v31, %v3034_v51  ;;  %v7977_v32 = vpop.f32.mrb[29].mxu1 }
0x24cd   :  { %9636 = vtanh.f32 %v3035_v23  ;;  %v6897_v22 = vmul.f32 -1.442695, %v3035_v23 }
0x24cf   :  { %9638 = vpow2.f32 %v6897_v22 }
0x24d7   :  { %v9637_v57 = vpop.eup %9636 }
0x24d8   :  { %3047 = vrot.lane.b32.xlu0 %v9637_v57, %s9870_s19 }
0x24d9   :  { %v9639_v55 = vpop.eup %9638 }
0x24da   :  { %v3041_v20 = vadd.f32 1.0, %v9639_v55 }
0x24dc   :  { %9640 = vrcp.f32 %v3041_v20 }
0x24e6   :  { %v9641_v34 = vpop.eup %9640 }
0x24e7   :  { %v3045_v29 = vmul.f32 %v9641_v34, %v2734_v58 }
0x254a   :  { %v3048_v35 = vpop.permute.xlu0 %3047 }
0x254b   :  { %v3050_v36 = vmul.f32 %v9641_v34, %v3048_v35 }
0x254d   :  { %3052 = vrot.lane.b32.xlu1 %v3050_v36, %s9871_s20 }
0x25bf   :  { %v3053_v46 = vpop.permute.xlu1 %3052 }
0x25c0   :  { %v10755_v37 = vadd.f32 %v3053_v46, %v3045_v29 }
0x25c2   :  { %9642 = vtanh.f32 %v10755_v37 }
0x25cc   :  { %v9643_v59 = vpop.eup %9642 }
0x25cd   :  { %3058 = vrot.lane.b32.xlu0 %v9643_v59, %s9870_s19 }
0x263f   :  { %v3059_v24 = vpop.permute.xlu0 %3058 }
0x2640   :  { %v10779_v17 = vmul.f32 %v9641_v34, %v3059_v24 }
0x2642   :  { %3074 = vrot.lane.b32.xlu1 %v10779_v17, %s9871_s20 }
0x26b4   :  { %v3075_v41 = vpop.permute.xlu1 %3074 }
0x26b5   :  { %7987 = vmatmul.mubr.msk.f32.vlgmr.msra.gmra.mrb[30].mxu1 %vm270_vm2, %v3075_v41 }
0x26b6   :  { %8955 = vmatpush3.bf16.msra.mxu1 %v10561_v60  ;;  %7997 = vmatprep.mubr.msk.f32.mxu1 %vm9868_vm1, %v9869_v11 }
0x26b7   :  { %8956 = vmatprep.subr.bf16.mxu1 %v9867_v6 }
0x26ba   :  { %8958 = vmatpush3.bf16.msra.mxu1 %v10567_v48 }
0x26bb   :  { %8983 = vmatprep.subr.bf16.mxu1 %v9867_v6 }
0x26bd   :  { %7998 = vmatmul.mubr.msk.f32.vlgmr.msra.gmra.mrb[32].mxu1 %vm270_vm2, %v2943_v47 }
0x26be   :  { %8985 = vmatpush3.bf16.msra.mxu1 %v10710_v5  ;;  %8051 = vmatprep.mubr.msk.f32.mxu1 %vm9868_vm1, %v9869_v11 }
0x26bf   :  { %8986 = vmatprep.subr.bf16.mxu1 %v9867_v6 }
0x26c2   :  { %8988 = vmatpush3.bf16.msra.mxu1 %v10716_v9 }
0x26c3   :  { %8989 = vmatprep.subr.bf16.mxu1 %v9867_v6 }
0x26c6   :  { %8991 = vmatpush3.bf16.msra.mxu1 %v10726_v14 }
0x26c7   :  { %8992 = vmatprep.subr.bf16.mxu1 %v9867_v6 }
0x26ca   :  { %8994 = vmatpush3.bf16.msra.mxu1 %v10736_v19 }
0x26cb   :  { %8995 = vmatprep.subr.bf16.mxu1 %v9867_v6 }
0x2788   :  { %v3144_v58 = vpop.f32.mrb[30].mxu1 }
0x2789   :  { %v10807_v62 = vadd.f32 %v10804_v61, %v3144_v58  ;;  %v7988_v56 = vpop.f32.mrb[31].mxu1 }
0x278b   :  { %3148 = vmax.xlane.f32.xlu0 %v10807_v62 }
0x2790   :  { %v3272_v63 = vpop.f32.mrb[32].mxu1 }
0x2791   :  { %v7999_v2 = vpop.f32.mrb[33].mxu1 }
0x2818   :  { %v10816_v39 = vpop.xlane.xlu0 %3148 }
0x2819   :  { %vm3189_vm4 = vcmp.eq.f32.partialorder %v10807_v62, %v10816_v39 }
0x281a   :  { %v3191_v7 = vsel %vm3189_vm4, %v10814_v3, -128.0 }
0x281b   :  { %3192 = vmax.xlane.f32.xlu1 %v3191_v7 }
0x28a8   :  { %v3193_v13 = vpop.xlane.xlu1 %3192 }
0x28a9   :  { %v3194_v15 = vsub.f32 0.0, %v3193_v13 }
0x28ab   :  { %vm3195_vm6 = vcmp.eq.f32.partialorder %v10811_v50, %v3194_v15 }
0x28ac   :  { %v6900_v28 = vsel %vm3195_vm6, 1.0, %v9869_v11 }
0x28ad   :  { %v3203_v18 = vsel %vm3202_vm5, %v3158_v54, %v6900_v28 }
0x28ae   :  { %8033 = vmatmul.mubr.f32.vlgmr.msra.gmra.mrb[36].mxu0 %v3203_v18 }
0x28af   :  { %9009 = vmatpush3.bf16.msra.mxu0 %v10581_v0  ;;  %8108 = vmatprep.mubr.msk.f32.mxu0 %vm9868_vm1, %v9869_v11 }
0x28b0   :  { %9010 = vmatprep.subr.bf16.mxu0 %v9867_v6 }
0x28b3   :  { %9012 = vmatpush3.bf16.msra.mxu0 %v10591_v4 }
0x28b4   :  { %9013 = vmatprep.subr.bf16.mxu0 %v9867_v6 }
0x28b7   :  { %9015 = vmatpush3.bf16.msra.mxu0 %v10603_v8 }
0x28b8   :  { %9016 = vmatprep.subr.bf16.mxu0 %v9867_v6 }
0x28bb   :  { %9018 = vmatpush3.bf16.msra.mxu0 %v10613_v10 }
0x28bc   :  { %9019 = vmatprep.subr.bf16.mxu0 %v9867_v6 }
0x28bf   :  { %9021 = vmatpush3.bf16.msra.mxu0 %v10625_v16 }
0x28c0   :  { %9022 = vmatprep.subr.bf16.mxu0 %v9867_v6 }
0x28c3   :  { %9024 = vmatpush3.bf16.msra.mxu0 %v10637_v21 }
0x28c4   :  { %9025 = vmatprep.subr.bf16.mxu0 %v9867_v6 }
0x28c7   :  { %9027 = vmatpush3.bf16.msra.mxu0 %v10647_v44 }
0x28c8   :  { %9028 = vmatprep.subr.bf16.mxu0 %v9867_v6 }
0x28cb   :  { %9030 = vmatpush3.bf16.msra.mxu0 %v10657_v45 }
0x28cc   :  { %9055 = vmatprep.subr.bf16.mxu0 %v9867_v6 }
0x2981   :  { %v3342_v25 = vpop.f32.mrb[36].mxu0 }
0x2982   :  { %v3343_v42 = vadd.f32 %v3342_v25, %v3272_v63  ;;  %v8034_v26 = vpop.f32.mrb[37].mxu0 }
0x2984   :  { %v3346_v27 = vadd.f32 %v10688_v33, %v3343_v42 }
0x2986   :  { %9644 = vtanh.f32 %v3346_v27  ;;  %v6902_v30 = vmul.f32 -1.442695, %v3346_v27 }
0x2988   :  { %9646 = vpow2.f32 %v6902_v30  ;;  %v3603_v30 = vstv %s3602_s9 }
0x2989   :  { %vm3604_vm8 = vcmp.eq.s32.totalorder %v3603_v30, 1 }
0x2990   :  { %v9645_v47 = vpop.eup %9644 }
0x2991   :  { %3356 = vrot.lane.b32.xlu0 %v9645_v47, %s9870_s19 }
0x2992   :  { %v9647_v51 = vpop.eup %9646 }
0x2993   :  { %v3350_v23 = vadd.f32 1.0, %v9647_v51 }
0x2995   :  { %9648 = vrcp.f32 %v3350_v23 }
0x299f   :  { %v9649_v32 = vpop.eup %9648 }
0x29a0   :  { %v3354_v55 = vmul.f32 %v9649_v32, %v10697_v1 }
0x2a03   :  { %v3357_v57 = vpop.permute.xlu0 %3356 }
0x2a04   :  { %v3359_v22 = vmul.f32 %v9649_v32, %v3357_v57  ;;  %v6906_v57 = vld [vmem:[%s11643_s2 + $0x8] sm:$0xff] }
0x2a06   :  { %3361 = vrot.lane.b32.xlu1 %v3359_v22, %s9871_s20 }
0x2a78   :  { %v3362_v20 = vpop.permute.xlu1 %3361 }
0x2a79   :  { %v10848_v34 = vadd.f32 %v3362_v20, %v3354_v55 }
0x2a7b   :  { %9650 = vtanh.f32 %v10848_v34 }
0x2a85   :  { %v9651_v35 = vpop.eup %9650 }
0x2a86   :  { %3367 = vrot.lane.b32.xlu0 %v9651_v35, %s9870_s19 }
0x2a8a   :  { %3375 = vrot.lane.b32.xlu0 %v10779_v17, %s9870_s19 }
0x2af8   :  { %v3368_v36 = vpop.permute.xlu0 %3367 }
0x2af9   :  { %v3370_v29 = vmul.f32 %v9649_v32, %v3368_v36 }
0x2afb   :  { %3372 = vrot.lane.b32.xlu1 %v3370_v29, %s9871_s20 }
0x2afc   :  { %v3376_v46 = vpop.permute.xlu0 %3375 }
0x2b6d   :  { %v3373_v38 = vpop.permute.xlu1 %3372 }
0x2b6e   :  { %v3378_v40 = vsel %vm270_vm2, %v3373_v38, %v3376_v46 }
0x2b6f   :  { %8052 = vmatmul.mubr.msk.f32.vlgmr.msra.gmra.mrb[34].mxu1 %vm91_vm0, %v3378_v40 }
0x2b70   :  { %8997 = vmatpush3.bf16.msra.mxu1 %v10767_v52  ;;  %8062 = vmatprep.mubr.msk.f32.mxu1 %vm9868_vm1, %v9869_v11 }
0x2b71   :  { %8998 = vmatprep.subr.bf16.mxu1 %v9867_v6 }
0x2b74   :  { %9000 = vmatpush3.bf16.msra.mxu1 %v10773_v12 }
0x2b75   :  { %9001 = vmatprep.subr.bf16.mxu1 %v9867_v6 }
0x2c42   :  { %v3448_v1 = vpop.f32.mrb[34].mxu1 }
0x2c43   :  { %v3449_v43 = vadd.f32 %v10750_v31, %v3448_v1  ;;  %v8053_v53 = vpop.f32.mrb[35].mxu1 }
0x2c45   :  { %9652 = vtanh.f32 %v3449_v43  ;;  %v6904_v24 = vmul.f32 -1.442695, %v3449_v43 }
0x2c47   :  { %9654 = vpow2.f32 %v6904_v24 }
0x2c4f   :  { %v9653_v59 = vpop.eup %9652 }
0x2c50   :  { %3461 = vrot.lane.b32.xlu1 %v9653_v59, %s9870_s19 }
0x2c51   :  { %v9655_v17 = vpop.eup %9654 }
0x2c52   :  { %v3455_v41 = vadd.f32 1.0, %v9655_v17 }
0x2c54   :  { %9656 = vrcp.f32 %v3455_v41 }
0x2c5e   :  { %v9657_v58 = vpop.eup %9656 }
0x2c5f   :  { %v3459_v2 = vmul.f32 %v9657_v58, %v10755_v37 }
0x2cc2   :  { %v3462_v56 = vpop.permute.xlu1 %3461 }
0x2cc3   :  { %v3464_v63 = vmul.f32 %v9657_v58, %v3462_v56 }
0x2cc5   :  { %3466 = vrot.lane.b32.xlu0 %v3464_v63, %s9871_s20 }
0x2d37   :  { %v3467_v7 = vpop.permute.xlu0 %3466 }
0x2d38   :  { %v10867_v49 = vadd.f32 %v3467_v7, %v3459_v2 }
0x2d3a   :  { %9658 = vtanh.f32 %v10867_v49 }
0x2d44   :  { %v9659_v13 = vpop.eup %9658 }
0x2d45   :  { %3472 = vrot.lane.b32.xlu1 %v9659_v13, %s9870_s19 }
0x2db7   :  { %v3473_v15 = vpop.permute.xlu1 %3472 }
0x2db8   :  { %v10871_v28 = vmul.f32 %v9657_v58, %v3473_v15 }
0x2dba   :  { %3477 = vrot.lane.b32.xlu0 %v10871_v28, %s9871_s20 }
0x2e2c   :  { %v3478_v54 = vpop.permute.xlu0 %3477 }
0x2e2d   :  { %8063 = vmatmul.mubr.msk.f32.vlgmr.msra.gmra.mrb[36].mxu1 %vm270_vm2, %v3478_v54 }
0x2e2e   :  { %9003 = vmatpush3.bf16.msra.mxu1 %v10561_v60  ;;  %8073 = vmatprep.mubr.msk.f32.mxu1 %vm9868_vm1, %v9869_v11 }
0x2e2f   :  { %9004 = vmatprep.subr.bf16.mxu1 %v9867_v6 }
0x2e32   :  { %9006 = vmatpush3.bf16.msra.mxu1 %v10567_v48 }
0x2e33   :  { %9031 = vmatprep.subr.bf16.mxu1 %v9867_v6 }
0x2e35   :  { %8074 = vmatmul.mubr.msk.f32.vlgmr.msra.gmra.mrb[38].mxu1 %vm270_vm2, %v3373_v38 }
0x2e36   :  { %9033 = vmatpush3.bf16.msra.mxu1 %v10710_v5  ;;  %8127 = vmatprep.mubr.msk.f32.mxu1 %vm9868_vm1, %v9869_v11 }
0x2e37   :  { %9034 = vmatprep.subr.bf16.mxu1 %v9867_v6 }
0x2e3a   :  { %9036 = vmatpush3.bf16.msra.mxu1 %v10716_v9 }
0x2e3b   :  { %9037 = vmatprep.subr.bf16.mxu1 %v9867_v6 }
0x2e3e   :  { %9039 = vmatpush3.bf16.msra.mxu1 %v10726_v14 }
0x2e3f   :  { %9040 = vmatprep.subr.bf16.mxu1 %v9867_v6 }
0x2e42   :  { %9042 = vmatpush3.bf16.msra.mxu1 %v10736_v19 }
0x2e43   :  { %9043 = vmatprep.subr.bf16.mxu1 %v9867_v6 }
0x2f00   :  { %v3547_v37 = vpop.f32.mrb[36].mxu1 }
0x2f01   :  { %v10894_v18 = vadd.f32 %v10804_v61, %v3547_v37  ;;  %v8064_v25 = vpop.f32.mrb[37].mxu1 }
0x2f03   :  { %3551 = vmax.xlane.f32.xlu1 %v10894_v18 }
0x2f08   :  { %v3674_v42 = vpop.f32.mrb[38].mxu1 }
0x2f09   :  { %v8075_v26 = vpop.f32.mrb[39].mxu1 }
0x2f90   :  { %v10897_v27 = vpop.xlane.xlu1 %3551 }
0x2f91   :  { %vm3592_vm7 = vcmp.eq.f32.partialorder %v10894_v18, %v10897_v27 }
0x2f92   :  { %v3593_v47 = vsel %vm3592_vm7, %v10814_v3, -128.0 }
0x2f93   :  { %3594 = vmax.xlane.f32.xlu0 %v3593_v47 }
0x3020   :  { %v3595_v51 = vpop.xlane.xlu0 %3594 }
0x3021   :  { %v3596_v23 = vsub.f32 0.0, %v3595_v51 }
0x3023   :  { %vm3597_vm9 = vcmp.eq.f32.partialorder %v10811_v50, %v3596_v23 }
0x3024   :  { %v6907_v32 = vsel %vm3597_vm9, 1.0, %v9869_v11 }
0x3025   :  { %v3605_v22 = vsel %vm3604_vm8, %v6906_v57, %v6907_v32 }
0x3026   :  { %8109 = vmatmul.mubr.f32.vlgmr.msra.gmra.mrb[38].mxu0 %v3605_v22 }
0x3027   :  { %9057 = vmatpush3.bf16.msra.mxu0 %v10581_v0  ;;  %8184 = vmatprep.mubr.msk.f32.mxu0 %vm9868_vm1, %v9869_v11 }
0x3028   :  { %9058 = vmatprep.subr.bf16.mxu0 %v9867_v6 }
0x302b   :  { %9060 = vmatpush3.bf16.msra.mxu0 %v10591_v4 }
0x302c   :  { %9061 = vmatprep.subr.bf16.mxu0 %v9867_v6 }
0x302f   :  { %9063 = vmatpush3.bf16.msra.mxu0 %v10603_v8 }
0x3030   :  { %9064 = vmatprep.subr.bf16.mxu0 %v9867_v6 }
0x3033   :  { %9066 = vmatpush3.bf16.msra.mxu0 %v10613_v10 }
0x3034   :  { %9067 = vmatprep.subr.bf16.mxu0 %v9867_v6 }
0x3037   :  { %9069 = vmatpush3.bf16.msra.mxu0 %v10625_v16 }
0x3038   :  { %9070 = vmatprep.subr.bf16.mxu0 %v9867_v6 }
0x303b   :  { %9072 = vmatpush3.bf16.msra.mxu0 %v10637_v21 }
0x303c   :  { %9073 = vmatprep.subr.bf16.mxu0 %v9867_v6 }
0x303f   :  { %9075 = vmatpush3.bf16.msra.mxu0 %v10647_v44 }
0x3040   :  { %9076 = vmatprep.subr.bf16.mxu0 %v9867_v6 }
0x3043   :  { %9078 = vmatpush3.bf16.msra.mxu0 %v10657_v45 }
0x3044   :  { %9103 = vmatprep.subr.bf16.mxu0 %v9867_v6 }
0x30f9   :  { %v3744_v55 = vpop.f32.mrb[38].mxu0 }
0x30fa   :  { %v3745_v20 = vadd.f32 %v3744_v55, %v3674_v42  ;;  %v8110_v35 = vpop.f32.mrb[39].mxu0 }
0x30fc   :  { %v3748_v36 = vadd.f32 %v10688_v33, %v3745_v20 }
0x30fe   :  { %9660 = vtanh.f32 %v3748_v36  ;;  %v6910_v46 = vmul.f32 -1.442695, %v3748_v36 }
0x3100   :  { %9662 = vpow2.f32 %v6910_v46 }
0x3108   :  { %v9661_v29 = vpop.eup %9660 }
0x3109   :  { %3758 = vrot.lane.b32.xlu0 %v9661_v29, %s9870_s19 }
0x310a   :  { %v9663_v38 = vpop.eup %9662 }
0x310b   :  { %v3752_v40 = vadd.f32 1.0, %v9663_v38 }
0x310d   :  { %9664 = vrcp.f32 %v3752_v40  ;;  %v4005_v40 = vstv %s4004_s6 }
0x310e   :  { %vm4006_vm11 = vcmp.eq.s32.totalorder %v4005_v40, 1 }
0x3117   :  { %v9665_v1 = vpop.eup %9664 }
0x3118   :  { %v3756_v59 = vmul.f32 %v9665_v1, %v10848_v34 }
0x317b   :  { %v3759_v43 = vpop.permute.xlu0 %3758 }
0x317c   :  { %v3761_v53 = vmul.f32 %v9665_v1, %v3759_v43 }
0x317e   :  { %3763 = vrot.lane.b32.xlu1 %v3761_v53, %s9871_s20 }
0x31f0   :  { %v3764_v24 = vpop.permute.xlu1 %3763 }
0x31f1   :  { %v10929_v17 = vadd.f32 %v3764_v24, %v3756_v59  ;;  %v6914_v59 = vld [vmem:[%s11643_s2 + $0x10] sm:$0xff] }
0x31f3   :  { %9666 = vtanh.f32 %v10929_v17 }
0x31fd   :  { %v9667_v41 = vpop.eup %9666 }
0x31fe   :  { %3769 = vrot.lane.b32.xlu1 %v9667_v41, %s9870_s19 }
0x3202   :  { %3777 = vrot.lane.b32.xlu1 %v10871_v28, %s9870_s19 }
0x3270   :  { %v3770_v58 = vpop.permute.xlu1 %3769 }
0x3271   :  { %v3772_v56 = vmul.f32 %v9665_v1, %v3770_v58 }
0x3273   :  { %3774 = vrot.lane.b32.xlu0 %v3772_v56, %s9871_s20 }
0x3274   :  { %v3778_v63 = vpop.permute.xlu1 %3777 }
0x32e5   :  { %v3775_v2 = vpop.permute.xlu0 %3774 }
0x32e6   :  { %v3780_v7 = vsel %vm270_vm2, %v3775_v2, %v3778_v63 }
0x32e7   :  { %8128 = vmatmul.mubr.msk.f32.vlgmr.msra.gmra.mrb[40].mxu1 %vm91_vm0, %v3780_v7 }
0x32e8   :  { %9045 = vmatpush3.bf16.msra.mxu1 %v10767_v52  ;;  %8138 = vmatprep.mubr.msk.f32.mxu1 %vm9868_vm1, %v9869_v11 }
0x32e9   :  { %9046 = vmatprep.subr.bf16.mxu1 %v9867_v6 }
0x32ec   :  { %9048 = vmatpush3.bf16.msra.mxu1 %v10773_v12 }
0x32ed   :  { %9049 = vmatprep.subr.bf16.mxu1 %v9867_v6 }
0x33ba   :  { %v3850_v34 = vpop.f32.mrb[40].mxu1 }
0x33bb   :  { %v3851_v13 = vadd.f32 %v10750_v31, %v3850_v34  ;;  %v8129_v15 = vpop.f32.mrb[41].mxu1 }
0x33bd   :  { %9668 = vtanh.f32 %v3851_v13  ;;  %v6912_v54 = vmul.f32 -1.442695, %v3851_v13 }
0x33bf   :  { %9670 = vpow2.f32 %v6912_v54 }
0x33c7   :  { %v9669_v28 = vpop.eup %9668 }
0x33c8   :  { %3863 = vrot.lane.b32.xlu0 %v9669_v28, %s9870_s19 }
0x33c9   :  { %v9671_v37 = vpop.eup %9670 }
0x33ca   :  { %v3857_v25 = vadd.f32 1.0, %v9671_v37 }
0x33cc   :  { %9672 = vrcp.f32 %v3857_v25 }
0x33d6   :  { %v9673_v42 = vpop.eup %9672 }
0x33d7   :  { %v3861_v30 = vmul.f32 %v9673_v42, %v10867_v49 }
0x343a   :  { %v3864_v26 = vpop.permute.xlu0 %3863 }
0x343b   :  { %v3866_v47 = vmul.f32 %v9673_v42, %v3864_v26 }
0x343d   :  { %3868 = vrot.lane.b32.xlu1 %v3866_v47, %s9871_s20 }
0x34af   :  { %v3869_v51 = vpop.permute.xlu1 %3868 }
0x34b0   :  { %v10948_v23 = vadd.f32 %v3869_v51, %v3861_v30 }
0x34b2   :  { %9674 = vtanh.f32 %v10948_v23 }
0x34bc   :  { %v9675_v32 = vpop.eup %9674 }
0x34bd   :  { %3874 = vrot.lane.b32.xlu0 %v9675_v32, %s9870_s19 }
0x352f   :  { %v3875_v57 = vpop.permute.xlu0 %3874 }
0x3530   :  { %v10952_v22 = vmul.f32 %v9673_v42, %v3875_v57 }
0x3532   :  { %3879 = vrot.lane.b32.xlu1 %v10952_v22, %s9871_s20 }
0x35a4   :  { %v3880_v55 = vpop.permute.xlu1 %3879 }
0x35a5   :  { %8139 = vmatmul.mubr.msk.f32.vlgmr.msra.gmra.mrb[42].mxu1 %vm270_vm2, %v3880_v55 }
0x35a6   :  { %9051 = vmatpush3.bf16.msra.mxu1 %v10561_v60  ;;  %8149 = vmatprep.mubr.msk.f32.mxu1 %vm9868_vm1, %v9869_v11 }
0x35a7   :  { %9052 = vmatprep.subr.bf16.mxu1 %v9867_v6 }
0x35aa   :  { %9054 = vmatpush3.bf16.msra.mxu1 %v10567_v48 }
0x35ab   :  { %9079 = vmatprep.subr.bf16.mxu1 %v9867_v6 }
0x35ad   :  { %8150 = vmatmul.mubr.msk.f32.vlgmr.msra.gmra.mrb[44].mxu1 %vm270_vm2, %v3775_v2 }
0x35ae   :  { %9081 = vmatpush3.bf16.msra.mxu1 %v10710_v5  ;;  %8203 = vmatprep.mubr.msk.f32.mxu1 %vm9868_vm1, %v9869_v11 }
0x35af   :  { %9082 = vmatprep.subr.bf16.mxu1 %v9867_v6 }
0x35b2   :  { %9084 = vmatpush3.bf16.msra.mxu1 %v10716_v9 }
0x35b3   :  { %9085 = vmatprep.subr.bf16.mxu1 %v9867_v6 }
0x35b6   :  { %9087 = vmatpush3.bf16.msra.mxu1 %v10726_v14 }
0x35b7   :  { %9088 = vmatprep.subr.bf16.mxu1 %v9867_v6 }
0x35ba   :  { %9090 = vmatpush3.bf16.msra.mxu1 %v10736_v19 }
0x35bb   :  { %9091 = vmatprep.subr.bf16.mxu1 %v9867_v6 }
0x3678   :  { %v3949_v49 = vpop.f32.mrb[42].mxu1 }
0x3679   :  { %v10975_v20 = vadd.f32 %v10804_v61, %v3949_v49  ;;  %v8140_v35 = vpop.f32.mrb[43].mxu1 }
0x367b   :  { %3953 = vmax.xlane.f32.xlu0 %v10975_v20 }
0x3680   :  { %v4076_v36 = vpop.f32.mrb[44].mxu1 }
0x3681   :  { %v8151_v29 = vpop.f32.mrb[45].mxu1 }
0x3708   :  { %v10978_v46 = vpop.xlane.xlu0 %3953 }
0x3709   :  { %vm3994_vm10 = vcmp.eq.f32.partialorder %v10975_v20, %v10978_v46 }
0x370a   :  { %v3995_v38 = vsel %vm3994_vm10, %v10814_v3, -128.0 }
0x370b   :  { %3996 = vmax.xlane.f32.xlu1 %v3995_v38 }
0x3798   :  { %v3997_v1 = vpop.xlane.xlu1 %3996 }
0x3799   :  { %v3998_v43 = vsub.f32 0.0, %v3997_v1 }
0x379b   :  { %vm3999_vm12 = vcmp.eq.f32.partialorder %v10811_v50, %v3998_v43 }
0x379c   :  { %v6915_v53 = vsel %vm3999_vm12, 1.0, %v9869_v11 }
0x379d   :  { %v4007_v24 = vsel %vm4006_vm11, %v6914_v59, %v6915_v53 }
0x379e   :  { %8185 = vmatmul.mubr.f32.vlgmr.msra.gmra.mrb[40].mxu0 %v4007_v24 }
0x379f   :  { %9105 = vmatpush3.bf16.msra.mxu0 %v10581_v0  ;;  %8260 = vmatprep.mubr.msk.f32.mxu0 %vm9868_vm1, %v9869_v11 }
0x37a0   :  { %9106 = vmatprep.subr.bf16.mxu0 %v9867_v6 }
0x37a3   :  { %9108 = vmatpush3.bf16.msra.mxu0 %v10591_v4 }
0x37a4   :  { %9109 = vmatprep.subr.bf16.mxu0 %v9867_v6 }
0x37a7   :  { %9111 = vmatpush3.bf16.msra.mxu0 %v10603_v8 }
0x37a8   :  { %9112 = vmatprep.subr.bf16.mxu0 %v9867_v6 }
0x37ab   :  { %9114 = vmatpush3.bf16.msra.mxu0 %v10613_v10 }
0x37ac   :  { %9115 = vmatprep.subr.bf16.mxu0 %v9867_v6 }
0x37af   :  { %9117 = vmatpush3.bf16.msra.mxu0 %v10625_v16 }
0x37b0   :  { %9118 = vmatprep.subr.bf16.mxu0 %v9867_v6 }
0x37b3   :  { %9120 = vmatpush3.bf16.msra.mxu0 %v10637_v21 }
0x37b4   :  { %9121 = vmatprep.subr.bf16.mxu0 %v9867_v6 }
0x37b7   :  { %9123 = vmatpush3.bf16.msra.mxu0 %v10647_v44 }
0x37b8   :  { %9124 = vmatprep.subr.bf16.mxu0 %v9867_v6 }
0x37bb   :  { %9126 = vmatpush3.bf16.msra.mxu0 %v10657_v45 }
0x37bc   :  { %9151 = vmatprep.subr.bf16.mxu0 %v9867_v6 }
0x3871   :  { %v4146_v41 = vpop.f32.mrb[40].mxu0 }
0x3872   :  { %v4147_v58 = vadd.f32 %v4146_v41, %v4076_v36  ;;  %v8186_v56 = vpop.f32.mrb[41].mxu0 }
0x3874   :  { %v4150_v63 = vadd.f32 %v10688_v33, %v4147_v58 }
0x3876   :  { %9676 = vtanh.f32 %v4150_v63  ;;  %v6918_v7 = vmul.f32 -1.442695, %v4150_v63 }
0x3878   :  { %9678 = vpow2.f32 %v6918_v7 }
0x3880   :  { %v9677_v2 = vpop.eup %9676 }
0x3881   :  { %4160 = vrot.lane.b32.xlu0 %v9677_v2, %s9870_s19 }
0x3882   :  { %v9679_v34 = vpop.eup %9678 }
0x3883   :  { %v4154_v13 = vadd.f32 1.0, %v9679_v34 }
0x3885   :  { %9680 = vrcp.f32 %v4154_v13 }
0x388f   :  { %v9681_v15 = vpop.eup %9680 }
0x3890   :  { %v4158_v37 = vmul.f32 %v9681_v15, %v10929_v17 }
0x38f3   :  { %v4161_v28 = vpop.permute.xlu0 %4160 }
0x38f4   :  { %v4163_v54 = vmul.f32 %v9681_v15, %v4161_v28  ;;  %v4407_v28 = vstv %s4406_s23 }
0x38f5   :  { %vm4408_vm14 = vcmp.eq.s32.totalorder %v4407_v28, 1 }
0x38f6   :  { %4165 = vrot.lane.b32.xlu1 %v4163_v54, %s9871_s20 }
0x3968   :  { %v4166_v25 = vpop.permute.xlu1 %4165 }
0x3969   :  { %v11010_v42 = vadd.f32 %v4166_v25, %v4158_v37 }
0x396b   :  { %9682 = vtanh.f32 %v11010_v42 }
0x3975   :  { %v9683_v26 = vpop.eup %9682 }
0x3976   :  { %4171 = vrot.lane.b32.xlu0 %v9683_v26, %s9870_s19  ;;  %v6922_v26 = vld [vmem:[%s11643_s2 + $0x18] sm:$0xff] }
0x397a   :  { %4179 = vrot.lane.b32.xlu0 %v10952_v22, %s9870_s19 }
0x39e8   :  { %v4172_v47 = vpop.permute.xlu0 %4171 }
0x39e9   :  { %v4174_v30 = vmul.f32 %v9681_v15, %v4172_v47 }
0x39eb   :  { %4176 = vrot.lane.b32.xlu1 %v4174_v30, %s9871_s20 }
0x39ec   :  { %v4180_v51 = vpop.permute.xlu0 %4179 }
0x3a5d   :  { %v4177_v32 = vpop.permute.xlu1 %4176 }
0x3a5e   :  { %v4182_v57 = vsel %vm270_vm2, %v4177_v32, %v4180_v51 }
0x3a5f   :  { %8204 = vmatmul.mubr.msk.f32.vlgmr.msra.gmra.mrb[46].mxu1 %vm91_vm0, %v4182_v57 }
0x3a60   :  { %9093 = vmatpush3.bf16.msra.mxu1 %v10767_v52  ;;  %8214 = vmatprep.mubr.msk.f32.mxu1 %vm9868_vm1, %v9869_v11 }
0x3a61   :  { %9094 = vmatprep.subr.bf16.mxu1 %v9867_v6 }
0x3a64   :  { %9096 = vmatpush3.bf16.msra.mxu1 %v10773_v12 }
0x3a65   :  { %9097 = vmatprep.subr.bf16.mxu1 %v9867_v6 }
0x3b32   :  { %v4252_v17 = vpop.f32.mrb[46].mxu1 }
0x3b33   :  { %v4253_v22 = vadd.f32 %v10750_v31, %v4252_v17  ;;  %v8205_v55 = vpop.f32.mrb[47].mxu1 }
0x3b35   :  { %9684 = vtanh.f32 %v4253_v22  ;;  %v6920_v35 = vmul.f32 -1.442695, %v4253_v22 }
0x3b37   :  { %9686 = vpow2.f32 %v6920_v35 }
0x3b3f   :  { %v9685_v49 = vpop.eup %9684 }
0x3b40   :  { %4265 = vrot.lane.b32.xlu1 %v9685_v49, %s9870_s19 }
0x3b41   :  { %v9687_v36 = vpop.eup %9686 }
0x3b42   :  { %v4259_v29 = vadd.f32 1.0, %v9687_v36 }
0x3b44   :  { %9688 = vrcp.f32 %v4259_v29 }
0x3b4e   :  { %v9689_v38 = vpop.eup %9688 }
0x3b4f   :  { %v4263_v43 = vmul.f32 %v9689_v38, %v10948_v23 }
0x3bb2   :  { %v4266_v40 = vpop.permute.xlu1 %4265 }
0x3bb3   :  { %v4268_v1 = vmul.f32 %v9689_v38, %v4266_v40 }
0x3bb5   :  { %4270 = vrot.lane.b32.xlu0 %v4268_v1, %s9871_s20 }
0x3c27   :  { %v4271_v53 = vpop.permute.xlu0 %4270 }
0x3c28   :  { %v11029_v59 = vadd.f32 %v4271_v53, %v4263_v43 }
0x3c2a   :  { %9690 = vtanh.f32 %v11029_v59 }
0x3c34   :  { %v9691_v24 = vpop.eup %9690 }
0x3c35   :  { %4276 = vrot.lane.b32.xlu1 %v9691_v24, %s9870_s19 }
0x3ca7   :  { %v4277_v41 = vpop.permute.xlu1 %4276 }
0x3ca8   :  { %v11033_v58 = vmul.f32 %v9689_v38, %v4277_v41 }
0x3caa   :  { %4281 = vrot.lane.b32.xlu0 %v11033_v58, %s9871_s20 }
0x3d1c   :  { %v4282_v56 = vpop.permute.xlu0 %4281 }
0x3d1d   :  { %8215 = vmatmul.mubr.msk.f32.vlgmr.msra.gmra.mrb[48].mxu1 %vm270_vm2, %v4282_v56 }
0x3d1e   :  { %9099 = vmatpush3.bf16.msra.mxu1 %v10561_v60  ;;  %8225 = vmatprep.mubr.msk.f32.mxu1 %vm9868_vm1, %v9869_v11 }
0x3d1f   :  { %9100 = vmatprep.subr.bf16.mxu1 %v9867_v6 }
0x3d22   :  { %9102 = vmatpush3.bf16.msra.mxu1 %v10567_v48 }
0x3d23   :  { %9127 = vmatprep.subr.bf16.mxu1 %v9867_v6 }
0x3d25   :  { %8226 = vmatmul.mubr.msk.f32.vlgmr.msra.gmra.mrb[50].mxu1 %vm270_vm2, %v4177_v32 }
0x3d26   :  { %9129 = vmatpush3.bf16.msra.mxu1 %v10710_v5  ;;  %8279 = vmatprep.mubr.msk.f32.mxu1 %vm9868_vm1, %v9869_v11 }
0x3d27   :  { %9130 = vmatprep.subr.bf16.mxu1 %v9867_v6 }
0x3d2a   :  { %9132 = vmatpush3.bf16.msra.mxu1 %v10716_v9 }
0x3d2b   :  { %9133 = vmatprep.subr.bf16.mxu1 %v9867_v6 }
0x3d2e   :  { %9135 = vmatpush3.bf16.msra.mxu1 %v10726_v14 }
0x3d2f   :  { %9136 = vmatprep.subr.bf16.mxu1 %v9867_v6 }
0x3d32   :  { %9138 = vmatpush3.bf16.msra.mxu1 %v10736_v19 }
0x3d33   :  { %9139 = vmatprep.subr.bf16.mxu1 %v9867_v6 }
0x3df0   :  { %v4351_v23 = vpop.f32.mrb[48].mxu1 }
0x3df1   :  { %v11056_v63 = vadd.f32 %v10804_v61, %v4351_v23  ;;  %v8216_v2 = vpop.f32.mrb[49].mxu1 }
0x3df3   :  { %4355 = vmax.xlane.f32.xlu1 %v11056_v63 }
0x3df8   :  { %v4478_v7 = vpop.f32.mrb[50].mxu1 }
0x3df9   :  { %v8227_v34 = vpop.f32.mrb[51].mxu1 }
0x3e80   :  { %v11059_v13 = vpop.xlane.xlu1 %4355 }
0x3e81   :  { %vm4396_vm13 = vcmp.eq.f32.partialorder %v11056_v63, %v11059_v13 }
0x3e82   :  { %v4397_v15 = vsel %vm4396_vm13, %v10814_v3, -128.0 }
0x3e83   :  { %4398 = vmax.xlane.f32.xlu0 %v4397_v15 }
0x3f10   :  { %v4399_v54 = vpop.xlane.xlu0 %4398 }
0x3f11   :  { %v4400_v37 = vsub.f32 0.0, %v4399_v54 }
0x3f13   :  { %vm4401_vm15 = vcmp.eq.f32.partialorder %v10811_v50, %v4400_v37 }
0x3f14   :  { %v6923_v25 = vsel %vm4401_vm15, 1.0, %v9869_v11 }
0x3f15   :  { %v4409_v47 = vsel %vm4408_vm14, %v6922_v26, %v6923_v25 }
0x3f16   :  { %8261 = vmatmul.mubr.f32.vlgmr.msra.gmra.mrb[42].mxu0 %v4409_v47 }
0x3f17   :  { %9153 = vmatpush3.bf16.msra.mxu0 %v10581_v0  ;;  %8336 = vmatprep.mubr.msk.f32.mxu0 %vm9868_vm1, %v9869_v11 }
0x3f18   :  { %9154 = vmatprep.subr.bf16.mxu0 %v9867_v6 }
0x3f1b   :  { %9156 = vmatpush3.bf16.msra.mxu0 %v10591_v4 }
0x3f1c   :  { %9157 = vmatprep.subr.bf16.mxu0 %v9867_v6 }
0x3f1f   :  { %9159 = vmatpush3.bf16.msra.mxu0 %v10603_v8 }
0x3f20   :  { %9160 = vmatprep.subr.bf16.mxu0 %v9867_v6 }
0x3f23   :  { %9162 = vmatpush3.bf16.msra.mxu0 %v10613_v10 }
0x3f24   :  { %9163 = vmatprep.subr.bf16.mxu0 %v9867_v6 }
0x3f27   :  { %9165 = vmatpush3.bf16.msra.mxu0 %v10625_v16 }
0x3f28   :  { %9166 = vmatprep.subr.bf16.mxu0 %v9867_v6 }
0x3f2b   :  { %9168 = vmatpush3.bf16.msra.mxu0 %v10637_v21 }
0x3f2c   :  { %9169 = vmatprep.subr.bf16.mxu0 %v9867_v6 }
0x3f2f   :  { %9171 = vmatpush3.bf16.msra.mxu0 %v10647_v44 }
0x3f30   :  { %9172 = vmatprep.subr.bf16.mxu0 %v9867_v6 }
0x3f33   :  { %9174 = vmatpush3.bf16.msra.mxu0 %v10657_v45 }
0x3f34   :  { %9199 = vmatprep.subr.bf16.mxu0 %v9867_v6 }
0x3fe9   :  { %v4548_v30 = vpop.f32.mrb[42].mxu0 }
0x3fea   :  { %v4549_v51 = vadd.f32 %v4548_v30, %v4478_v7  ;;  %v8262_v32 = vpop.f32.mrb[43].mxu0 }
0x3fec   :  { %v4552_v57 = vadd.f32 %v10688_v33, %v4549_v51 }
0x3fee   :  { %9692 = vtanh.f32 %v4552_v57  ;;  %v6926_v22 = vmul.f32 -1.442695, %v4552_v57 }
0x3ff0   :  { %9694 = vpow2.f32 %v6926_v22 }
0x3ff8   :  { %v9693_v17 = vpop.eup %9692 }
0x3ff9   :  { %4562 = vrot.lane.b32.xlu0 %v9693_v17, %s9870_s19 }
0x3ffa   :  { %v9695_v55 = vpop.eup %9694 }
0x3ffb   :  { %v4556_v49 = vadd.f32 1.0, %v9695_v55 }
0x3ffd   :  { %9696 = vrcp.f32 %v4556_v49 }
0x4007   :  { %v9697_v35 = vpop.eup %9696 }
0x4008   :  { %v4560_v38 = vmul.f32 %v9697_v35, %v11010_v42 }
0x406b   :  { %v4563_v36 = vpop.permute.xlu0 %4562 }
0x406c   :  { %v4565_v29 = vmul.f32 %v9697_v35, %v4563_v36  ;;  %v4809_v36 = vstv %s4808_s8 }
0x406d   :  { %vm4810_vm4 = vcmp.eq.s32.totalorder %v4809_v36, 1 }
0x406e   :  { %4567 = vrot.lane.b32.xlu1 %v4565_v29, %s9871_s20 }
0x40e0   :  { %v4568_v40 = vpop.permute.xlu1 %4567 }
0x40e1   :  { %v11091_v1 = vadd.f32 %v4568_v40, %v4560_v38  ;;  %v6930_v40 = vld [vmem:[%s11643_s2 + $0x20] sm:$0xff] }
0x40e3   :  { %9698 = vtanh.f32 %v11091_v1 }
0x40ed   :  { %v9699_v33 = vpop.eup %9698 }
0x40ee   :  { %4573 = vrot.lane.b32.xlu1 %v9699_v33, %s9870_s19 }
0x40f2   :  { %4581 = vrot.lane.b32.xlu1 %v11033_v58, %s9870_s19 }
0x4160   :  { %v4574_v43 = vpop.permute.xlu1 %4573 }
0x4161   :  { %v4576_v53 = vmul.f32 %v9697_v35, %v4574_v43 }
0x4163   :  { %4578 = vrot.lane.b32.xlu0 %v4576_v53, %s9871_s20 }
0x4164   :  { %v4582_v24 = vpop.permute.xlu1 %4581 }
0x41d5   :  { %v4579_v41 = vpop.permute.xlu0 %4578 }
0x41d6   :  { %v4584_v56 = vsel %vm270_vm2, %v4579_v41, %v4582_v24 }
0x41d7   :  { %8280 = vmatmul.mubr.msk.f32.vlgmr.msra.gmra.mrb[52].mxu1 %vm91_vm0, %v4584_v56 }
0x41d8   :  { %9141 = vmatpush3.bf16.msra.mxu1 %v10767_v52  ;;  %8290 = vmatprep.mubr.msk.f32.mxu1 %vm9868_vm1, %v9869_v11 }
0x41d9   :  { %9142 = vmatprep.subr.bf16.mxu1 %v9867_v6 }
0x41dc   :  { %9144 = vmatpush3.bf16.msra.mxu1 %v10773_v12 }
0x41dd   :  { %9145 = vmatprep.subr.bf16.mxu1 %v9867_v6 }
0x42aa   :  { %v4654_v42 = vpop.f32.mrb[52].mxu1 }
0x42ab   :  { %v4655_v58 = vadd.f32 %v10750_v31, %v4654_v42  ;;  %v8281_v23 = vpop.f32.mrb[53].mxu1 }
0x42ad   :  { %9700 = vtanh.f32 %v4655_v58  ;;  %v6928_v7 = vmul.f32 -1.442695, %v4655_v58 }
0x42af   :  { %9702 = vpow2.f32 %v6928_v7 }
0x42b7   :  { %v9701_v2 = vpop.eup %9700 }
0x42b8   :  { %4667 = vrot.lane.b32.xlu0 %v9701_v2, %s9870_s19 }
0x42b9   :  { %v9703_v34 = vpop.eup %9702 }
0x42ba   :  { %v4661_v15 = vadd.f32 1.0, %v9703_v34 }
0x42bc   :  { %9704 = vrcp.f32 %v4661_v15 }
0x42c6   :  { %v9705_v28 = vpop.eup %9704 }
0x42c7   :  { %v4665_v25 = vmul.f32 %v9705_v28, %v11029_v59 }
0x432a   :  { %v4668_v54 = vpop.permute.xlu0 %4667 }
0x432b   :  { %v4670_v37 = vmul.f32 %v9705_v28, %v4668_v54 }
0x432d   :  { %4672 = vrot.lane.b32.xlu1 %v4670_v37, %s9871_s20 }
0x439f   :  { %v4673_v26 = vpop.permute.xlu1 %4672 }
0x43a0   :  { %v11110_v47 = vadd.f32 %v4673_v26, %v4665_v25 }
0x43a2   :  { %9706 = vtanh.f32 %v11110_v47 }
0x43ac   :  { %v9707_v31 = vpop.eup %9706 }
0x43ad   :  { %4678 = vrot.lane.b32.xlu0 %v9707_v31, %s9870_s19 }
0x441f   :  { %v4679_v30 = vpop.permute.xlu0 %4678 }
0x4420   :  { %v11114_v51 = vmul.f32 %v9705_v28, %v4679_v30 }
0x4422   :  { %4683 = vrot.lane.b32.xlu1 %v11114_v51, %s9871_s20 }
0x4494   :  { %v4684_v32 = vpop.permute.xlu1 %4683 }
0x4495   :  { %8291 = vmatmul.mubr.msk.f32.vlgmr.msra.gmra.mrb[54].mxu1 %vm270_vm2, %v4684_v32 }
0x4496   :  { %9147 = vmatpush3.bf16.msra.mxu1 %v10561_v60  ;;  %8301 = vmatprep.mubr.msk.f32.mxu1 %vm9868_vm1, %v9869_v11 }
0x4497   :  { %9148 = vmatprep.subr.bf16.mxu1 %v9867_v6 }
0x449a   :  { %9150 = vmatpush3.bf16.msra.mxu1 %v10567_v48 }
0x449b   :  { %9175 = vmatprep.subr.bf16.mxu1 %v9867_v6 }
0x449d   :  { %8302 = vmatmul.mubr.msk.f32.vlgmr.msra.gmra.mrb[56].mxu1 %vm270_vm2, %v4579_v41  ;;  %v11171_v41 = vld [vmem:[%s11651_s10] ss:$0 sm:$0xff] }
0x449e   :  { %9177 = vmatpush3.bf16.msra.mxu1 %v10710_v5  ;;  %8355 = vmatprep.mubr.msk.f32.mxu1 %vm9868_vm1, %v9869_v11 }
0x449f   :  { %9178 = vmatprep.subr.bf16.mxu1 %v9867_v6 }
0x44a2   :  { %9180 = vmatpush3.bf16.msra.mxu1 %v10716_v9 }
0x44a3   :  { %9181 = vmatprep.subr.bf16.mxu1 %v9867_v6 }
0x44a6   :  { %9183 = vmatpush3.bf16.msra.mxu1 %v10726_v14 }
0x44a7   :  { %9184 = vmatprep.subr.bf16.mxu1 %v9867_v6 }
0x44aa   :  { %9186 = vmatpush3.bf16.msra.mxu1 %v10736_v19 }
0x44ab   :  { %9187 = vmatprep.subr.bf16.mxu1 %v9867_v6 }
0x4568   :  { %v4753_v59 = vpop.f32.mrb[54].mxu1 }
0x4569   :  { %v11137_v57 = vadd.f32 %v10804_v61, %v4753_v59  ;;  %v8292_v17 = vpop.f32.mrb[55].mxu1 }
0x456b   :  { %4757 = vmax.xlane.f32.xlu0 %v11137_v57 }
0x4570   :  { %v4880_v22 = vpop.f32.mrb[56].mxu1 }
0x4571   :  { %v8303_v55 = vpop.f32.mrb[57].mxu1 }
0x45f8   :  { %v11140_v49 = vpop.xlane.xlu0 %4757 }
0x45f9   :  { %vm4798_vm3 = vcmp.eq.f32.partialorder %v11137_v57, %v11140_v49 }
0x45fa   :  { %v4799_v35 = vsel %vm4798_vm3, %v10814_v3, -128.0 }
0x45fb   :  { %4800 = vmax.xlane.f32.xlu1 %v4799_v35 }
0x4688   :  { %v4801_v29 = vpop.xlane.xlu1 %4800 }
0x4689   :  { %v4802_v61 = vsub.f32 0.0, %v4801_v29 }
0x468b   :  { %vm4803_vm5 = vcmp.eq.f32.partialorder %v10811_v50, %v4802_v61 }
0x468c   :  { %v6931_v38 = vsel %vm4803_vm5, 1.0, %v9869_v11 }
0x468d   :  { %v4811_v33 = vsel %vm4810_vm4, %v6930_v40, %v6931_v38 }
0x468e   :  { %8337 = vmatmul.mubr.f32.vlgmr.msra.gmra.mrb[44].mxu0 %v4811_v33 }
0x468f   :  { %9201 = vmatpush3.bf16.msra.mxu0 %v10581_v0  ;;  %8412 = vmatprep.mubr.msk.f32.mxu0 %vm9868_vm1, %v9869_v11 }
0x4690   :  { %9202 = vmatprep.subr.bf16.mxu0 %v9867_v6 }
0x4693   :  { %9204 = vmatpush3.bf16.msra.mxu0 %v10591_v4 }
0x4694   :  { %9205 = vmatprep.subr.bf16.mxu0 %v9867_v6 }
0x4697   :  { %9207 = vmatpush3.bf16.msra.mxu0 %v10603_v8 }
0x4698   :  { %9208 = vmatprep.subr.bf16.mxu0 %v9867_v6 }
0x469b   :  { %9210 = vmatpush3.bf16.msra.mxu0 %v10613_v10 }
0x469c   :  { %9211 = vmatprep.subr.bf16.mxu0 %v9867_v6 }
0x469f   :  { %9213 = vmatpush3.bf16.msra.mxu0 %v10625_v16 }
0x46a0   :  { %9214 = vmatprep.subr.bf16.mxu0 %v9867_v6 }
0x46a3   :  { %9216 = vmatpush3.bf16.msra.mxu0 %v10637_v21 }
0x46a4   :  { %9217 = vmatprep.subr.bf16.mxu0 %v9867_v6 }
0x46a7   :  { %9219 = vmatpush3.bf16.msra.mxu0 %v10647_v44 }
0x46a8   :  { %9220 = vmatprep.subr.bf16.mxu0 %v9867_v6 }
0x46ab   :  { %9222 = vmatpush3.bf16.msra.mxu0 %v10657_v45 }
0x46ac   :  { %9247 = vmatprep.subr.bf16.mxu0 %v9867_v6 }
0x4761   :  { %v4950_v43 = vpop.f32.mrb[44].mxu0 }
0x4762   :  { %v4951_v53 = vadd.f32 %v4950_v43, %v4880_v22  ;;  %v8338_v24 = vpop.f32.mrb[45].mxu0 }
0x4764   :  { %v4954_v56 = vadd.f32 %v11171_v41, %v4951_v53 }
0x4766   :  { %9708 = vtanh.f32 %v4954_v56  ;;  %v6934_v58 = vmul.f32 -1.442695, %v4954_v56 }
0x4768   :  { %9710 = vpow2.f32 %v6934_v58 }
0x4770   :  { %v9709_v42 = vpop.eup %9708 }
0x4771   :  { %4964 = vrot.lane.b32.xlu0 %v9709_v42, %s9870_s19 }
0x4772   :  { %v9711_v23 = vpop.eup %9710 }
0x4773   :  { %v4958_v2 = vadd.f32 1.0, %v9711_v23  ;;  %v11230_v23 = vld [vmem:[%s11655_s14] ss:$0 sm:$0xff]  ;;  %s5210_s14 = scalar_select %p5209_p10, 1, 0 }
0x4775   :  { %9712 = vrcp.f32 %v4958_v2 }
0x477f   :  { %v9713_v7 = vpop.eup %9712 }
0x4780   :  { %v4962_v28 = vmul.f32 %v9713_v7, %v11091_v1 }
0x47e3   :  { %v4965_v34 = vpop.permute.xlu0 %4964 }
0x47e4   :  { %v4967_v15 = vmul.f32 %v9713_v7, %v4965_v34 }
0x47e6   :  { %4969 = vrot.lane.b32.xlu1 %v4967_v15, %s9871_s20 }
0x4858   :  { %v4970_v54 = vpop.permute.xlu1 %4969 }
0x4859   :  { %v11177_v37 = vadd.f32 %v4970_v54, %v4962_v28 }
0x485b   :  { %9714 = vtanh.f32 %v11177_v37 }
0x4865   :  { %v9715_v25 = vpop.eup %9714 }
0x4866   :  { %4975 = vrot.lane.b32.xlu0 %v9715_v25, %s9870_s19  ;;  %v5211_v25 = vstv %s5210_s14 }
0x4867   :  { %vm5212_vm7 = vcmp.eq.s32.totalorder %v5211_v25, 1 }
0x486a   :  { %4983 = vrot.lane.b32.xlu0 %v11114_v51, %s9870_s19  ;;  %v11195_v51 = vld [vmem:[%s11653_s12] ss:$0 sm:$0xff]  ;;  %s9873_s12 = smov 1.0  }
0x48d8   :  { %v4976_v26 = vpop.permute.xlu0 %4975 }
0x48d9   :  { %v4978_v31 = vmul.f32 %v9713_v7, %v4976_v26 }
0x48db   :  { %4980 = vrot.lane.b32.xlu1 %v4978_v31, %s9871_s20 }
0x48dc   :  { %v4984_v30 = vpop.permute.xlu0 %4983 }
0x494d   :  { %v4981_v32 = vpop.permute.xlu1 %4980 }
0x494e   :  { %v4986_v59 = vsel %vm270_vm2, %v4981_v32, %v4984_v30 }
0x494f   :  { %8356 = vmatmul.mubr.msk.f32.vlgmr.msra.gmra.mrb[58].mxu1 %vm91_vm0, %v4986_v59 }
0x4950   :  { %9189 = vmatpush3.bf16.msra.mxu1 %v10767_v52  ;;  %8366 = vmatprep.mubr.msk.f32.mxu1 %vm9868_vm1, %v9869_v11 }
0x4951   :  { %9190 = vmatprep.subr.bf16.mxu1 %v9867_v6 }
0x4954   :  { %9192 = vmatpush3.bf16.msra.mxu1 %v10773_v12 }
0x4955   :  { %9193 = vmatprep.subr.bf16.mxu1 %v9867_v6 }
0x4a22   :  { %v5056_v1 = vpop.f32.mrb[58].mxu1 }
0x4a23   :  { %v5057_v17 = vadd.f32 %v11195_v51, %v5056_v1  ;;  %v8357_v22 = vpop.f32.mrb[59].mxu1 }
0x4a25   :  { %9716 = vtanh.f32 %v5057_v17  ;;  %v6936_v35 = vmul.f32 -1.442695, %v5057_v17 }
0x4a27   :  { %9718 = vpow2.f32 %v6936_v35 }
0x4a2f   :  { %v9717_v55 = vpop.eup %9716 }
0x4a30   :  { %5069 = vrot.lane.b32.xlu1 %v9717_v55, %s9870_s19 }
0x4a31   :  { %v9719_v36 = vpop.eup %9718 }
0x4a32   :  { %v5063_v29 = vadd.f32 1.0, %v9719_v36 }
0x4a34   :  { %9720 = vrcp.f32 %v5063_v29 }
0x4a3e   :  { %v9721_v61 = vpop.eup %9720 }
0x4a3f   :  { %v5067_v33 = vmul.f32 %v9721_v61, %v11110_v47 }
0x4aa2   :  { %v5070_v38 = vpop.permute.xlu1 %5069 }
0x4aa3   :  { %v5072_v40 = vmul.f32 %v9721_v61, %v5070_v38 }
0x4aa5   :  { %5074 = vrot.lane.b32.xlu0 %v5072_v40, %s9871_s20 }
0x4b17   :  { %v5075_v43 = vpop.permute.xlu0 %5074 }
0x4b18   :  { %v11201_v53 = vadd.f32 %v5075_v43, %v5067_v33 }
0x4b1a   :  { %9722 = vtanh.f32 %v11201_v53 }
0x4b24   :  { %v9723_v24 = vpop.eup %9722 }
0x4b25   :  { %5080 = vrot.lane.b32.xlu1 %v9723_v24, %s9870_s19 }
0x4b97   :  { %v5081_v56 = vpop.permute.xlu1 %5080 }
0x4b98   :  { %v11205_v42 = vmul.f32 %v9721_v61, %v5081_v56 }
0x4b9a   :  { %5085 = vrot.lane.b32.xlu0 %v11205_v42, %s9871_s20 }
0x4c0c   :  { %v5086_v58 = vpop.permute.xlu0 %5085 }
0x4c0d   :  { %8367 = vmatmul.mubr.msk.f32.vlgmr.msra.gmra.mrb[60].mxu1 %vm270_vm2, %v5086_v58 }
0x4c0e   :  { %9195 = vmatpush3.bf16.msra.mxu1 %v10561_v60  ;;  %8377 = vmatprep.mubr.msk.f32.mxu1 %vm9868_vm1, %v9869_v11 }
0x4c0f   :  { %9196 = vmatprep.subr.bf16.mxu1 %v9867_v6 }
0x4c12   :  { %9198 = vmatpush3.bf16.msra.mxu1 %v10567_v48 }
0x4c13   :  { %9223 = vmatprep.subr.bf16.mxu1 %v9867_v6 }
0x4c15   :  { %8378 = vmatmul.mubr.msk.f32.vlgmr.msra.gmra.mrb[62].mxu1 %vm270_vm2, %v4981_v32  ;;  %v11246_v32 = vld [vmem:[%s11643_s2 + $0x28] sm:$0xff] }
0x4c16   :  { %9225 = vmatpush3.bf16.msra.mxu1 %v10710_v5  ;;  %8431 = vmatprep.mubr.msk.f32.mxu1 %vm9868_vm1, %v9869_v11 }
0x4c17   :  { %9226 = vmatprep.subr.bf16.mxu1 %v9867_v6 }
0x4c1a   :  { %9228 = vmatpush3.bf16.msra.mxu1 %v10716_v9 }
0x4c1b   :  { %9229 = vmatprep.subr.bf16.mxu1 %v9867_v6 }
0x4c1e   :  { %9231 = vmatpush3.bf16.msra.mxu1 %v10726_v14 }
0x4c1f   :  { %9232 = vmatprep.subr.bf16.mxu1 %v9867_v6 }
0x4c22   :  { %9234 = vmatpush3.bf16.msra.mxu1 %v10736_v19 }
0x4c23   :  { %9235 = vmatprep.subr.bf16.mxu1 %v9867_v6 }
0x4ce0   :  { %v5155_v47 = vpop.f32.mrb[60].mxu1 }
0x4ce1   :  { %v11233_v2 = vadd.f32 %v11230_v23, %v5155_v47  ;;  %v8368_v7 = vpop.f32.mrb[61].mxu1 }
0x4ce3   :  { %5159 = vmax.xlane.f32.xlu1 %v11233_v2 }
0x4ce8   :  { %v5282_v34 = vpop.f32.mrb[62].mxu1 }
0x4ce9   :  { %v8379_v15 = vpop.f32.mrb[63].mxu1 }
0x4d70   :  { %v11236_v28 = vpop.xlane.xlu1 %5159 }
0x4d71   :  { %vm5200_vm6 = vcmp.eq.f32.partialorder %v11233_v2, %v11236_v28 }
0x4d72   :  { %v5201_v54 = vsel %vm5200_vm6, %v10814_v3, -128.0 }
0x4d73   :  { %5202 = vmax.xlane.f32.xlu0 %v5201_v54 }
0x4e00   :  { %v5203_v26 = vpop.xlane.xlu0 %5202 }
0x4e01   :  { %v5204_v31 = vsub.f32 0.0, %v5203_v26 }
0x4e03   :  { %vm5205_vm8 = vcmp.eq.f32.partialorder %v10811_v50, %v5204_v31 }
0x4e04   :  { %v6939_v30 = vsel %vm5205_vm8, 1.0, %v9869_v11 }
0x4e05   :  { %v5213_v59 = vsel %vm5212_vm7, %v11246_v32, %v6939_v30 }
0x4e06   :  { %8413 = vmatmul.mubr.f32.vlgmr.msra.gmra.mrb[46].mxu0 %v5213_v59 }
0x4e07   :  { %9249 = vmatpush3.bf16.msra.mxu0 %v10581_v0  ;;  %8488 = vmatprep.mubr.msk.f32.mxu0 %vm9868_vm1, %v9869_v11 }
0x4e08   :  { %9250 = vmatprep.subr.bf16.mxu0 %v9867_v6 }
0x4e0b   :  { %9252 = vmatpush3.bf16.msra.mxu0 %v10591_v4 }
0x4e0c   :  { %9253 = vmatprep.subr.bf16.mxu0 %v9867_v6 }
0x4e0f   :  { %9255 = vmatpush3.bf16.msra.mxu0 %v10603_v8 }
0x4e10   :  { %9256 = vmatprep.subr.bf16.mxu0 %v9867_v6 }
0x4e13   :  { %9258 = vmatpush3.bf16.msra.mxu0 %v10613_v10 }
0x4e14   :  { %9259 = vmatprep.subr.bf16.mxu0 %v9867_v6 }
0x4e17   :  { %9261 = vmatpush3.bf16.msra.mxu0 %v10625_v16 }
0x4e18   :  { %9262 = vmatprep.subr.bf16.mxu0 %v9867_v6 }
0x4e1b   :  { %9264 = vmatpush3.bf16.msra.mxu0 %v10637_v21 }
0x4e1c   :  { %9265 = vmatprep.subr.bf16.mxu0 %v9867_v6 }
0x4e1f   :  { %9267 = vmatpush3.bf16.msra.mxu0 %v10647_v44 }
0x4e20   :  { %9268 = vmatprep.subr.bf16.mxu0 %v9867_v6 }
0x4e23   :  { %9270 = vmatpush3.bf16.msra.mxu0 %v10657_v45 }
0x4e24   :  { %9295 = vmatprep.subr.bf16.mxu0 %v9867_v6 }
0x4ed9   :  { %v5352_v1 = vpop.f32.mrb[46].mxu0 }
0x4eda   :  { %v5353_v17 = vadd.f32 %v5352_v1, %v5282_v34  ;;  %v8414_v22 = vpop.f32.mrb[47].mxu0 }
0x4edc   :  { %v5356_v55 = vadd.f32 %v11171_v41, %v5353_v17 }
0x4ede   :  { %9724 = vtanh.f32 %v5356_v55  ;;  %v6942_v36 = vmul.f32 -1.442695, %v5356_v55 }
0x4ee0   :  { %9726 = vpow2.f32 %v6942_v36 }
0x4ee8   :  { %v9725_v35 = vpop.eup %9724 }
0x4ee9   :  { %5366 = vrot.lane.b32.xlu0 %v9725_v35, %s9870_s19 }
0x4eea   :  { %v9727_v29 = vpop.eup %9726 }
0x4eeb   :  { %v5360_v61 = vadd.f32 1.0, %v9727_v29 }
0x4eed   :  { %9728 = vrcp.f32 %v5360_v61 }
0x4ef7   :  { %v9729_v38 = vpop.eup %9728 }
0x4ef8   :  { %v5364_v43 = vmul.f32 %v9729_v38, %v11177_v37 }
0x4f5b   :  { %v5367_v40 = vpop.permute.xlu0 %5366 }
0x4f5c   :  { %v5369_v33 = vmul.f32 %v9729_v38, %v5367_v40 }
0x4f5e   :  { %5371 = vrot.lane.b32.xlu1 %v5369_v33, %s9871_s20 }
0x4fd0   :  { %v5372_v24 = vpop.permute.xlu1 %5371 }
0x4fd1   :  { %v11271_v56 = vadd.f32 %v5372_v24, %v5364_v43 }
0x4fd3   :  { %9730 = vtanh.f32 %v11271_v56 }
0x4fdd   :  { %v9731_v58 = vpop.eup %9730 }
0x4fde   :  { %5377 = vrot.lane.b32.xlu1 %v9731_v58, %s9870_s19 }
0x4fe2   :  { %5385 = vrot.lane.b32.xlu1 %v11205_v42, %s9870_s19 }
0x5050   :  { %v5378_v47 = vpop.permute.xlu1 %5377 }
0x5051   :  { %v5380_v7 = vmul.f32 %v9729_v38, %v5378_v47 }
0x5053   :  { %5382 = vrot.lane.b32.xlu0 %v5380_v7, %s9871_s20 }
0x5054   :  { %v5386_v34 = vpop.permute.xlu1 %5385 }
0x50c5   :  { %v5383_v15 = vpop.permute.xlu0 %5382 }
0x50c6   :  { %v5388_v54 = vsel %vm270_vm2, %v5383_v15, %v5386_v34  ;;  %v5613_v34 = vstv %s5612_s4 }
0x50c7   :  { %8432 = vmatmul.mubr.msk.f32.vlgmr.msra.gmra.mrb[64].mxu1 %vm91_vm0, %v5388_v54  ;;  %vm5614_vm10 = vcmp.eq.s32.totalorder %v5613_v34, 1 }
0x50c8   :  { %9237 = vmatpush3.bf16.msra.mxu1 %v10767_v52  ;;  %8442 = vmatprep.mubr.msk.f32.mxu1 %vm9868_vm1, %v9869_v11 }
0x50c9   :  { %9238 = vmatprep.subr.bf16.mxu1 %v9867_v6 }
0x50cc   :  { %9240 = vmatpush3.bf16.msra.mxu1 %v10773_v12 }
0x50cd   :  { %9241 = vmatprep.subr.bf16.mxu1 %v9867_v6 }
0x519a   :  { %v5458_v37 = vpop.f32.mrb[64].mxu1 }
0x519b   :  { %v5459_v42 = vadd.f32 %v11195_v51, %v5458_v37  ;;  %v8433_v25 = vpop.f32.mrb[65].mxu1 }
0x519d   :  { %9732 = vtanh.f32 %v5459_v42  ;;  %v6944_v31 = vmul.f32 -1.442695, %v5459_v42  ;;  %v11330_v42 = vld [vmem:[%s11643_s2 + $0x30] sm:$0xff] }
0x519f   :  { %9734 = vpow2.f32 %v6944_v31 }
0x51a7   :  { %v9733_v26 = vpop.eup %9732 }
0x51a8   :  { %5471 = vrot.lane.b32.xlu0 %v9733_v26, %s9870_s19 }
0x51a9   :  { %v9735_v30 = vpop.eup %9734 }
0x51aa   :  { %v5465_v59 = vadd.f32 1.0, %v9735_v30 }
0x51ac   :  { %9736 = vrcp.f32 %v5465_v59 }
0x51b6   :  { %v9737_v1 = vpop.eup %9736 }
0x51b7   :  { %v5469_v55 = vmul.f32 %v9737_v1, %v11201_v53 }
0x521a   :  { %v5472_v17 = vpop.permute.xlu0 %5471 }
0x521b   :  { %v5474_v22 = vmul.f32 %v9737_v1, %v5472_v17 }
0x521d   :  { %5476 = vrot.lane.b32.xlu1 %v5474_v22, %s9871_s20 }
0x528f   :  { %v5477_v35 = vpop.permute.xlu1 %5476 }
0x5290   :  { %v11290_v36 = vadd.f32 %v5477_v35, %v5469_v55 }
0x5292   :  { %9738 = vtanh.f32 %v11290_v36 }
0x529c   :  { %v9739_v29 = vpop.eup %9738 }
0x529d   :  { %5482 = vrot.lane.b32.xlu0 %v9739_v29, %s9870_s19 }
0x530f   :  { %v5483_v61 = vpop.permute.xlu0 %5482 }
0x5310   :  { %v11294_v38 = vmul.f32 %v9737_v1, %v5483_v61 }
0x5312   :  { %5487 = vrot.lane.b32.xlu1 %v11294_v38, %s9871_s20 }
0x5384   :  { %v5488_v40 = vpop.permute.xlu1 %5487 }
0x5385   :  { %8443 = vmatmul.mubr.msk.f32.vlgmr.msra.gmra.mrb[66].mxu1 %vm270_vm2, %v5488_v40 }
0x5386   :  { %9243 = vmatpush3.bf16.msra.mxu1 %v10561_v60  ;;  %8453 = vmatprep.mubr.msk.f32.mxu1 %vm9868_vm1, %v9869_v11 }
0x5387   :  { %9244 = vmatprep.subr.bf16.mxu1 %v9867_v6 }
0x538a   :  { %9246 = vmatpush3.bf16.msra.mxu1 %v10567_v48 }
0x538b   :  { %9271 = vmatprep.subr.bf16.mxu1 %v9867_v6 }
0x538d   :  { %8454 = vmatmul.mubr.msk.f32.vlgmr.msra.gmra.mrb[68].mxu1 %vm270_vm2, %v5383_v15 }
0x538e   :  { %9273 = vmatpush3.bf16.msra.mxu1 %v10710_v5  ;;  %8507 = vmatprep.mubr.msk.f32.mxu1 %vm9868_vm1, %v9869_v11 }
0x538f   :  { %9274 = vmatprep.subr.bf16.mxu1 %v9867_v6 }
0x5392   :  { %9276 = vmatpush3.bf16.msra.mxu1 %v10716_v9 }
0x5393   :  { %9277 = vmatprep.subr.bf16.mxu1 %v9867_v6 }
0x5396   :  { %9279 = vmatpush3.bf16.msra.mxu1 %v10726_v14 }
0x5397   :  { %9280 = vmatprep.subr.bf16.mxu1 %v9867_v6 }
0x539a   :  { %9282 = vmatpush3.bf16.msra.mxu1 %v10736_v19 }
0x539b   :  { %9283 = vmatprep.subr.bf16.mxu1 %v9867_v6 }
0x5458   :  { %v5557_v53 = vpop.f32.mrb[66].mxu1 }
0x5459   :  { %v11317_v33 = vadd.f32 %v11230_v23, %v5557_v53  ;;  %v8444_v43 = vpop.f32.mrb[67].mxu1 }
0x545b   :  { %5561 = vmax.xlane.f32.xlu0 %v11317_v33 }
0x5460   :  { %v5684_v24 = vpop.f32.mrb[68].mxu1 }
0x5461   :  { %v8455_v58 = vpop.f32.mrb[69].mxu1 }
0x54e8   :  { %v11320_v47 = vpop.xlane.xlu0 %5561 }
0x54e9   :  { %vm5602_vm9 = vcmp.eq.f32.partialorder %v11317_v33, %v11320_v47 }
0x54ea   :  { %v5603_v7 = vsel %vm5602_vm9, %v10814_v3, -128.0 }
0x54eb   :  { %5604 = vmax.xlane.f32.xlu1 %v5603_v7 }
0x5578   :  { %v5605_v15 = vpop.xlane.xlu1 %5604 }
0x5579   :  { %v5606_v54 = vsub.f32 0.0, %v5605_v15 }
0x557b   :  { %vm5607_vm11 = vcmp.eq.f32.partialorder %v10811_v50, %v5606_v54 }
0x557c   :  { %v6947_v37 = vsel %vm5607_vm11, 1.0, %v9869_v11 }
0x557d   :  { %v5615_v25 = vsel %vm5614_vm10, %v11330_v42, %v6947_v37 }
0x557e   :  { %8489 = vmatmul.mubr.f32.vlgmr.msra.gmra.mrb[48].mxu0 %v5615_v25 }
0x557f   :  { %9297 = vmatpush3.bf16.msra.mxu0 %v10581_v0  ;;  %8564 = vmatprep.mubr.msk.f32.mxu0 %vm9868_vm1, %v9869_v11 }
0x5580   :  { %9298 = vmatprep.subr.bf16.mxu0 %v9867_v6 }
0x5583   :  { %9300 = vmatpush3.bf16.msra.mxu0 %v10591_v4 }
0x5584   :  { %9301 = vmatprep.subr.bf16.mxu0 %v9867_v6 }
0x5587   :  { %9303 = vmatpush3.bf16.msra.mxu0 %v10603_v8 }
0x5588   :  { %9304 = vmatprep.subr.bf16.mxu0 %v9867_v6 }
0x558b   :  { %9306 = vmatpush3.bf16.msra.mxu0 %v10613_v10 }
0x558c   :  { %9307 = vmatprep.subr.bf16.mxu0 %v9867_v6 }
0x558f   :  { %9309 = vmatpush3.bf16.msra.mxu0 %v10625_v16 }
0x5590   :  { %9310 = vmatprep.subr.bf16.mxu0 %v9867_v6 }
0x5593   :  { %9312 = vmatpush3.bf16.msra.mxu0 %v10637_v21 }
0x5594   :  { %9313 = vmatprep.subr.bf16.mxu0 %v9867_v6 }
0x5597   :  { %9315 = vmatpush3.bf16.msra.mxu0 %v10647_v44 }
0x5598   :  { %9316 = vmatprep.subr.bf16.mxu0 %v9867_v6 }
0x559b   :  { %9318 = vmatpush3.bf16.msra.mxu0 %v10657_v45 }
0x559c   :  { %9343 = vmatprep.subr.bf16.mxu0 %v9867_v6 }
0x5651   :  { %v5754_v26 = vpop.f32.mrb[48].mxu0 }
0x5652   :  { %v5755_v31 = vadd.f32 %v5754_v26, %v5684_v24  ;;  %v8490_v30 = vpop.f32.mrb[49].mxu0 }
0x5654   :  { %v5758_v59 = vadd.f32 %v11171_v41, %v5755_v31 }
0x5656   :  { %9740 = vtanh.f32 %v5758_v59  ;;  %v6950_v17 = vmul.f32 -1.442695, %v5758_v59 }
0x5658   :  { %9742 = vpow2.f32 %v6950_v17 }
0x5660   :  { %v9741_v1 = vpop.eup %9740 }
0x5661   :  { %5768 = vrot.lane.b32.xlu0 %v9741_v1, %s9870_s19 }
0x5662   :  { %v9743_v22 = vpop.eup %9742 }
0x5663   :  { %v5762_v55 = vadd.f32 1.0, %v9743_v22 }
0x5665   :  { %9744 = vrcp.f32 %v5762_v55 }
0x566f   :  { %v9745_v35 = vpop.eup %9744 }
0x5670   :  { %v5766_v40 = vmul.f32 %v9745_v35, %v11271_v56 }
0x56d3   :  { %v5769_v29 = vpop.permute.xlu0 %5768 }
0x56d4   :  { %v5771_v61 = vmul.f32 %v9745_v35, %v5769_v29 }
0x56d6   :  { %5773 = vrot.lane.b32.xlu1 %v5771_v61, %s9871_s20 }
0x5748   :  { %v5774_v53 = vpop.permute.xlu1 %5773 }
0x5749   :  { %v11355_v43 = vadd.f32 %v5774_v53, %v5766_v40 }
0x574b   :  { %9746 = vtanh.f32 %v11355_v43 }
0x5755   :  { %v9747_v24 = vpop.eup %9746 }
0x5756   :  { %5779 = vrot.lane.b32.xlu0 %v9747_v24, %s9870_s19 }
0x575a   :  { %5787 = vrot.lane.b32.xlu0 %v11294_v38, %s9870_s19 }
0x57c8   :  { %v5780_v58 = vpop.permute.xlu0 %5779 }
0x57c9   :  { %v5782_v7 = vmul.f32 %v9745_v35, %v5780_v58 }
0x57cb   :  { %5784 = vrot.lane.b32.xlu1 %v5782_v7, %s9871_s20 }
0x57cc   :  { %v5788_v34 = vpop.permute.xlu0 %5787 }
0x583d   :  { %v5785_v15 = vpop.permute.xlu1 %5784 }
0x583e   :  { %v5790_v54 = vsel %vm270_vm2, %v5785_v15, %v5788_v34 }
0x583f   :  { %8508 = vmatmul.mubr.msk.f32.vlgmr.msra.gmra.mrb[70].mxu1 %vm91_vm0, %v5790_v54 }
0x5840   :  { %9285 = vmatpush3.bf16.msra.mxu1 %v10767_v52  ;;  %8518 = vmatprep.mubr.msk.f32.mxu1 %vm9868_vm1, %v9869_v11 }
0x5841   :  { %9286 = vmatprep.subr.bf16.mxu1 %v9867_v6 }
0x5844   :  { %9288 = vmatpush3.bf16.msra.mxu1 %v10773_v12 }
0x5845   :  { %9289 = vmatprep.subr.bf16.mxu1 %v9867_v6 }
0x5912   :  { %v5860_v56 = vpop.f32.mrb[70].mxu1 }
0x5913   :  { %v5861_v38 = vadd.f32 %v11195_v51, %v5860_v56  ;;  %v8509_v37 = vpop.f32.mrb[71].mxu1  ;;  %v6015_v56 = vstv %s6014_s18 }
0x5914   :  { %vm6016_vm13 = vcmp.eq.s32.totalorder %v6015_v56, 1 }
0x5915   :  { %9748 = vtanh.f32 %v5861_v38  ;;  %v6952_v26 = vmul.f32 -1.442695, %v5861_v38 }
0x5917   :  { %9750 = vpow2.f32 %v6952_v26  ;;  %v11414_v26 = vld [vmem:[%s11643_s2 + $0x38] sm:$0xff] }
0x591f   :  { %v9749_v25 = vpop.eup %9748 }
0x5920   :  { %5873 = vrot.lane.b32.xlu1 %v9749_v25, %s9870_s19 }
0x5921   :  { %v9751_v31 = vpop.eup %9750 }
0x5922   :  { %v5867_v30 = vadd.f32 1.0, %v9751_v31 }
0x5924   :  { %9752 = vrcp.f32 %v5867_v30 }
0x592e   :  { %v9753_v59 = vpop.eup %9752 }
0x592f   :  { %v5871_v22 = vmul.f32 %v9753_v59, %v11290_v36 }
0x5992   :  { %v5874_v1 = vpop.permute.xlu1 %5873 }
0x5993   :  { %v5876_v17 = vmul.f32 %v9753_v59, %v5874_v1 }
0x5995   :  { %5878 = vrot.lane.b32.xlu0 %v5876_v17, %s9871_s20 }
0x5a07   :  { %v5879_v55 = vpop.permute.xlu0 %5878 }
0x5a08   :  { %v11374_v35 = vadd.f32 %v5879_v55, %v5871_v22 }
0x5a0a   :  { %9754 = vtanh.f32 %v11374_v35 }
0x5a14   :  { %v9755_v29 = vpop.eup %9754 }
0x5a15   :  { %5884 = vrot.lane.b32.xlu1 %v9755_v29, %s9870_s19 }
0x5a87   :  { %v5885_v61 = vpop.permute.xlu1 %5884 }
0x5a88   :  { %v11378_v40 = vmul.f32 %v9753_v59, %v5885_v61 }
0x5a8a   :  { %5889 = vrot.lane.b32.xlu0 %v11378_v40, %s9871_s20 }
0x5afc   :  { %v5890_v53 = vpop.permute.xlu0 %5889 }
0x5afd   :  { %8519 = vmatmul.mubr.msk.f32.vlgmr.msra.gmra.mrb[72].mxu1 %vm270_vm2, %v5890_v53 }
0x5afe   :  { %9291 = vmatpush3.bf16.msra.mxu1 %v10561_v60  ;;  %8529 = vmatprep.mubr.msk.f32.mxu1 %vm9868_vm1, %v9869_v11 }
0x5aff   :  { %9292 = vmatprep.subr.bf16.mxu1 %v9867_v6 }
0x5b02   :  { %9294 = vmatpush3.bf16.msra.mxu1 %v10567_v48 }
0x5b03   :  { %9319 = vmatprep.subr.bf16.mxu1 %v9867_v6 }
0x5b05   :  { %8530 = vmatmul.mubr.msk.f32.vlgmr.msra.gmra.mrb[74].mxu1 %vm270_vm2, %v5785_v15 }
0x5b06   :  { %9321 = vmatpush3.bf16.msra.mxu1 %v10710_v5  ;;  %8583 = vmatprep.mubr.msk.f32.mxu1 %vm9868_vm1, %v9869_v11 }
0x5b07   :  { %9322 = vmatprep.subr.bf16.mxu1 %v9867_v6 }
0x5b0a   :  { %9324 = vmatpush3.bf16.msra.mxu1 %v10716_v9 }
0x5b0b   :  { %9325 = vmatprep.subr.bf16.mxu1 %v9867_v6 }
0x5b0e   :  { %9327 = vmatpush3.bf16.msra.mxu1 %v10726_v14 }
0x5b0f   :  { %9328 = vmatprep.subr.bf16.mxu1 %v9867_v6 }
0x5b12   :  { %9330 = vmatpush3.bf16.msra.mxu1 %v10736_v19 }
0x5b13   :  { %9331 = vmatprep.subr.bf16.mxu1 %v9867_v6 }
0x5bd0   :  { %v5959_v36 = vpop.f32.mrb[72].mxu1 }
0x5bd1   :  { %v11401_v24 = vadd.f32 %v11230_v23, %v5959_v36  ;;  %v8520_v58 = vpop.f32.mrb[73].mxu1 }
0x5bd3   :  { %5963 = vmax.xlane.f32.xlu1 %v11401_v24 }
0x5bd8   :  { %v6086_v7 = vpop.f32.mrb[74].mxu1 }
0x5bd9   :  { %v8531_v34 = vpop.f32.mrb[75].mxu1 }
0x5c60   :  { %v11404_v15 = vpop.xlane.xlu1 %5963 }
0x5c61   :  { %vm6004_vm12 = vcmp.eq.f32.partialorder %v11401_v24, %v11404_v15 }
0x5c62   :  { %v6005_v54 = vsel %vm6004_vm12, %v10814_v3, -128.0 }
0x5c63   :  { %6006 = vmax.xlane.f32.xlu0 %v6005_v54 }
0x5cf0   :  { %v6007_v38 = vpop.xlane.xlu0 %6006 }
0x5cf1   :  { %v6008_v37 = vsub.f32 0.0, %v6007_v38 }
0x5cf3   :  { %vm6009_vm14 = vcmp.eq.f32.partialorder %v10811_v50, %v6008_v37 }
0x5cf4   :  { %v6955_v25 = vsel %vm6009_vm14, 1.0, %v9869_v11 }
0x5cf5   :  { %v6017_v31 = vsel %vm6016_vm13, %v11414_v26, %v6955_v25 }
0x5cf6   :  { %8565 = vmatmul.mubr.f32.vlgmr.msra.gmra.mrb[50].mxu0 %v6017_v31 }
0x5cf7   :  { %9345 = vmatpush3.bf16.msra.mxu0 %v10581_v0  ;;  %8640 = vmatprep.mubr.msk.f32.mxu0 %vm9868_vm1, %v9869_v11 }
0x5cf8   :  { %9346 = vmatprep.subr.bf16.mxu0 %v9867_v6 }
0x5cfb   :  { %9348 = vmatpush3.bf16.msra.mxu0 %v10591_v4 }
0x5cfc   :  { %9349 = vmatprep.subr.bf16.mxu0 %v9867_v6 }
0x5cff   :  { %9351 = vmatpush3.bf16.msra.mxu0 %v10603_v8 }
0x5d00   :  { %9352 = vmatprep.subr.bf16.mxu0 %v9867_v6 }
0x5d03   :  { %9354 = vmatpush3.bf16.msra.mxu0 %v10613_v10 }
0x5d04   :  { %9355 = vmatprep.subr.bf16.mxu0 %v9867_v6 }
0x5d07   :  { %9357 = vmatpush3.bf16.msra.mxu0 %v10625_v16 }
0x5d08   :  { %9358 = vmatprep.subr.bf16.mxu0 %v9867_v6 }
0x5d0b   :  { %9360 = vmatpush3.bf16.msra.mxu0 %v10637_v21 }
0x5d0c   :  { %9361 = vmatprep.subr.bf16.mxu0 %v9867_v6 }
0x5d0f   :  { %9363 = vmatpush3.bf16.msra.mxu0 %v10647_v44 }
0x5d10   :  { %9364 = vmatprep.subr.bf16.mxu0 %v9867_v6 }
0x5d13   :  { %9366 = vmatpush3.bf16.msra.mxu0 %v10657_v45 }
0x5dc9   :  { %v6156_v0 = vpop.f32.mrb[50].mxu0 }
0x5dca   :  { %v6157_v4 = vadd.f32 %v6156_v0, %v6086_v7  ;;  %v8566_v8 = vpop.f32.mrb[51].mxu0 }
0x5dcc   :  { %v6160_v10 = vadd.f32 %v11171_v41, %v6157_v4 }
0x5dce   :  { %9756 = vtanh.f32 %v6160_v10  ;;  %v6958_v16 = vmul.f32 -1.442695, %v6160_v10 }
0x5dd0   :  { %9758 = vpow2.f32 %v6958_v16 }
0x5dd8   :  { %v9757_v30 = vpop.eup %9756 }
0x5dd9   :  { %6170 = vrot.lane.b32.xlu0 %v9757_v30, %s9870_s19 }
0x5dda   :  { %v9759_v21 = vpop.eup %9758 }
0x5ddb   :  { %v6164_v59 = vadd.f32 1.0, %v9759_v21 }
0x5ddd   :  { %9760 = vrcp.f32 %v6164_v59 }
0x5de7   :  { %v9761_v1 = vpop.eup %9760 }
0x5de8   :  { %v6168_v45 = vmul.f32 %v9761_v1, %v11355_v43 }
0x5e4b   :  { %v6171_v44 = vpop.permute.xlu0 %6170 }
0x5e4c   :  { %v6173_v17 = vmul.f32 %v9761_v1, %v6171_v44 }
0x5e4e   :  { %6175 = vrot.lane.b32.xlu1 %v6173_v17, %s9871_s20 }
0x5ec0   :  { %v6176_v22 = vpop.permute.xlu1 %6175 }
0x5ec1   :  { %v11438_v55 = vadd.f32 %v6176_v22, %v6168_v45  ;;  %v11494_v22 = vld [vmem:[%s11643_s2 + $0x40] sm:$0xff] }
0x5ec3   :  { %9762 = vtanh.f32 %v11438_v55 }
0x5ecd   :  { %v9763_v29 = vpop.eup %9762 }
0x5ece   :  { %6181 = vrot.lane.b32.xlu1 %v9763_v29, %s9870_s19 }
0x5ed2   :  { %6189 = vrot.lane.b32.xlu1 %v11378_v40, %s9870_s19 }
0x5f40   :  { %v6182_v61 = vpop.permute.xlu1 %6181 }
0x5f41   :  { %v6184_v53 = vmul.f32 %v9761_v1, %v6182_v61 }
0x5f43   :  { %6186 = vrot.lane.b32.xlu0 %v6184_v53, %s9871_s20 }
0x5f44   :  { %v6190_v36 = vpop.permute.xlu1 %6189 }
0x5fb5   :  { %v6187_v58 = vpop.permute.xlu0 %6186 }
0x5fb6   :  { %v6192_v7 = vsel %vm270_vm2, %v6187_v58, %v6190_v36 }
0x5fb7   :  { %8584 = vmatmul.mubr.msk.f32.vlgmr.msra.gmra.mrb[76].mxu1 %vm91_vm0, %v6192_v7 }
0x5fb8   :  { %9333 = vmatpush3.bf16.msra.mxu1 %v10767_v52  ;;  %8594 = vmatprep.mubr.msk.f32.mxu1 %vm9868_vm1, %v9869_v11 }
0x5fb9   :  { %9334 = vmatprep.subr.bf16.mxu1 %v9867_v6 }
0x5fbc   :  { %9336 = vmatpush3.bf16.msra.mxu1 %v10773_v12 }
0x5fbd   :  { %9337 = vmatprep.subr.bf16.mxu1 %v9867_v6 }
0x608a   :  { %v6262_v43 = vpop.f32.mrb[76].mxu1 }
0x608b   :  { %v6263_v40 = vadd.f32 %v11195_v51, %v6262_v43  ;;  %v8585_v34 = vpop.f32.mrb[77].mxu1 }
0x608d   :  { %9764 = vtanh.f32 %v6263_v40  ;;  %v6960_v56 = vmul.f32 -1.442695, %v6263_v40 }
0x608f   :  { %9766 = vpow2.f32 %v6960_v56 }
0x6097   :  { %v9765_v54 = vpop.eup %9764 }
0x6098   :  { %6275 = vrot.lane.b32.xlu0 %v9765_v54, %s9870_s19 }
0x6099   :  { %v9767_v38 = vpop.eup %9766 }
0x609a   :  { %v6269_v37 = vadd.f32 1.0, %v9767_v38 }
0x609c   :  { %9768 = vrcp.f32 %v6269_v37 }
0x60a6   :  { %v9769_v25 = vpop.eup %9768 }
0x60a7   :  { %v6273_v4 = vmul.f32 %v9769_v25, %v11374_v35 }
0x610a   :  { %v6276_v31 = vpop.permute.xlu0 %6275 }
0x610b   :  { %v6278_v0 = vmul.f32 %v9769_v25, %v6276_v31 }
0x610d   :  { %6280 = vrot.lane.b32.xlu1 %v6278_v0, %s9871_s20 }
0x617f   :  { %v6281_v8 = vpop.permute.xlu1 %6280 }
0x6180   :  { %v11457_v10 = vadd.f32 %v6281_v8, %v6273_v4 }
0x6182   :  { %9770 = vtanh.f32 %v11457_v10 }
0x618c   :  { %v9771_v30 = vpop.eup %9770 }
0x618d   :  { %6286 = vrot.lane.b32.xlu0 %v9771_v30, %s9870_s19 }
0x61ff   :  { %v6287_v16 = vpop.permute.xlu0 %6286 }
0x6200   :  { %v6289_v21 = vmul.f32 %v9769_v25, %v6287_v16 }
0x6202   :  { %6291 = vrot.lane.b32.xlu1 %v6289_v21, %s9871_s20 }
0x6274   :  { %v6292_v59 = vpop.permute.xlu1 %6291 }
0x6275   :  { %8595 = vmatmul.mubr.msk.f32.vlgmr.msra.gmra.mrb[78].mxu1 %vm270_vm2, %v6292_v59 }
0x6276   :  { %9339 = vmatpush3.bf16.msra.mxu1 %v10561_v60  ;;  %8605 = vmatprep.mubr.msk.f32.mxu1 %vm9868_vm1, %v9869_v11 }
0x6277   :  { %9340 = vmatprep.subr.bf16.mxu1 %v9867_v6 }
0x627a   :  { %9342 = vmatpush3.bf16.msra.mxu1 %v10567_v48 }
0x627b   :  { %9367 = vmatprep.subr.bf16.mxu1 %v9867_v6 }
0x627d   :  { %8606 = vmatmul.mubr.msk.f32.vlgmr.msra.gmra.mrb[80].mxu1 %vm270_vm2, %v6187_v58 }
0x627e   :  { %9369 = vmatpush3.bf16.msra.mxu1 %v10710_v5  ;;  %8659 = vmatprep.mubr.msk.f32.mxu1 %vm9868_vm1, %v9869_v11 }
0x627f   :  { %9370 = vmatprep.subr.bf16.mxu1 %v9867_v6 }
0x6282   :  { %9372 = vmatpush3.bf16.msra.mxu1 %v10716_v9 }
0x6283   :  { %9373 = vmatprep.subr.bf16.mxu1 %v9867_v6 }
0x6286   :  { %9375 = vmatpush3.bf16.msra.mxu1 %v10726_v14 }
0x6287   :  { %9376 = vmatprep.subr.bf16.mxu1 %v9867_v6 }
0x628a   :  { %9378 = vmatpush3.bf16.msra.mxu1 %v10736_v19  ;;  %v6417_v19 = vstv %s6416_s11 }
0x628b   :  { %9379 = vmatprep.subr.bf16.mxu1 %v9867_v6  ;;  %vm6418_vm3 = vcmp.eq.s32.totalorder %v6417_v19, 1 }
0x6348   :  { %v6361_v60 = vpop.f32.mrb[78].mxu1 }
0x6349   :  { %v11481_v48 = vadd.f32 %v11230_v23, %v6361_v60  ;;  %v8596_v5 = vpop.f32.mrb[79].mxu1 }
0x634b   :  { %6365 = vmax.xlane.f32.xlu0 %v11481_v48 }
0x6350   :  { %v6488_v35 = vpop.f32.mrb[80].mxu1 }
0x6351   :  { %v8607_v1 = vpop.f32.mrb[81].mxu1 }
0x63d8   :  { %v11484_v9 = vpop.xlane.xlu0 %6365 }
0x63d9   :  { %vm6406_vm15 = vcmp.eq.f32.partialorder %v11481_v48, %v11484_v9 }
0x63da   :  { %v6407_v14 = vsel %vm6406_vm15, %v10814_v3, -128.0 }
0x63db   :  { %6408 = vmax.xlane.f32.xlu1 %v6407_v14 }
0x6468   :  { %v6409_v44 = vpop.xlane.xlu1 %6408 }
0x6469   :  { %v6410_v17 = vsub.f32 0.0, %v6409_v44  ;;  %v3150_v44 = vsub.f32 %v10807_v62, %v10816_v39 }
0x646b   :  { %vm6411_vm4 = vcmp.eq.f32.partialorder %v10811_v50, %v6410_v17  ;;  %v3151_v17 = vmul.f32 1.442695, %v3150_v44 }
0x646c   :  { %v6963_v45 = vsel %vm6411_vm4, 1.0, %v9869_v11 }
0x646d   :  { %v6419_v29 = vsel %vm6418_vm3, %v11494_v22, %v6963_v45  ;;  %v3553_v45 = vsub.f32 %v10894_v18, %v10897_v27 }
0x646e   :  { %8641 = vmatmul.mubr.f32.vlgmr.msra.gmra.mrb[52].mxu0 %v6419_v29 }
0x646f   :  { %v3554_v29 = vmul.f32 1.442695, %v3553_v45 }
0x6541   :  { %v6558_v3 = vpop.f32.mrb[52].mxu0 }
0x6542   :  { %v6559_v61 = vadd.f32 %v6558_v3, %v6488_v35  ;;  %v8642_v53 = vpop.f32.mrb[53].mxu0 }
0x6544   :  { %v6562_v36 = vadd.f32 %v11171_v41, %v6559_v61  ;;  %v5161_v61 = vsub.f32 %v11233_v2, %v11236_v28 }
0x6546   :  { %9772 = vtanh.f32 %v6562_v36  ;;  %v6966_v50 = vmul.f32 -1.442695, %v6562_v36  ;;  %v5162_v53 = vmul.f32 1.442695, %v5161_v61  ;;  %v5965_v36 = vsub.f32 %v11401_v24, %v11404_v15 }
0x6548   :  { %9774 = vpow2.f32 %v6966_v50  ;;  %v5966_v50 = vmul.f32 1.442695, %v5965_v36 }
0x6550   :  { %v9773_v58 = vpop.eup %9772 }
0x6551   :  { %6572 = vrot.lane.b32.xlu0 %v9773_v58, %s9870_s19 }
0x6552   :  { %v9775_v7 = vpop.eup %9774 }
0x6553   :  { %v6566_v43 = vadd.f32 1.0, %v9775_v7 }
0x6555   :  { %9776 = vrcp.f32 %v6566_v43 }
0x655f   :  { %v9777_v40 = vpop.eup %9776 }
0x6560   :  { %v6570_v56 = vmul.f32 %v9777_v40, %v11438_v55 }
0x65c3   :  { %v6573_v34 = vpop.permute.xlu0 %6572 }
0x65c4   :  { %v6575_v54 = vmul.f32 %v9777_v40, %v6573_v34 }
0x65c6   :  { %6577 = vrot.lane.b32.xlu1 %v6575_v54, %s9871_s20  ;;  %v9835_v54 = vld [vmem:[%s11643_s2] sm:$0xff] }
0x6638   :  { %v6578_v38 = vpop.permute.xlu1 %6577 }
0x6639   :  { %v6580_v37 = vadd.f32 %v6578_v38, %v6570_v56  ;;  %v9836_v56 = vld [vmem:[%s11643_s2 + $0x8] sm:$0xff] }
0x663a   :  { %v3565_v38 = vmul.f32 %v9836_v56, %v10894_v18 }
0x663b   :  { %9778 = vtanh.f32 %v6580_v37  ;;  %v9837_v37 = vld [vmem:[%s11643_s2 + $0x10] sm:$0xff] }
0x6645   :  { %v9779_v41 = vpop.eup %9778 }
0x6646   :  { %6583 = vrot.lane.b32.xlu0 %v9779_v41, %s9870_s19  ;;  %v3967_v41 = vmul.f32 %v9837_v37, %v10975_v20 }
0x664a   :  { %6591 = vrot.lane.b32.xlu0 %v6289_v21, %s9870_s19 }
0x66b8   :  { %v6584_v25 = vpop.permute.xlu0 %6583 }
0x66b9   :  { %v6586_v31 = vmul.f32 %v9777_v40, %v6584_v25  ;;  %v9838_v25 = vld [vmem:[%s11643_s2 + $0x18] sm:$0xff] }
0x66bb   :  { %6588 = vrot.lane.b32.xlu1 %v6586_v31, %s9871_s20  ;;  %v4369_v31 = vmul.f32 %v9838_v25, %v11056_v63 }
0x66bc   :  { %v6592_v0 = vpop.permute.xlu0 %6591 }
0x672d   :  { %v6589_v4 = vpop.permute.xlu1 %6588 }
0x672e   :  { %v6594_v8 = vsel %vm270_vm2, %v6589_v4, %v6592_v0  ;;  %v9839_v0 = vld [vmem:[%s11643_s2 + $0x20] sm:$0xff] }
0x672f   :  { %8660 = vmatmul.mubr.msk.f32.vlgmr.msra.gmra.mrb[82].mxu1 %vm91_vm0, %v6594_v8  ;;  %v4771_v18 = vmul.f32 %v9839_v0, %v11137_v57  ;;  %v3955_v8 = vsub.f32 %v10975_v20, %v10978_v46  ;;  %vm3166_vm0 = vcmask 7168  }
0x6730   :  { %9381 = vmatpush3.bf16.msra.mxu1 %v10767_v52  ;;  %8670 = vmatprep.mubr.msk.f32.mxu1 %vm9868_vm1, %v9869_v11 }
0x6731   :  { %9382 = vmatprep.subr.bf16.mxu1 %v9867_v6 }
0x6734   :  { %9384 = vmatpush3.bf16.msra.mxu1 %v10773_v12 }
0x6802   :  { %v6664_v55 = vpop.f32.mrb[82].mxu1 }
0x6803   :  { %v6665_v30 = vadd.f32 %v11195_v51, %v6664_v55  ;;  %v8661_v16 = vpop.f32.mrb[83].mxu1  ;;  %v3956_v55 = vmul.f32 1.442695, %v3955_v8 }
0x6804   :  { %v5563_v16 = vsub.f32 %v11317_v33, %v11320_v47 }
0x6805   :  { %9780 = vtanh.f32 %v6665_v30  ;;  %v6968_v59 = vmul.f32 -1.442695, %v6665_v30  ;;  %v4759_v30 = vsub.f32 %v11137_v57, %v11140_v49 }
0x6807   :  { %9782 = vpow2.f32 %v6968_v59  ;;  %v6367_v59 = vsub.f32 %v11481_v48, %v11484_v9 }
0x6809   :  { %v6368_v20 = vmul.f32 1.442695, %v6367_v59 }
0x680f   :  { %v9781_v21 = vpop.eup %9780 }
0x6810   :  { %6677 = vrot.lane.b32.xlu1 %v9781_v21, %s9870_s19  ;;  %v5564_v21 = vmul.f32 1.442695, %v5563_v16  ;;  %v6379_v16 = vmul.f32 %v11494_v22, %v11481_v48 }
0x6811   :  { %v9783_v60 = vpop.eup %9782 }
0x6812   :  { %v6671_v5 = vadd.f32 1.0, %v9783_v60 }
0x6814   :  { %9784 = vrcp.f32 %v6671_v5 }
0x681e   :  { %v9785_v52 = vpop.eup %9784 }
0x681f   :  { %v6675_v6 = vmul.f32 %v9785_v52, %v11457_v10  ;;  %v4357_v10 = vsub.f32 %v11056_v63, %v11059_v13  ;;  %v4760_v63 = vmul.f32 1.442695, %v4759_v30 }
0x6821   :  { %v4358_v3 = vmul.f32 1.442695, %v4357_v10 }
0x6882   :  { %v6678_v35 = vpop.permute.xlu1 %6677 }
0x6883   :  { %v6680_v11 = vmul.f32 %v9785_v52, %v6678_v35 }
0x6885   :  { %6682 = vrot.lane.b32.xlu0 %v6680_v11, %s9871_s20 }
0x68f7   :  { %v6683_v12 = vpop.permute.xlu0 %6682 }
0x68f8   :  { %v6685_v1 = vadd.f32 %v6683_v12, %v6675_v6  ;;  %v3161_v12 = vmul.f32 %v9835_v54, %v10807_v62 }
0x68fa   :  { %9786 = vtanh.f32 %v6685_v1 }
0x68fb   :  { %9788 = vpow2.f32 %v3151_v17 }
0x68fc   :  { %9790 = vpow2.f32 %v3554_v29 }
0x68fd   :  { %9792 = vpow2.f32 %v4358_v3 }
0x68fe   :  { %9794 = vpow2.f32 %v5162_v53 }
0x68ff   :  { %9796 = vpow2.f32 %v5966_v50 }
0x6900   :  { %9798 = vpow2.f32 %v3956_v55 }
0x6901   :  { %9800 = vpow2.f32 %v4760_v63 }
0x6902   :  { %9802 = vpow2.f32 %v5564_v21 }
0x6903   :  { %9804 = vpow2.f32 %v6368_v20 }
0x6904   :  { %v9787_v51 = vpop.eup %9786 }
0x6905   :  { %6688 = vrot.lane.b32.xlu1 %v9787_v51, %s9870_s19  ;;  %v9789_v58 = vpop.eup %9788 }
0x6906   :  { %v9791_v7 = vpop.eup %9790 }
0x6907   :  { %v9793_v43 = vpop.eup %9792 }
0x6908   :  { %v9795_v40 = vpop.eup %9794 }
0x6909   :  { %v9797_v34 = vpop.eup %9796 }
0x690a   :  { %v9799_v57 = vpop.eup %9798 }
0x690b   :  { %v9801_v35 = vpop.eup %9800 }
0x690c   :  { %v9803_v11 = vpop.eup %9802 }
0x690d   :  { %v9805_v6 = vpop.eup %9804 }
0x6977   :  { %v6689_v14 = vpop.permute.xlu1 %6688 }
0x6978   :  { %v6691_v19 = vmul.f32 %v9785_v52, %v6689_v14 }
0x697a   :  { %6693 = vrot.lane.b32.xlu0 %v6691_v19, %s9871_s20 }
0x6999   :  { %3153 = vadd.xlane.f32.xlu0 %v9789_v58 }
0x699d   :  { %3556 = vadd.xlane.f32.xlu0 %v9791_v7 }
0x69a1   :  { %4360 = vadd.xlane.f32.xlu0 %v9793_v43 }
0x69a5   :  { %5164 = vadd.xlane.f32.xlu0 %v9795_v40  ;;  %v5173_v40 = vmul.f32 %v11246_v32, %v11233_v2 }
0x69a9   :  { %5968 = vadd.xlane.f32.xlu0 %v9797_v34 }
0x69ad   :  { %3159 = vadd.xlane.f32.xlu0 %v9835_v54 }
0x69b1   :  { %3566 = vadd.xlane.f32.xlu0 %v3565_v38 }
0x69b5   :  { %3968 = vadd.xlane.f32.xlu0 %v3967_v41  ;;  %v5575_v41 = vmul.f32 %v11330_v42, %v11317_v33 }
0x69b9   :  { %4370 = vadd.xlane.f32.xlu0 %v4369_v31 }
0x69bd   :  { %4772 = vadd.xlane.f32.xlu0 %v4771_v18 }
0x69ec   :  { %v6694_v4 = vpop.permute.xlu0 %6693 }
0x69ed   :  { %8671 = vmatmul.mubr.msk.f32.vlgmr.msra.gmra.mrb[84].mxu1 %vm270_vm2, %v6694_v4 }
0x6a26   :  { %v3154_v62 = vpop.xlane.xlu0 %3153 }
0x6a27   :  { %9806 = vlog2.f32 %v3154_v62 }
0x6a2a   :  { %v3557_v1 = vpop.xlane.xlu0 %3556 }
0x6a2b   :  { %9808 = vlog2.f32 %v3557_v1 }
0x6a2e   :  { %v4361_v51 = vpop.xlane.xlu0 %4360 }
0x6a31   :  { %v9807_v61 = vpop.eup %9806 }
0x6a32   :  { %v5165_v44 = vpop.xlane.xlu0 %5164  ;;  %v3156_v7 = vmul.f32 0.6931472, %v9807_v61 }
0x6a34   :  { %v3157_v38 = vadd.f32 %v3156_v7, %v10816_v39 }
0x6a35   :  { %v9809_v53 = vpop.eup %9808 }
0x6a36   :  { %v5969_v29 = vpop.xlane.xlu0 %5968  ;;  %v3559_v43 = vmul.f32 0.6931472, %v9809_v53 }
0x6a3a   :  { %v3160_v36 = vpop.xlane.xlu0 %3159 }
0x6a3b   :  { %v3178_v62 = vsel %vm3166_vm0, %v3160_v36, 0.0 }
0x6a3e   :  { %v3567_v54 = vpop.xlane.xlu0 %3566 }
0x6a42   :  { %v3969_v2 = vpop.xlane.xlu0 %3968 }
0x6ac0   :  { %v6763_v60 = vpop.f32.mrb[84].mxu1 }
0x6ac1   :  { %v11556_v5 = vadd.f32 %v11230_v23, %v6763_v60  ;;  %v8672_v52 = vpop.f32.mrb[85].mxu1  ;;  %v11567_v23 = vld [vmem:[%s11643_s2 + $0x48] sm:$0xff] }
0x6ac2   :  { %v4371_v52 = vpop.xlane.xlu0 %4370 }
0x6ac3   :  { %6767 = vmax.xlane.f32.xlu1 %v11556_v5 }
0x6ac6   :  { %v4773_v1 = vpop.xlane.xlu0 %4772 }
0x6ac7   :  { %3958 = vadd.xlane.f32.xlu1 %v9799_v57  ;;  %v6781_v57 = vmul.f32 %v11567_v23, %v11556_v5 }
0x6acb   :  { %4762 = vadd.xlane.f32.xlu1 %v9801_v35 }
0x6acf   :  { %5566 = vadd.xlane.f32.xlu1 %v9803_v11 }
0x6ad3   :  { %6370 = vadd.xlane.f32.xlu1 %v9805_v6 }
0x6ad7   :  { %3563 = vadd.xlane.f32.xlu1 %v9836_v56 }
0x6adb   :  { %3162 = vadd.xlane.f32.xlu1 %v3161_v12 }
0x6adf   :  { %3965 = vadd.xlane.f32.xlu1 %v9837_v37  ;;  %v3560_v37 = vadd.f32 %v3559_v43, %v10897_v27 }
0x6ae3   :  { %4367 = vadd.xlane.f32.xlu1 %v9838_v25  ;;  %v3164_v25 = vmul.f32 %v3160_v36, %v3157_v38 }
0x6ae7   :  { %4769 = vadd.xlane.f32.xlu1 %v9839_v0 }
0x6aeb   :  { %5171 = vadd.xlane.f32.xlu1 %v11246_v32  ;;  %v5977_v32 = vmul.f32 %v11414_v26, %v11401_v24 }
0x6aef   :  { %5573 = vadd.xlane.f32.xlu1 %v11330_v42 }
0x6af3   :  { %5975 = vadd.xlane.f32.xlu1 %v11414_v26 }
0x6af7   :  { %6377 = vadd.xlane.f32.xlu1 %v11494_v22 }
0x6afb   :  { %6779 = vadd.xlane.f32.xlu1 %v11567_v23 }
0x6b50   :  { %v11570_v14 = vpop.xlane.xlu1 %6767 }
0x6b51   :  { %v6769_v19 = vsub.f32 %v11556_v5, %v11570_v14 }
0x6b53   :  { %v6770_v17 = vmul.f32 1.442695, %v6769_v19 }
0x6b54   :  { %v3959_v45 = vpop.xlane.xlu1 %3958 }
0x6b55   :  { %9810 = vpow2.f32 %v6770_v17 }
0x6b56   :  { %9812 = vlog2.f32 %v3959_v45 }
0x6b57   :  { %9814 = vlog2.f32 %v4361_v51 }
0x6b58   :  { %v4763_v10 = vpop.xlane.xlu1 %4762 }
0x6b59   :  { %9816 = vlog2.f32 %v4763_v10 }
0x6b5a   :  { %9818 = vlog2.f32 %v5165_v44 }
0x6b5c   :  { %v5567_v3 = vpop.xlane.xlu1 %5566 }
0x6b5d   :  { %9820 = vlog2.f32 %v5567_v3 }
0x6b5e   :  { %9822 = vlog2.f32 %v5969_v29 }
0x6b5f   :  { %v9811_v58 = vpop.eup %9810 }
0x6b60   :  { %6772 = vadd.xlane.f32.xlu0 %v9811_v58  ;;  %v6371_v50 = vpop.xlane.xlu1 %6370  ;;  %v9813_v34 = vpop.eup %9812 }
0x6b61   :  { %v3961_v31 = vmul.f32 0.6931472, %v9813_v34  ;;  %v9815_v18 = vpop.eup %9814  ;;  %9824 = vlog2.f32 %v6371_v50 }
0x6b62   :  { %v4363_v39 = vmul.f32 0.6931472, %v9815_v18 }
0x6b63   :  { %v3962_v55 = vadd.f32 %v3961_v31, %v10978_v46  ;;  %v9817_v33 = vpop.eup %9816 }
0x6b64   :  { %5174 = vadd.xlane.f32.xlu0 %v5173_v40  ;;  %v3564_v56 = vpop.xlane.xlu1 %3563  ;;  %v4765_v21 = vmul.f32 0.6931472, %v9817_v33  ;;  %v4364_v24 = vadd.f32 %v4363_v39, %v11059_v13  ;;  %v9819_v60 = vpop.eup %9818 }
0x6b65   :  { %v3568_v0 = vmul.f32 %v3564_v56, %v3560_v37  ;;  %v5167_v35 = vmul.f32 0.6931472, %v9819_v60  ;;  %v3581_v45 = vsel %vm3166_vm0, %v3564_v56, 0.0 }
0x6b66   :  { %v4766_v48 = vadd.f32 %v4765_v21, %v11140_v49 }
0x6b67   :  { %v3569_v30 = vsub.f32 %v3568_v0, %v3567_v54  ;;  %v9821_v6 = vpop.eup %9820  ;;  %v5168_v44 = vadd.f32 %v5167_v35, %v11236_v28 }
0x6b68   :  { %5576 = vadd.xlane.f32.xlu0 %v5575_v41  ;;  %v3163_v4 = vpop.xlane.xlu1 %3162  ;;  %v5569_v51 = vmul.f32 0.6931472, %v9821_v6  ;;  %v9823_v23 = vpop.eup %9822 }
0x6b69   :  { %v3165_v8 = vsub.f32 %v3164_v25, %v3163_v4  ;;  %v3570_v59 = vsel %vm3166_vm0, %v3569_v30, 0.0  ;;  %v5971_v29 = vmul.f32 0.6931472, %v9823_v23 }
0x6b6a   :  { %v5570_v3 = vadd.f32 %v5569_v51, %v11320_v47 }
0x6b6b   :  { %v3167_v27 = vsel %vm3166_vm0, %v3165_v8, 0.0  ;;  %v9825_v61 = vpop.eup %9824  ;;  %v5972_v50 = vadd.f32 %v5971_v29, %v11404_v15 }
0x6b6c   :  { %5978 = vadd.xlane.f32.xlu0 %v5977_v32  ;;  %3168 = vadd.xlane.f32.xlu1 %v3167_v27  ;;  %v3966_v42 = vpop.xlane.xlu1 %3965  ;;  %v6373_v58 = vmul.f32 0.6931472, %v9825_v61 }
0x6b6d   :  { %v3970_v63 = vmul.f32 %v3966_v42, %v3962_v55  ;;  %v3983_v28 = vsel %vm3166_vm0, %v3966_v42, 0.0 }
0x6b6e   :  { %v6374_v34 = vadd.f32 %v6373_v58, %v11484_v9 }
0x6b6f   :  { %v3971_v26 = vsub.f32 %v3970_v63, %v3969_v2 }
0x6b70   :  { %6380 = vadd.xlane.f32.xlu0 %v6379_v16  ;;  %3571 = vadd.xlane.f32.xlu1 %v3570_v59  ;;  %v4368_v46 = vpop.xlane.xlu1 %4367 }
0x6b71   :  { %v4372_v20 = vmul.f32 %v4368_v46, %v4364_v24  ;;  %v3972_v11 = vsel %vm3166_vm0, %v3971_v26, 0.0  ;;  %v4385_v40 = vsel %vm3166_vm0, %v4368_v46, 0.0 }
0x6b73   :  { %v4373_v22 = vsub.f32 %v4372_v20, %v4371_v52 }
0x6b74   :  { %3973 = vadd.xlane.f32.xlu1 %v3972_v11  ;;  %v4770_v13 = vpop.xlane.xlu1 %4769  ;;  %6782 = vadd.xlane.f32.xlu0 %v6781_v57 }
0x6b75   :  { %v4774_v12 = vmul.f32 %v4770_v13, %v4766_v48  ;;  %v4374_v19 = vsel %vm3166_vm0, %v4373_v22, 0.0  ;;  %v4787_v56 = vsel %vm3166_vm0, %v4770_v13, 0.0 }
0x6b77   :  { %v4775_v5 = vsub.f32 %v4774_v12, %v4773_v1 }
0x6b78   :  { %4375 = vadd.xlane.f32.xlu1 %v4374_v19  ;;  %v5172_v17 = vpop.xlane.xlu1 %5171  ;;  %3179 = vadd.xlane.f32.xlu0 %v3178_v62 }
0x6b79   :  { %v5176_v49 = vmul.f32 %v5172_v17, %v5168_v44  ;;  %v4776_v10 = vsel %vm3166_vm0, %v4775_v5, 0.0  ;;  %v5189_v38 = vsel %vm3166_vm0, %v5172_v17, 0.0 }
0x6b7c   :  { %4777 = vadd.xlane.f32.xlu1 %v4776_v10  ;;  %v5574_v53 = vpop.xlane.xlu1 %5573  ;;  %3582 = vadd.xlane.f32.xlu0 %v3581_v45 }
0x6b7d   :  { %v5578_v36 = vmul.f32 %v5574_v53, %v5570_v3  ;;  %v5591_v37 = vsel %vm3166_vm0, %v5574_v53, 0.0 }
0x6b80   :  { %v5976_v7 = vpop.xlane.xlu1 %5975  ;;  %3984 = vadd.xlane.f32.xlu0 %v3983_v28 }
0x6b81   :  { %v5980_v43 = vmul.f32 %v5976_v7, %v5972_v50  ;;  %v5993_v15 = vsel %vm3166_vm0, %v5976_v7, 0.0 }
0x6b84   :  { %v6378_v54 = vpop.xlane.xlu1 %6377  ;;  %4386 = vadd.xlane.f32.xlu0 %v4385_v40 }
0x6b85   :  { %v6382_v47 = vmul.f32 %v6378_v54, %v6374_v34  ;;  %v6395_v41 = vsel %vm3166_vm0, %v6378_v54, 0.0 }
0x6b88   :  { %4788 = vadd.xlane.f32.xlu0 %v4787_v56  ;;  %v6780_v25 = vpop.xlane.xlu1 %6779 }
0x6b89   :  { %v6797_v9 = vsel %vm3166_vm0, %v6780_v25, 0.0 }
0x6b8c   :  { %5190 = vadd.xlane.f32.xlu0 %v5189_v38 }
0x6b90   :  { %5592 = vadd.xlane.f32.xlu0 %v5591_v37 }
0x6b94   :  { %5994 = vadd.xlane.f32.xlu0 %v5993_v15 }
0x6b98   :  { %6396 = vadd.xlane.f32.xlu0 %v6395_v41 }
0x6b9c   :  { %6798 = vadd.xlane.f32.xlu0 %v6797_v9 }
0x6bed   :  { %v6773_v31 = vpop.xlane.xlu0 %6772 }
0x6bee   :  { %9826 = vlog2.f32 %v6773_v31 }
0x6bf1   :  { %v5175_v0 = vpop.xlane.xlu0 %5174 }
0x6bf2   :  { %v5177_v18 = vsub.f32 %v5176_v49, %v5175_v0 }
0x6bf4   :  { %v5178_v4 = vsel %vm3166_vm0, %v5177_v18, 0.0 }
0x6bf5   :  { %v5577_v8 = vpop.xlane.xlu0 %5576  ;;  %5179 = vadd.xlane.f32.xlu1 %v5178_v4 }
0x6bf6   :  { %v5579_v2 = vsub.f32 %v5578_v36, %v5577_v8 }
0x6bf8   :  { %v9827_v32 = vpop.eup %9826  ;;  %v5580_v39 = vsel %vm3166_vm0, %v5579_v2, 0.0 }
0x6bf9   :  { %v6775_v27 = vmul.f32 0.6931472, %v9827_v32  ;;  %v5979_v55 = vpop.xlane.xlu0 %5978  ;;  %5581 = vadd.xlane.f32.xlu1 %v5580_v39  ;;  %v3169_v30 = vpop.xlane.xlu1 %3168 }
0x6bfa   :  { %v5981_v33 = vsub.f32 %v5980_v43, %v5979_v55  ;;  %v3170_v42 = vrot.slane %v3169_v30, 4 }
0x6bfb   :  { %v6776_v63 = vadd.f32 %v6775_v27, %v11570_v14 }
0x6bfc   :  { %v3171_v16 = vadd.f32 %v3170_v42, %v3169_v30  ;;  %v5982_v21 = vsel %vm3166_vm0, %v5981_v33, 0.0 }
0x6bfd   :  { %v6381_v59 = vpop.xlane.xlu0 %6380  ;;  %5983 = vadd.xlane.f32.xlu1 %v5982_v21  ;;  %v3572_v24 = vpop.xlane.xlu1 %3571  ;;  %v6784_v46 = vmul.f32 %v6780_v25, %v6776_v63 }
0x6bfe   :  { %v3172_v26 = vrot.slane %v3171_v16, 2  ;;  %v6383_v60 = vsub.f32 %v6382_v47, %v6381_v59  ;;  %v3573_v52 = vrot.slane %v3572_v24, 4 }
0x6c00   :  { %v6384_v20 = vsel %vm3166_vm0, %v6383_v60, 0.0  ;;  %v3173_v57 = vadd.f32 %v3172_v26, %v3171_v16  ;;  %v3574_v35 = vadd.f32 %v3573_v52, %v3572_v24 }
0x6c01   :  { %6385 = vadd.xlane.f32.xlu1 %v6384_v20  ;;  %v3974_v11 = vpop.xlane.xlu1 %3973  ;;  %v6783_v48 = vpop.xlane.xlu0 %6782 }
0x6c02   :  { %v3975_v22 = vrot.slane %v3974_v11, 4  ;;  %v6785_v6 = vsub.f32 %v6784_v46, %v6783_v48  ;;  %v3174_v14 = vrot.slane %v3173_v57, 1  ;;  %v3575_v62 = vrot.slane %v3574_v35, 2 }
0x6c04   :  { %v6786_v13 = vsel %vm3166_vm0, %v6785_v6, 0.0  ;;  %v3175_v12 = vadd.f32 %v3174_v14, %v3173_v57  ;;  %v3976_v1 = vadd.f32 %v3975_v22, %v3974_v11  ;;  %v3576_v10 = vadd.f32 %v3575_v62, %v3574_v35 }
0x6c05   :  { %v4376_v51 = vpop.xlane.xlu1 %4375  ;;  %6787 = vadd.xlane.f32.xlu1 %v6786_v13  ;;  %v3180_v19 = vpop.xlane.xlu0 %3179 }
0x6c06   :  { %v4377_v44 = vrot.slane %v4376_v51, 4  ;;  %v3181_v5 = vrot.slane %v3180_v19, 4  ;;  %9385 = vpush %v3175_v12  ;;  %v3977_v17 = vrot.slane %v3976_v1, 2  ;;  %v3577_v43 = vrot.slane %v3576_v10, 1 }
0x6c08   :  { %v3182_v23 = vadd.f32 %v3181_v5, %v3180_v19  ;;  %v4378_v49 = vadd.f32 %v4377_v44, %v4376_v51  ;;  %v3978_v40 = vadd.f32 %v3977_v17, %v3976_v1  ;;  %v3578_v25 = vadd.f32 %v3577_v43, %v3576_v10 }
0x6c09   :  { %v4778_v45 = vpop.xlane.xlu1 %4777  ;;  %v3583_v29 = vpop.xlane.xlu0 %3582 }
0x6c0a   :  { %v3183_v3 = vrot.slane %v3182_v23, 2  ;;  %v4779_v61 = vrot.slane %v4778_v45, 4  ;;  %v3584_v53 = vrot.slane %v3583_v29, 4  ;;  %v4379_v58 = vrot.slane %v4378_v49, 2 }
0x6c0b   :  { %v3979_v9 = vrot.slane %v3978_v40, 1 }
0x6c0c   :  { %v3585_v36 = vadd.f32 %v3584_v53, %v3583_v29  ;;  %v3184_v28 = vadd.f32 %v3183_v3, %v3182_v23  ;;  %v4780_v50 = vadd.f32 %v4779_v61, %v4778_v45  ;;  %v4380_v31 = vadd.f32 %v4379_v58, %v4378_v49 }
0x6c0d   :  { %v3985_v7 = vpop.xlane.xlu0 %3984  ;;  %v3980_v39 = vadd.f32 %v3979_v9, %v3978_v40 }
0x6c0e   :  { %v3586_v34 = vrot.slane %v3585_v36, 2  ;;  %v3986_v54 = vrot.slane %v3985_v7, 4  ;;  %v3185_v47 = vrot.slane %v3184_v28, 1  ;;  %v4781_v15 = vrot.slane %v4780_v50, 2 }
0x6c0f   :  { %v4381_v27 = vrot.slane %v4380_v31, 1 }
0x6c10   :  { %v3987_v56 = vadd.f32 %v3986_v54, %v3985_v7  ;;  %v3186_v38 = vadd.f32 %v3185_v47, %v3184_v28  ;;  %v3587_v37 = vadd.f32 %v3586_v34, %v3585_v36  ;;  %v4782_v55 = vadd.f32 %v4781_v15, %v4780_v50 }
0x6c11   :  { %v4387_v41 = vpop.xlane.xlu0 %4386  ;;  %v4382_v24 = vadd.f32 %v4381_v27, %v4380_v31 }
0x6c12   :  { %v3988_v0 = vrot.slane %v3987_v56, 2  ;;  %v4388_v18 = vrot.slane %v4387_v41, 4  ;;  %9387 = vpush %v3186_v38  ;;  %v3588_v4 = vrot.slane %v3587_v37, 1  ;;  %v4783_v26 = vrot.slane %v4782_v55, 1 }
0x6c13   :  { %9389 = vpush %v3578_v25 }
0x6c14   :  { %v4389_v8 = vadd.f32 %v4388_v18, %v4387_v41  ;;  %v3589_v2 = vadd.f32 %v3588_v4, %v3587_v37  ;;  %v3989_v32 = vadd.f32 %v3988_v0, %v3987_v56  ;;  %v4784_v57 = vadd.f32 %v4783_v26, %v4782_v55 }
0x6c15   :  { %v4789_v30 = vpop.xlane.xlu0 %4788 }
0x6c16   :  { %v4390_v33 = vrot.slane %v4389_v8, 2  ;;  %9391 = vpush %v3589_v2  ;;  %v3990_v42 = vrot.slane %v3989_v32, 1  ;;  %v4790_v63 = vrot.slane %v4789_v30, 4 }
0x6c17   :  { %9393 = vpush %v3980_v39 }
0x6c18   :  { %v3991_v16 = vadd.f32 %v3990_v42, %v3989_v32  ;;  %v4391_v21 = vadd.f32 %v4390_v33, %v4389_v8  ;;  %v4791_v59 = vadd.f32 %v4790_v63, %v4789_v30 }
0x6c19   :  { %v5191_v48 = vpop.xlane.xlu0 %5190 }
0x6c1a   :  { %9395 = vpush %v3991_v16  ;;  %v4392_v60 = vrot.slane %v4391_v21, 1  ;;  %v4792_v52 = vrot.slane %v4791_v59, 2  ;;  %v5192_v6 = vrot.slane %v5191_v48, 4 }
0x6c1b   :  { %9397 = vpush %v4382_v24 }
0x6c1c   :  { %v4393_v46 = vadd.f32 %v4392_v60, %v4391_v21  ;;  %v4793_v20 = vadd.f32 %v4792_v52, %v4791_v59  ;;  %v5193_v13 = vadd.f32 %v5192_v6, %v5191_v48 }
0x6c1d   :  { %v5593_v22 = vpop.xlane.xlu0 %5592 }
0x6c1e   :  { %9399 = vpush %v4393_v46  ;;  %v4794_v35 = vrot.slane %v4793_v20, 1  ;;  %v5594_v12 = vrot.slane %v5593_v22, 4  ;;  %v5194_v62 = vrot.slane %v5193_v13, 2 }
0x6c1f   :  { %9401 = vpush %v4784_v57 }
0x6c20   :  { %v4795_v11 = vadd.f32 %v4794_v35, %v4793_v20  ;;  %v5595_v51 = vadd.f32 %v5594_v12, %v5593_v22  ;;  %v5195_v17 = vadd.f32 %v5194_v62, %v5193_v13 }
0x6c21   :  { %v5995_v14 = vpop.xlane.xlu0 %5994 }
0x6c22   :  { %9403 = vpush %v4795_v11  ;;  %v5996_v19 = vrot.slane %v5995_v14, 4  ;;  %v5596_v49 = vrot.slane %v5595_v51, 2  ;;  %v5196_v58 = vrot.slane %v5195_v17, 1 }
0x6c24   :  { %v5997_v45 = vadd.f32 %v5996_v19, %v5995_v14  ;;  %v5597_v34 = vadd.f32 %v5596_v49, %v5595_v51  ;;  %v5197_v15 = vadd.f32 %v5196_v58, %v5195_v17 }
0x6c25   :  { %v6397_v1 = vpop.xlane.xlu0 %6396 }
0x6c26   :  { %v6398_v29 = vrot.slane %v6397_v1, 4  ;;  %v5998_v50 = vrot.slane %v5997_v45, 2  ;;  %v5598_v0 = vrot.slane %v5597_v34, 1 }
0x6c28   :  { %v6399_v7 = vadd.f32 %v6398_v29, %v6397_v1  ;;  %v5999_v18 = vadd.f32 %v5998_v50, %v5997_v45  ;;  %v5599_v33 = vadd.f32 %v5598_v0, %v5597_v34 }
0x6c29   :  { %v6799_v53 = vpop.xlane.xlu0 %6798 }
0x6c2a   :  { %v6800_v43 = vrot.slane %v6799_v53, 4  ;;  %v6400_v25 = vrot.slane %v6399_v7, 2  ;;  %v6000_v42 = vrot.slane %v5999_v18, 1 }
0x6c2c   :  { %v6801_v9 = vadd.f32 %v6800_v43, %v6799_v53  ;;  %v6401_v63 = vadd.f32 %v6400_v25, %v6399_v7  ;;  %v6001_v46 = vadd.f32 %v6000_v42, %v5999_v18 }
0x6c2e   :  { %v6802_v55 = vrot.slane %v6801_v9, 2  ;;  %v6402_v20 = vrot.slane %v6401_v63, 1 }
0x6c30   :  { %v6803_v52 = vadd.f32 %v6802_v55, %v6801_v9  ;;  %v6403_v22 = vadd.f32 %v6402_v20, %v6401_v63 }
0x6c32   :  { %v6804_v6 = vrot.slane %v6803_v52, 1 }
0x6c34   :  { %v6805_v12 = vadd.f32 %v6804_v6, %v6803_v52 }
0x6c37   :  { %s11614_s2 = spop %9385 }
0x6c43   :  { %s9388_s27 = spop %9387 }
0x6c44   :  { %s11616_s28 = spop %9389 }
0x6c47   :  { %s9392_s14 = spop %9391 }
0x6c48   :  { %s11618_s29 = spop %9393  ;;  %s3591_s30 = sadd.f32 %s9392_s14, %s9388_s27 }
0x6c49   :  { %s3580_s14 = sadd.f32 %s11616_s28, %s11614_s2 }
0x6c4b   :  { %s9396_s16 = spop %9395 }
0x6c4c   :  { %s11620_s4 = spop %9397  ;;  %s3993_s17 = sadd.f32 %s9396_s16, %s3591_s30 }
0x6c4d   :  { %s3982_s30 = sadd.f32 %s11618_s29, %s3580_s14 }
0x6c4f   :  { %s9400_s9 = spop %9399  ;;  %s4384_s16 = sadd.f32 %s11620_s4, %s3982_s30 }
0x6c50   :  { %s9402_s3 = spop %9401  ;;  %s4395_s21 = sadd.f32 %s9400_s9, %s3993_s17 }
0x6c51   :  { %s4786_s9 = sadd.f32 %s9402_s3, %s4384_s16 }
0x6c53   :  { %s9404_s18 = spop %9403 }
0x6c54   :  { %s4797_s23 = sadd.f32 %s9404_s18, %s4395_s21 }
0x6c82   :  { %v5180_v44 = vpop.xlane.xlu1 %5179 }
0x6c83   :  { %v5181_v5 = vrot.slane %v5180_v44, 4 }
0x6c85   :  { %v5182_v23 = vadd.f32 %v5181_v5, %v5180_v44 }
0x6c86   :  { %v5582_v10 = vpop.xlane.xlu1 %5581 }
0x6c87   :  { %v5183_v3 = vrot.slane %v5182_v23, 2  ;;  %v5583_v61 = vrot.slane %v5582_v10, 4 }
0x6c89   :  { %v5584_v36 = vadd.f32 %v5583_v61, %v5582_v10  ;;  %v5184_v28 = vadd.f32 %v5183_v3, %v5182_v23 }
0x6c8a   :  { %v5984_v40 = vpop.xlane.xlu1 %5983 }
0x6c8b   :  { %v5585_v54 = vrot.slane %v5584_v36, 2  ;;  %v5985_v47 = vrot.slane %v5984_v40, 4  ;;  %v5185_v56 = vrot.slane %v5184_v28, 1 }
0x6c8d   :  { %v5986_v38 = vadd.f32 %v5985_v47, %v5984_v40  ;;  %v5186_v37 = vadd.f32 %v5185_v56, %v5184_v28  ;;  %v5586_v41 = vadd.f32 %v5585_v54, %v5584_v36 }
0x6c8e   :  { %v6386_v31 = vpop.xlane.xlu1 %6385 }
0x6c8f   :  { %v5987_v4 = vrot.slane %v5986_v38, 2  ;;  %v6387_v8 = vrot.slane %v6386_v31, 4  ;;  %9405 = vpush %v5186_v37  ;;  %v5587_v2 = vrot.slane %v5586_v41, 1 }
0x6c90   :  { %9407 = vpush %v5197_v15 }
0x6c91   :  { %v6388_v32 = vadd.f32 %v6387_v8, %v6386_v31  ;;  %v5588_v39 = vadd.f32 %v5587_v2, %v5586_v41  ;;  %v5988_v27 = vadd.f32 %v5987_v4, %v5986_v38 }
0x6c92   :  { %v6788_v30 = vpop.xlane.xlu1 %6787 }
0x6c93   :  { %v6389_v16 = vrot.slane %v6388_v32, 2  ;;  %v6789_v21 = vrot.slane %v6788_v30, 4  ;;  %9409 = vpush %v5588_v39  ;;  %v5989_v59 = vrot.slane %v5988_v27, 1 }
0x6c94   :  { %9411 = vpush %v5599_v33 }
0x6c95   :  { %v6790_v24 = vadd.f32 %v6789_v21, %v6788_v30  ;;  %v5990_v26 = vadd.f32 %v5989_v59, %v5988_v27  ;;  %v6390_v60 = vadd.f32 %v6389_v16, %v6388_v32 }
0x6c97   :  { %v6791_v57 = vrot.slane %v6790_v24, 2  ;;  %9413 = vpush %v5990_v26  ;;  %v6391_v35 = vrot.slane %v6390_v60, 1 }
0x6c98   :  { %9415 = vpush %v6001_v46 }
0x6c99   :  { %v6792_v11 = vadd.f32 %v6791_v57, %v6790_v24  ;;  %v6392_v48 = vadd.f32 %v6391_v35, %v6390_v60 }
0x6c9b   :  { %9417 = vpush %v6392_v48  ;;  %v6793_v14 = vrot.slane %v6792_v11, 1 }
0x6c9c   :  { %9419 = vpush %v6403_v22 }
0x6c9d   :  { %v6794_v13 = vadd.f32 %v6793_v14, %v6792_v11 }
0x6c9f   :  { %9421 = vpush %v6794_v13 }
0x6ca0   :  { %9423 = vpush %v6805_v12 }
0x6cc0   :  { %s11622_s6 = spop %9405 }
0x6cc1   :  { %s9408_s22 = spop %9407  ;;  %s5188_s17 = sadd.f32 %s11622_s6, %s4786_s9 }
0x6cc2   :  { %s5199_s20 = sadd.f32 %s9408_s22, %s4797_s23 }
0x6cc4   :  { %s9410_s11 = spop %9409 }
0x6cc5   :  { %s9412_s24 = spop %9411  ;;  %s5590_s18 = sadd.f32 %s9410_s11, %s5188_s17 }
0x6cc6   :  { %s5601_s25 = sadd.f32 %s9412_s24, %s5199_s20 }
0x6cc8   :  { %s9414_s19 = spop %9413 }
0x6cc9   :  { %s9416_s1 = spop %9415  ;;  %s5992_s21 = sadd.f32 %s9414_s19, %s5590_s18 }
0x6cca   :  { %s6003_s0 = sadd.f32 %s9416_s1, %s5601_s25 }
0x6ccc   :  { %s9418_s8 = spop %9417 }
0x6ccd   :  { %s9420_s26 = spop %9419  ;;  %s6394_s22 = sadd.f32 %s9418_s8, %s5992_s21 }
0x6cce   :  { %s6405_s5 = sadd.f32 %s9420_s26, %s6003_s0  ;;  %s9852_s26 = scalar_lea.hbm %s11656_s15, 16 }
0x6ccf   :  { %p9853_p0 = scmp.ne.s32.totalorder %s11656_s15, %s9852_s26  ;;  %p9856_p1 = scmp.lt.u32.totalorder %s9852_s26, %s11656_s15 }
0x6cd0   :  { %s9422_s7 = spop %9421 }
0x6cd1   :  { %s9424_s10 = spop %9423  ;;  %s6796_s23 = sadd.f32 %s9422_s7, %s6394_s22 }
0x6cd2   :  { %s6807_s13 = sadd.f32 %s9424_s10, %s6405_s5  ;;  %p9858_p2 = pnand %p9856_p1, %p9853_p0 }
0x6cd4   :  { %s6808_s27 = smax.f32 %s9873_s12, %s6807_s13 }
0x6cd5   :  { %v6809_v62 = vstv %s6808_s27 }
0x6cd6   :  { %9828 = vrcp.f32 %v6809_v62 }
0x6ce0   :  { %v9829_v1 = vpop.eup %9828 }
0x6ce1   :  { %9425 = vpush %v9829_v1 }
0x6d12   :  { %s9426_s24 = spop %9425 }
0x6d13   :  { %s6812_s20 = smul.f32 %s9426_s24, %s6796_s23 }
0x6d15   :  { %6814 = sst [smem:[#allocation6]] %s6812_s20 }
0x6d16   :  { %9861 = shalt.err (!%p9858_p2)
}
0x6d17   :  { %s9874_s29 = smov [#allocation6]  }
0x6d18   :  { %6822 = dma.smem_to_hbm %s9874_s29, 16, %s11656_s15, [#allocation4]  }
0x6d19   :  { %9864 = dma.done.wait [#allocation4], 16  }
0x6d1a   :  { %9865 = vsyncadd [#allocation4], 4294967280 }
0x6d1b   :  { %6826 = sfence }
0x6d1c   :  { %6827 = vsyncpa [#allocation4], 1 }
0x6d1d   :  { %6828 = vsyncpa [#allocation5], 1 }

</bundles_post_ra>
